<compile_context>
chip_gen: v6e
topology: v6e:2x2x1
jax: 0.10.0
libtpu: 0.0.40
codegen_flags: <defaults>
</compile_context>

<pallas_src>
import jax
import jax.numpy as jnp
from jax.experimental import pallas as pl
from jax.experimental.pallas import tpu as pltpu

# Pin f32 matmul precision so XLA-side param folding / reference matches the
# f32 MXU matmuls inside the Pallas kernel.
jax.config.update("jax_default_matmul_precision", "float32")


# ------------------------------ Pallas kernel ------------------------------- #

def _fused_block_kernel(x_ref, A_ref, c_ref, w1_ref, b1_ref, w2_ref, b2_ref,
                        w3_ref, b3_ref, o_ref, xbuf_ref, pad_a_ref, pad_h_ref):
    """Runs every Flow for one batch chunk; activations never leave VMEM."""
    f32 = jnp.float32
    n_flow, C = A_ref.shape[0], A_ref.shape[1]
    F = w2_ref.shape[1]
    Ch = C // 2
    Bt, Hp, Wp = pad_a_ref.shape[0], pad_a_ref.shape[1], pad_a_ref.shape[2]
    Hh, Ww = Hp - 2, Wp - 2
    M = Bt * Hh * Ww

    # --- halo rings only (interiors are fully overwritten each flow) --------
    def init_halo(pad_ref, value, cin):
        row = jnp.full((Bt, 1, Wp, cin), value, f32)
        col = jnp.full((Bt, Hp, 1, cin), value, f32)
        pad_ref[:, pl.ds(0, 1), :, :] = row
        pad_ref[:, pl.ds(Hh + 1, 1), :, :] = row
        pad_ref[:, :, pl.ds(0, 1), :] = col
        pad_ref[:, :, pl.ds(Ww + 1, 1), :] = col

    init_halo(pad_a_ref, 0.0, Ch)     # conv1 zero padding
    init_halo(pad_h_ref, 1.0, F)      # ZeroConv2d pads with 1

    # --- lane-dense input (Bt, H, W*C) -> pixel-major (M, C) ----------------
    # Done via the image-layout scratch with per-column ref stores + one load:
    # only static lane slices and leading-dim reshapes (always lowerable).
    xv = x_ref[...].astype(f32)                        # (Bt, Hh, Ww*C)
    for w in range(Ww):
        xbuf_ref[:, :, w, :] = xv[:, :, w * C:(w + 1) * C]
    x = xbuf_ref[...].reshape(M, C)

    def im2col(pad_ref, cin):
        # (M, 9*cin) patch matrix: the 9 shifted windows concatenated along
        # lanes, so each 3x3 conv is ONE MXU matmul instead of 9 accumulated.
        cols = [pad_ref[:, pl.ds(dh, Hh), pl.ds(dw, Ww), :].reshape(M, cin)
                for dh in range(3) for dw in range(3)]
        return jnp.concatenate(cols, axis=1)

    for f in range(n_flow):
        # ActNorm + invertible 1x1 conv, pre-folded affine: y = x @ A + c.
        y = jnp.dot(x, A_ref[f], preferred_element_type=f32) + c_ref[f]
        in_a = y[:, :Ch]

        # coupling-net conv1: 3x3, zero pad, ReLU (single im2col matmul).
        pad_a_ref[:, pl.ds(1, Hh), pl.ds(1, Ww), :] = in_a.reshape(Bt, Hh, Ww, Ch)
        h1 = jnp.dot(im2col(pad_a_ref, Ch), w1_ref[f], preferred_element_type=f32)
        h1 = jnp.maximum(h1 + b1_ref[f], 0.0)

        # conv2: 1x1 + ReLU (stays in VMEM).
        h2 = jnp.dot(h1, w2_ref[f], preferred_element_type=f32) + b2_ref[f]
        h2 = jnp.maximum(h2, 0.0)

        # ZeroConv2d: 3x3, pad value 1; exp(zscale*3) pre-folded into w3 / b3.
        pad_h_ref[:, pl.ds(1, Hh), pl.ds(1, Ww), :] = h2.reshape(Bt, Hh, Ww, F)
        net = jnp.dot(im2col(pad_h_ref, F), w3_ref[f], preferred_element_type=f32)
        net = net + b3_ref[f]                          # columns: [log_s | t]

        # affine-coupling combine: out = [in_a | (in_b + t) * sigmoid(log_s+2)]
        s = jax.nn.sigmoid(net[:, :Ch] + 2.0)
        out_b = (y[:, Ch:] + net[:, Ch:]) * s
        x = jnp.concatenate([in_a, out_b], axis=1)     # next flow's input

    # --- pixel-major (M, C) -> lane-dense (Bt, Hh, Ww*C) store ---------------
    x3 = x.reshape(Bt * Hh, Ww, C)
    dense = jnp.concatenate([x3[:, w, :] for w in range(Ww)], axis=1)
    o_ref[...] = dense.reshape(Bt, Hh, Ww * C).astype(o_ref.dtype)


# ------------------------------ wrappers ------------------------------------ #

def _grid_invariant_spec(shape):
    # Weight blocks: index never changes with the grid step.
    # (pl.Buffered(1) would halve their VMEM footprint; left at the default.)
    n = len(shape)
    return pl.BlockSpec(shape, lambda b, _n=n: (0,) * _n)


def _padded_bytes(shape, dtype):
    s = [int(d) for d in shape]
    if len(s) == 1:
        s = [1] + s
    s[-1] = -(-s[-1] // 128) * 128
    s[-2] = -(-s[-2] // 8) * 8
    n = 1
    for d in s:
        n *= d
    return n * jnp.dtype(dtype).itemsize


def _pick_batch_tile(B, HW):
    """Largest divisor of B with Bt*HW <= ~128 MXU rows while keeping at least
    two grid steps (so v7x megacore has work for both TensorCores)."""
    target = max(1, 128 // max(HW, 1))
    bt = 1
    for cand in range(1, B + 1):
        if B % cand == 0 and cand <= target and B // cand >= min(2, B):
            bt = cand
    return bt


def fused_block_flows(x_nhwc, sp):
    """One pallas_call running every Flow. x_nhwc: (B, H, W, C) float32."""
    B, H, W, C = x_nhwc.shape
    F = sp['w2'].shape[1]
    Ch = C // 2
    Bt = _pick_batch_tile(B, H * W)

    x2d = x_nhwc.reshape(B, H, W * C)          # lane-dense HBM layout (free)
    operands = (x2d, sp['A'], sp['c'], sp['w1'], sp['b1'],
                sp['w2'], sp['b2'], sp['w3'], sp['b3'])

    scratch_shapes = [(Bt, H, W, C),           # image-layout copy of the input
                      (Bt, H + 2, W + 2, Ch),  # conv1 zero-padded scratch
                      (Bt, H + 2, W + 2, F)]   # ZeroConv2d one-padded scratch

    io_block = (Bt, H, W * C)
    est = (2 * 2 * _padded_bytes(io_block, x2d.dtype)
           + 2 * sum(_padded_bytes(op.shape, op.dtype) for op in operands[1:])
           + sum(_padded_bytes(s, jnp.float32) for s in scratch_shapes))
    # TODO(synk): at production sizes (large H, W, filter_size) add a row-strip
    # / F-dim tiling path; this whole-image layout targets small feature maps.
    vmem_limit = int(min(max(2 * est, 16 * 1024 * 1024), 64 * 1024 * 1024))

    in_specs = [pl.BlockSpec(io_block, lambda b: (b, 0, 0))]
    in_specs += [_grid_invariant_spec(op.shape) for op in operands[1:]]

    out = pl.pallas_call(
        _fused_block_kernel,
        out_shape=jax.ShapeDtypeStruct((B, H, W * C), x_nhwc.dtype),
        grid=(B // Bt,),
        in_specs=in_specs,
        out_specs=pl.BlockSpec(io_block, lambda b: (b, 0, 0)),
        scratch_shapes=[pltpu.VMEM(s, jnp.float32) for s in scratch_shapes],
        compiler_params=pltpu.CompilerParams(
            dimension_semantics=("parallel",),
            vmem_limit_bytes=vmem_limit),
    )(*operands)
    return out.reshape(B, H, W, C)


# -------------------------- parameter preparation --------------------------- #

def _actnorm_invconv_affine(p):
    """ActNorm (+loc, *scale) then invertible 1x1 conv (@ w_t) as y = x@A + c."""
    C = p['w_t'].shape[0]
    A = p['scale'].reshape(C, 1) * p['w_t']      # diag(scale) @ W^T
    c = (p['loc'] * p['scale']) @ p['w_t']       # (1, C)
    return A, c


def _compose_affine(A1, c1, A2, c2):
    """(x @ A1 + c1) @ A2 + c2 == x @ (A1 @ A2) + (c1 @ A2 + c2)."""
    return A1 @ A2, c1 @ A2 + c2


def prepare_flow_params(p):
    """Fold per-flow constants once: ActNorm+invconv affine and the ZeroConv2d
    exp(zscale*3) per-output-channel scale into w3 / b3."""
    A, c = _actnorm_invconv_affine(p)
    zs = jnp.exp(p['zscale'] * 3.0)              # (1, C)
    return dict(A=A, c=c.reshape(1, -1), w1=p['w1'], b1=p['b1'],
                w2=p['w2'], b2=p['b2'], w3=p['w3'] * zs, b3=p['b3'] * zs)


def init_flow_params(key, C, filter_size):
    ks = jax.random.split(key, 8)
    loc = 0.1 * jax.random.normal(ks[0], (1, C), jnp.float32)
    scale = 1.0 + 0.1 * jax.random.normal(ks[1], (1, C), jnp.float32)
    q, _ = jnp.linalg.qr(jax.random.normal(ks[2], (C, C), jnp.float32))
    w_t = q.T
    Ch = C // 2
    w1 = 0.05 * jax.random.normal(ks[3], (3, 3, Ch, filter_size),
                                  jnp.float32).reshape(9 * Ch, filter_size)
    b1 = jnp.zeros((1, filter_size), jnp.float32)
    w2 = 0.05 * jax.random.normal(ks[4], (1, 1, filter_size, filter_size),
                                  jnp.float32).reshape(filter_size, filter_size)
    b2 = jnp.zeros((1, filter_size), jnp.float32)
    w3 = 0.01 * jax.random.normal(ks[5], (3, 3, filter_size, C),
                                  jnp.float32).reshape(9 * filter_size, C)
    b3 = jnp.zeros((1, C), jnp.float32)
    zscale = 0.01 * jax.random.normal(ks[6], (1, C), jnp.float32)
    return dict(loc=loc, scale=scale, w_t=w_t, w1=w1, b1=b1,
                w2=w2, b2=b2, w3=w3, b3=b3, zscale=zscale)


# ------------------------------ Block forward ------------------------------- #

def block_forward(x_nchw, flow_params, trans_params):
    """Block.forward: squeeze 2x2 -> transition flows -> flows (NCHW in/out)."""
    B, C, H, W = x_nchw.shape
    C4 = C * 4
    # Squeeze straight to NHWC with a single transpose; channel order (c, i, j)
    # matches the PyTorch permute(0,1,3,5,2,4).view(B, 4C, H/2, W/2).
    sq = x_nchw.reshape(B, C, H // 2, 2, W // 2, 2)
    x = sq.transpose(0, 2, 4, 1, 3, 5).reshape(B, H // 2, W // 2, C4)

    # TODO(synk): TransitionFlow guessed as ActNorm + invertible 1x1 conv; as a
    # per-pixel affine it is folded into the first Flow's affine (no kernel).
    pend = None
    for p in trans_params:
        A_t, c_t = _actnorm_invconv_affine(p)
        c_t = c_t.reshape(1, -1)
        pend = (A_t, c_t) if pend is None else _compose_affine(*pend, A_t, c_t)

    if flow_params:
        fps = [prepare_flow_params(p) for p in flow_params]
        if pend is not None:
            fps[0]['A'], fps[0]['c'] = _compose_affine(pend[0], pend[1],
                                                       fps[0]['A'], fps[0]['c'])
            pend = None
        # Stack per-flow params on a leading n_flow axis -> one fused call.
        stacked = {k: jnp.stack([fp[k] for fp in fps], axis=0) for k in fps[0]}
        x = fused_block_flows(x, stacked)

    if pend is not None:
        # Corner case: transitions with no trailing Flow -> plain XLA affine.
        x = (x.reshape(-1, C4) @ pend[0] + pend[1]).reshape(x.shape)

    return x.transpose(0, 3, 1, 2)               # back to NCHW


# ----------------------- pure-JAX reference (self-check) -------------------- #

def reference_block(x_nchw, flow_params, trans_params):
    B, C, H, W = x_nchw.shape
    C4 = C * 4
    sq = x_nchw.reshape(B, C, H // 2, 2, W // 2, 2)
    x = sq.transpose(0, 2, 4, 1, 3, 5).reshape(B, H // 2, W // 2, C4)

    def actnorm_invconv(z, p):
        b, h, w, _ = z.shape
        y = ((z.reshape(-1, C4) + p['loc']) * p['scale']) @ p['w_t']
        return y.reshape(b, h, w, C4)

    def im2col3x3(img, pad_value):
        b, h, w, cc = img.shape
        xp = jnp.pad(img, ((0, 0), (1, 1), (1, 1), (0, 0)),
                     constant_values=pad_value)
        cols = [xp[:, dh:dh + h, dw:dw + w, :]
                for dh in range(3) for dw in range(3)]
        return jnp.concatenate(cols, axis=-1).reshape(b * h * w, 9 * cc)

    for p in trans_params:
        x = actnorm_invconv(x, p)
    for p in flow_params:
        b, h, w, _ = x.shape
        Ch = C4 // 2
        F = p['w2'].shape[0]
        y = actnorm_invconv(x, p)
        in_a, in_b = y[..., :Ch], y[..., Ch:]
        h1 = jnp.maximum(im2col3x3(in_a, 0.0) @ p['w1'] + p['b1'], 0.0)
        h2 = jnp.maximum(h1 @ p['w2'] + p['b2'], 0.0)
        net = ((im2col3x3(h2.reshape(b, h, w, F), 1.0) @ p['w3'] + p['b3'])
               * jnp.exp(p['zscale'] * 3.0))
        log_s, t = net[:, :Ch], net[:, Ch:]
        out_b = (in_b.reshape(-1, Ch) + t) * jax.nn.sigmoid(log_s + 2.0)
        x = jnp.concatenate([in_a.reshape(-1, Ch), out_b],
                            axis=-1).reshape(b, h, w, C4)
    return x.transpose(0, 3, 1, 2)


# --------------------------------- main -------------------------------------- #

if __name__ == "__main__":
    key = jax.random.PRNGKey(0)
    B, Cin, H, W = 2, 4, 16, 16
    n_flow, n_transitions, filter_size = 2, 1, 32

    kx, kp = jax.random.split(key)
    x = jax.random.normal(kx, (B, Cin, H, W), jnp.float32)

    C4 = Cin * 4
    keys = jax.random.split(kp, n_flow + n_transitions)
    flow_params = [init_flow_params(keys[i], C4, filter_size)
                   for i in range(n_flow)]
    trans_params = [init_flow_params(keys[n_flow + i], C4, filter_size)
                    for i in range(n_transitions)]

    out = jax.jit(block_forward)(x, flow_params, trans_params)
    out = jax.block_until_ready(out)

    assert out.shape == (B, C4, H // 2, W // 2), out.shape
    assert bool(jnp.all(jnp.isfinite(out)))

    ref = reference_block(x, flow_params, trans_params)
    assert bool(jnp.allclose(out, ref, rtol=1e-3, atol=1e-3)), \
        float(jnp.max(jnp.abs(out - ref)))

    print("KERNEL_OK")
</pallas_src>

<mosaic_0001>
module attributes {stable_mosaic.version = 11 : i64} {
  func.func @_fused_block_kernel(%arg0: i32, %arg1: memref<1x8x128xf32, #tpu.memory_space<vmem>>, %arg2: memref<2x16x16xf32, #tpu.memory_space<vmem>>, %arg3: memref<2x1x16xf32, #tpu.memory_space<vmem>>, %arg4: memref<2x72x32xf32, #tpu.memory_space<vmem>>, %arg5: memref<2x1x32xf32, #tpu.memory_space<vmem>>, %arg6: memref<2x32x32xf32, #tpu.memory_space<vmem>>, %arg7: memref<2x1x32xf32, #tpu.memory_space<vmem>>, %arg8: memref<2x288x16xf32, #tpu.memory_space<vmem>>, %arg9: memref<2x1x16xf32, #tpu.memory_space<vmem>>, %arg10: memref<1x8x128xf32, #tpu.memory_space<vmem>>, %arg11: memref<1x8x8x16xf32, #tpu.memory_space<vmem>>, %arg12: memref<1x10x10x8xf32, #tpu.memory_space<vmem>>, %arg13: memref<1x10x10x32xf32, #tpu.memory_space<vmem>>) attributes {dimension_semantics = [#tpu.dimension_semantics<parallel>], iteration_bounds = array<i64: 2>, scalar_prefetch = 0 : i64, scratch_operands = 3 : i64, tpu.core_type = #tpu.core_type<tc>, window_params = [{transform_indices = @transform_0, window_bounds = array<i64: 1, 8, 128>}, {pipeline_mode = #tpu.pipeline_mode<synchronous>, transform_indices = @transform_1, window_bounds = array<i64: 2, 16, 16>}, {pipeline_mode = #tpu.pipeline_mode<synchronous>, transform_indices = @transform_2, window_bounds = array<i64: 2, 1, 16>}, {pipeline_mode = #tpu.pipeline_mode<synchronous>, transform_indices = @transform_3, window_bounds = array<i64: 2, 72, 32>}, {pipeline_mode = #tpu.pipeline_mode<synchronous>, transform_indices = @transform_4, window_bounds = array<i64: 2, 1, 32>}, {pipeline_mode = #tpu.pipeline_mode<synchronous>, transform_indices = @transform_5, window_bounds = array<i64: 2, 32, 32>}, {pipeline_mode = #tpu.pipeline_mode<synchronous>, transform_indices = @transform_6, window_bounds = array<i64: 2, 1, 32>}, {pipeline_mode = #tpu.pipeline_mode<synchronous>, transform_indices = @transform_7, window_bounds = array<i64: 2, 288, 16>}, {pipeline_mode = #tpu.pipeline_mode<synchronous>, transform_indices = @transform_8, window_bounds = array<i64: 2, 1, 16>}, {transform_indices = @transform_9, window_bounds = array<i64: 1, 8, 128>}]} {
    %cst = arith.constant 0.000000e+00 : f32
    %0 = vector.broadcast %cst : f32 to vector<1x1x10x8xf32>
    %cst_0 = arith.constant 0.000000e+00 : f32
    %1 = vector.broadcast %cst_0 : f32 to vector<1x10x1x8xf32>
    %c0 = arith.constant 0 : index
    %c0_1 = arith.constant 0 : index
    %c0_2 = arith.constant 0 : index
    %c0_3 = arith.constant 0 : index
    %2 = vector.load %arg12[%c0, %c0_1, %c0_2, %c0_3] : memref<1x10x10x8xf32, #tpu.memory_space<vmem>>, vector<1x1x10x8xf32>
    tpu.vector_store %arg12[%c0, %c0_1, %c0_2, %c0_3], %0 {strides = array<i32>} : memref<1x10x10x8xf32, #tpu.memory_space<vmem>>, vector<1x1x10x8xf32>,
    %c0_4 = arith.constant 0 : index
    %c9 = arith.constant 9 : index
    %c0_5 = arith.constant 0 : index
    %c0_6 = arith.constant 0 : index
    %3 = vector.load %arg12[%c0_4, %c9, %c0_5, %c0_6] : memref<1x10x10x8xf32, #tpu.memory_space<vmem>>, vector<1x1x10x8xf32>
    tpu.vector_store %arg12[%c0_4, %c9, %c0_5, %c0_6], %0 {strides = array<i32>} : memref<1x10x10x8xf32, #tpu.memory_space<vmem>>, vector<1x1x10x8xf32>,
    %c0_7 = arith.constant 0 : index
    %c0_8 = arith.constant 0 : index
    %c0_9 = arith.constant 0 : index
    %c0_10 = arith.constant 0 : index
    %4 = vector.load %arg12[%c0_7, %c0_8, %c0_9, %c0_10] : memref<1x10x10x8xf32, #tpu.memory_space<vmem>>, vector<1x10x1x8xf32>
    tpu.vector_store %arg12[%c0_7, %c0_8, %c0_9, %c0_10], %1 {strides = array<i32>} : memref<1x10x10x8xf32, #tpu.memory_space<vmem>>, vector<1x10x1x8xf32>,
    %c0_11 = arith.constant 0 : index
    %c0_12 = arith.constant 0 : index
    %c9_13 = arith.constant 9 : index
    %c0_14 = arith.constant 0 : index
    %5 = vector.load %arg12[%c0_11, %c0_12, %c9_13, %c0_14] : memref<1x10x10x8xf32, #tpu.memory_space<vmem>>, vector<1x10x1x8xf32>
    tpu.vector_store %arg12[%c0_11, %c0_12, %c9_13, %c0_14], %1 {strides = array<i32>} : memref<1x10x10x8xf32, #tpu.memory_space<vmem>>, vector<1x10x1x8xf32>,
    %cst_15 = arith.constant 1.000000e+00 : f32
    %6 = vector.broadcast %cst_15 : f32 to vector<1x1x10x32xf32>
    %cst_16 = arith.constant 1.000000e+00 : f32
    %7 = vector.broadcast %cst_16 : f32 to vector<1x10x1x32xf32>
    %c0_17 = arith.constant 0 : index
    %c0_18 = arith.constant 0 : index
    %c0_19 = arith.constant 0 : index
    %c0_20 = arith.constant 0 : index
    %8 = vector.load %arg13[%c0_17, %c0_18, %c0_19, %c0_20] : memref<1x10x10x32xf32, #tpu.memory_space<vmem>>, vector<1x1x10x32xf32>
    tpu.vector_store %arg13[%c0_17, %c0_18, %c0_19, %c0_20], %6 {strides = array<i32>} : memref<1x10x10x32xf32, #tpu.memory_space<vmem>>, vector<1x1x10x32xf32>,
    %c0_21 = arith.constant 0 : index
    %c9_22 = arith.constant 9 : index
    %c0_23 = arith.constant 0 : index
    %c0_24 = arith.constant 0 : index
    %9 = vector.load %arg13[%c0_21, %c9_22, %c0_23, %c0_24] : memref<1x10x10x32xf32, #tpu.memory_space<vmem>>, vector<1x1x10x32xf32>
    tpu.vector_store %arg13[%c0_21, %c9_22, %c0_23, %c0_24], %6 {strides = array<i32>} : memref<1x10x10x32xf32, #tpu.memory_space<vmem>>, vector<1x1x10x32xf32>,
    %c0_25 = arith.constant 0 : index
    %c0_26 = arith.constant 0 : index
    %c0_27 = arith.constant 0 : index
    %c0_28 = arith.constant 0 : index
    %10 = vector.load %arg13[%c0_25, %c0_26, %c0_27, %c0_28] : memref<1x10x10x32xf32, #tpu.memory_space<vmem>>, vector<1x10x1x32xf32>
    tpu.vector_store %arg13[%c0_25, %c0_26, %c0_27, %c0_28], %7 {strides = array<i32>} : memref<1x10x10x32xf32, #tpu.memory_space<vmem>>, vector<1x10x1x32xf32>,
    %c0_29 = arith.constant 0 : index
    %c0_30 = arith.constant 0 : index
    %c9_31 = arith.constant 9 : index
    %c0_32 = arith.constant 0 : index
    %11 = vector.load %arg13[%c0_29, %c0_30, %c9_31, %c0_32] : memref<1x10x10x32xf32, #tpu.memory_space<vmem>>, vector<1x10x1x32xf32>
    tpu.vector_store %arg13[%c0_29, %c0_30, %c9_31, %c0_32], %7 {strides = array<i32>} : memref<1x10x10x32xf32, #tpu.memory_space<vmem>>, vector<1x10x1x32xf32>,
    %c0_33 = arith.constant 0 : index
    %c0_34 = arith.constant 0 : index
    %c0_35 = arith.constant 0 : index
    %12 = vector.load %arg1[%c0_33, %c0_34, %c0_35] : memref<1x8x128xf32, #tpu.memory_space<vmem>>, vector<1x8x128xf32>
    %13 = vector.extract_strided_slice %12 {offsets = [0, 0, 0], sizes = [1, 8, 16], strides = [1, 1, 1]} : vector<1x8x128xf32> to vector<1x8x16xf32>
    %c0_36 = arith.constant 0 : index
    %c0_37 = arith.constant 0 : index
    %c0_38 = arith.constant 0 : index
    %c0_39 = arith.constant 0 : index
    %14 = vector.load %arg11[%c0_36, %c0_37, %c0_38, %c0_39] : memref<1x8x8x16xf32, #tpu.memory_space<vmem>>, vector<1x8x1x16xf32>
    %15 = vector.shape_cast %14 : vector<1x8x1x16xf32> to vector<1x8x16xf32>
    %16 = vector.shape_cast %13 : vector<1x8x16xf32> to vector<1x8x1x16xf32>
    tpu.vector_store %arg11[%c0_36, %c0_37, %c0_38, %c0_39], %16 {strides = array<i32>} : memref<1x8x8x16xf32, #tpu.memory_space<vmem>>, vector<1x8x1x16xf32>,
    %17 = vector.extract_strided_slice %12 {offsets = [0, 0, 16], sizes = [1, 8, 16], strides = [1, 1, 1]} : vector<1x8x128xf32> to vector<1x8x16xf32>
    %c0_40 = arith.constant 0 : index
    %c0_41 = arith.constant 0 : index
    %c1 = arith.constant 1 : index
    %c0_42 = arith.constant 0 : index
    %18 = vector.load %arg11[%c0_40, %c0_41, %c1, %c0_42] : memref<1x8x8x16xf32, #tpu.memory_space<vmem>>, vector<1x8x1x16xf32>
    %19 = vector.shape_cast %18 : vector<1x8x1x16xf32> to vector<1x8x16xf32>
    %20 = vector.shape_cast %17 : vector<1x8x16xf32> to vector<1x8x1x16xf32>
    tpu.vector_store %arg11[%c0_40, %c0_41, %c1, %c0_42], %20 {strides = array<i32>} : memref<1x8x8x16xf32, #tpu.memory_space<vmem>>, vector<1x8x1x16xf32>,
    %21 = vector.extract_strided_slice %12 {offsets = [0, 0, 32], sizes = [1, 8, 16], strides = [1, 1, 1]} : vector<1x8x128xf32> to vector<1x8x16xf32>
    %c0_43 = arith.constant 0 : index
    %c0_44 = arith.constant 0 : index
    %c2 = arith.constant 2 : index
    %c0_45 = arith.constant 0 : index
    %22 = vector.load %arg11[%c0_43, %c0_44, %c2, %c0_45] : memref<1x8x8x16xf32, #tpu.memory_space<vmem>>, vector<1x8x1x16xf32>
    %23 = vector.shape_cast %22 : vector<1x8x1x16xf32> to vector<1x8x16xf32>
    %24 = vector.shape_cast %21 : vector<1x8x16xf32> to vector<1x8x1x16xf32>
    tpu.vector_store %arg11[%c0_43, %c0_44, %c2, %c0_45], %24 {strides = array<i32>} : memref<1x8x8x16xf32, #tpu.memory_space<vmem>>, vector<1x8x1x16xf32>,
    %25 = vector.extract_strided_slice %12 {offsets = [0, 0, 48], sizes = [1, 8, 16], strides = [1, 1, 1]} : vector<1x8x128xf32> to vector<1x8x16xf32>
    %c0_46 = arith.constant 0 : index
    %c0_47 = arith.constant 0 : index
    %c3 = arith.constant 3 : index
    %c0_48 = arith.constant 0 : index
    %26 = vector.load %arg11[%c0_46, %c0_47, %c3, %c0_48] : memref<1x8x8x16xf32, #tpu.memory_space<vmem>>, vector<1x8x1x16xf32>
    %27 = vector.shape_cast %26 : vector<1x8x1x16xf32> to vector<1x8x16xf32>
    %28 = vector.shape_cast %25 : vector<1x8x16xf32> to vector<1x8x1x16xf32>
    tpu.vector_store %arg11[%c0_46, %c0_47, %c3, %c0_48], %28 {strides = array<i32>} : memref<1x8x8x16xf32, #tpu.memory_space<vmem>>, vector<1x8x1x16xf32>,
    %29 = vector.extract_strided_slice %12 {offsets = [0, 0, 64], sizes = [1, 8, 16], strides = [1, 1, 1]} : vector<1x8x128xf32> to vector<1x8x16xf32>
    %c0_49 = arith.constant 0 : index
    %c0_50 = arith.constant 0 : index
    %c4 = arith.constant 4 : index
    %c0_51 = arith.constant 0 : index
    %30 = vector.load %arg11[%c0_49, %c0_50, %c4, %c0_51] : memref<1x8x8x16xf32, #tpu.memory_space<vmem>>, vector<1x8x1x16xf32>
    %31 = vector.shape_cast %30 : vector<1x8x1x16xf32> to vector<1x8x16xf32>
    %32 = vector.shape_cast %29 : vector<1x8x16xf32> to vector<1x8x1x16xf32>
    tpu.vector_store %arg11[%c0_49, %c0_50, %c4, %c0_51], %32 {strides = array<i32>} : memref<1x8x8x16xf32, #tpu.memory_space<vmem>>, vector<1x8x1x16xf32>,
    %33 = vector.extract_strided_slice %12 {offsets = [0, 0, 80], sizes = [1, 8, 16], strides = [1, 1, 1]} : vector<1x8x128xf32> to vector<1x8x16xf32>
    %c0_52 = arith.constant 0 : index
    %c0_53 = arith.constant 0 : index
    %c5 = arith.constant 5 : index
    %c0_54 = arith.constant 0 : index
    %34 = vector.load %arg11[%c0_52, %c0_53, %c5, %c0_54] : memref<1x8x8x16xf32, #tpu.memory_space<vmem>>, vector<1x8x1x16xf32>
    %35 = vector.shape_cast %34 : vector<1x8x1x16xf32> to vector<1x8x16xf32>
    %36 = vector.shape_cast %33 : vector<1x8x16xf32> to vector<1x8x1x16xf32>
    tpu.vector_store %arg11[%c0_52, %c0_53, %c5, %c0_54], %36 {strides = array<i32>} : memref<1x8x8x16xf32, #tpu.memory_space<vmem>>, vector<1x8x1x16xf32>,
    %37 = vector.extract_strided_slice %12 {offsets = [0, 0, 96], sizes = [1, 8, 16], strides = [1, 1, 1]} : vector<1x8x128xf32> to vector<1x8x16xf32>
    %c0_55 = arith.constant 0 : index
    %c0_56 = arith.constant 0 : index
    %c6 = arith.constant 6 : index
    %c0_57 = arith.constant 0 : index
    %38 = vector.load %arg11[%c0_55, %c0_56, %c6, %c0_57] : memref<1x8x8x16xf32, #tpu.memory_space<vmem>>, vector<1x8x1x16xf32>
    %39 = vector.shape_cast %38 : vector<1x8x1x16xf32> to vector<1x8x16xf32>
    %40 = vector.shape_cast %37 : vector<1x8x16xf32> to vector<1x8x1x16xf32>
    tpu.vector_store %arg11[%c0_55, %c0_56, %c6, %c0_57], %40 {strides = array<i32>} : memref<1x8x8x16xf32, #tpu.memory_space<vmem>>, vector<1x8x1x16xf32>,
    %41 = vector.extract_strided_slice %12 {offsets = [0, 0, 112], sizes = [1, 8, 16], strides = [1, 1, 1]} : vector<1x8x128xf32> to vector<1x8x16xf32>
    %c0_58 = arith.constant 0 : index
    %c0_59 = arith.constant 0 : index
    %c7 = arith.constant 7 : index
    %c0_60 = arith.constant 0 : index
    %42 = vector.load %arg11[%c0_58, %c0_59, %c7, %c0_60] : memref<1x8x8x16xf32, #tpu.memory_space<vmem>>, vector<1x8x1x16xf32>
    %43 = vector.shape_cast %42 : vector<1x8x1x16xf32> to vector<1x8x16xf32>
    %44 = vector.shape_cast %41 : vector<1x8x16xf32> to vector<1x8x1x16xf32>
    tpu.vector_store %arg11[%c0_58, %c0_59, %c7, %c0_60], %44 {strides = array<i32>} : memref<1x8x8x16xf32, #tpu.memory_space<vmem>>, vector<1x8x1x16xf32>,
    %c0_61 = arith.constant 0 : index
    %c0_62 = arith.constant 0 : index
    %c0_63 = arith.constant 0 : index
    %c0_64 = arith.constant 0 : index
    %45 = vector.load %arg11[%c0_61, %c0_62, %c0_63, %c0_64] : memref<1x8x8x16xf32, #tpu.memory_space<vmem>>, vector<1x8x8x16xf32>
    %46 = vector.shape_cast %45 : vector<1x8x8x16xf32> to vector<64x16xf32>
    %c0_65 = arith.constant 0 : index
    %c0_66 = arith.constant 0 : index
    %c0_67 = arith.constant 0 : index
    %47 = vector.load %arg2[%c0_65, %c0_66, %c0_67] : memref<2x16x16xf32, #tpu.memory_space<vmem>>, vector<1x16x16xf32>
    %48 = vector.shape_cast %47 : vector<1x16x16xf32> to vector<16x16xf32>
    %cst_68 = arith.constant dense<0.000000e+00> : vector<64x16xf32>
    %49 = tpu.matmul %46, %48, %cst_68 {dimension_numbers = #tpu.dot_dimension_numbers<[1], [0], [0], [1], [0, 0, 1, 1], [], []>, precision = #tpu.contract_precision<fp32>} : vector<64x16xf32>, vector<16x16xf32>, vector<64x16xf32> -> vector<64x16xf32>
    %c0_69 = arith.constant 0 : index
    %c0_70 = arith.constant 0 : index
    %c0_71 = arith.constant 0 : index
    %50 = vector.load %arg3[%c0_69, %c0_70, %c0_71] : memref<2x1x16xf32, #tpu.memory_space<vmem>>, vector<1x1x16xf32>
    %51 = vector.shape_cast %50 : vector<1x1x16xf32> to vector<1x16xf32>
    %52 = vector.broadcast %51 : vector<1x16xf32> to vector<64x16xf32>
    %53 = arith.addf %49, %52 : vector<64x16xf32>
    %54 = vector.extract_strided_slice %53 {offsets = [0, 0], sizes = [64, 8], strides = [1, 1]} : vector<64x16xf32> to vector<64x8xf32>
    %55 = vector.shape_cast %54 : vector<64x8xf32> to vector<1x8x8x8xf32>
    %c0_72 = arith.constant 0 : index
    %c1_73 = arith.constant 1 : index
    %c1_74 = arith.constant 1 : index
    %c0_75 = arith.constant 0 : index
    %56 = vector.load %arg12[%c0_72, %c1_73, %c1_74, %c0_75] : memref<1x10x10x8xf32, #tpu.memory_space<vmem>>, vector<1x8x8x8xf32>
    tpu.vector_store %arg12[%c0_72, %c1_73, %c1_74, %c0_75], %55 {strides = array<i32>} : memref<1x10x10x8xf32, #tpu.memory_space<vmem>>, vector<1x8x8x8xf32>,
    %c0_76 = arith.constant 0 : index
    %c0_77 = arith.constant 0 : index
    %c0_78 = arith.constant 0 : index
    %c0_79 = arith.constant 0 : index
    %57 = vector.load %arg12[%c0_76, %c0_77, %c0_78, %c0_79] : memref<1x10x10x8xf32, #tpu.memory_space<vmem>>, vector<1x8x8x8xf32>
    %58 = vector.shape_cast %57 : vector<1x8x8x8xf32> to vector<64x8xf32>
    %c0_80 = arith.constant 0 : index
    %c0_81 = arith.constant 0 : index
    %c1_82 = arith.constant 1 : index
    %c0_83 = arith.constant 0 : index
    %59 = vector.load %arg12[%c0_80, %c0_81, %c1_82, %c0_83] : memref<1x10x10x8xf32, #tpu.memory_space<vmem>>, vector<1x8x8x8xf32>
    %60 = vector.shape_cast %59 : vector<1x8x8x8xf32> to vector<64x8xf32>
    %c0_84 = arith.constant 0 : index
    %c0_85 = arith.constant 0 : index
    %c2_86 = arith.constant 2 : index
    %c0_87 = arith.constant 0 : index
    %61 = vector.load %arg12[%c0_84, %c0_85, %c2_86, %c0_87] : memref<1x10x10x8xf32, #tpu.memory_space<vmem>>, vector<1x8x8x8xf32>
    %62 = vector.shape_cast %61 : vector<1x8x8x8xf32> to vector<64x8xf32>
    %c0_88 = arith.constant 0 : index
    %c1_89 = arith.constant 1 : index
    %c0_90 = arith.constant 0 : index
    %c0_91 = arith.constant 0 : index
    %63 = vector.load %arg12[%c0_88, %c1_89, %c0_90, %c0_91] : memref<1x10x10x8xf32, #tpu.memory_space<vmem>>, vector<1x8x8x8xf32>
    %64 = vector.shape_cast %63 : vector<1x8x8x8xf32> to vector<64x8xf32>
    %c0_92 = arith.constant 0 : index
    %c1_93 = arith.constant 1 : index
    %c1_94 = arith.constant 1 : index
    %c0_95 = arith.constant 0 : index
    %65 = vector.load %arg12[%c0_92, %c1_93, %c1_94, %c0_95] : memref<1x10x10x8xf32, #tpu.memory_space<vmem>>, vector<1x8x8x8xf32>
    %66 = vector.shape_cast %65 : vector<1x8x8x8xf32> to vector<64x8xf32>
    %c0_96 = arith.constant 0 : index
    %c1_97 = arith.constant 1 : index
    %c2_98 = arith.constant 2 : index
    %c0_99 = arith.constant 0 : index
    %67 = vector.load %arg12[%c0_96, %c1_97, %c2_98, %c0_99] : memref<1x10x10x8xf32, #tpu.memory_space<vmem>>, vector<1x8x8x8xf32>
    %68 = vector.shape_cast %67 : vector<1x8x8x8xf32> to vector<64x8xf32>
    %c0_100 = arith.constant 0 : index
    %c2_101 = arith.constant 2 : index
    %c0_102 = arith.constant 0 : index
    %c0_103 = arith.constant 0 : index
    %69 = vector.load %arg12[%c0_100, %c2_101, %c0_102, %c0_103] : memref<1x10x10x8xf32, #tpu.memory_space<vmem>>, vector<1x8x8x8xf32>
    %70 = vector.shape_cast %69 : vector<1x8x8x8xf32> to vector<64x8xf32>
    %c0_104 = arith.constant 0 : index
    %c2_105 = arith.constant 2 : index
    %c1_106 = arith.constant 1 : index
    %c0_107 = arith.constant 0 : index
    %71 = vector.load %arg12[%c0_104, %c2_105, %c1_106, %c0_107] : memref<1x10x10x8xf32, #tpu.memory_space<vmem>>, vector<1x8x8x8xf32>
    %72 = vector.shape_cast %71 : vector<1x8x8x8xf32> to vector<64x8xf32>
    %c0_108 = arith.constant 0 : index
    %c2_109 = arith.constant 2 : index
    %c2_110 = arith.constant 2 : index
    %c0_111 = arith.constant 0 : index
    %73 = vector.load %arg12[%c0_108, %c2_109, %c2_110, %c0_111] : memref<1x10x10x8xf32, #tpu.memory_space<vmem>>, vector<1x8x8x8xf32>
    %74 = vector.shape_cast %73 : vector<1x8x8x8xf32> to vector<64x8xf32>
    %75 = tpu.concatenate %58, %60, %62, %64, %66, %68, %70, %72, %74 in 1 : vector<64x8xf32>, vector<64x8xf32>, vector<64x8xf32>, vector<64x8xf32>, vector<64x8xf32>, vector<64x8xf32>, vector<64x8xf32>, vector<64x8xf32>, vector<64x8xf32> -> vector<64x72xf32>
    %c0_112 = arith.constant 0 : index
    %c0_113 = arith.constant 0 : index
    %c0_114 = arith.constant 0 : index
    %76 = vector.load %arg4[%c0_112, %c0_113, %c0_114] : memref<2x72x32xf32, #tpu.memory_space<vmem>>, vector<1x72x32xf32>
    %77 = vector.shape_cast %76 : vector<1x72x32xf32> to vector<72x32xf32>
    %cst_115 = arith.constant dense<0.000000e+00> : vector<64x32xf32>
    %78 = tpu.matmul %75, %77, %cst_115 {dimension_numbers = #tpu.dot_dimension_numbers<[1], [0], [0], [1], [0, 0, 1, 1], [], []>, precision = #tpu.contract_precision<fp32>} : vector<64x72xf32>, vector<72x32xf32>, vector<64x32xf32> -> vector<64x32xf32>
    %c0_116 = arith.constant 0 : index
    %c0_117 = arith.constant 0 : index
    %c0_118 = arith.constant 0 : index
    %79 = vector.load %arg5[%c0_116, %c0_117, %c0_118] : memref<2x1x32xf32, #tpu.memory_space<vmem>>, vector<1x1x32xf32>
    %80 = vector.shape_cast %79 : vector<1x1x32xf32> to vector<1x32xf32>
    %81 = vector.broadcast %80 : vector<1x32xf32> to vector<64x32xf32>
    %82 = arith.addf %78, %81 : vector<64x32xf32>
    %cst_119 = arith.constant 0.000000e+00 : f32
    %83 = vector.broadcast %cst_119 : f32 to vector<64x32xf32>
    %84 = arith.maximumf %82, %83 : vector<64x32xf32>
    %c0_120 = arith.constant 0 : index
    %c0_121 = arith.constant 0 : index
    %c0_122 = arith.constant 0 : index
    %85 = vector.load %arg6[%c0_120, %c0_121, %c0_122] : memref<2x32x32xf32, #tpu.memory_space<vmem>>, vector<1x32x32xf32>
    %86 = vector.shape_cast %85 : vector<1x32x32xf32> to vector<32x32xf32>
    %cst_123 = arith.constant dense<0.000000e+00> : vector<64x32xf32>
    %87 = tpu.matmul %84, %86, %cst_123 {dimension_numbers = #tpu.dot_dimension_numbers<[1], [0], [0], [1], [0, 0, 1, 1], [], []>, precision = #tpu.contract_precision<fp32>} : vector<64x32xf32>, vector<32x32xf32>, vector<64x32xf32> -> vector<64x32xf32>
    %c0_124 = arith.constant 0 : index
    %c0_125 = arith.constant 0 : index
    %c0_126 = arith.constant 0 : index
    %88 = vector.load %arg7[%c0_124, %c0_125, %c0_126] : memref<2x1x32xf32, #tpu.memory_space<vmem>>, vector<1x1x32xf32>
    %89 = vector.shape_cast %88 : vector<1x1x32xf32> to vector<1x32xf32>
    %90 = vector.broadcast %89 : vector<1x32xf32> to vector<64x32xf32>
    %91 = arith.addf %87, %90 : vector<64x32xf32>
    %cst_127 = arith.constant 0.000000e+00 : f32
    %92 = vector.broadcast %cst_127 : f32 to vector<64x32xf32>
    %93 = arith.maximumf %91, %92 : vector<64x32xf32>
    %94 = vector.shape_cast %93 : vector<64x32xf32> to vector<1x8x8x32xf32>
    %c0_128 = arith.constant 0 : index
    %c1_129 = arith.constant 1 : index
    %c1_130 = arith.constant 1 : index
    %c0_131 = arith.constant 0 : index
    %95 = vector.load %arg13[%c0_128, %c1_129, %c1_130, %c0_131] : memref<1x10x10x32xf32, #tpu.memory_space<vmem>>, vector<1x8x8x32xf32>
    tpu.vector_store %arg13[%c0_128, %c1_129, %c1_130, %c0_131], %94 {strides = array<i32>} : memref<1x10x10x32xf32, #tpu.memory_space<vmem>>, vector<1x8x8x32xf32>,
    %c0_132 = arith.constant 0 : index
    %c0_133 = arith.constant 0 : index
    %c0_134 = arith.constant 0 : index
    %c0_135 = arith.constant 0 : index
    %96 = vector.load %arg13[%c0_132, %c0_133, %c0_134, %c0_135] : memref<1x10x10x32xf32, #tpu.memory_space<vmem>>, vector<1x8x8x32xf32>
    %97 = vector.shape_cast %96 : vector<1x8x8x32xf32> to vector<64x32xf32>
    %c0_136 = arith.constant 0 : index
    %c0_137 = arith.constant 0 : index
    %c1_138 = arith.constant 1 : index
    %c0_139 = arith.constant 0 : index
    %98 = vector.load %arg13[%c0_136, %c0_137, %c1_138, %c0_139] : memref<1x10x10x32xf32, #tpu.memory_space<vmem>>, vector<1x8x8x32xf32>
    %99 = vector.shape_cast %98 : vector<1x8x8x32xf32> to vector<64x32xf32>
    %c0_140 = arith.constant 0 : index
    %c0_141 = arith.constant 0 : index
    %c2_142 = arith.constant 2 : index
    %c0_143 = arith.constant 0 : index
    %100 = vector.load %arg13[%c0_140, %c0_141, %c2_142, %c0_143] : memref<1x10x10x32xf32, #tpu.memory_space<vmem>>, vector<1x8x8x32xf32>
    %101 = vector.shape_cast %100 : vector<1x8x8x32xf32> to vector<64x32xf32>
    %c0_144 = arith.constant 0 : index
    %c1_145 = arith.constant 1 : index
    %c0_146 = arith.constant 0 : index
    %c0_147 = arith.constant 0 : index
    %102 = vector.load %arg13[%c0_144, %c1_145, %c0_146, %c0_147] : memref<1x10x10x32xf32, #tpu.memory_space<vmem>>, vector<1x8x8x32xf32>
    %103 = vector.shape_cast %102 : vector<1x8x8x32xf32> to vector<64x32xf32>
    %c0_148 = arith.constant 0 : index
    %c1_149 = arith.constant 1 : index
    %c1_150 = arith.constant 1 : index
    %c0_151 = arith.constant 0 : index
    %104 = vector.load %arg13[%c0_148, %c1_149, %c1_150, %c0_151] : memref<1x10x10x32xf32, #tpu.memory_space<vmem>>, vector<1x8x8x32xf32>
    %105 = vector.shape_cast %104 : vector<1x8x8x32xf32> to vector<64x32xf32>
    %c0_152 = arith.constant 0 : index
    %c1_153 = arith.constant 1 : index
    %c2_154 = arith.constant 2 : index
    %c0_155 = arith.constant 0 : index
    %106 = vector.load %arg13[%c0_152, %c1_153, %c2_154, %c0_155] : memref<1x10x10x32xf32, #tpu.memory_space<vmem>>, vector<1x8x8x32xf32>
    %107 = vector.shape_cast %106 : vector<1x8x8x32xf32> to vector<64x32xf32>
    %c0_156 = arith.constant 0 : index
    %c2_157 = arith.constant 2 : index
    %c0_158 = arith.constant 0 : index
    %c0_159 = arith.constant 0 : index
    %108 = vector.load %arg13[%c0_156, %c2_157, %c0_158, %c0_159] : memref<1x10x10x32xf32, #tpu.memory_space<vmem>>, vector<1x8x8x32xf32>
    %109 = vector.shape_cast %108 : vector<1x8x8x32xf32> to vector<64x32xf32>
    %c0_160 = arith.constant 0 : index
    %c2_161 = arith.constant 2 : index
    %c1_162 = arith.constant 1 : index
    %c0_163 = arith.constant 0 : index
    %110 = vector.load %arg13[%c0_160, %c2_161, %c1_162, %c0_163] : memref<1x10x10x32xf32, #tpu.memory_space<vmem>>, vector<1x8x8x32xf32>
    %111 = vector.shape_cast %110 : vector<1x8x8x32xf32> to vector<64x32xf32>
    %c0_164 = arith.constant 0 : index
    %c2_165 = arith.constant 2 : index
    %c2_166 = arith.constant 2 : index
    %c0_167 = arith.constant 0 : index
    %112 = vector.load %arg13[%c0_164, %c2_165, %c2_166, %c0_167] : memref<1x10x10x32xf32, #tpu.memory_space<vmem>>, vector<1x8x8x32xf32>
    %113 = vector.shape_cast %112 : vector<1x8x8x32xf32> to vector<64x32xf32>
    %114 = tpu.concatenate %97, %99, %101, %103, %105, %107, %109, %111, %113 in 1 : vector<64x32xf32>, vector<64x32xf32>, vector<64x32xf32>, vector<64x32xf32>, vector<64x32xf32>, vector<64x32xf32>, vector<64x32xf32>, vector<64x32xf32>, vector<64x32xf32> -> vector<64x288xf32>
    %c0_168 = arith.constant 0 : index
    %c0_169 = arith.constant 0 : index
    %c0_170 = arith.constant 0 : index
    %115 = vector.load %arg8[%c0_168, %c0_169, %c0_170] : memref<2x288x16xf32, #tpu.memory_space<vmem>>, vector<1x288x16xf32>
    %116 = vector.shape_cast %115 : vector<1x288x16xf32> to vector<288x16xf32>
    %cst_171 = arith.constant dense<0.000000e+00> : vector<64x16xf32>
    %117 = tpu.matmul %114, %116, %cst_171 {dimension_numbers = #tpu.dot_dimension_numbers<[1], [0], [0], [1], [0, 0, 1, 1], [], []>, precision = #tpu.contract_precision<fp32>} : vector<64x288xf32>, vector<288x16xf32>, vector<64x16xf32> -> vector<64x16xf32>
    %c0_172 = arith.constant 0 : index
    %c0_173 = arith.constant 0 : index
    %c0_174 = arith.constant 0 : index
    %118 = vector.load %arg9[%c0_172, %c0_173, %c0_174] : memref<2x1x16xf32, #tpu.memory_space<vmem>>, vector<1x1x16xf32>
    %119 = vector.shape_cast %118 : vector<1x1x16xf32> to vector<1x16xf32>
    %120 = vector.broadcast %119 : vector<1x16xf32> to vector<64x16xf32>
    %121 = arith.addf %117, %120 : vector<64x16xf32>
    %122 = vector.extract_strided_slice %121 {offsets = [0, 0], sizes = [64, 8], strides = [1, 1]} : vector<64x16xf32> to vector<64x8xf32>
    %cst_175 = arith.constant 2.000000e+00 : f32
    %123 = vector.broadcast %cst_175 : f32 to vector<64x8xf32>
    %124 = arith.addf %122, %123 : vector<64x8xf32>
    %125 = arith.negf %124 : vector<64x8xf32>
    %126 = math.exp %125 : vector<64x8xf32>
    %cst_176 = arith.constant 1.000000e+00 : f32
    %127 = vector.broadcast %cst_176 : f32 to vector<64x8xf32>
    %128 = arith.addf %127, %126 : vector<64x8xf32>
    %129 = arith.divf %127, %128 : vector<64x8xf32>
    %130 = vector.extract_strided_slice %53 {offsets = [0, 8], sizes = [64, 8], strides = [1, 1]} : vector<64x16xf32> to vector<64x8xf32>
    %131 = vector.extract_strided_slice %121 {offsets = [0, 8], sizes = [64, 8], strides = [1, 1]} : vector<64x16xf32> to vector<64x8xf32>
    %132 = arith.addf %130, %131 : vector<64x8xf32>
    %133 = arith.mulf %132, %129 : vector<64x8xf32>
    %134 = tpu.concatenate %54, %133 in 1 : vector<64x8xf32>, vector<64x8xf32> -> vector<64x16xf32>
    %c1_177 = arith.constant 1 : index
    %c0_178 = arith.constant 0 : index
    %c0_179 = arith.constant 0 : index
    %135 = vector.load %arg2[%c1_177, %c0_178, %c0_179] : memref<2x16x16xf32, #tpu.memory_space<vmem>>, vector<1x16x16xf32>
    %136 = vector.shape_cast %135 : vector<1x16x16xf32> to vector<16x16xf32>
    %cst_180 = arith.constant dense<0.000000e+00> : vector<64x16xf32>
    %137 = tpu.matmul %134, %136, %cst_180 {dimension_numbers = #tpu.dot_dimension_numbers<[1], [0], [0], [1], [0, 0, 1, 1], [], []>, precision = #tpu.contract_precision<fp32>} : vector<64x16xf32>, vector<16x16xf32>, vector<64x16xf32> -> vector<64x16xf32>
    %c1_181 = arith.constant 1 : index
    %c0_182 = arith.constant 0 : index
    %c0_183 = arith.constant 0 : index
    %138 = vector.load %arg3[%c1_181, %c0_182, %c0_183] : memref<2x1x16xf32, #tpu.memory_space<vmem>>, vector<1x1x16xf32>
    %139 = vector.shape_cast %138 : vector<1x1x16xf32> to vector<1x16xf32>
    %140 = vector.broadcast %139 : vector<1x16xf32> to vector<64x16xf32>
    %141 = arith.addf %137, %140 : vector<64x16xf32>
    %142 = vector.extract_strided_slice %141 {offsets = [0, 0], sizes = [64, 8], strides = [1, 1]} : vector<64x16xf32> to vector<64x8xf32>
    %143 = vector.shape_cast %142 : vector<64x8xf32> to vector<1x8x8x8xf32>
    %c0_184 = arith.constant 0 : index
    %c1_185 = arith.constant 1 : index
    %c1_186 = arith.constant 1 : index
    %c0_187 = arith.constant 0 : index
    %144 = vector.load %arg12[%c0_184, %c1_185, %c1_186, %c0_187] : memref<1x10x10x8xf32, #tpu.memory_space<vmem>>, vector<1x8x8x8xf32>
    tpu.vector_store %arg12[%c0_184, %c1_185, %c1_186, %c0_187], %143 {strides = array<i32>} : memref<1x10x10x8xf32, #tpu.memory_space<vmem>>, vector<1x8x8x8xf32>,
    %c0_188 = arith.constant 0 : index
    %c0_189 = arith.constant 0 : index
    %c0_190 = arith.constant 0 : index
    %c0_191 = arith.constant 0 : index
    %145 = vector.load %arg12[%c0_188, %c0_189, %c0_190, %c0_191] : memref<1x10x10x8xf32, #tpu.memory_space<vmem>>, vector<1x8x8x8xf32>
    %146 = vector.shape_cast %145 : vector<1x8x8x8xf32> to vector<64x8xf32>
    %c0_192 = arith.constant 0 : index
    %c0_193 = arith.constant 0 : index
    %c1_194 = arith.constant 1 : index
    %c0_195 = arith.constant 0 : index
    %147 = vector.load %arg12[%c0_192, %c0_193, %c1_194, %c0_195] : memref<1x10x10x8xf32, #tpu.memory_space<vmem>>, vector<1x8x8x8xf32>
    %148 = vector.shape_cast %147 : vector<1x8x8x8xf32> to vector<64x8xf32>
    %c0_196 = arith.constant 0 : index
    %c0_197 = arith.constant 0 : index
    %c2_198 = arith.constant 2 : index
    %c0_199 = arith.constant 0 : index
    %149 = vector.load %arg12[%c0_196, %c0_197, %c2_198, %c0_199] : memref<1x10x10x8xf32, #tpu.memory_space<vmem>>, vector<1x8x8x8xf32>
    %150 = vector.shape_cast %149 : vector<1x8x8x8xf32> to vector<64x8xf32>
    %c0_200 = arith.constant 0 : index
    %c1_201 = arith.constant 1 : index
    %c0_202 = arith.constant 0 : index
    %c0_203 = arith.constant 0 : index
    %151 = vector.load %arg12[%c0_200, %c1_201, %c0_202, %c0_203] : memref<1x10x10x8xf32, #tpu.memory_space<vmem>>, vector<1x8x8x8xf32>
    %152 = vector.shape_cast %151 : vector<1x8x8x8xf32> to vector<64x8xf32>
    %c0_204 = arith.constant 0 : index
    %c1_205 = arith.constant 1 : index
    %c1_206 = arith.constant 1 : index
    %c0_207 = arith.constant 0 : index
    %153 = vector.load %arg12[%c0_204, %c1_205, %c1_206, %c0_207] : memref<1x10x10x8xf32, #tpu.memory_space<vmem>>, vector<1x8x8x8xf32>
    %154 = vector.shape_cast %153 : vector<1x8x8x8xf32> to vector<64x8xf32>
    %c0_208 = arith.constant 0 : index
    %c1_209 = arith.constant 1 : index
    %c2_210 = arith.constant 2 : index
    %c0_211 = arith.constant 0 : index
    %155 = vector.load %arg12[%c0_208, %c1_209, %c2_210, %c0_211] : memref<1x10x10x8xf32, #tpu.memory_space<vmem>>, vector<1x8x8x8xf32>
    %156 = vector.shape_cast %155 : vector<1x8x8x8xf32> to vector<64x8xf32>
    %c0_212 = arith.constant 0 : index
    %c2_213 = arith.constant 2 : index
    %c0_214 = arith.constant 0 : index
    %c0_215 = arith.constant 0 : index
    %157 = vector.load %arg12[%c0_212, %c2_213, %c0_214, %c0_215] : memref<1x10x10x8xf32, #tpu.memory_space<vmem>>, vector<1x8x8x8xf32>
    %158 = vector.shape_cast %157 : vector<1x8x8x8xf32> to vector<64x8xf32>
    %c0_216 = arith.constant 0 : index
    %c2_217 = arith.constant 2 : index
    %c1_218 = arith.constant 1 : index
    %c0_219 = arith.constant 0 : index
    %159 = vector.load %arg12[%c0_216, %c2_217, %c1_218, %c0_219] : memref<1x10x10x8xf32, #tpu.memory_space<vmem>>, vector<1x8x8x8xf32>
    %160 = vector.shape_cast %159 : vector<1x8x8x8xf32> to vector<64x8xf32>
    %c0_220 = arith.constant 0 : index
    %c2_221 = arith.constant 2 : index
    %c2_222 = arith.constant 2 : index
    %c0_223 = arith.constant 0 : index
    %161 = vector.load %arg12[%c0_220, %c2_221, %c2_222, %c0_223] : memref<1x10x10x8xf32, #tpu.memory_space<vmem>>, vector<1x8x8x8xf32>
    %162 = vector.shape_cast %161 : vector<1x8x8x8xf32> to vector<64x8xf32>
    %163 = tpu.concatenate %146, %148, %150, %152, %154, %156, %158, %160, %162 in 1 : vector<64x8xf32>, vector<64x8xf32>, vector<64x8xf32>, vector<64x8xf32>, vector<64x8xf32>, vector<64x8xf32>, vector<64x8xf32>, vector<64x8xf32>, vector<64x8xf32> -> vector<64x72xf32>
    %c1_224 = arith.constant 1 : index
    %c0_225 = arith.constant 0 : index
    %c0_226 = arith.constant 0 : index
    %164 = vector.load %arg4[%c1_224, %c0_225, %c0_226] : memref<2x72x32xf32, #tpu.memory_space<vmem>>, vector<1x72x32xf32>
    %165 = vector.shape_cast %164 : vector<1x72x32xf32> to vector<72x32xf32>
    %cst_227 = arith.constant dense<0.000000e+00> : vector<64x32xf32>
    %166 = tpu.matmul %163, %165, %cst_227 {dimension_numbers = #tpu.dot_dimension_numbers<[1], [0], [0], [1], [0, 0, 1, 1], [], []>, precision = #tpu.contract_precision<fp32>} : vector<64x72xf32>, vector<72x32xf32>, vector<64x32xf32> -> vector<64x32xf32>
    %c1_228 = arith.constant 1 : index
    %c0_229 = arith.constant 0 : index
    %c0_230 = arith.constant 0 : index
    %167 = vector.load %arg5[%c1_228, %c0_229, %c0_230] : memref<2x1x32xf32, #tpu.memory_space<vmem>>, vector<1x1x32xf32>
    %168 = vector.shape_cast %167 : vector<1x1x32xf32> to vector<1x32xf32>
    %169 = vector.broadcast %168 : vector<1x32xf32> to vector<64x32xf32>
    %170 = arith.addf %166, %169 : vector<64x32xf32>
    %cst_231 = arith.constant 0.000000e+00 : f32
    %171 = vector.broadcast %cst_231 : f32 to vector<64x32xf32>
    %172 = arith.maximumf %170, %171 : vector<64x32xf32>
    %c1_232 = arith.constant 1 : index
    %c0_233 = arith.constant 0 : index
    %c0_234 = arith.constant 0 : index
    %173 = vector.load %arg6[%c1_232, %c0_233, %c0_234] : memref<2x32x32xf32, #tpu.memory_space<vmem>>, vector<1x32x32xf32>
    %174 = vector.shape_cast %173 : vector<1x32x32xf32> to vector<32x32xf32>
    %cst_235 = arith.constant dense<0.000000e+00> : vector<64x32xf32>
    %175 = tpu.matmul %172, %174, %cst_235 {dimension_numbers = #tpu.dot_dimension_numbers<[1], [0], [0], [1], [0, 0, 1, 1], [], []>, precision = #tpu.contract_precision<fp32>} : vector<64x32xf32>, vector<32x32xf32>, vector<64x32xf32> -> vector<64x32xf32>
    %c1_236 = arith.constant 1 : index
    %c0_237 = arith.constant 0 : index
    %c0_238 = arith.constant 0 : index
    %176 = vector.load %arg7[%c1_236, %c0_237, %c0_238] : memref<2x1x32xf32, #tpu.memory_space<vmem>>, vector<1x1x32xf32>
    %177 = vector.shape_cast %176 : vector<1x1x32xf32> to vector<1x32xf32>
    %178 = vector.broadcast %177 : vector<1x32xf32> to vector<64x32xf32>
    %179 = arith.addf %175, %178 : vector<64x32xf32>
    %cst_239 = arith.constant 0.000000e+00 : f32
    %180 = vector.broadcast %cst_239 : f32 to vector<64x32xf32>
    %181 = arith.maximumf %179, %180 : vector<64x32xf32>
    %182 = vector.shape_cast %181 : vector<64x32xf32> to vector<1x8x8x32xf32>
    %c0_240 = arith.constant 0 : index
    %c1_241 = arith.constant 1 : index
    %c1_242 = arith.constant 1 : index
    %c0_243 = arith.constant 0 : index
    %183 = vector.load %arg13[%c0_240, %c1_241, %c1_242, %c0_243] : memref<1x10x10x32xf32, #tpu.memory_space<vmem>>, vector<1x8x8x32xf32>
    tpu.vector_store %arg13[%c0_240, %c1_241, %c1_242, %c0_243], %182 {strides = array<i32>} : memref<1x10x10x32xf32, #tpu.memory_space<vmem>>, vector<1x8x8x32xf32>,
    %c0_244 = arith.constant 0 : index
    %c0_245 = arith.constant 0 : index
    %c0_246 = arith.constant 0 : index
    %c0_247 = arith.constant 0 : index
    %184 = vector.load %arg13[%c0_244, %c0_245, %c0_246, %c0_247] : memref<1x10x10x32xf32, #tpu.memory_space<vmem>>, vector<1x8x8x32xf32>
    %185 = vector.shape_cast %184 : vector<1x8x8x32xf32> to vector<64x32xf32>
    %c0_248 = arith.constant 0 : index
    %c0_249 = arith.constant 0 : index
    %c1_250 = arith.constant 1 : index
    %c0_251 = arith.constant 0 : index
    %186 = vector.load %arg13[%c0_248, %c0_249, %c1_250, %c0_251] : memref<1x10x10x32xf32, #tpu.memory_space<vmem>>, vector<1x8x8x32xf32>
    %187 = vector.shape_cast %186 : vector<1x8x8x32xf32> to vector<64x32xf32>
    %c0_252 = arith.constant 0 : index
    %c0_253 = arith.constant 0 : index
    %c2_254 = arith.constant 2 : index
    %c0_255 = arith.constant 0 : index
    %188 = vector.load %arg13[%c0_252, %c0_253, %c2_254, %c0_255] : memref<1x10x10x32xf32, #tpu.memory_space<vmem>>, vector<1x8x8x32xf32>
    %189 = vector.shape_cast %188 : vector<1x8x8x32xf32> to vector<64x32xf32>
    %c0_256 = arith.constant 0 : index
    %c1_257 = arith.constant 1 : index
    %c0_258 = arith.constant 0 : index
    %c0_259 = arith.constant 0 : index
    %190 = vector.load %arg13[%c0_256, %c1_257, %c0_258, %c0_259] : memref<1x10x10x32xf32, #tpu.memory_space<vmem>>, vector<1x8x8x32xf32>
    %191 = vector.shape_cast %190 : vector<1x8x8x32xf32> to vector<64x32xf32>
    %c0_260 = arith.constant 0 : index
    %c1_261 = arith.constant 1 : index
    %c1_262 = arith.constant 1 : index
    %c0_263 = arith.constant 0 : index
    %192 = vector.load %arg13[%c0_260, %c1_261, %c1_262, %c0_263] : memref<1x10x10x32xf32, #tpu.memory_space<vmem>>, vector<1x8x8x32xf32>
    %193 = vector.shape_cast %192 : vector<1x8x8x32xf32> to vector<64x32xf32>
    %c0_264 = arith.constant 0 : index
    %c1_265 = arith.constant 1 : index
    %c2_266 = arith.constant 2 : index
    %c0_267 = arith.constant 0 : index
    %194 = vector.load %arg13[%c0_264, %c1_265, %c2_266, %c0_267] : memref<1x10x10x32xf32, #tpu.memory_space<vmem>>, vector<1x8x8x32xf32>
    %195 = vector.shape_cast %194 : vector<1x8x8x32xf32> to vector<64x32xf32>
    %c0_268 = arith.constant 0 : index
    %c2_269 = arith.constant 2 : index
    %c0_270 = arith.constant 0 : index
    %c0_271 = arith.constant 0 : index
    %196 = vector.load %arg13[%c0_268, %c2_269, %c0_270, %c0_271] : memref<1x10x10x32xf32, #tpu.memory_space<vmem>>, vector<1x8x8x32xf32>
    %197 = vector.shape_cast %196 : vector<1x8x8x32xf32> to vector<64x32xf32>
    %c0_272 = arith.constant 0 : index
    %c2_273 = arith.constant 2 : index
    %c1_274 = arith.constant 1 : index
    %c0_275 = arith.constant 0 : index
    %198 = vector.load %arg13[%c0_272, %c2_273, %c1_274, %c0_275] : memref<1x10x10x32xf32, #tpu.memory_space<vmem>>, vector<1x8x8x32xf32>
    %199 = vector.shape_cast %198 : vector<1x8x8x32xf32> to vector<64x32xf32>
    %c0_276 = arith.constant 0 : index
    %c2_277 = arith.constant 2 : index
    %c2_278 = arith.constant 2 : index
    %c0_279 = arith.constant 0 : index
    %200 = vector.load %arg13[%c0_276, %c2_277, %c2_278, %c0_279] : memref<1x10x10x32xf32, #tpu.memory_space<vmem>>, vector<1x8x8x32xf32>
    %201 = vector.shape_cast %200 : vector<1x8x8x32xf32> to vector<64x32xf32>
    %202 = tpu.concatenate %185, %187, %189, %191, %193, %195, %197, %199, %201 in 1 : vector<64x32xf32>, vector<64x32xf32>, vector<64x32xf32>, vector<64x32xf32>, vector<64x32xf32>, vector<64x32xf32>, vector<64x32xf32>, vector<64x32xf32>, vector<64x32xf32> -> vector<64x288xf32>
    %c1_280 = arith.constant 1 : index
    %c0_281 = arith.constant 0 : index
    %c0_282 = arith.constant 0 : index
    %203 = vector.load %arg8[%c1_280, %c0_281, %c0_282] : memref<2x288x16xf32, #tpu.memory_space<vmem>>, vector<1x288x16xf32>
    %204 = vector.shape_cast %203 : vector<1x288x16xf32> to vector<288x16xf32>
    %cst_283 = arith.constant dense<0.000000e+00> : vector<64x16xf32>
    %205 = tpu.matmul %202, %204, %cst_283 {dimension_numbers = #tpu.dot_dimension_numbers<[1], [0], [0], [1], [0, 0, 1, 1], [], []>, precision = #tpu.contract_precision<fp32>} : vector<64x288xf32>, vector<288x16xf32>, vector<64x16xf32> -> vector<64x16xf32>
    %c1_284 = arith.constant 1 : index
    %c0_285 = arith.constant 0 : index
    %c0_286 = arith.constant 0 : index
    %206 = vector.load %arg9[%c1_284, %c0_285, %c0_286] : memref<2x1x16xf32, #tpu.memory_space<vmem>>, vector<1x1x16xf32>
    %207 = vector.shape_cast %206 : vector<1x1x16xf32> to vector<1x16xf32>
    %208 = vector.broadcast %207 : vector<1x16xf32> to vector<64x16xf32>
    %209 = arith.addf %205, %208 : vector<64x16xf32>
    %210 = vector.extract_strided_slice %209 {offsets = [0, 0], sizes = [64, 8], strides = [1, 1]} : vector<64x16xf32> to vector<64x8xf32>
    %cst_287 = arith.constant 2.000000e+00 : f32
    %211 = vector.broadcast %cst_287 : f32 to vector<64x8xf32>
    %212 = arith.addf %210, %211 : vector<64x8xf32>
    %213 = arith.negf %212 : vector<64x8xf32>
    %214 = math.exp %213 : vector<64x8xf32>
    %cst_288 = arith.constant 1.000000e+00 : f32
    %215 = vector.broadcast %cst_288 : f32 to vector<64x8xf32>
    %216 = arith.addf %215, %214 : vector<64x8xf32>
    %217 = arith.divf %215, %216 : vector<64x8xf32>
    %218 = vector.extract_strided_slice %141 {offsets = [0, 8], sizes = [64, 8], strides = [1, 1]} : vector<64x16xf32> to vector<64x8xf32>
    %219 = vector.extract_strided_slice %209 {offsets = [0, 8], sizes = [64, 8], strides = [1, 1]} : vector<64x16xf32> to vector<64x8xf32>
    %220 = arith.addf %218, %219 : vector<64x8xf32>
    %221 = arith.mulf %220, %217 : vector<64x8xf32>
    %222 = tpu.concatenate %142, %221 in 1 : vector<64x8xf32>, vector<64x8xf32> -> vector<64x16xf32>
    %223 = vector.shape_cast %222 : vector<64x16xf32> to vector<8x8x16xf32>
    %224 = vector.extract_strided_slice %223 {offsets = [0, 0, 0], sizes = [8, 1, 16], strides = [1, 1, 1]} : vector<8x8x16xf32> to vector<8x1x16xf32>
    %225 = vector.shape_cast %224 : vector<8x1x16xf32> to vector<8x16xf32>
    %226 = vector.extract_strided_slice %223 {offsets = [0, 1, 0], sizes = [8, 1, 16], strides = [1, 1, 1]} : vector<8x8x16xf32> to vector<8x1x16xf32>
    %227 = vector.shape_cast %226 : vector<8x1x16xf32> to vector<8x16xf32>
    %228 = vector.extract_strided_slice %223 {offsets = [0, 2, 0], sizes = [8, 1, 16], strides = [1, 1, 1]} : vector<8x8x16xf32> to vector<8x1x16xf32>
    %229 = vector.shape_cast %228 : vector<8x1x16xf32> to vector<8x16xf32>
    %230 = vector.extract_strided_slice %223 {offsets = [0, 3, 0], sizes = [8, 1, 16], strides = [1, 1, 1]} : vector<8x8x16xf32> to vector<8x1x16xf32>
    %231 = vector.shape_cast %230 : vector<8x1x16xf32> to vector<8x16xf32>
    %232 = vector.extract_strided_slice %223 {offsets = [0, 4, 0], sizes = [8, 1, 16], strides = [1, 1, 1]} : vector<8x8x16xf32> to vector<8x1x16xf32>
    %233 = vector.shape_cast %232 : vector<8x1x16xf32> to vector<8x16xf32>
    %234 = vector.extract_strided_slice %223 {offsets = [0, 5, 0], sizes = [8, 1, 16], strides = [1, 1, 1]} : vector<8x8x16xf32> to vector<8x1x16xf32>
    %235 = vector.shape_cast %234 : vector<8x1x16xf32> to vector<8x16xf32>
    %236 = vector.extract_strided_slice %223 {offsets = [0, 6, 0], sizes = [8, 1, 16], strides = [1, 1, 1]} : vector<8x8x16xf32> to vector<8x1x16xf32>
    %237 = vector.shape_cast %236 : vector<8x1x16xf32> to vector<8x16xf32>
    %238 = vector.extract_strided_slice %223 {offsets = [0, 7, 0], sizes = [8, 1, 16], strides = [1, 1, 1]} : vector<8x8x16xf32> to vector<8x1x16xf32>
    %239 = vector.shape_cast %238 : vector<8x1x16xf32> to vector<8x16xf32>
    %240 = tpu.concatenate %225, %227, %229, %231, %233, %235, %237, %239 in 1 : vector<8x16xf32>, vector<8x16xf32>, vector<8x16xf32>, vector<8x16xf32>, vector<8x16xf32>, vector<8x16xf32>, vector<8x16xf32>, vector<8x16xf32> -> vector<8x128xf32>
    %241 = vector.shape_cast %240 : vector<8x128xf32> to vector<1x8x128xf32>
    %c0_289 = arith.constant 0 : index
    %c0_290 = arith.constant 0 : index
    %c0_291 = arith.constant 0 : index
    %242 = vector.load %arg10[%c0_289, %c0_290, %c0_291] : memref<1x8x128xf32, #tpu.memory_space<vmem>>, vector<1x8x128xf32>
    tpu.vector_store %arg10[%c0_289, %c0_290, %c0_291], %241 {strides = array<i32>} : memref<1x8x128xf32, #tpu.memory_space<vmem>>, vector<1x8x128xf32>,
    return
  }
  func.func @transform_0(%arg0: i32) -> (i32, i32, i32) {
    %c0_i32 = arith.constant 0 : i32
    %c0_i32_0 = arith.constant 0 : i32
    %c0_i32_1 = arith.constant 0 : i32
    return %arg0, %c0_i32, %c0_i32_0 : i32, i32, i32
  }
  func.func @transform_1(%arg0: i32) -> (i32, i32, i32) {
    %c0_i32 = arith.constant 0 : i32
    %c0_i32_0 = arith.constant 0 : i32
    %c0_i32_1 = arith.constant 0 : i32
    %c0_i32_2 = arith.constant 0 : i32
    return %c0_i32, %c0_i32_0, %c0_i32_1 : i32, i32, i32
  }
  func.func @transform_2(%arg0: i32) -> (i32, i32, i32) {
    %c0_i32 = arith.constant 0 : i32
    %c0_i32_0 = arith.constant 0 : i32
    %c0_i32_1 = arith.constant 0 : i32
    %c0_i32_2 = arith.constant 0 : i32
    return %c0_i32, %c0_i32_0, %c0_i32_1 : i32, i32, i32
  }
  func.func @transform_3(%arg0: i32) -> (i32, i32, i32) {
    %c0_i32 = arith.constant 0 : i32
    %c0_i32_0 = arith.constant 0 : i32
    %c0_i32_1 = arith.constant 0 : i32
    %c0_i32_2 = arith.constant 0 : i32
    return %c0_i32, %c0_i32_0, %c0_i32_1 : i32, i32, i32
  }
  func.func @transform_4(%arg0: i32) -> (i32, i32, i32) {
    %c0_i32 = arith.constant 0 : i32
    %c0_i32_0 = arith.constant 0 : i32
    %c0_i32_1 = arith.constant 0 : i32
    %c0_i32_2 = arith.constant 0 : i32
    return %c0_i32, %c0_i32_0, %c0_i32_1 : i32, i32, i32
  }
  func.func @transform_5(%arg0: i32) -> (i32, i32, i32) {
    %c0_i32 = arith.constant 0 : i32
    %c0_i32_0 = arith.constant 0 : i32
    %c0_i32_1 = arith.constant 0 : i32
    %c0_i32_2 = arith.constant 0 : i32
    return %c0_i32, %c0_i32_0, %c0_i32_1 : i32, i32, i32
  }
  func.func @transform_6(%arg0: i32) -> (i32, i32, i32) {
    %c0_i32 = arith.constant 0 : i32
    %c0_i32_0 = arith.constant 0 : i32
    %c0_i32_1 = arith.constant 0 : i32
    %c0_i32_2 = arith.constant 0 : i32
    return %c0_i32, %c0_i32_0, %c0_i32_1 : i32, i32, i32
  }
  func.func @transform_7(%arg0: i32) -> (i32, i32, i32) {
    %c0_i32 = arith.constant 0 : i32
    %c0_i32_0 = arith.constant 0 : i32
    %c0_i32_1 = arith.constant 0 : i32
    %c0_i32_2 = arith.constant 0 : i32
    return %c0_i32, %c0_i32_0, %c0_i32_1 : i32, i32, i32
  }
  func.func @transform_8(%arg0: i32) -> (i32, i32, i32) {
    %c0_i32 = arith.constant 0 : i32
    %c0_i32_0 = arith.constant 0 : i32
    %c0_i32_1 = arith.constant 0 : i32
    %c0_i32_2 = arith.constant 0 : i32
    return %c0_i32, %c0_i32_0, %c0_i32_1 : i32, i32, i32
  }
  func.func @transform_9(%arg0: i32) -> (i32, i32, i32) {
    %c0_i32 = arith.constant 0 : i32
    %c0_i32_0 = arith.constant 0 : i32
    %c0_i32_1 = arith.constant 0 : i32
    return %arg0, %c0_i32, %c0_i32_0 : i32, i32, i32
  }
}

</mosaic_0001>

<bundles_post_ra>
// kernel: block_forward.1
= control target key start
LH: loop header
LB: loop body
LE: loop exit
PB: predicated region body
PF: predicated region fallthrough
CT: control target
= control target key end

     0   :  { %s14430_s30 = smov 0   ;;  %s19684_s0 = inlined_call_operand.vmem [shape: f32[2,8,128], index: 0, kind: input, shape index: {}]   ;;  %s19685_s1 = inlined_call_operand.vmem [shape: f32[2,16,16], index: 1, kind: input, shape index: {}]   ;;  %s19686_s2 = inlined_call_operand.vmem [shape: f32[2,1,16], index: 2, kind: input, shape index: {}]   ;;  %s19687_s3 = inlined_call_operand.vmem [shape: f32[2,72,32], index: 3, kind: input, shape index: {}]   ;;  %s19688_s4 = inlined_call_operand.vmem [shape: f32[2,1,32], index: 4, kind: input, shape index: {}]   ;;  %s19689_s5 = inlined_call_operand.vmem [shape: f32[2,32,32], index: 5, kind: input, shape index: {}]   ;;  %s19690_s6 = inlined_call_operand.vmem [shape: f32[2,1,32], index: 6, kind: input, shape index: {}]   ;;  %s19691_s7 = inlined_call_operand.vmem [shape: f32[2,288,16], index: 7, kind: input, shape index: {}]   ;;  %s19692_s8 = inlined_call_operand.vmem [shape: f32[2,1,16], index: 8, kind: input, shape index: {}]   ;;  %s19693_s9 = inlined_call_operand.vmem [shape: f32[2,8,128], index: 9, kind: output, shape index: {}]  }
   0x1 LB: > { %s11868_s10 = sadd.s32 4294967295, %s14364_s30   ;;  %p11872_p0 = scmp.ge.s32.totalorder %s14364_s30, 1  ;;  %s14364_s30 = sphi %s14430_s30, %s19_s30  }
   0x2   : > { %p286_p1 = scmp.lt.s32.totalorder %s14364_s30, 3 }
   0x4   : > { %p287_p2 = pnand %p11872_p0, %p286_p1 }
   0x6   : > { %290 = sbr.rel (%p287_p2) target bundleno = 3701 (0xe75), region = 56 }
   0xb   : > { %p320_p3 = scmp.lt.s32.totalorder %s11868_s10, 1  ;;  %v390_v0 = vlaneseq  ;;  %v14366_v1 = vmov 1966171168   ;;  %vm443_vm0 = vcmask 122880   ;;  %s14367_s15 = smov 80   ;;  %v717_v25 = vld [vmem:[%s19685_s1 + $0x8] sm:$0xff] }
   0xc   : > { %v388_v2 = vunpack.c.l.s4 %v14366_v1  ;;  %s14368_s16 = smov 112   ;;  %s14369_s17 = smov 64   ;;  %v14481_v27 = vand.u32 4294901760, %v717_v25  ;;  %v716_v28 = vld [vmem:[%s19685_s1] sm:$0xff]  ;;  %vm725_vm1 = vcmask 130048   ;;  %vm328_vm2 = vcmask 64512  }
   0xd   : > { %s20441_s10 = smov (!%p320_p3, %s11868_s10), 1  ;;  %v391_v3 = vshrl.u32 %v390_v0, 7  ;;  %s14370_s18 = smov 96   ;;  %v14489_v30 = vand.u32 4294901760, %v716_v28  ;;  %vm330_vm3 = vcmask 58368   ;;  %vm335_vm4 = vcmask 57344  }
   0xe   : > { %v389_v4 = vunpack.c.0.s8 %v388_v2  ;;  %s19715_s11 = sshll.u32 %s20441_s10, 3  ;;  %s14371_s21 = smov 32   ;;  %v14487_v29 = vsub.f32 %v717_v25, %v14481_v27  ;;  %13240 = vmatprep.subr.mxu0 %v14481_v27  ;;  %vm1864_vm5 = vcmask 195584   ;;  %vm356_vm6 = vcmask 261120  }
   0xf   : > { %s323_s14 = scalar_lea.vmem %s19684_s0, %s19715_s11  ;;  %v14446_v8 = vsub.s32 0, %v391_v3  ;;  %s14372_s22 = smov 48   ;;  %13241 = vmatpush3.msra.mxu0 %v14481_v27  ;;  %v14499_v32 = vsub.f32 %v716_v28, %v14489_v30  ;;  %vm1881_vm7 = vcmask 326656   ;;  %vm1890_vm8 = vcmask 392192  }
  0x10   : > { %v392_v5 = vsub.s32 %v389_v4, %v391_v3  ;;  %v384_v6 = vld [vmem:[%s323_s14] sm:$0xff]  ;;  %s14373_s25 = smov 16   ;;  %v14496_v31 = vand.u32 4294901760, %v14487_v29  ;;  %13242 = vmatprep.subr.mxu0 %v14489_v30  ;;  %s14375_s26 = smov 8   ;;  %vm1899_vm9 = vcmask 457728   ;;  %vm1908_vm10 = vcmask 523264  }
  0x11   : > { %v386_v9 = vcombine.high %v384_v6, %v384_v6  ;;  %v14505_v34 = vand.u32 4294901760, %v14499_v32  ;;  %13243 = vmatpush3.msra.mxu0 %v14489_v30  ;;  %s14376_s27 = smov 56   ;;  %s14377_s12 = smov 24   ;;  %vm1933_vm11 = vcmask 588800   ;;  %vm358_vm12 = vcmask 254976  }
  0x12   : > { %v393_v7 = vrot.slane %v384_v6, %v392_v5  ;;  %v929_v33 = vsub.f32 %v14487_v29, %v14496_v31  ;;  %13272 = vmatprep.subr.mxu0 %v14487_v29  ;;  %s14378_s23 = smov 40   ;;  %vm363_vm13 = vcmask 253952   ;;  %vm3936_vm14 = vcmask 785408  }
  0x13   : > { %v400_v12 = vrot.slane %v386_v9, %v392_v5  ;;  %v936_v36 = vsub.f32 %v14499_v32, %v14505_v34  ;;  %vm11665_vm15 = vcmask 1041409  }
  0x14   : > { %v409_v10 = vrot.slane %v393_v7, %v392_v5  ;;  %v401_v11 = vcombine.high %v393_v7, %v393_v7  ;;  %v930_v35 = vand.u32 4294901760, %v929_v33 }
  0x15   : > { %v14450_v16 = vrot.slane %v400_v12, %v392_v5  ;;  %v402_v17 = vcombine.high %v400_v12, %v400_v12  ;;  %v937_v37 = vand.u32 4294901760, %v936_v36 }
  0x16   : > { %v455_v13 = vrot.slane %v409_v10, %v14446_v8  ;;  %444 = vst.msk [vmem:[#allocation2] sm:$0x1] %vm443_vm0, %v409_v10  ;;  %v423_v14 = vrot.slane %v401_v11, %v392_v5  ;;  %v431_v15 = vcombine.high %v409_v10, %v409_v10  ;;  %13256 = vmatprep.subr.mxu1 %v930_v35 }
  0x17   : > { %448 = vst.msk [vmem:[#allocation2 + $0x20] sm:$0x1] %vm443_vm0, %v14450_v16  ;;  %v430_v19 = vrot.slane %v402_v17, %v392_v5  ;;  %v432_v20 = vcombine.high %v14450_v16, %v14450_v16  ;;  %13257 = vmatpush3.msra.mxu1 %v930_v35  ;;  %v471_v40 = vrot.slane %v14450_v16, %v14446_v8 }
  0x18   : > { %548 = vrot.lane.b32.xlu1 %v455_v13, %s14367_s15  ;;  %484 = vrot.lane.b32.xlu0 %v455_v13, %s14368_s16  ;;  %445 = vst.msk [vmem:[#allocation2 + $0x8] sm:$0x1] %vm443_vm0, %v423_v14  ;;  %446 = vst.msk [vmem:[#allocation2 + $0x10] sm:$0x1] %vm443_vm0, %v431_v15  ;;  %v433_v18 = vcombine.high %v423_v14, %v423_v14  ;;  %v459_v26 = vrot.slane %v423_v14, %v14446_v8 }
  0x19   : > { %v14462_v21 = vrot.slane %v430_v19, %v14446_v8  ;;  %449 = vst.msk [vmem:[#allocation2 + $0x28] sm:$0x1] %vm443_vm0, %v430_v19  ;;  %450 = vst.msk [vmem:[#allocation2 + $0x30] sm:$0x1] %vm443_vm0, %v432_v20  ;;  %v14467_v22 = vrot.slane %v432_v20, %v14446_v8  ;;  %v434_v23 = vcombine.high %v430_v19, %v430_v19  ;;  %13258 = vmatprep.subr.mxu1 %v937_v37 }
  0x1a   : > { %447 = vst.msk [vmem:[#allocation2 + $0x18] sm:$0x1] %vm443_vm0, %v433_v18  ;;  %13259 = vmatpush3.msra.mxu1 %v937_v37  ;;  %v463_v38 = vrot.slane %v431_v15, %v14446_v8  ;;  %v467_v39 = vrot.slane %v433_v18, %v14446_v8 }
  0x1b   : > { %v14472_v24 = vrot.slane %v434_v23, %v14446_v8  ;;  %451 = vst.msk [vmem:[#allocation2 + $0x38] sm:$0x1] %vm443_vm0, %v434_v23  ;;  %13288 = vmatprep.subr.mxu1 %v14481_v27 }
  0x1c   : > { %580 = vrot.lane.b32.xlu1 %v455_v13, %s14369_s17  ;;  %516 = vrot.lane.b32.xlu0 %v455_v13, %s14370_s18 }
  0x20   : > { %644 = vrot.lane.b32.xlu1 %v455_v13, %s14371_s21  ;;  %612 = vrot.lane.b32.xlu0 %v455_v13, %s14372_s22 }
  0x24   : > { %676 = vrot.lane.b32.xlu0 %v455_v13, %s14373_s25  ;;  %486 = vrot.lane.b32.xlu1 %v459_v26, %s14368_s16 }
  0x28   : > { %518 = vrot.lane.b32.xlu0 %v459_v26, %s14370_s18  ;;  %550 = vrot.lane.b32.xlu1 %v459_v26, %s14367_s15 }
  0x2c   : > { %582 = vrot.lane.b32.xlu0 %v459_v26, %s14369_s17  ;;  %614 = vrot.lane.b32.xlu1 %v459_v26, %s14372_s22 }
  0x30   : > { %646 = vrot.lane.b32.xlu0 %v459_v26, %s14371_s21  ;;  %678 = vrot.lane.b32.xlu1 %v459_v26, %s14373_s25 }
  0x34   : > { %488 = vrot.lane.b32.xlu0 %v463_v38, %s14368_s16  ;;  %520 = vrot.lane.b32.xlu1 %v463_v38, %s14370_s18 }
  0x38   : > { %552 = vrot.lane.b32.xlu0 %v463_v38, %s14367_s15  ;;  %584 = vrot.lane.b32.xlu1 %v463_v38, %s14369_s17 }
  0x3c   : > { %616 = vrot.lane.b32.xlu0 %v463_v38, %s14372_s22  ;;  %648 = vrot.lane.b32.xlu1 %v463_v38, %s14371_s21 }
  0x40   : > { %680 = vrot.lane.b32.xlu0 %v463_v38, %s14373_s25  ;;  %490 = vrot.lane.b32.xlu1 %v467_v39, %s14368_s16 }
  0x44   : > { %522 = vrot.lane.b32.xlu0 %v467_v39, %s14370_s18  ;;  %554 = vrot.lane.b32.xlu1 %v467_v39, %s14367_s15 }
  0x48   : > { %586 = vrot.lane.b32.xlu0 %v467_v39, %s14369_s17  ;;  %618 = vrot.lane.b32.xlu1 %v467_v39, %s14372_s22 }
  0x4c   : > { %650 = vrot.lane.b32.xlu0 %v467_v39, %s14371_s21  ;;  %682 = vrot.lane.b32.xlu1 %v467_v39, %s14373_s25 }
  0x50   : > { %524 = vrot.lane.b32.xlu1 %v471_v40, %s14370_s18  ;;  %492 = vrot.lane.b32.xlu0 %v471_v40, %s14368_s16 }
  0x54   : > { %588 = vrot.lane.b32.xlu1 %v471_v40, %s14369_s17  ;;  %556 = vrot.lane.b32.xlu0 %v471_v40, %s14367_s15 }
  0x58   : > { %652 = vrot.lane.b32.xlu1 %v471_v40, %s14371_s21  ;;  %620 = vrot.lane.b32.xlu0 %v471_v40, %s14372_s22 }
  0x5c   : > { %684 = vrot.lane.b32.xlu0 %v471_v40, %s14373_s25  ;;  %494 = vrot.lane.b32.xlu1 %v14462_v21, %s14368_s16 }
  0x60   : > { %526 = vrot.lane.b32.xlu0 %v14462_v21, %s14370_s18  ;;  %558 = vrot.lane.b32.xlu1 %v14462_v21, %s14367_s15 }
  0x64   : > { %590 = vrot.lane.b32.xlu0 %v14462_v21, %s14369_s17  ;;  %622 = vrot.lane.b32.xlu1 %v14462_v21, %s14372_s22 }
  0x68   : > { %654 = vrot.lane.b32.xlu0 %v14462_v21, %s14371_s21  ;;  %686 = vrot.lane.b32.xlu1 %v14462_v21, %s14373_s25 }
  0x6c   : > { %496 = vrot.lane.b32.xlu0 %v14467_v22, %s14368_s16  ;;  %528 = vrot.lane.b32.xlu1 %v14467_v22, %s14370_s18 }
  0x70   : > { %560 = vrot.lane.b32.xlu0 %v14467_v22, %s14367_s15  ;;  %592 = vrot.lane.b32.xlu1 %v14467_v22, %s14369_s17 }
  0x74   : > { %624 = vrot.lane.b32.xlu0 %v14467_v22, %s14372_s22  ;;  %656 = vrot.lane.b32.xlu1 %v14467_v22, %s14371_s21 }
  0x78   : > { %688 = vrot.lane.b32.xlu0 %v14467_v22, %s14373_s25  ;;  %498 = vrot.lane.b32.xlu1 %v14472_v24, %s14368_s16 }
  0x7c   : > { %530 = vrot.lane.b32.xlu0 %v14472_v24, %s14370_s18  ;;  %562 = vrot.lane.b32.xlu1 %v14472_v24, %s14367_s15 }
  0x80   : > { %594 = vrot.lane.b32.xlu0 %v14472_v24, %s14369_s17  ;;  %626 = vrot.lane.b32.xlu1 %v14472_v24, %s14372_s22 }
  0x84   : > { %658 = vrot.lane.b32.xlu0 %v14472_v24, %s14371_s21  ;;  %690 = vrot.lane.b32.xlu1 %v14472_v24, %s14373_s25 }
  0x8a   : > { %v549_v41 = vpop.permute.xlu1 %548  ;;  %v485_v42 = vpop.permute.xlu0 %484 }
  0x8b   : > { %572 = vst.msk [vmem:[#allocation2 + $0x3] sm:$0x1] %vm443_vm0, %v549_v41  ;;  %508 = vst.msk [vmem:[#allocation2 + $0x1] sm:$0x1] %vm443_vm0, %v485_v42 }
  0x8e   : > { %v581_v43 = vpop.permute.xlu1 %580  ;;  %v517_v44 = vpop.permute.xlu0 %516 }
  0x8f   : > { %604 = vst.msk [vmem:[#allocation2 + $0x4] sm:$0x1] %vm443_vm0, %v581_v43  ;;  %540 = vst.msk [vmem:[#allocation2 + $0x2] sm:$0x1] %vm443_vm0, %v517_v44 }
  0x92   : > { %v645_v45 = vpop.permute.xlu1 %644  ;;  %v613_v46 = vpop.permute.xlu0 %612 }
  0x93   : > { %668 = vst.msk [vmem:[#allocation2 + $0x6] sm:$0x1] %vm443_vm0, %v645_v45  ;;  %636 = vst.msk [vmem:[#allocation2 + $0x5] sm:$0x1] %vm443_vm0, %v613_v46 }
  0x96   : > { %v677_v47 = vpop.permute.xlu0 %676  ;;  %v487_v48 = vpop.permute.xlu1 %486 }
  0x97   : > { %700 = vst.msk [vmem:[#allocation2 + $0x7] sm:$0x1] %vm443_vm0, %v677_v47  ;;  %509 = vst.msk [vmem:[#allocation2 + $0x9] sm:$0x1] %vm443_vm0, %v487_v48 }
  0x9a   : > { %v519_v49 = vpop.permute.xlu0 %518  ;;  %v551_v50 = vpop.permute.xlu1 %550 }
  0x9b   : > { %541 = vst.msk [vmem:[#allocation2 + $0xa] sm:$0x1] %vm443_vm0, %v519_v49  ;;  %573 = vst.msk [vmem:[#allocation2 + $0xb] sm:$0x1] %vm443_vm0, %v551_v50 }
  0x9e   : > { %v583_v51 = vpop.permute.xlu0 %582  ;;  %v615_v52 = vpop.permute.xlu1 %614  ;;  %v708_v53 = vld [vmem:[#allocation2] sm:$0xff] }
  0x9f   : > { %605 = vst.msk [vmem:[#allocation2 + $0xc] sm:$0x1] %vm443_vm0, %v583_v51  ;;  %637 = vst.msk [vmem:[#allocation2 + $0xd] sm:$0x1] %vm443_vm0, %v615_v52  ;;  %v727_v54 = vsel %vm725_vm1, %v708_v53, 0 }
  0xa0   : > { %v14598_v55 = vand.u32 4294901760, %v727_v54 }
  0xa2   : > { %13260 = vmatprep.mubr.f32.mxu1 %v14598_v55  ;;  %v647_v56 = vpop.permute.xlu0 %646  ;;  %v679_v57 = vpop.permute.xlu1 %678  ;;  %v14602_v58 = vsub.f32 %v727_v54, %v14598_v55 }
  0xa3   : > { %669 = vst.msk [vmem:[#allocation2 + $0xe] sm:$0x1] %vm443_vm0, %v647_v56  ;;  %701 = vst.msk [vmem:[#allocation2 + $0xf] sm:$0x1] %vm443_vm0, %v679_v57 }
  0xa4   : > { %v819_v59 = vand.u32 4294901760, %v14602_v58 }
  0xa6   : > { %v489_v60 = vpop.permute.xlu0 %488  ;;  %v521_v61 = vpop.permute.xlu1 %520  ;;  %v820_v62 = vsub.f32 %v14602_v58, %v819_v59 }
  0xa7   : > { %510 = vst.msk [vmem:[#allocation2 + $0x11] sm:$0x1] %vm443_vm0, %v489_v60  ;;  %542 = vst.msk [vmem:[#allocation2 + $0x12] sm:$0x1] %vm443_vm0, %v521_v61 }
  0xa8   : > { %v821_v63 = vand.u32 4294901760, %v820_v62 }
  0xaa   : > { %13244 = vmatprep.mubr.f32.mxu0 %v821_v63  ;;  %v553_v0 = vpop.permute.xlu0 %552  ;;  %v585_v1 = vpop.permute.xlu1 %584  ;;  %v709_v2 = vld [vmem:[#allocation2 + $0x8] sm:$0xff] }
  0xab   : > { %574 = vst.msk [vmem:[#allocation2 + $0x13] sm:$0x1] %vm443_vm0, %v553_v0  ;;  %606 = vst.msk [vmem:[#allocation2 + $0x14] sm:$0x1] %vm443_vm0, %v585_v1  ;;  %v730_v3 = vsel %vm725_vm1, %v709_v2, 0 }
  0xac   : > { %v14615_v4 = vand.u32 4294901760, %v730_v3 }
  0xae   : > { %v617_v5 = vpop.permute.xlu0 %616  ;;  %v649_v6 = vpop.permute.xlu1 %648  ;;  %13261 = vmatmul.mubr.f32.vlgmr.msra.gmra.mxu1 %v14615_v4  ;;  %v14619_v7 = vsub.f32 %v730_v3, %v14615_v4 }
  0xaf   : > { %638 = vst.msk [vmem:[#allocation2 + $0x15] sm:$0x1] %vm443_vm0, %v617_v5  ;;  %670 = vst.msk [vmem:[#allocation2 + $0x16] sm:$0x1] %vm443_vm0, %v649_v6  ;;  %13289 = vmatpush3.msra.mxu1 %v14481_v27 }
  0xb0   : > { %v829_v8 = vand.u32 4294901760, %v14619_v7  ;;  %13290 = vmatprep.subr.mxu1 %v14489_v30 }
  0xb1   : > { %13291 = vmatpush3.msra.mxu1 %v14489_v30 }
  0xb2   : > { %v681_v9 = vpop.permute.xlu0 %680  ;;  %v491_v10 = vpop.permute.xlu1 %490  ;;  %v830_v11 = vsub.f32 %v14619_v7, %v829_v8  ;;  %13320 = vmatprep.subr.mxu1 %v14481_v27 }
  0xb3   : > { %702 = vst.msk [vmem:[#allocation2 + $0x17] sm:$0x1] %vm443_vm0, %v681_v9  ;;  %511 = vst.msk [vmem:[#allocation2 + $0x19] sm:$0x1] %vm443_vm0, %v491_v10 }
  0xb4   : > { %v831_v12 = vand.u32 4294901760, %v830_v11 }
  0xb6   : > { %13245 = vmatmul.mubr.f32.vlgmr.msra.gmra.mxu0 %v831_v12  ;;  %v523_v13 = vpop.permute.xlu0 %522  ;;  %v555_v14 = vpop.permute.xlu1 %554 }
  0xb7   : > { %543 = vst.msk [vmem:[#allocation2 + $0x1a] sm:$0x1] %vm443_vm0, %v523_v13  ;;  %575 = vst.msk [vmem:[#allocation2 + $0x1b] sm:$0x1] %vm443_vm0, %v555_v14  ;;  %13273 = vmatpush3.msra.mxu0 %v14487_v29 }
  0xb8   : > { %13274 = vmatprep.subr.mxu0 %v14499_v32 }
  0xb9   : > { %13275 = vmatpush3.msra.mxu0 %v14499_v32 }
  0xba   : > { %v587_v15 = vpop.permute.xlu0 %586  ;;  %v619_v16 = vpop.permute.xlu1 %618  ;;  %v710_v17 = vld [vmem:[#allocation2 + $0x10] sm:$0xff]  ;;  %13304 = vmatprep.subr.mxu0 %v14496_v31 }
  0xbb   : > { %607 = vst.msk [vmem:[#allocation2 + $0x1c] sm:$0x1] %vm443_vm0, %v587_v15  ;;  %639 = vst.msk [vmem:[#allocation2 + $0x1d] sm:$0x1] %vm443_vm0, %v619_v16  ;;  %v733_v18 = vsel %vm725_vm1, %v710_v17, 0 }
  0xbc   : > { %v14642_v19 = vand.u32 4294901760, %v733_v18 }
  0xbe   : > { %13263 = vmatprep.mubr.f32.mxu1 %v14642_v19  ;;  %v651_v20 = vpop.permute.xlu0 %650  ;;  %v683_v21 = vpop.permute.xlu1 %682  ;;  %v14646_v22 = vsub.f32 %v733_v18, %v14642_v19 }
  0xbf   : > { %671 = vst.msk [vmem:[#allocation2 + $0x1e] sm:$0x1] %vm443_vm0, %v651_v20  ;;  %703 = vst.msk [vmem:[#allocation2 + $0x1f] sm:$0x1] %vm443_vm0, %v683_v21 }
  0xc0   : > { %v839_v23 = vand.u32 4294901760, %v14646_v22 }
  0xc2   : > { %v525_v24 = vpop.permute.xlu1 %524  ;;  %v493_v25 = vpop.permute.xlu0 %492  ;;  %v840_v26 = vsub.f32 %v14646_v22, %v839_v23 }
  0xc3   : > { %544 = vst.msk [vmem:[#allocation2 + $0x22] sm:$0x1] %vm443_vm0, %v525_v24  ;;  %512 = vst.msk [vmem:[#allocation2 + $0x21] sm:$0x1] %vm443_vm0, %v493_v25 }
  0xc4   : > { %v841_v28 = vand.u32 4294901760, %v840_v26 }
  0xc6   : > { %13247 = vmatprep.mubr.f32.mxu0 %v841_v28  ;;  %v589_v29 = vpop.permute.xlu1 %588  ;;  %v557_v32 = vpop.permute.xlu0 %556  ;;  %v711_v33 = vld [vmem:[#allocation2 + $0x18] sm:$0xff] }
  0xc7   : > { %608 = vst.msk [vmem:[#allocation2 + $0x24] sm:$0x1] %vm443_vm0, %v589_v29  ;;  %576 = vst.msk [vmem:[#allocation2 + $0x23] sm:$0x1] %vm443_vm0, %v557_v32  ;;  %v736_v35 = vsel %vm725_vm1, %v711_v33, 0 }
  0xc8   : > { %v14659_v36 = vand.u32 4294901760, %v736_v35 }
  0xca   : > { %13264 = vmatmul.mubr.f32.gmra.mxu1 %v14659_v36  ;;  %v653_v37 = vpop.permute.xlu1 %652  ;;  %v621_v38 = vpop.permute.xlu0 %620  ;;  %v14663_v39 = vsub.f32 %v736_v35, %v14659_v36 }
  0xcb   : > { %672 = vst.msk [vmem:[#allocation2 + $0x26] sm:$0x1] %vm443_vm0, %v653_v37  ;;  %640 = vst.msk [vmem:[#allocation2 + $0x25] sm:$0x1] %vm443_vm0, %v621_v38 }
  0xcc   : > { %v849_v40 = vand.u32 4294901760, %v14663_v39 }
  0xce   : > { %v685_v41 = vpop.permute.xlu0 %684  ;;  %v495_v42 = vpop.permute.xlu1 %494  ;;  %v850_v43 = vsub.f32 %v14663_v39, %v849_v40 }
  0xcf   : > { %704 = vst.msk [vmem:[#allocation2 + $0x27] sm:$0x1] %vm443_vm0, %v685_v41  ;;  %513 = vst.msk [vmem:[#allocation2 + $0x29] sm:$0x1] %vm443_vm0, %v495_v42 }
  0xd0   : > { %v851_v44 = vand.u32 4294901760, %v850_v43 }
  0xd2   : > { %13248 = vmatmul.mubr.f32.gmra.mxu0 %v851_v44  ;;  %v527_v45 = vpop.permute.xlu0 %526  ;;  %v559_v46 = vpop.permute.xlu1 %558 }
  0xd3   : > { %545 = vst.msk [vmem:[#allocation2 + $0x2a] sm:$0x1] %vm443_vm0, %v527_v45  ;;  %577 = vst.msk [vmem:[#allocation2 + $0x2b] sm:$0x1] %vm443_vm0, %v559_v46 }
  0xd6   : > { %v591_v47 = vpop.permute.xlu0 %590  ;;  %v623_v48 = vpop.permute.xlu1 %622  ;;  %v712_v49 = vld [vmem:[#allocation2 + $0x20] sm:$0xff] }
  0xd7   : > { %609 = vst.msk [vmem:[#allocation2 + $0x2c] sm:$0x1] %vm443_vm0, %v591_v47  ;;  %641 = vst.msk [vmem:[#allocation2 + $0x2d] sm:$0x1] %vm443_vm0, %v623_v48  ;;  %v739_v50 = vsel %vm725_vm1, %v712_v49, 0 }
  0xd8   : > { %v14678_v51 = vand.u32 4294901760, %v739_v50 }
  0xda   : > { %13266 = vmatprep.mubr.f32.mxu1 %v14678_v51  ;;  %v655_v52 = vpop.permute.xlu0 %654  ;;  %v687_v53 = vpop.permute.xlu1 %686  ;;  %v14682_v54 = vsub.f32 %v739_v50, %v14678_v51 }
  0xdb   : > { %673 = vst.msk [vmem:[#allocation2 + $0x2e] sm:$0x1] %vm443_vm0, %v655_v52  ;;  %705 = vst.msk [vmem:[#allocation2 + $0x2f] sm:$0x1] %vm443_vm0, %v687_v53 }
  0xdc   : > { %v859_v56 = vand.u32 4294901760, %v14682_v54 }
  0xde   : > { %v497_v57 = vpop.permute.xlu0 %496  ;;  %v529_v60 = vpop.permute.xlu1 %528  ;;  %v860_v61 = vsub.f32 %v14682_v54, %v859_v56 }
  0xdf   : > { %514 = vst.msk [vmem:[#allocation2 + $0x31] sm:$0x1] %vm443_vm0, %v497_v57  ;;  %546 = vst.msk [vmem:[#allocation2 + $0x32] sm:$0x1] %vm443_vm0, %v529_v60  ;;  %v11875_v57 = vld [vmem:[%s19686_s2] ss:$0 sm:$0xff] }
  0xe0   : > { %v861_v62 = vand.u32 4294901760, %v860_v61 }
  0xe2   : > { %13250 = vmatprep.mubr.f32.mxu0 %v861_v62  ;;  %v561_v63 = vpop.permute.xlu0 %560  ;;  %v593_v0 = vpop.permute.xlu1 %592  ;;  %v713_v1 = vld [vmem:[#allocation2 + $0x28] sm:$0xff] }
  0xe3   : > { %578 = vst.msk [vmem:[#allocation2 + $0x33] sm:$0x1] %vm443_vm0, %v561_v63  ;;  %610 = vst.msk [vmem:[#allocation2 + $0x34] sm:$0x1] %vm443_vm0, %v593_v0  ;;  %v742_v2 = vsel %vm725_vm1, %v713_v1, 0 }
  0xe4   : > { %v14695_v3 = vand.u32 4294901760, %v742_v2 }
  0xe6   : > { %v625_v5 = vpop.permute.xlu0 %624  ;;  %v657_v6 = vpop.permute.xlu1 %656  ;;  %13267 = vmatmul.mubr.f32.gmra.mxu1 %v14695_v3  ;;  %v868_v9 = vsub.f32 %v742_v2, %v14695_v3 }
  0xe7   : > { %642 = vst.msk [vmem:[#allocation2 + $0x35] sm:$0x1] %vm443_vm0, %v625_v5  ;;  %674 = vst.msk [vmem:[#allocation2 + $0x36] sm:$0x1] %vm443_vm0, %v657_v6 }
  0xe8   : > { %v869_v10 = vand.u32 4294901760, %v868_v9 }
  0xea   : > { %v689_v11 = vpop.permute.xlu0 %688  ;;  %v499_v12 = vpop.permute.xlu1 %498  ;;  %v870_v13 = vsub.f32 %v868_v9, %v869_v10 }
  0xeb   : > { %706 = vst.msk [vmem:[#allocation2 + $0x37] sm:$0x1] %vm443_vm0, %v689_v11  ;;  %515 = vst.msk [vmem:[#allocation2 + $0x39] sm:$0x1] %vm443_vm0, %v499_v12 }
  0xec   : > { %v871_v14 = vand.u32 4294901760, %v870_v13 }
  0xee   : > { %13251 = vmatmul.mubr.f32.gmra.mxu0 %v871_v14  ;;  %v531_v15 = vpop.permute.xlu0 %530  ;;  %v563_v16 = vpop.permute.xlu1 %562 }
  0xef   : > { %547 = vst.msk [vmem:[#allocation2 + $0x3a] sm:$0x1] %vm443_vm0, %v531_v15  ;;  %579 = vst.msk [vmem:[#allocation2 + $0x3b] sm:$0x1] %vm443_vm0, %v563_v16 }
  0xf2   : > { %v595_v17 = vpop.permute.xlu0 %594  ;;  %v627_v18 = vpop.permute.xlu1 %626  ;;  %v714_v20 = vld [vmem:[#allocation2 + $0x30] sm:$0xff] }
  0xf3   : > { %611 = vst.msk [vmem:[#allocation2 + $0x3c] sm:$0x1] %vm443_vm0, %v595_v17  ;;  %643 = vst.msk [vmem:[#allocation2 + $0x3d] sm:$0x1] %vm443_vm0, %v627_v18  ;;  %v745_v21 = vsel %vm725_vm1, %v714_v20, 0 }
  0xf4   : > { %v877_v24 = vand.u32 4294901760, %v745_v21 }
  0xf6   : > { %13269 = vmatprep.mubr.f32.mxu1 %v877_v24  ;;  %v659_v25 = vpop.permute.xlu0 %658  ;;  %v691_v26 = vpop.permute.xlu1 %690  ;;  %v878_v28 = vsub.f32 %v745_v21, %v877_v24 }
  0xf7   : > { %675 = vst.msk [vmem:[#allocation2 + $0x3e] sm:$0x1] %vm443_vm0, %v659_v25  ;;  %707 = vst.msk [vmem:[#allocation2 + $0x3f] sm:$0x1] %vm443_vm0, %v691_v26  ;;  %vm11668_vm0 = vcmask 1042434  }
  0xf8   : > { %v879_v29 = vand.u32 4294901760, %v878_v28 }
  0xfa   : > { %v880_v32 = vsub.f32 %v878_v28, %v879_v29 }
  0xfc   : > { %v881_v33 = vand.u32 4294901760, %v880_v32 }
  0xfe   : > { %13253 = vmatprep.mubr.f32.mxu0 %v881_v33  ;;  %v715_v35 = vld [vmem:[#allocation2 + $0x38] sm:$0xff] }
  0xff   : > { %v748_v37 = vsel %vm725_vm1, %v715_v35, 0 }
 0x100   : > { %v887_v38 = vand.u32 4294901760, %v748_v37 }
 0x102   : > { %13270 = vmatmul.mubr.f32.gmra.mxu1 %v887_v38  ;;  %v888_v41 = vsub.f32 %v748_v37, %v887_v38 }
 0x103   : > { %13292 = vmatprep.mubr.f32.mxu1 %v819_v59 }
 0x104   : > { %v889_v42 = vand.u32 4294901760, %v888_v41 }
 0x106   : > { %13293 = vmatmul.mubr.f32.vlgmr.msra.gmra.mxu1 %v829_v8  ;;  %v890_v43 = vsub.f32 %v888_v41, %v889_v42 }
 0x107   : > { %13295 = vmatprep.mubr.f32.mxu1 %v839_v23  ;;  %13321 = vmatpush3.msra.mxu1 %v14481_v27  ;;  %v14374_v27 = vmov 0.0  }
 0x108   : > { %v891_v44 = vand.u32 4294901760, %v890_v43  ;;  %13322 = vmatprep.subr.mxu1 %v14489_v30  ;;  %329 = vst.msk [vmem:[#allocation3] sm:$0xff] %vm328_vm2, %v14374_v27  ;;  %333 = vst.msk [vmem:[#allocation3 + $0x90] sm:$0xff] %vm328_vm2, %v14374_v27 }
 0x109   : > { %13323 = vmatpush3.msra.mxu1 %v14489_v30  ;;  %331 = vst.msk [vmem:[#allocation3 + $0x8] sm:$0x3] %vm330_vm3, %v14374_v27  ;;  %334 = vst.msk [vmem:[#allocation3 + $0x98] sm:$0x3] %vm330_vm3, %v14374_v27  ;;  %vm11671_vm3 = vcmask 1043459  }
 0x10a   : > { %13254 = vmatmul.mubr.f32.gmra.mxu0 %v891_v44  ;;  %13296 = vmatmul.mubr.f32.gmra.mxu1 %v849_v40  ;;  %345 = vst.msk [vmem:[#allocation3 + $0x90] sm:$0x1] %vm335_vm4, %v14374_v27  ;;  %336 = vst.msk [vmem:[#allocation3] sm:$0x1] %vm335_vm4, %v14374_v27 }
 0x10b   : > { %13276 = vmatprep.mubr.f32.mxu0 %v14602_v58  ;;  %13298 = vmatprep.mubr.f32.mxu1 %v859_v56  ;;  %337 = vst.msk [vmem:[#allocation3 + $0x10] sm:$0x1] %vm335_vm4, %v14374_v27  ;;  %338 = vst.msk [vmem:[#allocation3 + $0x20] sm:$0x1] %vm335_vm4, %v14374_v27 }
 0x10c   : > { %339 = vst.msk [vmem:[#allocation3 + $0x30] sm:$0x1] %vm335_vm4, %v14374_v27  ;;  %340 = vst.msk [vmem:[#allocation3 + $0x40] sm:$0x1] %vm335_vm4, %v14374_v27 }
 0x10d   : > { %341 = vst.msk [vmem:[#allocation3 + $0x50] sm:$0x1] %vm335_vm4, %v14374_v27  ;;  %342 = vst.msk [vmem:[#allocation3 + $0x60] sm:$0x1] %vm335_vm4, %v14374_v27 }
 0x10e   : > { %13277 = vmatmul.mubr.f32.vlgmr.msra.gmra.mxu0 %v14619_v7  ;;  %13299 = vmatmul.mubr.f32.gmra.mxu1 %v869_v10  ;;  %343 = vst.msk [vmem:[#allocation3 + $0x70] sm:$0x1] %vm335_vm4, %v14374_v27  ;;  %344 = vst.msk [vmem:[#allocation3 + $0x80] sm:$0x1] %vm335_vm4, %v14374_v27 }
 0x10f   : > { %13305 = vmatpush3.msra.mxu0 %v14496_v31  ;;  %13279 = vmatprep.mubr.f32.mxu0 %v14646_v22  ;;  %346 = vst.msk [vmem:[#allocation3 + $0x9] sm:$0x1] %vm335_vm4, %v14374_v27  ;;  %347 = vst.msk [vmem:[#allocation3 + $0x19] sm:$0x1] %vm335_vm4, %v14374_v27 }
 0x110   : > { %13301 = vmatprep.mubr.f32.mxu1 %v879_v29  ;;  %13306 = vmatprep.subr.mxu0 %v14505_v34  ;;  %348 = vst.msk [vmem:[#allocation3 + $0x29] sm:$0x1] %vm335_vm4, %v14374_v27  ;;  %349 = vst.msk [vmem:[#allocation3 + $0x39] sm:$0x1] %vm335_vm4, %v14374_v27  ;;  %v1527_v30 = vld [vmem:[#allocation3 + $0x1] sm:$0xff] }
 0x111   : > { %13307 = vmatpush3.msra.mxu0 %v14505_v34  ;;  %350 = vst.msk [vmem:[#allocation3 + $0x49] sm:$0x1] %vm335_vm4, %v14374_v27  ;;  %351 = vst.msk [vmem:[#allocation3 + $0x59] sm:$0x1] %vm335_vm4, %v14374_v27  ;;  %1600 = vrot.lane.b32.xlu0 %v1527_v30, %s14375_s26  ;;  %v1575_v31 = vld [vmem:[#allocation3 + $0x90] sm:$0xff] }
 0x112   : > { %13280 = vmatmul.mubr.f32.gmra.mxu0 %v14663_v39  ;;  %13302 = vmatmul.mubr.f32.gmra.mxu1 %v889_v42  ;;  %352 = vst.msk [vmem:[#allocation3 + $0x69] sm:$0x1] %vm335_vm4, %v14374_v27  ;;  %353 = vst.msk [vmem:[#allocation3 + $0x79] sm:$0x1] %vm335_vm4, %v14374_v27 }
 0x113   : > { %13282 = vmatprep.mubr.f32.mxu0 %v14682_v54  ;;  %13324 = vmatprep.mubr.f32.mxu1 %v14598_v55  ;;  %354 = vst.msk [vmem:[#allocation3 + $0x89] sm:$0x1] %vm335_vm4, %v14374_v27  ;;  %355 = vst.msk [vmem:[#allocation3 + $0x99] sm:$0x1] %vm335_vm4, %v14374_v27  ;;  %vm11674_vm4 = vcmask 1044484  }
 0x114   : > { %1774 = vrot.lane.b32.xlu1 %v1575_v31, %s14372_s22 }
 0x116   : > { %13283 = vmatmul.mubr.f32.gmra.mxu0 %v868_v9  ;;  %13325 = vmatmul.mubr.f32.vlgmr.msra.gmra.mxu1 %v14615_v4  ;;  %v1535_v34 = vld [vmem:[#allocation3 + $0x2] sm:$0xff] }
 0x117   : > { %13285 = vmatprep.mubr.f32.mxu0 %v878_v28  ;;  %13327 = vmatprep.mubr.f32.mxu1 %v14642_v19 }
 0x118   : > { %1632 = vrot.lane.b32.xlu0 %v1535_v34, %s14373_s25 }
 0x11a   : > { %13286 = vmatmul.mubr.f32.gmra.mxu0 %v888_v41  ;;  %13328 = vmatmul.mubr.f32.gmra.mxu1 %v14659_v36 }
 0x11b   : > { %13308 = vmatprep.mubr.f32.mxu0 %v14598_v55  ;;  %13330 = vmatprep.mubr.f32.mxu1 %v14678_v51  ;;  %v1583_v55 = vld [vmem:[#allocation3 + $0x91] sm:$0xff] }
 0x11c   : > { %1806 = vrot.lane.b32.xlu1 %v1583_v55, %s14376_s27 }
 0x11e   : > { %13309 = vmatmul.mubr.f32.vlgmr.msra.gmra.mxu0 %v14615_v4  ;;  %13331 = vmatmul.mubr.f32.gmra.mxu1 %v14695_v3 }
 0x11f   : > { %13311 = vmatprep.mubr.f32.mxu0 %v14642_v19  ;;  %13333 = vmatprep.mubr.f32.mxu1 %v877_v24 }
 0x122   : > { %13312 = vmatmul.mubr.f32.gmra.mxu0 %v14659_v36  ;;  %13334 = vmatmul.mubr.f32.gmra.mxu1 %v887_v38 }
 0x123   : > { %13314 = vmatprep.mubr.f32.mxu0 %v14678_v51 }
 0x126   : > { %13315 = vmatmul.mubr.f32.gmra.mxu0 %v14695_v3 }
 0x127   : > { %13317 = vmatprep.mubr.f32.mxu0 %v877_v24 }
 0x12a   : > { %13318 = vmatmul.mubr.f32.gmra.mxu0 %v887_v38 }
 0x16e   : > { %v13262_v58 = vpop.f32.mrf.mxu1 }
 0x170   : > { %v974_v59 = vpop.f32.mrf.mxu1 }
 0x176   : > { %v13246_v7 = vpop.f32.mrf.mxu0 }
 0x177   : > { %v834_v0 = vadd.f32 %v13246_v7, %v11875_v57 }
 0x178   : > { %v823_v19 = vpop.f32.mrf.mxu0 }
 0x179   : > { %v824_v3 = vadd.f32 %v11875_v57, %v823_v19  ;;  %v981_v10 = vadd.f32 %v13262_v58, %v834_v0 }
 0x17b   : > { %v975_v15 = vadd.f32 %v974_v59, %v824_v3 }
 0x18a   : > { %v13265_v4 = vpop.f32.mrf.mxu1 }
 0x18c   : > { %v986_v8 = vpop.f32.mrf.mxu1 }
 0x192   : > { %v13249_v23 = vpop.f32.mrf.mxu0 }
 0x193   : > { %v854_v9 = vadd.f32 %v13249_v23, %v11875_v57 }
 0x194   : > { %v843_v39 = vpop.f32.mrf.mxu0 }
 0x195   : > { %v844_v13 = vadd.f32 %v11875_v57, %v843_v39  ;;  %v993_v21 = vadd.f32 %v13265_v4, %v854_v9 }
 0x197   : > { %v987_v28 = vadd.f32 %v986_v8, %v844_v13 }
 0x1a6   : > { %v13268_v22 = vpop.f32.mrf.mxu1 }
 0x1a8   : > { %v998_v36 = vpop.f32.mrf.mxu1 }
 0x1ae   : > { %v13252_v45 = vpop.f32.mrf.mxu0 }
 0x1af   : > { %v874_v18 = vadd.f32 %v13252_v45, %v11875_v57 }
 0x1b0   : > { %v863_v48 = vpop.f32.mrf.mxu0 }
 0x1b1   : > { %v864_v24 = vadd.f32 %v11875_v57, %v863_v48  ;;  %v1005_v38 = vadd.f32 %v13268_v22, %v874_v18 }
 0x1b3   : > { %v999_v44 = vadd.f32 %v998_v36, %v864_v24 }
 0x1c2   : > { %v13271_v40 = vpop.f32.mrf.mxu1 }
 0x1c4   : > { %v1010_v46 = vpop.f32.mrf.mxu1 }
 0x1c6   : > { %v13294_v47 = vpop.f32.mrf.mxu1 }
 0x1c8   : > { %v1216_v49 = vpop.f32.mrf.mxu1 }
 0x1ca   : > { %v13255_v50 = vpop.f32.mrf.mxu0  ;;  %v13297_v51 = vpop.f32.mrf.mxu1 }
 0x1cb   : > { %v894_v32 = vadd.f32 %v13255_v50, %v11875_v57 }
 0x1cc   : > { %v883_v52 = vpop.f32.mrf.mxu0  ;;  %v1232_v53 = vpop.f32.mrf.mxu1 }
 0x1cd   : > { %v884_v43 = vadd.f32 %v11875_v57, %v883_v52  ;;  %v1017_v58 = vadd.f32 %v13271_v40, %v894_v32 }
 0x1ce   : > { %v13278_v54 = vpop.f32.mrf.mxu0  ;;  %v13300_v56 = vpop.f32.mrf.mxu1 }
 0x1cf   : > { %v1100_v14 = vadd.f32 %v13278_v54, %v981_v10  ;;  %v1011_v23 = vadd.f32 %v1010_v46, %v884_v43 }
 0x1d0   : > { %v1092_v60 = vpop.f32.mrf.mxu0  ;;  %v1248_v61 = vpop.f32.mrf.mxu1 }
 0x1d1   : > { %v1093_v20 = vadd.f32 %v1092_v60, %v975_v15  ;;  %v1225_v29 = vadd.f32 %v13294_v47, %v1100_v14  ;;  %v1924_v14 = vld [vmem:[%s19687_s3 + $0x38] sm:$0xff] }
 0x1d2   : > { %v13281_v62 = vpop.f32.mrf.mxu0  ;;  %v14773_v63 = vpop.f32.mrf.mxu1  ;;  %v14837_v18 = vand.u32 4294901760, %v1924_v14 }
 0x1d3   : > { %v1114_v26 = vadd.f32 %v13281_v62, %v993_v21  ;;  %v1217_v42 = vadd.f32 %v1216_v49, %v1093_v20  ;;  %v1923_v20 = vld [vmem:[%s19687_s3 + $0x30] sm:$0xff] }
 0x1d4   : > { %v1106_v1 = vpop.f32.mrf.mxu0  ;;  %v14775_v2 = vpop.f32.mrf.mxu1  ;;  %v14851_v24 = vsub.f32 %v1924_v14, %v14837_v18 }
 0x1d5   : > { %v1107_v37 = vadd.f32 %v1106_v1, %v987_v28  ;;  %v1241_v55 = vadd.f32 %v13297_v51, %v1114_v26  ;;  %v1922_v26 = vld [vmem:[%s19687_s3 + $0x28] sm:$0xff] }
 0x1d6   : > { %v13284_v5 = vpop.f32.mrf.mxu0  ;;  %v13326_v6 = vpop.f32.mrf.mxu1  ;;  %v14865_v32 = vand.u32 4294901760, %v14851_v24 }
 0x1d7   : > { %v1128_v30 = vadd.f32 %v13284_v5, %v1005_v38  ;;  %v1233_v22 = vadd.f32 %v1232_v53, %v1107_v37  ;;  %v1921_v37 = vld [vmem:[%s19687_s3 + $0x20] sm:$0xff] }
 0x1d8   : > { %v1120_v11 = vpop.f32.mrf.mxu0  ;;  %v1464_v12 = vpop.f32.mrf.mxu1 }
 0x1d9   : > { %v1121_v7 = vadd.f32 %v1120_v11, %v999_v44  ;;  %v1257_v40 = vadd.f32 %v13300_v56, %v1128_v30  ;;  %v14888_v44 = vand.u32 4294901760, %v1921_v37 }
 0x1da   : > { %v13287_v16 = vpop.f32.mrf.mxu0  ;;  %v13329_v17 = vpop.f32.mrf.mxu1 }
 0x1db   : > { %v1142_v36 = vadd.f32 %v13287_v16, %v1017_v58  ;;  %v1249_v53 = vadd.f32 %v1248_v61, %v1121_v7  ;;  %v14911_v7 = vsub.f32 %v1921_v37, %v14888_v44 }
 0x1dc   : > { %v1134_v25 = vpop.f32.mrf.mxu0  ;;  %v1476_v33 = vpop.f32.mrf.mxu1 }
 0x1dd   : > { %v1135_v50 = vadd.f32 %v1134_v25, %v1011_v23  ;;  %v1273_v60 = vadd.f32 %v14773_v63, %v1142_v36  ;;  %v14853_v25 = vand.u32 4294901760, %v1923_v20  ;;  %v1918_v36 = vld [vmem:[%s19687_s3 + $0x8] sm:$0xff] }
 0x1de   : > { %v13310_v35 = vpop.f32.mrf.mxu0  ;;  %v13332_v59 = vpop.f32.mrf.mxu1 }
 0x1df   : > { %v1356_v41 = vadd.f32 %v13310_v35, %v1225_v29  ;;  %v1265_v61 = vadd.f32 %v14775_v2, %v1135_v50  ;;  %v1925_v2 = vld [vmem:[%s19687_s3 + $0x40] sm:$0xff]  ;;  %v14870_v35 = vand.u32 4294901760, %v1922_v26 }
 0x1e0   : > { %v1349_v27 = vpop.f32.mrf.mxu0  ;;  %v1488_v48 = vpop.f32.mrf.mxu1  ;;  %v14823_v13 = vand.u32 4294901760, %v1925_v2 }
 0x1e1   : > { %v14777_v31 = vadd.f32 %v13326_v6, %v1356_v41  ;;  %v1350_v34 = vadd.f32 %v1349_v27, %v1217_v42  ;;  %v2137_v41 = vsub.f32 %v14851_v24, %v14865_v32  ;;  %v14885_v43 = vsub.f32 %v1922_v26, %v14870_v35  ;;  %v1920_v27 = vld [vmem:[%s19687_s3 + $0x18] sm:$0xff] }
 0x1e2   : > { %v13313_v4 = vpop.f32.mrf.mxu0  ;;  %v13335_v56 = vpop.f32.mrf.mxu1  ;;  %13336 = vmatprep.subr.mxu0 %v14823_v13 }
 0x1e3   : > { %19992 = vst [vmem:[#allocation5_spill] sm:$0xff] %v14777_v31  ;;  %1512 = vst.msk [vmem:[#allocation3 + $0x21] sm:$0xff] %vm328_vm2, %v14777_v31  ;;  %v14781_v8 = vadd.f32 %v1464_v12, %v1350_v34  ;;  %v1368_v19 = vadd.f32 %v13313_v4, %v1241_v55  ;;  %13337 = vmatpush3.msra.mxu0 %v14823_v13  ;;  %v2138_v34 = vand.u32 4294901760, %v2137_v41  ;;  %v14899_v58 = vand.u32 4294901760, %v14885_v43  ;;  %v1919_v4 = vld [vmem:[%s19687_s3 + $0x10] sm:$0xff] }
 0x1e4   : > { %v1361_v39 = vpop.f32.mrf.mxu0  ;;  %v1500_v9 = vpop.f32.mrf.mxu1  ;;  %13338 = vmatprep.subr.mxu0 %v14837_v18 }
 0x1e5   : > { %19993 = vst [vmem:[#allocation6_spill] sm:$0xff] %v14781_v8  ;;  %1511 = vst.msk [vmem:[#allocation3 + $0x11] sm:$0xff] %vm328_vm2, %v14781_v8  ;;  %v14785_v45 = vadd.f32 %v13329_v17, %v1368_v19  ;;  %v1362_v47 = vadd.f32 %v1361_v39, %v1233_v22  ;;  %v14835_v17 = vsub.f32 %v1925_v2, %v14823_v13  ;;  %13339 = vmatpush3.msra.mxu0 %v14837_v18 }
 0x1e6   : > { %v13316_v49 = vpop.f32.mrf.mxu0  ;;  %13340 = vmatprep.subr.mxu0 %v14853_v25  ;;  %v14913_v19 = vand.u32 4294901760, %v1919_v4  ;;  %v2151_v23 = vsub.f32 %v14885_v43, %v14899_v58 }
 0x1e7   : > { %19994 = vst [vmem:[#allocation7_spill] sm:$0xff] %v14785_v45  ;;  %1514 = vst.msk [vmem:[#allocation3 + $0x41] sm:$0xff] %vm328_vm2, %v14785_v45  ;;  %v14789_v51 = vadd.f32 %v1476_v33, %v1362_v47  ;;  %v1380_v52 = vadd.f32 %v13316_v49, %v1257_v40  ;;  %v14848_v21 = vand.u32 4294901760, %v14835_v17  ;;  %v14868_v33 = vsub.f32 %v1923_v20, %v14853_v25 }
 0x1e8   : > { %v1373_v46 = vpop.f32.mrf.mxu0  ;;  %13341 = vmatpush3.msra.mxu0 %v14853_v25  ;;  %v14925_v47 = vand.u32 4294901760, %v14911_v7  ;;  %v14928_v40 = vsub.f32 %v1919_v4, %v14913_v19  ;;  %v2152_v50 = vand.u32 4294901760, %v2151_v23 }
 0x1e9   : > { %19995 = vst [vmem:[#allocation8_spill] sm:$0xff] %v14789_v51  ;;  %1513 = vst.msk [vmem:[#allocation3 + $0x31] sm:$0xff] %vm328_vm2, %v14789_v51  ;;  %v14793_v54 = vadd.f32 %v13332_v59, %v1380_v52  ;;  %v1374_v57 = vadd.f32 %v1373_v46, %v1249_v53  ;;  %v2130_v29 = vsub.f32 %v14835_v17, %v14848_v21  ;;  %v14882_v42 = vand.u32 4294901760, %v14868_v33  ;;  %v1917_v53 = vld [vmem:[%s19687_s3] sm:$0xff] }
 0x1ea   : > { %v13319_v62 = vpop.f32.mrf.mxu0  ;;  %v14796_v0 = vld [vmem:[#allocation3 + $0x20] sm:$0xff]  ;;  %v14901_v59 = vand.u32 4294901760, %v1920_v27  ;;  %13342 = vmatprep.subr.mxu0 %v14870_v35  ;;  %v2158_v46 = vsub.f32 %v14911_v7, %v14925_v47 }
 0x1eb   : > { %19996 = vst [vmem:[#allocation9_spill] sm:$0xff] %v14793_v54  ;;  %1516 = vst.msk [vmem:[#allocation3 + $0x61] sm:$0xff] %vm328_vm2, %v14793_v54  ;;  %v14800_v1 = vadd.f32 %v1488_v48, %v1374_v57  ;;  %v1392_v3 = vadd.f32 %v13319_v62, %v1273_v60  ;;  %1760 = vrot.lane.b32.xlu0 %v14796_v0, %s14372_s22  ;;  %1666 = vrot.lane.b32.xlu1 %v14796_v0, %s14377_s12  ;;  %v1552_v10 = vld [vmem:[#allocation3 + $0x21] sm:$0xff]  ;;  %v2131_v38 = vand.u32 4294901760, %v2130_v29 }
 0x1ec   : > { %v1385_v63 = vpop.f32.mrf.mxu0  ;;  %v14811_v11 = vld [vmem:[#allocation3 + $0x10] sm:$0xff]  ;;  %v14830_v15 = vld [vmem:[#allocation3 + $0x22] sm:$0xff]  ;;  %v2144_v55 = vsub.f32 %v14868_v33, %v14882_v42  ;;  %v14918_v39 = vsub.f32 %v1920_v27, %v14901_v59  ;;  %13343 = vmatpush3.msra.mxu0 %v14870_v35  ;;  %v14930_v48 = vand.u32 4294901760, %v1918_v36  ;;  %v14949_v57 = vand.u32 4294901760, %v14928_v40 }
 0x1ed   : > { %19997 = vst [vmem:[#allocation10_spill] sm:$0xff] %v14800_v1  ;;  %1515 = vst.msk [vmem:[#allocation3 + $0x51] sm:$0xff] %vm328_vm2, %v14800_v1  ;;  %v14809_v5 = vadd.f32 %v13335_v56, %v1392_v3  ;;  %v1386_v6 = vadd.f32 %v1385_v63, %v1265_v61  ;;  %v14832_v16 = vld [vmem:[#allocation3 + $0x11] sm:$0xff]  ;;  %13366 = vmatprep.subr.mxu1 %v2131_v38  ;;  %13344 = vmatprep.subr.mxu0 %v14888_v44  ;;  %v14954_v56 = vand.u32 4294901760, %v1917_v53 }
 0x1ee   : > { %v14860_v28 = vld [vmem:[#allocation3 + $0x12] sm:$0xff]  ;;  %v14894_v30 = vld [vmem:[#allocation3 + $0x41] sm:$0xff]  ;;  %13367 = vmatpush3.msra.mxu1 %v2131_v38  ;;  %v2145_v22 = vand.u32 4294901760, %v2144_v55  ;;  %v14936_v52 = vand.u32 4294901760, %v14918_v39  ;;  %13345 = vmatpush3.msra.mxu0 %v14888_v44  ;;  %v14952_v60 = vsub.f32 %v1918_v36, %v14930_v48  ;;  %v2159_v3 = vand.u32 4294901760, %v2158_v46  ;;  %v1601_v46 = vpop.permute.xlu0 %1600 }
 0x1ef   : > { %19998 = vst [vmem:[#allocation11_spill] sm:$0xff] %v14809_v5  ;;  %1518 = vst.msk [vmem:[#allocation3 + $0x81] sm:$0xff] %vm328_vm2, %v14809_v5  ;;  %v14815_v12 = vadd.f32 %v1500_v9, %v1386_v6  ;;  %1698 = vrot.lane.b32.xlu1 %v1552_v10, %s14371_s21  ;;  %1664 = vrot.lane.b32.xlu0 %v14811_v11, %s14377_s12  ;;  %v14933_v49 = vld [vmem:[#allocation3 + $0x42] sm:$0xff]  ;;  %v14963_v63 = vsub.f32 %v1917_v53, %v14954_v56 }
 0x1f0   : > { %13368 = vmatprep.subr.mxu1 %v2138_v34  ;;  %v2165_v62 = vsub.f32 %v14918_v39, %v14936_v52  ;;  %13346 = vmatprep.subr.mxu0 %v14901_v59  ;;  %v14960_v61 = vand.u32 4294901760, %v14952_v60  ;;  %v14966_v6 = vld [vmem:[#allocation3 + $0x30] sm:$0xff]  ;;  %v2172_v9 = vsub.f32 %v14928_v40, %v14949_v57  ;;  %v14994_v38 = vld [vmem:[#allocation3 + $0x40] sm:$0xff] }
 0x1f1   : > { %19999 = vst [vmem:[#allocation12_spill] sm:$0xff] %v14815_v12  ;;  %1517 = vst.msk [vmem:[#allocation3 + $0x71] sm:$0xff] %vm328_vm2, %v14815_v12  ;;  %13369 = vmatpush3.msra.mxu1 %v2138_v34  ;;  %13347 = vmatpush3.msra.mxu0 %v14901_v59  ;;  %v14976_v2 = vand.u32 4294901760, %v14963_v63  ;;  %v1530_v20 = vld [vmem:[#allocation3 + $0x31] sm:$0xff] }
 0x1f2   : > { %13370 = vmatprep.subr.mxu1 %v2145_v22  ;;  %13348 = vmatprep.subr.mxu0 %v14913_v19  ;;  %v2179_v14 = vsub.f32 %v14952_v60, %v14960_v61  ;;  %v2173_v26 = vand.u32 4294901760, %v2172_v9  ;;  %v1538_v37 = vld [vmem:[#allocation3 + $0x32] sm:$0xff]  ;;  %v1533_v41 = vld [vmem:[#allocation3 + $0x61] sm:$0xff] }
 0x1f3   : > { %1730 = vrot.lane.b32.xlu1 %v14830_v15, %s14378_s23  ;;  %1696 = vrot.lane.b32.xlu0 %v14832_v16, %s14371_s21  ;;  %v1564_v27 = vld [vmem:[#allocation3 + $0x62] sm:$0xff]  ;;  %v1591_v9 = vld [vmem:[#allocation3 + $0x92] sm:$0xff] }
 0x1f4   : > { %13371 = vmatpush3.msra.mxu1 %v2145_v22  ;;  %13349 = vmatpush3.msra.mxu0 %v14913_v19  ;;  %v2180_v29 = vand.u32 4294901760, %v2179_v14  ;;  %v1532_v34 = vld [vmem:[#allocation3 + $0x51] sm:$0xff] }
 0x1f5   : > { %13372 = vmatprep.subr.mxu1 %v2152_v50  ;;  %13350 = vmatprep.subr.mxu0 %v14930_v48  ;;  %v1540_v55 = vld [vmem:[#allocation3 + $0x52] sm:$0xff] }
 0x1f6   : > { %13373 = vmatpush3.msra.mxu1 %v2152_v50  ;;  %13351 = vmatpush3.msra.mxu0 %v14930_v48  ;;  %v15023_v4 = vld [vmem:[#allocation3 + $0x50] sm:$0xff]  ;;  %v1558_v22 = vld [vmem:[#allocation3 + $0x81] sm:$0xff]  ;;  %v15046_v50 = vpop.permute.xlu1 %1774 }
 0x1f7   : > { %1604 = vrot.lane.b32.xlu1 %v1552_v10, %s14375_s26  ;;  %1728 = vrot.lane.b32.xlu0 %v14860_v28, %s14378_s23  ;;  %v1566_v36 = vld [vmem:[#allocation3 + $0x82] sm:$0xff] }
 0x1f8   : > { %13374 = vmatprep.subr.mxu1 %v2159_v3  ;;  %13352 = vmatprep.subr.mxu0 %v14954_v56  ;;  %v1534_v23 = vld [vmem:[#allocation3 + $0x71] sm:$0xff] }
 0x1f9   : > { %13375 = vmatpush3.msra.mxu1 %v2159_v3  ;;  %13353 = vmatpush3.msra.mxu0 %v14954_v56  ;;  %v15048_v53 = vld [vmem:[#allocation3 + $0x70] sm:$0xff]  ;;  %v1633_v3 = vpop.permute.xlu0 %1632 }
 0x1fa   : > { %13396 = vmatprep.subr.mxu0 %v14835_v17 }
 0x1fb   : > { %1792 = vrot.lane.b32.xlu1 %v1552_v10, %s14376_s27  ;;  %1702 = vrot.lane.b32.xlu0 %v14894_v30, %s14371_s21  ;;  %v2166_v10 = vand.u32 4294901760, %v2165_v62  ;;  %v15056_v62 = vpop.permute.xlu1 %1806 }
 0x1fd   : > { %13376 = vmatprep.subr.mxu1 %v2166_v10 }
 0x1fe   : > { %13377 = vmatpush3.msra.mxu1 %v2166_v10 }
 0x1ff   : > { %1636 = vrot.lane.b32.xlu1 %v14830_v15, %s14373_s25  ;;  %1734 = vrot.lane.b32.xlu0 %v14933_v49, %s14378_s23 }
 0x200   : > { %13378 = vmatprep.subr.mxu1 %v2173_v26 }
 0x201   : > { %13379 = vmatpush3.msra.mxu1 %v2173_v26 }
 0x202   : > { %13380 = vmatprep.subr.mxu1 %v2180_v29 }
 0x203   : > { %1824 = vrot.lane.b32.xlu1 %v14830_v15, %s14369_s17  ;;  %1762 = vrot.lane.b32.xlu0 %v14966_v6, %s14372_s22  ;;  %v2186_v15 = vsub.f32 %v14963_v63, %v14976_v2 }
 0x204   : > { %13381 = vmatpush3.msra.mxu1 %v2180_v29 }
 0x207   : > { %1606 = vrot.lane.b32.xlu0 %v1530_v20, %s14375_s26  ;;  %1602 = vrot.lane.b32.xlu1 %v14832_v16, %s14375_s26  ;;  %v2187_v16 = vand.u32 4294901760, %v2186_v15 }
 0x209   : > { %13382 = vmatprep.subr.mxu1 %v2187_v16 }
 0x20a   : > { %13383 = vmatpush3.msra.mxu1 %v2187_v16  ;;  %v1519_v16 = vld [vmem:[#allocation3] sm:$0xff] }
 0x20b   : > { %1794 = vrot.lane.b32.xlu0 %v1530_v20, %s14376_s27  ;;  %1634 = vrot.lane.b32.xlu1 %v14860_v28, %s14373_s25  ;;  %v15006_v28 = vld [vmem:[#allocation3 + $0x60] sm:$0xff] }
 0x20c   : > { %13426 = vmatprep.subr.mxu1 %v14823_v13 }
 0x20f   : > { %1638 = vrot.lane.b32.xlu0 %v1538_v37, %s14373_s25  ;;  %1670 = vrot.lane.b32.xlu1 %v14994_v38, %s14377_s12 }
 0x213   : > { %1826 = vrot.lane.b32.xlu0 %v1538_v37, %s14369_s17  ;;  %1608 = vrot.lane.b32.xlu1 %v14894_v30, %s14375_s26 }
 0x217   : > { %1700 = vrot.lane.b32.xlu0 %v1530_v20, %s14371_s21  ;;  %1640 = vrot.lane.b32.xlu1 %v14933_v49, %s14373_s25 }
 0x21b   : > { %1674 = vrot.lane.b32.xlu0 %v15006_v28, %s14377_s12  ;;  %1764 = vrot.lane.b32.xlu1 %v14994_v38, %s14372_s22 }
 0x21f   : > { %1612 = vrot.lane.b32.xlu0 %v1533_v41, %s14375_s26  ;;  %1796 = vrot.lane.b32.xlu1 %v14894_v30, %s14376_s27  ;;  %v1550_v30 = vld [vmem:[#allocation3 + $0x80] sm:$0xff] }
 0x223   : > { %1738 = vrot.lane.b32.xlu0 %v1564_v27, %s14378_s23  ;;  %1828 = vrot.lane.b32.xlu1 %v14933_v49, %s14369_s17  ;;  %v1542_v49 = vld [vmem:[#allocation3 + $0x72] sm:$0xff] }
 0x227   : > { %1610 = vrot.lane.b32.xlu0 %v1532_v34, %s14375_s26  ;;  %1668 = vrot.lane.b32.xlu1 %v14966_v6, %s14377_s12 }
 0x22b   : > { %1642 = vrot.lane.b32.xlu0 %v1540_v55, %s14373_s25  ;;  %1732 = vrot.lane.b32.xlu1 %v1538_v37, %s14378_s23 }
 0x22f   : > { %1766 = vrot.lane.b32.xlu0 %v15023_v4, %s14372_s22  ;;  %1706 = vrot.lane.b32.xlu1 %v1533_v41, %s14371_s21 }
 0x233   : > { %1798 = vrot.lane.b32.xlu0 %v1532_v34, %s14376_s27  ;;  %1644 = vrot.lane.b32.xlu1 %v1564_v27, %s14373_s25 }
 0x237   : > { %1736 = vrot.lane.b32.xlu0 %v1540_v55, %s14378_s23  ;;  %1768 = vrot.lane.b32.xlu1 %v15006_v28, %s14372_s22 }
 0x23b   : > { %1678 = vrot.lane.b32.xlu0 %v1550_v30, %s14377_s12  ;;  %1800 = vrot.lane.b32.xlu1 %v1533_v41, %s14376_s27 }
 0x23f   : > { %1710 = vrot.lane.b32.xlu0 %v1558_v22, %s14371_s21  ;;  %1832 = vrot.lane.b32.xlu1 %v1564_v27, %s14369_s17  ;;  %v1848_v27 = vsel %vm328_vm2, %v1519_v16, %v1601_v46 }
 0x243   : > { %1772 = vrot.lane.b32.xlu0 %v1550_v30, %s14372_s22  ;;  %1672 = vrot.lane.b32.xlu1 %v15023_v4, %s14377_s12  ;;  %v1856_v30 = vsel %vm725_vm1, %v1848_v27, %v1633_v3 }
 0x247   : > { %1804 = vrot.lane.b32.xlu0 %v1558_v22, %s14376_s27  ;;  %1704 = vrot.lane.b32.xlu1 %v1532_v34, %s14371_s21 }
 0x24b   : > { %1830 = vrot.lane.b32.xlu1 %v1540_v55, %s14369_s17  ;;  %1614 = vrot.lane.b32.xlu0 %v1534_v23, %s14375_s26 }
 0x24f   : > { %1742 = vrot.lane.b32.xlu1 %v1566_v36, %s14378_s23  ;;  %1646 = vrot.lane.b32.xlu0 %v1542_v49, %s14373_s25 }
 0x253   : > { %1676 = vrot.lane.b32.xlu1 %v15048_v53, %s14377_s12  ;;  %1770 = vrot.lane.b32.xlu0 %v15048_v53, %s14372_s22 }
 0x257   : > { %1708 = vrot.lane.b32.xlu1 %v1534_v23, %s14371_s21  ;;  %1802 = vrot.lane.b32.xlu0 %v1534_v23, %s14376_s27 }
 0x25b   : > { %1740 = vrot.lane.b32.xlu1 %v1542_v49, %s14378_s23  ;;  %1834 = vrot.lane.b32.xlu0 %v1542_v49, %s14369_s17 }
 0x25d   : > { %v1761_v10 = vpop.permute.xlu0 %1760  ;;  %v1667_v14 = vpop.permute.xlu1 %1666 }
 0x25f   : > { %1838 = vrot.lane.b32.xlu1 %v1591_v9, %s14369_s17  ;;  %1836 = vrot.lane.b32.xlu0 %v1566_v36, %s14369_s17 }
 0x261   : > { %v1699_v20 = vpop.permute.xlu1 %1698  ;;  %v1665_v26 = vpop.permute.xlu0 %1664 }
 0x262   : > { %v1865_v22 = vsel %vm1864_vm5, %v1856_v30, %v1665_v26 }
 0x265   : > { %v1731_v15 = vpop.permute.xlu1 %1730  ;;  %v1697_v29 = vpop.permute.xlu0 %1696 }
 0x266   : > { %v1873_v23 = vsel %vm356_vm6, %v1865_v22, %v1697_v29 }
 0x269   : > { %v15062_v37 = vpop.permute.xlu1 %1604  ;;  %v1729_v41 = vpop.permute.xlu0 %1728 }
 0x26a   : > { %v1882_v36 = vsel %vm1881_vm7, %v1873_v23, %v1729_v41 }
 0x26b   : > { %v1891_v46 = vsel %vm1890_vm8, %v1882_v36, %v1761_v10 }
 0x26d   : > { %v1793_v34 = vpop.permute.xlu1 %1792  ;;  %v15065_v55 = vpop.permute.xlu0 %1702 }
 0x26e   : > { %v1900_v16 = vsel %vm1899_vm9, %v1891_v46, %v1793_v34 }
 0x271   : > { %v15071_v49 = vpop.permute.xlu1 %1636  ;;  %v15073_v9 = vpop.permute.xlu0 %1734 }
 0x275   : > { %v1825_v3 = vpop.permute.xlu1 %1824  ;;  %v1763_v27 = vpop.permute.xlu0 %1762 }
 0x276   : > { %v1909_v26 = vsel %vm1908_vm10, %v1900_v16, %v1825_v3 }
 0x277   : > { %v1935_v29 = vsel %vm1933_vm11, %v1909_v26, 0 }
 0x278   : > { %v15079_v30 = vand.u32 4294901760, %v1935_v29 }
 0x279   : > { %v15081_v41 = vpop.permute.xlu0 %1606  ;;  %v1603_v22 = vpop.permute.xlu1 %1602 }
 0x27a   : > { %v15084_v23 = vsub.f32 %v1935_v29, %v15079_v30  ;;  %13384 = vmatprep.mubr.f32.mxu1 %v15079_v30  ;;  %v1849_v34 = vsel %vm328_vm2, %v14811_v11, %v1603_v22 }
 0x27c   : > { %v19702_v10 = vand.u32 4294901760, %v15084_v23 }
 0x27d   : > { %v1795_v36 = vpop.permute.xlu0 %1794  ;;  %v1635_v46 = vpop.permute.xlu1 %1634 }
 0x27e   : > { %v1857_v16 = vsel %vm725_vm1, %v1849_v34, %v1635_v46  ;;  %v2035_v3 = vsub.f32 %v15084_v23, %v19702_v10 }
 0x27f   : > { %v1866_v26 = vsel %vm1864_vm5, %v1857_v16, %v1667_v14 }
 0x280   : > { %v1874_v29 = vsel %vm356_vm6, %v1866_v26, %v1699_v20  ;;  %v2036_v12 = vand.u32 4294901760, %v2035_v3 }
 0x281   : > { %v15096_v5 = vpop.permute.xlu0 %1638  ;;  %v15098_v1 = vpop.permute.xlu1 %1670  ;;  %v1883_v54 = vsel %vm1881_vm7, %v1874_v29, %v1731_v15 }
 0x282   : > { %13354 = vmatprep.mubr.f32.mxu0 %v2036_v12  ;;  %v1892_v11 = vsel %vm1890_vm8, %v1883_v54, %v1763_v27 }
 0x283   : > { %v1901_v34 = vsel %vm1899_vm9, %v1892_v11, %v1795_v36 }
 0x285   : > { %v1827_v22 = vpop.permute.xlu0 %1826  ;;  %v15103_v46 = vpop.permute.xlu1 %1608 }
 0x286   : > { %v1910_v10 = vsel %vm1908_vm10, %v1901_v34, %v1827_v22 }
 0x287   : > { %v1938_v14 = vsel %vm1933_vm11, %v1910_v10, 0 }
 0x288   : > { %v15107_v20 = vand.u32 4294901760, %v1938_v14 }
 0x289   : > { %v1701_v16 = vpop.permute.xlu0 %1700  ;;  %v15109_v3 = vpop.permute.xlu1 %1640 }
 0x28a   : > { %v15112_v26 = vsub.f32 %v1938_v14, %v15107_v20  ;;  %13385 = vmatmul.mubr.f32.vlgmr.msra.gmra.mxu1 %v15107_v20 }
 0x28b   : > { %13427 = vmatpush3.msra.mxu1 %v14823_v13 }
 0x28c   : > { %v19703_v54 = vand.u32 4294901760, %v15112_v26  ;;  %13428 = vmatprep.subr.mxu1 %v14837_v18 }
 0x28d   : > { %v15118_v12 = vpop.permute.xlu0 %1674  ;;  %v1765_v15 = vpop.permute.xlu1 %1764  ;;  %13429 = vmatpush3.msra.mxu1 %v14837_v18 }
 0x28e   : > { %v2045_v27 = vsub.f32 %v15112_v26, %v19703_v54  ;;  %13430 = vmatprep.subr.mxu1 %v14853_v25 }
 0x28f   : > { %13431 = vmatpush3.msra.mxu1 %v14853_v25 }
 0x290   : > { %v2046_v10 = vand.u32 4294901760, %v2045_v27  ;;  %13432 = vmatprep.subr.mxu1 %v14870_v35 }
 0x291   : > { %v15127_v36 = vpop.permute.xlu0 %1612  ;;  %v1797_v29 = vpop.permute.xlu1 %1796  ;;  %13433 = vmatpush3.msra.mxu1 %v14870_v35 }
 0x292   : > { %13355 = vmatmul.mubr.f32.vlgmr.msra.gmra.mxu0 %v2046_v10  ;;  %13434 = vmatprep.subr.mxu1 %v14888_v44 }
 0x293   : > { %13397 = vmatpush3.msra.mxu0 %v14835_v17  ;;  %13435 = vmatpush3.msra.mxu1 %v14888_v44  ;;  %v1850_v17 = vsel %vm328_vm2, %v14796_v0, %v15062_v37 }
 0x294   : > { %13398 = vmatprep.subr.mxu0 %v14851_v24  ;;  %13436 = vmatprep.subr.mxu1 %v14901_v59 }
 0x295   : > { %v15135_v11 = vpop.permute.xlu0 %1738  ;;  %v1829_v22 = vpop.permute.xlu1 %1828  ;;  %13399 = vmatpush3.msra.mxu0 %v14851_v24  ;;  %13437 = vmatpush3.msra.mxu1 %v14901_v59  ;;  %v1858_v24 = vsel %vm725_vm1, %v1850_v17, %v15071_v49 }
 0x296   : > { %13400 = vmatprep.subr.mxu0 %v14868_v33  ;;  %13438 = vmatprep.subr.mxu1 %v14913_v19 }
 0x297   : > { %13401 = vmatpush3.msra.mxu0 %v14868_v33  ;;  %13439 = vmatpush3.msra.mxu1 %v14913_v19 }
 0x298   : > { %13402 = vmatprep.subr.mxu0 %v14885_v43  ;;  %13440 = vmatprep.subr.mxu1 %v14930_v48 }
 0x299   : > { %v15150_v34 = vpop.permute.xlu0 %1610  ;;  %v1669_v14 = vpop.permute.xlu1 %1668  ;;  %13403 = vmatpush3.msra.mxu0 %v14885_v43  ;;  %13441 = vmatpush3.msra.mxu1 %v14930_v48 }
 0x29a   : > { %v1867_v33 = vsel %vm1864_vm5, %v1858_v24, %v1669_v14  ;;  %13404 = vmatprep.subr.mxu0 %v14911_v7  ;;  %13442 = vmatprep.subr.mxu1 %v14954_v56 }
 0x29b   : > { %13405 = vmatpush3.msra.mxu0 %v14911_v7  ;;  %13443 = vmatpush3.msra.mxu1 %v14954_v56  ;;  %v1875_v43 = vsel %vm356_vm6, %v1867_v33, %v1701_v16 }
 0x29c   : > { %13406 = vmatprep.subr.mxu0 %v14918_v39  ;;  %13486 = vmatprep.subr.mxu1 %v14823_v13 }
 0x29d   : > { %v15161_v0 = vpop.permute.xlu0 %1642  ;;  %v1733_v37 = vpop.permute.xlu1 %1732  ;;  %13407 = vmatpush3.msra.mxu0 %v14918_v39 }
 0x29e   : > { %v1884_v49 = vsel %vm1881_vm7, %v1875_v43, %v1733_v37  ;;  %13408 = vmatprep.subr.mxu0 %v14928_v40 }
 0x29f   : > { %v1893_v27 = vsel %vm1890_vm8, %v1884_v49, %v1765_v15  ;;  %13409 = vmatpush3.msra.mxu0 %v14928_v40  ;;  %v1851_v49 = vsel %vm328_vm2, %v14966_v6, %v15081_v41 }
 0x2a0   : > { %v1902_v7 = vsel %vm1899_vm9, %v1893_v27, %v1797_v29  ;;  %13410 = vmatprep.subr.mxu0 %v14952_v60 }
 0x2a1   : > { %v1911_v10 = vsel %vm1908_vm10, %v1902_v7, %v1829_v22  ;;  %v1767_v17 = vpop.permute.xlu0 %1766  ;;  %v15172_v24 = vpop.permute.xlu1 %1706  ;;  %13411 = vmatpush3.msra.mxu0 %v14952_v60 }
 0x2a2   : > { %v1941_v39 = vsel %vm1933_vm11, %v1911_v10, 0  ;;  %13412 = vmatprep.subr.mxu0 %v14963_v63  ;;  %v1859_v10 = vsel %vm725_vm1, %v1851_v49, %v15096_v5 }
 0x2a3   : > { %v15177_v16 = vand.u32 4294901760, %v1941_v39  ;;  %13413 = vmatpush3.msra.mxu0 %v14963_v63 }
 0x2a4   : > { %13456 = vmatprep.subr.mxu0 %v14848_v21 }
 0x2a5   : > { %v1799_v40 = vpop.permute.xlu0 %1798  ;;  %v15181_v15 = vpop.permute.xlu1 %1644  ;;  %13387 = vmatprep.mubr.f32.mxu1 %v15177_v16  ;;  %v15185_v29 = vsub.f32 %v1941_v39, %v15177_v16  ;;  %v1868_v39 = vsel %vm1864_vm5, %v1859_v10, %v15098_v1 }
 0x2a7   : > { %v19706_v60 = vand.u32 4294901760, %v15185_v29 }
 0x2a9   : > { %v1737_v22 = vpop.permute.xlu0 %1736  ;;  %v1769_v14 = vpop.permute.xlu1 %1768  ;;  %v2055_v33 = vsub.f32 %v15185_v29, %v19706_v60 }
 0x2ab   : > { %v2056_v43 = vand.u32 4294901760, %v2055_v33  ;;  %v1852_v33 = vsel %vm328_vm2, %v14994_v38, %v15103_v46 }
 0x2ac   : > { %v1860_v6 = vsel %vm725_vm1, %v1852_v33, %v15109_v3 }
 0x2ad   : > { %v1679_v63 = vpop.permute.xlu0 %1678  ;;  %v1801_v37 = vpop.permute.xlu1 %1800  ;;  %13357 = vmatprep.mubr.f32.mxu0 %v2056_v43  ;;  %v1876_v43 = vsel %vm356_vm6, %v1868_v39, %v15065_v55 }
 0x2ae   : > { %v1885_v1 = vsel %vm1881_vm7, %v1876_v43, %v15073_v9 }
 0x2af   : > { %v1894_v45 = vsel %vm1890_vm8, %v1885_v1, %v1767_v17 }
 0x2b0   : > { %v1903_v55 = vsel %vm1899_vm9, %v1894_v45, %v1799_v40 }
 0x2b1   : > { %v1711_v27 = vpop.permute.xlu0 %1710  ;;  %v1833_v7 = vpop.permute.xlu1 %1832 }
 0x2b5   : > { %v15198_v54 = vpop.permute.xlu0 %1772  ;;  %v1673_v51 = vpop.permute.xlu1 %1672 }
 0x2b6   : > { %v1869_v41 = vsel %vm1864_vm5, %v1860_v6, %v1673_v51 }
 0x2b9   : > { %v1805_v60 = vpop.permute.xlu0 %1804  ;;  %v1705_v5 = vpop.permute.xlu1 %1704 }
 0x2ba   : > { %v1877_v49 = vsel %vm356_vm6, %v1869_v41, %v1705_v5  ;;  %v1853_v41 = vsel %vm328_vm2, %v15023_v4, %v15150_v34 }
 0x2bb   : > { %v1886_v10 = vsel %vm1881_vm7, %v1877_v49, %v1737_v22 }
 0x2bc   : > { %v1895_v38 = vsel %vm1890_vm8, %v1886_v10, %v1769_v14 }
 0x2bd   : > { %v1904_v46 = vsel %vm1899_vm9, %v1895_v38, %v1801_v37  ;;  %v1831_v3 = vpop.permute.xlu1 %1830  ;;  %v1615_v39 = vpop.permute.xlu0 %1614 }
 0x2be   : > { %v1912_v51 = vsel %vm1908_vm10, %v1903_v55, %v1831_v3  ;;  %v1913_v33 = vsel %vm1908_vm10, %v1904_v46, %v1833_v7  ;;  %v1855_v17 = vsel %vm328_vm2, %v15048_v53, %v1615_v39  ;;  %v1861_v53 = vsel %vm725_vm1, %v1853_v41, %v15161_v0 }
 0x2bf   : > { %v1944_v6 = vsel %vm1933_vm11, %v1912_v51, 0  ;;  %v1947_v9 = vsel %vm1933_vm11, %v1913_v33, 0  ;;  %v1870_v34 = vsel %vm1864_vm5, %v1861_v53, %v15118_v12  ;;  %v1854_v33 = vsel %vm328_vm2, %v15006_v28, %v15127_v36 }
 0x2c0   : > { %v15220_v43 = vand.u32 4294901760, %v1944_v6  ;;  %v15222_v22 = vand.u32 4294901760, %v1947_v9  ;;  %v1878_v0 = vsel %vm356_vm6, %v1870_v34, %v15172_v24 }
 0x2c1   : > { %v1743_v45 = vpop.permute.xlu1 %1742  ;;  %v1647_v40 = vpop.permute.xlu0 %1646  ;;  %v1887_v12 = vsel %vm1881_vm7, %v1878_v0, %v15135_v11 }
 0x2c2   : > { %v15227_v14 = vsub.f32 %v1944_v6, %v15220_v43  ;;  %v1863_v37 = vsel %vm725_vm1, %v1855_v17, %v1647_v40  ;;  %13388 = vmatmul.mubr.f32.gmra.mxu1 %v15220_v43  ;;  %v15232_v7 = vsub.f32 %v1947_v9, %v15222_v22  ;;  %v1862_v6 = vsel %vm725_vm1, %v1854_v33, %v15181_v15 }
 0x2c3   : > { %13390 = vmatprep.mubr.f32.mxu1 %v15222_v22  ;;  %v1872_v1 = vsel %vm1864_vm5, %v1863_v37, %v1679_v63 }
 0x2c4   : > { %v2064_v5 = vand.u32 4294901760, %v15227_v14  ;;  %v2074_v49 = vand.u32 4294901760, %v15232_v7  ;;  %v1880_v46 = vsel %vm356_vm6, %v1872_v1, %v1711_v27 }
 0x2c5   : > { %v1677_v10 = vpop.permute.xlu1 %1676  ;;  %v1771_v38 = vpop.permute.xlu0 %1770  ;;  %v1889_v24 = vsel %vm1881_vm7, %v1880_v46, %v1743_v45 }
 0x2c6   : > { %v2065_v55 = vsub.f32 %v15227_v14, %v2064_v5  ;;  %v2075_v4 = vsub.f32 %v15232_v7, %v2074_v49  ;;  %v1871_v27 = vsel %vm1864_vm5, %v1862_v6, %v1677_v10  ;;  %v1896_v9 = vsel %vm1890_vm8, %v1887_v12, %v1771_v38 }
 0x2c7   : > { %v1898_v11 = vsel %vm1890_vm8, %v1889_v24, %v15046_v50 }
 0x2c8   : > { %v2066_v3 = vand.u32 4294901760, %v2065_v55  ;;  %v2076_v63 = vand.u32 4294901760, %v2075_v4  ;;  %v1907_v38 = vsel %vm1899_vm9, %v1898_v11, %v15056_v62 }
 0x2c9   : > { %v1709_v39 = vpop.permute.xlu1 %1708  ;;  %v1803_v51 = vpop.permute.xlu0 %1802 }
 0x2ca   : > { %13358 = vmatmul.mubr.f32.gmra.mxu0 %v2066_v3  ;;  %v1879_v17 = vsel %vm356_vm6, %v1871_v27, %v1709_v39  ;;  %v1905_v40 = vsel %vm1899_vm9, %v1896_v9, %v1803_v51  ;;  %v20000_v51 = vand.u32 4294901760, %v15084_v23  ;;  %v20001_v9 = vand.u32 4294901760, %v15112_v26 }
 0x2cb   : > { %13360 = vmatprep.mubr.f32.mxu0 %v2076_v63 }
 0x2cd   : > { %v1741_v37 = vpop.permute.xlu1 %1740  ;;  %v1835_v28 = vpop.permute.xlu0 %1834 }
 0x2ce   : > { %v1888_v36 = vsel %vm1881_vm7, %v1879_v17, %v1741_v37  ;;  %v1914_v15 = vsel %vm1908_vm10, %v1905_v40, %v1835_v28  ;;  %v20002_v17 = vand.u32 4294901760, %v15185_v29 }
 0x2cf   : > { %v1897_v45 = vsel %vm1890_vm8, %v1888_v36, %v15198_v54  ;;  %v1950_v41 = vsel %vm1933_vm11, %v1914_v15, 0 }
 0x2d0   : > { %v15273_v53 = vand.u32 4294901760, %v1950_v41  ;;  %v1906_v1 = vsel %vm1899_vm9, %v1897_v45, %v1805_v60 }
 0x2d1   : > { %v1839_v10 = vpop.permute.xlu1 %1838  ;;  %v1837_v55 = vpop.permute.xlu0 %1836 }
 0x2d2   : > { %v2083_v4 = vsub.f32 %v1950_v41, %v15273_v53  ;;  %v1916_v34 = vsel %vm1908_vm10, %v1907_v38, %v1839_v10  ;;  %v1915_v50 = vsel %vm1908_vm10, %v1906_v1, %v1837_v55  ;;  %13391 = vmatmul.mubr.f32.gmra.mxu1 %v15273_v53 }
 0x2d3   : > { %v1956_v54 = vsel %vm1933_vm11, %v1916_v34, 0  ;;  %v1953_v0 = vsel %vm1933_vm11, %v1915_v50, 0 }
 0x2d4   : > { %v15284_v46 = vand.u32 4294901760, %v1956_v54  ;;  %v15286_v60 = vand.u32 4294901760, %v1953_v0  ;;  %v2084_v3 = vand.u32 4294901760, %v2083_v4 }
 0x2d6   : > { %v2103_v62 = vsub.f32 %v1956_v54, %v15284_v46  ;;  %v2093_v63 = vsub.f32 %v1953_v0, %v15286_v60  ;;  %13393 = vmatprep.mubr.f32.mxu1 %v15286_v60  ;;  %v2085_v39 = vsub.f32 %v2083_v4, %v2084_v3 }
 0x2d7   : > { %13394 = vmatmul.mubr.f32.gmra.mxu1 %v15284_v46 }
 0x2d8   : > { %13444 = vmatprep.mubr.f32.mxu1 %v20000_v51  ;;  %v2086_v33 = vand.u32 4294901760, %v2085_v39  ;;  %v2094_v6 = vand.u32 4294901760, %v2093_v63  ;;  %v2104_v12 = vand.u32 4294901760, %v2103_v62 }
 0x2da   : > { %13361 = vmatmul.mubr.f32.gmra.mxu0 %v2086_v33  ;;  %v2095_v24 = vsub.f32 %v2093_v63, %v2094_v6  ;;  %v2105_v27 = vsub.f32 %v2103_v62, %v2104_v12 }
 0x2db   : > { %13445 = vmatmul.mubr.f32.vlgmr.msra.gmra.mxu1 %v20001_v9 }
 0x2dc   : > { %13487 = vmatpush3.msra.mxu1 %v14823_v13  ;;  %13447 = vmatprep.mubr.f32.mxu1 %v20002_v17  ;;  %v2096_v40 = vand.u32 4294901760, %v2095_v24  ;;  %v2106_v37 = vand.u32 4294901760, %v2105_v27  ;;  %v2820_v13 = vld [vmem:[%s19689_s5 + $0x18] sm:$0xff] }
 0x2dd   : > { %13488 = vmatprep.subr.mxu1 %v14837_v18 }
 0x2de   : > { %13489 = vmatpush3.msra.mxu1 %v14837_v18  ;;  %13363 = vmatprep.mubr.f32.mxu0 %v2096_v40  ;;  %v15360_v18 = vand.u32 4294901760, %v2820_v13 }
 0x2df   : > { %13490 = vmatprep.subr.mxu1 %v14853_v25  ;;  %13364 = vmatmul.mubr.f32.gmra.mxu0 %v2106_v37 }
 0x2e0   : > { %13448 = vmatmul.mubr.f32.gmra.mxu1 %v2064_v5  ;;  %13414 = vmatprep.mubr.f32.mxu0 %v15084_v23 }
 0x2e1   : > { %13491 = vmatpush3.msra.mxu1 %v14853_v25  ;;  %13450 = vmatprep.mubr.f32.mxu1 %v2074_v49  ;;  %v15367_v25 = vsub.f32 %v2820_v13, %v15360_v18 }
 0x2e2   : > { %13492 = vmatprep.subr.mxu1 %v14870_v35 }
 0x2e3   : > { %13493 = vmatpush3.msra.mxu1 %v14870_v35  ;;  %13415 = vmatmul.mubr.f32.vlgmr.msra.gmra.mxu0 %v15112_v26  ;;  %v2818_v35 = vld [vmem:[%s19689_s5 + $0x8] sm:$0xff] }
 0x2e4   : > { %13494 = vmatprep.subr.mxu1 %v14888_v44  ;;  %13451 = vmatmul.mubr.f32.gmra.mxu1 %v2084_v3 }
 0x2e5   : > { %13457 = vmatpush3.msra.mxu0 %v14848_v21  ;;  %13495 = vmatpush3.msra.mxu1 %v14888_v44  ;;  %v2819_v21 = vld [vmem:[%s19689_s5 + $0x10] sm:$0xff] }
 0x2e6   : > { %13417 = vmatprep.mubr.f32.mxu0 %v15185_v29  ;;  %13453 = vmatprep.mubr.f32.mxu1 %v2094_v6 }
 0x2e7   : > { %13458 = vmatprep.subr.mxu0 %v14865_v32  ;;  %13496 = vmatprep.subr.mxu1 %v14901_v59 }
 0x2e8   : > { %13459 = vmatpush3.msra.mxu0 %v14865_v32  ;;  %13497 = vmatpush3.msra.mxu1 %v14901_v59  ;;  %v15369_v32 = vand.u32 4294901760, %v2819_v21  ;;  %v2817_v59 = vld [vmem:[%s19689_s5] sm:$0xff] }
 0x2e9   : > { %13460 = vmatprep.subr.mxu0 %v14882_v42  ;;  %13498 = vmatprep.subr.mxu1 %v14913_v19 }
 0x2ea   : > { %13418 = vmatmul.mubr.f32.gmra.mxu0 %v15227_v14  ;;  %13454 = vmatmul.mubr.f32.gmra.mxu1 %v2104_v12  ;;  %v15379_v44 = vsub.f32 %v2819_v21, %v15369_v32 }
 0x2eb   : > { %13461 = vmatpush3.msra.mxu0 %v14882_v42  ;;  %13499 = vmatpush3.msra.mxu1 %v14913_v19  ;;  %v15376_v42 = vand.u32 4294901760, %v15367_v25 }
 0x2ec   : > { %13420 = vmatprep.mubr.f32.mxu0 %v15232_v7  ;;  %13462 = vmatprep.subr.mxu0 %v14899_v58 }
 0x2ed   : > { %13500 = vmatprep.subr.mxu1 %v14930_v48  ;;  %13504 = vmatprep.mubr.f32.mxu1 %v15079_v30  ;;  %v3029_v19 = vsub.f32 %v15367_v25, %v15376_v42 }
 0x2ee   : > { %13463 = vmatpush3.msra.mxu0 %v14899_v58  ;;  %13501 = vmatpush3.msra.mxu1 %v14930_v48  ;;  %v15382_v58 = vand.u32 4294901760, %v2818_v35 }
 0x2ef   : > { %13464 = vmatprep.subr.mxu0 %v14925_v47  ;;  %13502 = vmatprep.subr.mxu1 %v14954_v56 }
 0x2f0   : > { %13421 = vmatmul.mubr.f32.gmra.mxu0 %v2083_v4  ;;  %13503 = vmatpush3.msra.mxu1 %v14954_v56  ;;  %v15394_v48 = vsub.f32 %v2818_v35, %v15382_v58 }
 0x2f1   : > { %13465 = vmatpush3.msra.mxu0 %v14925_v47  ;;  %13423 = vmatprep.mubr.f32.mxu0 %v2093_v63  ;;  %v15391_v47 = vand.u32 4294901760, %v15379_v44  ;;  %v11876_v63 = vld [vmem:[%s19688_s4] ss:$0 sm:$0xff] }
 0x2f2   : > { %13466 = vmatprep.subr.mxu0 %v14936_v52  ;;  %13505 = vmatmul.mubr.f32.vlgmr.msra.gmra.mxu1 %v15107_v20 }
 0x2f3   : > { %13467 = vmatpush3.msra.mxu0 %v14936_v52  ;;  %13507 = vmatprep.mubr.f32.mxu1 %v15177_v16  ;;  %v15396_v52 = vand.u32 4294901760, %v2817_v59  ;;  %v3036_v56 = vsub.f32 %v15379_v44, %v15391_v47 }
 0x2f4   : > { %13468 = vmatprep.subr.mxu0 %v14949_v57  ;;  %13424 = vmatmul.mubr.f32.gmra.mxu0 %v2103_v62 }
 0x2f5   : > { %13469 = vmatpush3.msra.mxu0 %v14949_v57  ;;  %13474 = vmatprep.mubr.f32.mxu0 %v15079_v30  ;;  %v3030_v57 = vand.u32 4294901760, %v3029_v19  ;;  %v3037_v30 = vand.u32 4294901760, %v3036_v56 }
 0x2f6   : > { %13470 = vmatprep.subr.mxu0 %v14960_v61  ;;  %13508 = vmatmul.mubr.f32.gmra.mxu1 %v15220_v43 }
 0x2f7   : > { %13471 = vmatpush3.msra.mxu0 %v14960_v61  ;;  %13510 = vmatprep.mubr.f32.mxu1 %v15222_v22  ;;  %v15403_v61 = vand.u32 4294901760, %v15394_v48 }
 0x2f8   : > { %13472 = vmatprep.subr.mxu0 %v14976_v2  ;;  %13536 = vmatprep.subr.mxu1 %v3030_v57 }
 0x2f9   : > { %13473 = vmatpush3.msra.mxu0 %v14976_v2  ;;  %v15406_v2 = vsub.f32 %v2817_v59, %v15396_v52  ;;  %v3043_v23 = vsub.f32 %v15394_v48, %v15403_v61  ;;  %13537 = vmatpush3.msra.mxu1 %v3030_v57 }
 0x2fa   : > { %13475 = vmatmul.mubr.f32.vlgmr.msra.gmra.mxu0 %v15107_v20  ;;  %13511 = vmatmul.mubr.f32.gmra.mxu1 %v15273_v53 }
 0x2fb   : > { %13477 = vmatprep.mubr.f32.mxu0 %v15177_v16  ;;  %13513 = vmatprep.mubr.f32.mxu1 %v15286_v60  ;;  %v15413_v20 = vand.u32 4294901760, %v15406_v2  ;;  %v3044_v26 = vand.u32 4294901760, %v3043_v23 }
 0x2fc   : > { %13516 = vmatprep.subr.mxu0 %v15360_v18  ;;  %13538 = vmatprep.subr.mxu1 %v3037_v30 }
 0x2fd   : > { %13517 = vmatpush3.msra.mxu0 %v15360_v18  ;;  %20003 = vst [vmem:[#allocation13_spill] sm:$0xff] %v15413_v20  ;;  %v3050_v16 = vsub.f32 %v15406_v2, %v15413_v20  ;;  %13539 = vmatpush3.msra.mxu1 %v3037_v30 }
 0x2fe   : > { %13478 = vmatmul.mubr.f32.gmra.mxu0 %v15220_v43  ;;  %13514 = vmatmul.mubr.f32.gmra.mxu1 %v15284_v46 }
 0x2ff   : > { %13480 = vmatprep.mubr.f32.mxu0 %v15222_v22  ;;  %13518 = vmatprep.subr.mxu0 %v15369_v32  ;;  %v3051_v29 = vand.u32 4294901760, %v3050_v16 }
 0x300   : > { %13519 = vmatpush3.msra.mxu0 %v15369_v32  ;;  %13540 = vmatprep.subr.mxu1 %v3044_v26 }
 0x301   : > { %13520 = vmatprep.subr.mxu0 %v15382_v58  ;;  %13541 = vmatpush3.msra.mxu1 %v3044_v26 }
 0x302   : > { %13481 = vmatmul.mubr.f32.gmra.mxu0 %v15273_v53  ;;  %13542 = vmatprep.subr.mxu1 %v3051_v29 }
 0x303   : > { %13483 = vmatprep.mubr.f32.mxu0 %v15286_v60  ;;  %13521 = vmatpush3.msra.mxu0 %v15382_v58 }
 0x304   : > { %13522 = vmatprep.subr.mxu0 %v15396_v52  ;;  %13543 = vmatpush3.msra.mxu1 %v3051_v29 }
 0x305   : > { %13523 = vmatpush3.msra.mxu0 %v15396_v52  ;;  %13576 = vmatprep.subr.mxu1 %v15360_v18 }
 0x306   : > { %13484 = vmatmul.mubr.f32.gmra.mxu0 %v15284_v46  ;;  %13556 = vmatprep.subr.mxu0 %v15367_v25 }
 0x34a   : > { %v13386_v43 = vpop.f32.mrf.mxu1 }
 0x34c   : > { %v2224_v22 = vpop.f32.mrf.mxu1 }
 0x352   : > { %v13356_v7 = vpop.f32.mrf.mxu0 }
 0x353   : > { %v2049_v33 = vadd.f32 %v13356_v7, %v11876_v63 }
 0x354   : > { %v2038_v49 = vpop.f32.mrf.mxu0 }
 0x355   : > { %v2039_v12 = vadd.f32 %v11876_v63, %v2038_v49  ;;  %v2231_v17 = vadd.f32 %v13386_v43, %v2049_v33 }
 0x357   : > { %v2225_v35 = vadd.f32 %v2224_v22, %v2039_v12 }
 0x382   : > { %v13389_v14 = vpop.f32.mrf.mxu1 }
 0x384   : > { %v2236_v5 = vpop.f32.mrf.mxu1 }
 0x38a   : > { %v13359_v36 = vpop.f32.mrf.mxu0 }
 0x38b   : > { %v2069_v9 = vadd.f32 %v13359_v36, %v11876_v63 }
 0x38c   : > { %v2058_v45 = vpop.f32.mrf.mxu0 }
 0x38d   : > { %v2059_v13 = vadd.f32 %v11876_v63, %v2058_v45  ;;  %v2243_v30 = vadd.f32 %v13389_v14, %v2069_v9 }
 0x38f   : > { %v2237_v16 = vadd.f32 %v2236_v5, %v2059_v13 }
 0x392   : > { %v13392_v28 = vpop.f32.mrf.mxu1 }
 0x394   : > { %v2248_v15 = vpop.f32.mrf.mxu1 }
 0x397   : > { %v13395_v11 = vpop.f32.mrf.mxu1 }
 0x399   : > { %v2260_v41 = vpop.f32.mrf.mxu1 }
 0x39a   : > { %v13362_v53 = vpop.f32.mrf.mxu0 }
 0x39b   : > { %v13446_v1 = vpop.f32.mrf.mxu1  ;;  %v2089_v59 = vadd.f32 %v13362_v53, %v11876_v63 }
 0x39c   : > { %v2078_v10 = vpop.f32.mrf.mxu0 }
 0x39d   : > { %v2487_v38 = vpop.f32.mrf.mxu1  ;;  %v2079_v23 = vadd.f32 %v11876_v63, %v2078_v10  ;;  %v2255_v49 = vadd.f32 %v13392_v28, %v2089_v59 }
 0x39f   : > { %v13365_v55 = vpop.f32.mrf.mxu0 }
 0x3a0   : > { %v13449_v4 = vpop.f32.mrf.mxu1  ;;  %v2109_v7 = vadd.f32 %v13365_v55, %v11876_v63 }
 0x3a1   : > { %v2098_v34 = vpop.f32.mrf.mxu0 }
 0x3a2   : > { %v2503_v50 = vpop.f32.mrf.mxu1  ;;  %v2099_v20 = vadd.f32 %v11876_v63, %v2098_v34  ;;  %v2267_v14 = vadd.f32 %v13395_v11, %v2109_v7 }
 0x3a3   : > { %v13416_v54 = vpop.f32.mrf.mxu0 }
 0x3a4   : > { %v13452_v0 = vpop.f32.mrf.mxu1  ;;  %v2364_v21 = vadd.f32 %v13416_v54, %v2231_v17  ;;  %v2249_v54 = vadd.f32 %v2248_v15, %v2079_v23  ;;  %v2261_v13 = vadd.f32 %v2260_v41, %v2099_v20 }
 0x3a5   : > { %v2356_v46 = vpop.f32.mrf.mxu0 }
 0x3a6   : > { %v2519_v60 = vpop.f32.mrf.mxu1  ;;  %v2357_v56 = vadd.f32 %v2356_v46, %v2225_v35  ;;  %v2496_v29 = vadd.f32 %v13446_v1, %v2364_v21 }
 0x3a8   : > { %v2488_v33 = vadd.f32 %v2487_v38, %v2357_v56 }
 0x3aa   : > { %v13419_v3 = vpop.f32.mrf.mxu0  ;;  %v15419_v62 = vpop.f32.mrf.mxu1 }
 0x3ab   : > { %v2378_v26 = vadd.f32 %v13419_v3, %v2243_v30 }
 0x3ac   : > { %v2370_v39 = vpop.f32.mrf.mxu0  ;;  %v15424_v51 = vpop.f32.mrf.mxu1 }
 0x3ad   : > { %v2371_v36 = vadd.f32 %v2370_v39, %v2237_v16  ;;  %v2512_v17 = vadd.f32 %v13449_v4, %v2378_v26 }
 0x3af   : > { %v2504_v28 = vadd.f32 %v2503_v50, %v2371_v36 }
 0x3b0   : > { %v13422_v6 = vpop.f32.mrf.mxu0 }
 0x3b1   : > { %v2392_v45 = vadd.f32 %v13422_v6, %v2255_v49 }
 0x3b2   : > { %v13506_v24 = vpop.f32.mrf.mxu1  ;;  %v2384_v27 = vpop.f32.mrf.mxu0 }
 0x3b3   : > { %v2385_v46 = vadd.f32 %v2384_v27, %v2249_v54 }
 0x3b4   : > { %v2763_v40 = vpop.f32.mrf.mxu1  ;;  %v13425_v37 = vpop.f32.mrf.mxu0 }
 0x3b5   : > { %v2406_v9 = vadd.f32 %v13425_v37, %v2267_v14  ;;  %v2520_v27 = vadd.f32 %v2519_v60, %v2385_v46 }
 0x3b6   : > { %v13509_v19 = vpop.f32.mrf.mxu1  ;;  %v2398_v57 = vpop.f32.mrf.mxu0 }
 0x3b7   : > { %v2399_v6 = vadd.f32 %v2398_v57, %v2261_v13  ;;  %v2544_v37 = vadd.f32 %v15419_v62, %v2406_v9 }
 0x3b8   : > { %v2775_v8 = vpop.f32.mrf.mxu1 }
 0x3b9   : > { %v2536_v16 = vadd.f32 %v15424_v51, %v2399_v6 }
 0x3ba   : > { %v13476_v31 = vpop.f32.mrf.mxu0  ;;  %v13512_v10 = vpop.f32.mrf.mxu1 }
 0x3bb   : > { %v2648_v43 = vadd.f32 %v13476_v31, %v2496_v29  ;;  %v2528_v31 = vadd.f32 %v13452_v0, %v2392_v45 }
 0x3bc   : > { %v2641_v22 = vpop.f32.mrf.mxu0  ;;  %v2787_v4 = vpop.f32.mrf.mxu1 }
 0x3bd   : > { %v2770_v53 = vadd.f32 %v13506_v24, %v2648_v43  ;;  %v2642_v12 = vadd.f32 %v2641_v22, %v2488_v33 }
 0x3be   : > { %v13479_v3 = vpop.f32.mrf.mxu0  ;;  %v13515_v23 = vpop.f32.mrf.mxu1 }
 0x3bf   : > { %v2810_v5 = vmax.f32 %v2770_v53, 0.0  ;;  %v2764_v1 = vadd.f32 %v2763_v40, %v2642_v12  ;;  %v2660_v55 = vadd.f32 %v13479_v3, %v2512_v17 }
 0x3c0   : > { %v2653_v39 = vpop.f32.mrf.mxu0  ;;  %v2799_v46 = vpop.f32.mrf.mxu1 }
 0x3c1   : > { %v2832_v38 = vsel %vm356_vm6, %v2810_v5, 0  ;;  %v2809_v34 = vmax.f32 %v2764_v1, 0.0  ;;  %v2782_v15 = vadd.f32 %v13509_v19, %v2660_v55  ;;  %v2654_v63 = vadd.f32 %v2653_v39, %v2504_v28 }
 0x3c2   : > { %v15427_v24 = vand.u32 4294901760, %v2832_v38  ;;  %v13482_v11 = vpop.f32.mrf.mxu0 }
 0x3c3   : > { %v2829_v21 = vsel %vm356_vm6, %v2809_v34, 0  ;;  %v2812_v40 = vmax.f32 %v2782_v15, 0.0  ;;  %v2776_v35 = vadd.f32 %v2775_v8, %v2654_v63  ;;  %v2672_v50 = vadd.f32 %v13482_v11, %v2528_v31 }
 0x3c4   : > { %v15431_v20 = vsub.f32 %v2832_v38, %v15427_v24  ;;  %v15433_v41 = vand.u32 4294901760, %v2829_v21  ;;  %v2665_v0 = vpop.f32.mrf.mxu0 }
 0x3c5   : > { %v2838_v59 = vsel %vm356_vm6, %v2812_v40, 0  ;;  %v2811_v19 = vmax.f32 %v2776_v35, 0.0  ;;  %v2794_v57 = vadd.f32 %v13512_v10, %v2672_v50  ;;  %v2666_v56 = vadd.f32 %v2665_v0, %v2520_v27 }
 0x3c6   : > { %v2933_v60 = vand.u32 4294901760, %v15431_v20  ;;  %v15439_v30 = vsub.f32 %v2829_v21, %v15433_v41  ;;  %v15441_v8 = vand.u32 4294901760, %v2838_v59  ;;  %v13485_v26 = vpop.f32.mrf.mxu0  ;;  %13544 = vmatprep.mubr.f32.mxu1 %v15433_v41 }
 0x3c7   : > { %v2835_v62 = vsel %vm356_vm6, %v2811_v19, 0  ;;  %v2814_v29 = vmax.f32 %v2794_v57, 0.0  ;;  %v2788_v7 = vadd.f32 %v2787_v4, %v2666_v56  ;;  %v2684_v49 = vadd.f32 %v13485_v26, %v2544_v37  ;;  %13545 = vmatmul.mubr.f32.vlgmr.msra.gmra.mxu1 %v15427_v24 }
 0x3c8   : > { %v2934_v36 = vsub.f32 %v15431_v20, %v2933_v60  ;;  %v15451_v43 = vsub.f32 %v2838_v59, %v15441_v8  ;;  %v15453_v33 = vand.u32 4294901760, %v2835_v62  ;;  %v2677_v45 = vpop.f32.mrf.mxu0  ;;  %v2923_v54 = vand.u32 4294901760, %v15439_v30  ;;  %13577 = vmatpush3.msra.mxu1 %v15360_v18 }
 0x3c9   : > { %v2844_v51 = vsel %vm356_vm6, %v2814_v29, 0  ;;  %v2813_v22 = vmax.f32 %v2788_v7, 0.0  ;;  %v2806_v53 = vadd.f32 %v13515_v23, %v2684_v49  ;;  %v2678_v12 = vadd.f32 %v2677_v45, %v2536_v16  ;;  %13578 = vmatprep.subr.mxu1 %v15369_v32 }
 0x3ca   : > { %v15460_v17 = vsub.f32 %v2835_v62, %v15453_v33  ;;  %v15462_v14 = vand.u32 4294901760, %v2844_v51  ;;  %13547 = vmatprep.mubr.f32.mxu1 %v15453_v33  ;;  %v2924_v10 = vsub.f32 %v15439_v30, %v2923_v54  ;;  %13579 = vmatpush3.msra.mxu1 %v15369_v32  ;;  %v2953_v55 = vand.u32 4294901760, %v15451_v43 }
 0x3cb   : > { %v2841_v3 = vsel %vm356_vm6, %v2813_v22, 0  ;;  %v2816_v5 = vmax.f32 %v2806_v53, 0.0  ;;  %v2800_v1 = vadd.f32 %v2799_v46, %v2678_v12  ;;  %13548 = vmatmul.mubr.f32.gmra.mxu1 %v15441_v8  ;;  %13580 = vmatprep.subr.mxu1 %v15382_v58  ;;  %v2935_v31 = vand.u32 4294901760, %v2934_v36  ;;  %v4000_v12 = vld [vmem:[%s19691_s7 + $0xf8] sm:$0xff] }
 0x3cc   : > { %v15472_v28 = vsub.f32 %v2844_v51, %v15462_v14  ;;  %v15474_v9 = vand.u32 4294901760, %v2841_v3  ;;  %v2925_v13 = vand.u32 4294901760, %v2924_v10  ;;  %v2943_v39 = vand.u32 4294901760, %v15460_v17  ;;  %13581 = vmatpush3.msra.mxu1 %v15382_v58 }
 0x3cd   : > { %v2850_v38 = vsel %vm356_vm6, %v2816_v5, 0  ;;  %v2815_v34 = vmax.f32 %v2800_v1, 0.0  ;;  %v2954_v15 = vsub.f32 %v15451_v43, %v2953_v55  ;;  %13582 = vmatprep.subr.mxu1 %v15396_v52  ;;  %v15590_v10 = vand.u32 4294901760, %v4000_v12  ;;  %v3999_v5 = vld [vmem:[%s19691_s7 + $0xf0] sm:$0xff] }
 0x3ce   : > { %v2962_v63 = vsub.f32 %v2841_v3, %v15474_v9  ;;  %v15482_v6 = vand.u32 4294901760, %v2850_v38  ;;  %13524 = vmatprep.mubr.f32.mxu0 %v2925_v13  ;;  %13550 = vmatprep.mubr.f32.mxu1 %v15474_v9  ;;  %v2944_v4 = vsub.f32 %v15460_v17, %v2943_v39  ;;  %v2973_v11 = vand.u32 4294901760, %v15472_v28  ;;  %v3984_v3 = vld [vmem:[%s19691_s7 + $0x78] sm:$0xff]  ;;  %v3983_v1 = vld [vmem:[%s19691_s7 + $0x70] sm:$0xff] }
 0x3cf   : > { %v2847_v27 = vsel %vm356_vm6, %v2815_v34, 0  ;;  %13525 = vmatmul.mubr.f32.vlgmr.msra.gmra.mxu0 %v2935_v31  ;;  %13551 = vmatmul.mubr.f32.gmra.mxu1 %v15462_v14  ;;  %v2955_v0 = vand.u32 4294901760, %v2954_v15  ;;  %v15605_v13 = vand.u32 4294901760, %v3984_v3  ;;  %v15609_v31 = vand.u32 4294901760, %v3983_v1  ;;  %v3982_v34 = vld [vmem:[%s19691_s7 + $0x68] sm:$0xff] }
 0x3d0   : > { %v15490_v21 = vsub.f32 %v2850_v38, %v15482_v6  ;;  %v15492_v40 = vand.u32 4294901760, %v2847_v27  ;;  %13557 = vmatpush3.msra.mxu0 %v15367_v25  ;;  %v2945_v35 = vand.u32 4294901760, %v2944_v4  ;;  %v2963_v50 = vand.u32 4294901760, %v2962_v63  ;;  %13583 = vmatpush3.msra.mxu1 %v15396_v52  ;;  %v3998_v38 = vld [vmem:[%s19691_s7 + $0xe8] sm:$0xff] }
 0x3d1   : > { %13558 = vmatprep.subr.mxu0 %v15379_v44  ;;  %v2974_v37 = vsub.f32 %v15472_v28, %v2973_v11  ;;  %13616 = vmatprep.subr.mxu1 %v15360_v18  ;;  %v15622_v4 = vand.u32 4294901760, %v3998_v38 }
 0x3d2   : > { %v2982_v59 = vsub.f32 %v2847_v27, %v15492_v40  ;;  %13527 = vmatprep.mubr.f32.mxu0 %v2945_v35  ;;  %13553 = vmatprep.mubr.f32.mxu1 %v15492_v40  ;;  %v2964_v19 = vsub.f32 %v2962_v63, %v2963_v50  ;;  %v2993_v57 = vand.u32 4294901760, %v15490_v21  ;;  %v15634_v35 = vsub.f32 %v3983_v1, %v15609_v31 }
 0x3d3   : > { %13528 = vmatmul.mubr.f32.gmra.mxu0 %v2955_v0  ;;  %13554 = vmatmul.mubr.f32.gmra.mxu1 %v15482_v6  ;;  %v2975_v23 = vand.u32 4294901760, %v2974_v37 }
 0x3d4   : > { %13559 = vmatpush3.msra.mxu0 %v15379_v44  ;;  %13584 = vmatprep.mubr.f32.mxu1 %v2923_v54  ;;  %v2965_v25 = vand.u32 4294901760, %v2964_v19  ;;  %v2983_v56 = vand.u32 4294901760, %v2982_v59  ;;  %v2994_v26 = vsub.f32 %v15490_v21, %v2993_v57  ;;  %v15641_v19 = vsub.f32 %v3998_v38, %v15622_v4 }
 0x3d5   : > { %13560 = vmatprep.subr.mxu0 %v15394_v48 }
 0x3d6   : > { %13530 = vmatprep.mubr.f32.mxu0 %v2965_v25  ;;  %13561 = vmatpush3.msra.mxu0 %v15394_v48  ;;  %v2984_v16 = vsub.f32 %v2982_v59, %v2983_v56  ;;  %v2995_v44 = vand.u32 4294901760, %v2994_v26  ;;  %v19727_v26 = vand.u32 4294901760, %v15634_v35 }
 0x3d7   : > { %13531 = vmatmul.mubr.f32.gmra.mxu0 %v2975_v23  ;;  %13585 = vmatmul.mubr.f32.vlgmr.msra.gmra.mxu1 %v2933_v60  ;;  %v11877_v60 = vld [vmem:[%s19690_s6] ss:$0 sm:$0xff] }
 0x3d8   : > { %13587 = vmatprep.mubr.f32.mxu1 %v2943_v39  ;;  %v2985_v62 = vand.u32 4294901760, %v2984_v16  ;;  %13562 = vmatprep.subr.mxu0 %v15406_v2  ;;  %v15607_v39 = vand.u32 4294901760, %v3999_v5 }
 0x3d9   : > { %13563 = vmatpush3.msra.mxu0 %v15406_v2  ;;  %13617 = vmatpush3.msra.mxu1 %v15360_v18  ;;  %v20004_v18 = vld [vmem:[#allocation13_spill] sm:$0xff] }
 0x3da   : > { %13533 = vmatprep.mubr.f32.mxu0 %v2985_v62  ;;  %13596 = vmatprep.subr.mxu0 %v15376_v42  ;;  %20005 = vst [vmem:[#allocation13_spill] sm:$0xff] %v15590_v10 }
 0x3db   : > { %13534 = vmatmul.mubr.f32.gmra.mxu0 %v2995_v44  ;;  %13588 = vmatmul.mubr.f32.gmra.mxu1 %v2953_v55 }
 0x3dc   : > { %13564 = vmatprep.mubr.f32.mxu0 %v15439_v30  ;;  %13590 = vmatprep.mubr.f32.mxu1 %v2963_v50  ;;  %v15636_v50 = vand.u32 4294901760, %v3982_v34 }
 0x3dd   : > { %13618 = vmatprep.subr.mxu1 %v15369_v32 }
 0x3de   : > { %13619 = vmatpush3.msra.mxu1 %v15369_v32  ;;  %v14379_v32 = vmov 1.0   ;;  %v15650_v16 = vsub.f32 %v3982_v34, %v15636_v50 }
 0x3df   : > { %13565 = vmatmul.mubr.f32.vlgmr.msra.gmra.mxu0 %v15431_v20  ;;  %13591 = vmatmul.mubr.f32.gmra.mxu1 %v2973_v11  ;;  %357 = vst.msk [vmem:[#allocation4] sm:$0xff] %vm356_vm6, %v14379_v32  ;;  %361 = vst.msk [vmem:[#allocation4 + $0x90] sm:$0xff] %vm356_vm6, %v14379_v32 }
 0x3e0   : > { %13597 = vmatpush3.msra.mxu0 %v15376_v42  ;;  %13567 = vmatprep.mubr.f32.mxu0 %v15460_v17  ;;  %359 = vst.msk [vmem:[#allocation4 + $0x8] sm:$0x3] %vm358_vm12, %v14379_v32  ;;  %362 = vst.msk [vmem:[#allocation4 + $0x98] sm:$0x3] %vm358_vm12, %v14379_v32 }
 0x3e1   : > { %13593 = vmatprep.mubr.f32.mxu1 %v2983_v56  ;;  %13598 = vmatprep.subr.mxu0 %v15391_v47  ;;  %374 = vst.msk [vmem:[#allocation4 + $0x9] sm:$0x1] %vm363_vm13, %v14379_v32  ;;  %364 = vst.msk [vmem:[#allocation4] sm:$0x1] %vm363_vm13, %v14379_v32 }
 0x3e2   : > { %13599 = vmatpush3.msra.mxu0 %v15391_v47  ;;  %13620 = vmatprep.subr.mxu1 %v15382_v58  ;;  %365 = vst.msk [vmem:[#allocation4 + $0x10] sm:$0x1] %vm363_vm13, %v14379_v32  ;;  %366 = vst.msk [vmem:[#allocation4 + $0x20] sm:$0x1] %vm363_vm13, %v14379_v32 }
 0x3e3   : > { %13568 = vmatmul.mubr.f32.gmra.mxu0 %v15451_v43  ;;  %13594 = vmatmul.mubr.f32.gmra.mxu1 %v2993_v57  ;;  %367 = vst.msk [vmem:[#allocation4 + $0x30] sm:$0x1] %vm363_vm13, %v14379_v32  ;;  %368 = vst.msk [vmem:[#allocation4 + $0x40] sm:$0x1] %vm363_vm13, %v14379_v32 }
 0x3e4   : > { %13570 = vmatprep.mubr.f32.mxu0 %v2962_v63  ;;  %13621 = vmatpush3.msra.mxu1 %v15382_v58  ;;  %369 = vst.msk [vmem:[#allocation4 + $0x50] sm:$0x1] %vm363_vm13, %v14379_v32  ;;  %370 = vst.msk [vmem:[#allocation4 + $0x60] sm:$0x1] %vm363_vm13, %v14379_v32 }
 0x3e5   : > { %13624 = vmatprep.mubr.f32.mxu1 %v15433_v41  ;;  %13622 = vmatprep.subr.mxu1 %v15396_v52  ;;  %371 = vst.msk [vmem:[#allocation4 + $0x70] sm:$0x1] %vm363_vm13, %v14379_v32  ;;  %372 = vst.msk [vmem:[#allocation4 + $0x80] sm:$0x1] %vm363_vm13, %v14379_v32 }
 0x3e6   : > { %13600 = vmatprep.subr.mxu0 %v15403_v61  ;;  %13623 = vmatpush3.msra.mxu1 %v15396_v52  ;;  %373 = vst.msk [vmem:[#allocation4 + $0x90] sm:$0x1] %vm363_vm13, %v14379_v32  ;;  %375 = vst.msk [vmem:[#allocation4 + $0x19] sm:$0x1] %vm363_vm13, %v14379_v32 }
 0x3e7   : > { %13571 = vmatmul.mubr.f32.gmra.mxu0 %v15472_v28  ;;  %13625 = vmatmul.mubr.f32.vlgmr.msra.gmra.mxu1 %v15427_v24  ;;  %376 = vst.msk [vmem:[#allocation4 + $0x29] sm:$0x1] %vm363_vm13, %v14379_v32  ;;  %377 = vst.msk [vmem:[#allocation4 + $0x39] sm:$0x1] %vm363_vm13, %v14379_v32  ;;  %v3663_v42 = vld [vmem:[#allocation4 + $0x1] sm:$0xff] }
 0x3e8   : > { %13601 = vmatpush3.msra.mxu0 %v15403_v61  ;;  %13573 = vmatprep.mubr.f32.mxu0 %v2982_v59  ;;  %378 = vst.msk [vmem:[#allocation4 + $0x49] sm:$0x1] %vm363_vm13, %v14379_v32  ;;  %379 = vst.msk [vmem:[#allocation4 + $0x59] sm:$0x1] %vm363_vm13, %v14379_v32  ;;  %v3671_v58 = vld [vmem:[#allocation4 + $0x2] sm:$0xff] }
 0x3e9   : > { %13627 = vmatprep.mubr.f32.mxu1 %v15453_v33  ;;  %13602 = vmatprep.subr.mxu0 %v20004_v18  ;;  %380 = vst.msk [vmem:[#allocation4 + $0x69] sm:$0x1] %vm363_vm13, %v14379_v32  ;;  %381 = vst.msk [vmem:[#allocation4 + $0x79] sm:$0x1] %vm363_vm13, %v14379_v32 }
 0x3ea   : > { %13603 = vmatpush3.msra.mxu0 %v20004_v18  ;;  %382 = vst.msk [vmem:[#allocation4 + $0x89] sm:$0x1] %vm363_vm13, %v14379_v32  ;;  %383 = vst.msk [vmem:[#allocation4 + $0x99] sm:$0x1] %vm363_vm13, %v14379_v32  ;;  %3736 = vrot.lane.b32.xlu1 %v3663_v42, %s14371_s21  ;;  %v19726_v32 = vand.u32 4294901760, %v15641_v19 }
 0x3eb   : > { %13574 = vmatmul.mubr.f32.gmra.mxu0 %v15490_v21  ;;  %13628 = vmatmul.mubr.f32.gmra.mxu1 %v15441_v8  ;;  %v15628_v21 = vsub.f32 %v3984_v3, %v15605_v13 }
 0x3ec   : > { %13604 = vmatprep.mubr.f32.mxu0 %v15433_v41  ;;  %13630 = vmatprep.mubr.f32.mxu1 %v15474_v9 }
 0x3ed   : > { %12190 = vmatprep.subr.mxu0 %v15590_v10  ;;  %v19729_v56 = vand.u32 4294901760, %v15628_v21 }
 0x3ee   : > { %3768 = vrot.lane.b32.xlu1 %v3671_v58, %s14369_s17 }
 0x3ef   : > { %13605 = vmatmul.mubr.f32.vlgmr.msra.gmra.mxu0 %v15427_v24  ;;  %13631 = vmatmul.mubr.f32.gmra.mxu1 %v15462_v14 }
 0x3f0   : > { %13607 = vmatprep.mubr.f32.mxu0 %v15453_v33  ;;  %13633 = vmatprep.mubr.f32.mxu1 %v15492_v40 }
 0x3f1   : > { %12191 = vmatpush3.msra.mxu0 %v15605_v13 }
 0x3f2   : > { %12192 = vmatprep.subr.mxu0 %v15607_v39 }
 0x3f3   : > { %13608 = vmatmul.mubr.f32.gmra.mxu0 %v15441_v8  ;;  %13634 = vmatmul.mubr.f32.gmra.mxu1 %v15482_v6 }
 0x3f4   : > { %13610 = vmatprep.mubr.f32.mxu0 %v15474_v9  ;;  %12193 = vmatpush3.msra.mxu0 %v15609_v31 }
 0x3f5   : > { %12194 = vmatprep.subr.mxu0 %v15622_v4 }
 0x3f6   : > { %12195 = vmatpush3.msra.mxu0 %v15636_v50 }
 0x3f7   : > { %13611 = vmatmul.mubr.f32.gmra.mxu0 %v15462_v14 }
 0x3f8   : > { %13613 = vmatprep.mubr.f32.mxu0 %v15492_v40  ;;  %v15631_v40 = vsub.f32 %v3999_v5, %v15607_v39  ;;  %v3979_v5 = vld [vmem:[%s19691_s7 + $0x50] sm:$0xff] }
 0x3fa   : > { %v19728_v23 = vand.u32 4294901760, %v15631_v40 }
 0x3fb   : > { %13614 = vmatmul.mubr.f32.gmra.mxu0 %v15482_v6  ;;  %v15620_v6 = vsub.f32 %v4000_v12, %v15590_v10 }
 0x3fd   : > { %20006 = vst [vmem:[#allocation14_spill] sm:$0xff] %v15620_v6  ;;  %v19732_v59 = vand.u32 4294901760, %v15620_v6 }
 0x3ff   : > { %v4369_v18 = vsub.f32 %v15620_v6, %v19732_v59 }
 0x487   : > { %v13546_v47 = vpop.f32.mrf.mxu1 }
 0x489   : > { %v3088_v48 = vpop.f32.mrf.mxu1 }
 0x48b   : > { %v13549_v52 = vpop.f32.mrf.mxu1 }
 0x48d   : > { %v3100_v61 = vpop.f32.mrf.mxu1 }
 0x48f   : > { %v13526_v2 = vpop.f32.mrf.mxu0  ;;  %v13552_v24 = vpop.f32.mrf.mxu1 }
 0x490   : > { %v2938_v49 = vadd.f32 %v13526_v2, %v11877_v60  ;;  %v3997_v2 = vld [vmem:[%s19691_s7 + $0xe0] sm:$0xff] }
 0x491   : > { %v2927_v20 = vpop.f32.mrf.mxu0  ;;  %v3112_v41 = vpop.f32.mrf.mxu1  ;;  %v15706_v3 = vand.u32 4294901760, %v3997_v2 }
 0x492   : > { %v2928_v36 = vadd.f32 %v11877_v60, %v2927_v20  ;;  %v3095_v17 = vadd.f32 %v13546_v47, %v2938_v49  ;;  %v4257_v47 = vsub.f32 %v15628_v21, %v19729_v56 }
 0x493   : > { %v13529_v30 = vpop.f32.mrf.mxu0  ;;  %v15575_v8 = vpop.f32.mrf.mxu1  ;;  %12196 = vmatprep.subr.mxu0 %v15706_v3 }
 0x494   : > { %v2958_v43 = vadd.f32 %v13529_v30, %v11877_v60  ;;  %v15586_v46 = vadd.f32 %v3088_v48, %v2928_v36  ;;  %v4376_v48 = vsub.f32 %v15631_v40, %v19728_v23  ;;  %v3981_v30 = vld [vmem:[%s19691_s7 + $0x60] sm:$0xff]  ;;  %v4258_v36 = vand.u32 4294901760, %v4257_v47 }
 0x495   : > { %v2947_v29 = vpop.f32.mrf.mxu0  ;;  %v15577_v7 = vpop.f32.mrf.mxu1  ;;  %v15713_v34 = vand.u32 4294901760, %v3981_v30 }
 0x496   : > { %v2948_v33 = vadd.f32 %v11877_v60, %v2947_v29  ;;  %v15588_v14 = vadd.f32 %v13549_v52, %v2958_v43  ;;  %v4264_v52 = vsub.f32 %v15634_v35, %v19727_v26  ;;  %v3996_v29 = vld [vmem:[%s19691_s7 + $0xd8] sm:$0xff]  ;;  %v4377_v43 = vand.u32 4294901760, %v4376_v48 }
 0x497   : > { %v13532_v45 = vpop.f32.mrf.mxu0  ;;  %v15579_v54 = vpop.f32.mrf.mxu1  ;;  %12197 = vmatpush3.msra.mxu0 %v15713_v34 }
 0x498   : > { %v2978_v51 = vadd.f32 %v13532_v45, %v11877_v60  ;;  %v15603_v9 = vadd.f32 %v3100_v61, %v2948_v33  ;;  %v19722_v61 = vand.u32 4294901760, %v15650_v16  ;;  %v4265_v33 = vand.u32 4294901760, %v4264_v52 }
 0x499   : > { %v2967_v22 = vpop.f32.mrf.mxu0  ;;  %v15581_v53 = vpop.f32.mrf.mxu1 }
 0x49a   : > { %v2968_v15 = vadd.f32 %v11877_v60, %v2967_v22  ;;  %v15617_v63 = vadd.f32 %v13552_v24, %v2978_v51  ;;  %v4271_v45 = vsub.f32 %v15650_v16, %v19722_v61  ;;  %v3995_v51 = vld [vmem:[%s19691_s7 + $0xd0] sm:$0xff] }
 0x49b   : > { %v13535_v55 = vpop.f32.mrf.mxu0  ;;  %v15601_v28 = vpop.f32.mrf.mxu1 }
 0x49c   : > { %v2998_v0 = vadd.f32 %v13535_v55, %v11877_v60  ;;  %v15653_v44 = vadd.f32 %v3112_v41, %v2968_v15  ;;  %v4370_v41 = vand.u32 4294901760, %v4369_v18  ;;  %v4272_v38 = vand.u32 4294901760, %v4271_v45 }
 0x49d   : > { %v2987_v11 = vpop.f32.mrf.mxu0  ;;  %v15625_v27 = vpop.f32.mrf.mxu1  ;;  %v15715_v15 = vand.u32 4294901760, %v3996_v29  ;;  %v15730_v18 = vsub.f32 %v3981_v30, %v15713_v34 }
 0x49e   : > { %v2988_v37 = vadd.f32 %v11877_v60, %v2987_v11  ;;  %v15677_v24 = vadd.f32 %v15575_v8, %v2998_v0  ;;  %v4383_v60 = vsub.f32 %v15641_v19, %v19726_v32  ;;  %v3980_v8 = vld [vmem:[%s19691_s7 + $0x58] sm:$0xff]  ;;  %12246 = vmatprep.subr.mxu1 %v4370_v41  ;;  %v15722_v0 = vsub.f32 %v3997_v2, %v15706_v3 }
 0x49f   : > { %v13566_v57 = vpop.f32.mrf.mxu0  ;;  %v15644_v25 = vpop.f32.mrf.mxu1  ;;  %12247 = vmatpush3.msra.mxu1 %v4258_v36  ;;  %12198 = vmatprep.subr.mxu0 %v15715_v15  ;;  %v19719_v30 = vand.u32 4294901760, %v15730_v18 }
 0x4a0   : > { %v3218_v62 = vadd.f32 %v13566_v57, %v3095_v17  ;;  %v15680_v20 = vadd.f32 %v15577_v7, %v2988_v37  ;;  %v4384_v17 = vand.u32 4294901760, %v4383_v60  ;;  %12248 = vmatprep.subr.mxu1 %v4377_v43  ;;  %v15724_v37 = vand.u32 4294901760, %v3995_v51 }
 0x4a1   : > { %v3210_v42 = vpop.f32.mrf.mxu0  ;;  %v15660_v58 = vpop.f32.mrf.mxu1  ;;  %12249 = vmatpush3.msra.mxu1 %v4265_v33  ;;  %v19721_v52 = vand.u32 4294901760, %v15722_v0 }
 0x4a2   : > { %v3211_v22 = vadd.f32 %v3210_v42, %v15586_v46  ;;  %v15704_v12 = vadd.f32 %v15579_v54, %v3218_v62  ;;  %v15717_v46 = vand.u32 4294901760, %v3980_v8  ;;  %v15733_v42 = vsub.f32 %v3996_v29, %v15715_v15  ;;  %12250 = vmatprep.subr.mxu1 %v4384_v17  ;;  %v3994_v17 = vld [vmem:[%s19691_s7 + $0xc8] sm:$0xff] }
 0x4a3   : > { %v13569_v49 = vpop.f32.mrf.mxu0  ;;  %v15694_v7 = vpop.f32.mrf.mxu1  ;;  %v15747_v2 = vsub.f32 %v3995_v51, %v15724_v37  ;;  %12251 = vmatpush3.msra.mxu1 %v4272_v38  ;;  %v4390_v36 = vsub.f32 %v15722_v0, %v19721_v52 }
 0x4a4   : > { %v3232_v54 = vadd.f32 %v13569_v49, %v15588_v14  ;;  %v15736_v14 = vsub.f32 %v3980_v8, %v15717_v46  ;;  %v15743_v48 = vadd.f32 %v15581_v53, %v3211_v22  ;;  %v19718_v29 = vand.u32 4294901760, %v15733_v42  ;;  %12199 = vmatpush3.msra.mxu0 %v15717_v46 }
 0x4a5   : > { %v3224_v1 = vpop.f32.mrf.mxu0  ;;  %v15711_v55 = vpop.f32.mrf.mxu1  ;;  %v19717_v43 = vand.u32 4294901760, %v15747_v2  ;;  %12200 = vmatprep.subr.mxu0 %v15724_v37 }
 0x4a6   : > { %v3225_v11 = vadd.f32 %v3224_v1, %v15603_v9  ;;  %v15738_v9 = vand.u32 4294901760, %v3979_v5  ;;  %v15761_v49 = vadd.f32 %v15601_v28, %v3232_v54  ;;  %v4397_v28 = vsub.f32 %v15733_v42, %v19718_v29  ;;  %v3978_v54 = vld [vmem:[%s19691_s7 + $0x48] sm:$0xff] }
 0x4a7   : > { %v13572_v57 = vpop.f32.mrf.mxu0  ;;  %v15727_v62 = vpop.f32.mrf.mxu1  ;;  %v4391_v1 = vand.u32 4294901760, %v4390_v36  ;;  %v4404_v38 = vsub.f32 %v15747_v2, %v19717_v43  ;;  %v15807_v29 = vand.u32 4294901760, %v3994_v17 }
 0x4a8   : > { %v3246_v47 = vadd.f32 %v13572_v57, %v15617_v63  ;;  %v19716_v63 = vand.u32 4294901760, %v15736_v14  ;;  %v15756_v53 = vsub.f32 %v3979_v5, %v15738_v9  ;;  %v15771_v51 = vadd.f32 %v15625_v27, %v3225_v11  ;;  %12201 = vmatpush3.msra.mxu0 %v15738_v9  ;;  %v3993_v11 = vld [vmem:[%s19691_s7 + $0xc0] sm:$0xff] }
 0x4a9   : > { %v3238_v41 = vpop.f32.mrf.mxu0  ;;  %v15750_v60 = vpop.f32.mrf.mxu1  ;;  %12252 = vmatprep.subr.mxu1 %v4391_v1  ;;  %v4405_v43 = vand.u32 4294901760, %v4404_v38  ;;  %12202 = vmatprep.subr.mxu0 %v15807_v29 }
 0x4aa   : > { %v3239_v8 = vadd.f32 %v3238_v41, %v15653_v44  ;;  %v4278_v44 = vsub.f32 %v15730_v18, %v19719_v30  ;;  %v4285_v22 = vsub.f32 %v15736_v14, %v19716_v63  ;;  %v15788_v5 = vadd.f32 %v15644_v25, %v3246_v47  ;;  %v3977_v47 = vld [vmem:[%s19691_s7 + $0x40] sm:$0xff] }
 0x4ab   : > { %v13575_v33 = vpop.f32.mrf.mxu0  ;;  %v15768_v45 = vpop.f32.mrf.mxu1  ;;  %v4398_v63 = vand.u32 4294901760, %v4397_v28  ;;  %v19720_v25 = vand.u32 4294901760, %v15756_v53 }
 0x4ac   : > { %v3260_v27 = vadd.f32 %v13575_v33, %v15677_v24  ;;  %v4279_v41 = vand.u32 4294901760, %v4278_v44  ;;  %v4286_v24 = vand.u32 4294901760, %v4285_v22  ;;  %v15805_v33 = vadd.f32 %v15660_v58, %v3239_v8  ;;  %v3992_v44 = vld [vmem:[%s19691_s7 + $0xb8] sm:$0xff] }
 0x4ad   : > { %v3252_v57 = vpop.f32.mrf.mxu0  ;;  %v3604_v28 = vpop.f32.mrf.mxu1  ;;  %v15818_v58 = vand.u32 4294901760, %v3978_v54  ;;  %v15820_v8 = vand.u32 4294901760, %v3993_v11 }
 0x4ae   : > { %v3253_v36 = vadd.f32 %v3252_v57, %v15680_v20  ;;  %v15813_v30 = vadd.f32 %v15694_v7, %v3260_v27  ;;  %12253 = vmatpush3.msra.mxu1 %v4279_v41  ;;  %v4292_v20 = vsub.f32 %v15756_v53, %v19720_v25  ;;  %v15827_v57 = vsub.f32 %v3994_v17, %v15807_v29  ;;  %v3976_v27 = vld [vmem:[%s19691_s7 + $0x38] sm:$0xff] }
 0x4af   : > { %v13606_v22 = vpop.f32.mrf.mxu0  ;;  %12254 = vmatprep.subr.mxu1 %v4398_v63  ;;  %v15829_v7 = vand.u32 4294901760, %v3977_v47  ;;  %v15841_v63 = vand.u32 4294901760, %v3992_v44  ;;  %12203 = vmatpush3.msra.mxu0 %v15818_v58 }
 0x4b0   : > { %v3482_v1 = vadd.f32 %v13606_v22, %v15704_v12  ;;  %v15824_v38 = vadd.f32 %v15711_v55, %v3253_v36  ;;  %12255 = vmatpush3.msra.mxu1 %v4286_v24  ;;  %v4293_v25 = vand.u32 4294901760, %v4292_v20  ;;  %v15836_v12 = vsub.f32 %v3978_v54, %v15818_v58  ;;  %12204 = vmatprep.subr.mxu0 %v15820_v8  ;;  %v13632_v54 = vpop.f32.mrf.mxu1 }
 0x4b1   : > { %v3475_v41 = vpop.f32.mrf.mxu0  ;;  %v15839_v55 = vsub.f32 %v3993_v11, %v15820_v8  ;;  %12256 = vmatprep.subr.mxu1 %v4405_v43  ;;  %v19723_v22 = vand.u32 4294901760, %v15827_v57  ;;  %v15848_v24 = vsub.f32 %v3977_v47, %v15829_v7  ;;  %v15854_v61 = vsub.f32 %v3992_v44, %v15841_v63  ;;  %12205 = vmatpush3.msra.mxu0 %v15829_v7 }
 0x4b2   : > { %v3599_v17 = vadd.f32 %v15727_v62, %v3482_v1  ;;  %v3476_v36 = vadd.f32 %v3475_v41, %v15743_v48  ;;  %12257 = vmatpush3.msra.mxu1 %v4293_v25  ;;  %v19724_v11 = vand.u32 4294901760, %v15836_v12  ;;  %v15856_v62 = vand.u32 4294901760, %v3976_v27  ;;  %12206 = vmatprep.subr.mxu0 %v15841_v63  ;;  %v3616_v32 = vpop.f32.mrf.mxu1 }
 0x4b3   : > { %20007 = vst [vmem:[#allocation15_spill] sm:$0xff] %v15839_v55  ;;  %20008 = vst [vmem:[#allocation16_spill] sm:$0xff] %v15848_v24  ;;  %v13609_v20 = vpop.f32.mrf.mxu0  ;;  %v19725_v52 = vand.u32 4294901760, %v15839_v55  ;;  %v4411_v25 = vsub.f32 %v15827_v57, %v19723_v22 }
 0x4b4   : > { %20009 = vst [vmem:[#allocation17_spill] sm:$0xff] %v15854_v61  ;;  %v3639_v48 = vmax.f32 %v3599_v17, 0.0  ;;  %v3593_v43 = vadd.f32 %v15750_v60, %v3476_v36  ;;  %v3494_v47 = vadd.f32 %v13609_v20, %v15761_v49  ;;  %v4299_v44 = vsub.f32 %v15836_v12, %v19724_v11  ;;  %12207 = vmatpush3.msra.mxu0 %v15856_v62  ;;  %v3991_v11 = vld [vmem:[%s19691_s7 + $0xb0] sm:$0xff] }
 0x4b5   : > { %v3487_v1 = vpop.f32.mrf.mxu0  ;;  %v4418_v41 = vsub.f32 %v15839_v55, %v19725_v52  ;;  %v19731_v17 = vand.u32 4294901760, %v15848_v24  ;;  %v19730_v60 = vand.u32 4294901760, %v15854_v61  ;;  %v4412_v22 = vand.u32 4294901760, %v4411_v25  ;;  %v3975_v52 = vld [vmem:[%s19691_s7 + $0x30] sm:$0xff] }
 0x4b6   : > { %3648 = vst.msk [vmem:[#allocation4 + $0x21] sm:$0xff] %vm356_vm6, %v3639_v48  ;;  %v3638_v49 = vmax.f32 %v3593_v43, 0.0  ;;  %v3611_v36 = vadd.f32 %v15768_v45, %v3494_v47  ;;  %v3488_v20 = vadd.f32 %v3487_v1, %v15771_v51  ;;  %v4300_v23 = vand.u32 4294901760, %v4299_v44  ;;  %v3990_v1 = vld [vmem:[%s19691_s7 + $0xa8] sm:$0xff] }
 0x4b7   : > { %v13612_v26 = vpop.f32.mrf.mxu0  ;;  %v4419_v56 = vand.u32 4294901760, %v4418_v41  ;;  %v4306_v48 = vsub.f32 %v15848_v24, %v19731_v17  ;;  %v4425_v45 = vsub.f32 %v15854_v61, %v19730_v60  ;;  %12258 = vmatprep.subr.mxu1 %v4412_v22  ;;  %v15892_v25 = vsub.f32 %v3976_v27, %v15856_v62  ;;  %v3974_v44 = vld [vmem:[%s19691_s7 + $0x28] sm:$0xff] }
 0x4b8   : > { %3647 = vst.msk [vmem:[#allocation4 + $0x11] sm:$0xff] %vm356_vm6, %v3638_v49  ;;  %v3641_v51 = vmax.f32 %v3611_v36, 0.0  ;;  %v3605_v43 = vadd.f32 %v3604_v28, %v3488_v20  ;;  %v3506_v47 = vadd.f32 %v13612_v26, %v15788_v5  ;;  %12259 = vmatpush3.msra.mxu1 %v4300_v23  ;;  %v15900_v36 = vand.u32 4294901760, %v3991_v11  ;;  %v13635_v20 = vpop.f32.mrf.mxu1 }
 0x4b9   : > { %20010 = vst [vmem:[#allocation18_spill] sm:$0xff] %v15892_v25  ;;  %v3499_v41 = vpop.f32.mrf.mxu0  ;;  %v4307_v60 = vand.u32 4294901760, %v4306_v48  ;;  %v4426_v49 = vand.u32 4294901760, %v4425_v45  ;;  %v15902_v28 = vand.u32 4294901760, %v3975_v52  ;;  %12260 = vmatprep.subr.mxu1 %v4419_v56  ;;  %v19735_v22 = vand.u32 4294901760, %v15892_v25 }
 0x4ba   : > { %3650 = vst.msk [vmem:[#allocation4 + $0x41] sm:$0xff] %vm356_vm6, %v3641_v51  ;;  %v3640_v26 = vmax.f32 %v3605_v43, 0.0  ;;  %v3623_v5 = vadd.f32 %v13632_v54, %v3506_v47  ;;  %v3500_v27 = vadd.f32 %v3499_v41, %v15805_v33  ;;  %v15908_v23 = vsub.f32 %v3991_v11, %v15900_v36  ;;  %12208 = vmatprep.subr.mxu0 %v15900_v36 }
 0x4bb   : > { %v13615_v17 = vpop.f32.mrf.mxu0  ;;  %12261 = vmatpush3.msra.mxu1 %v4307_v60  ;;  %v15911_v48 = vsub.f32 %v3975_v52, %v15902_v28  ;;  %v15913_v45 = vand.u32 4294901760, %v3990_v1  ;;  %v15915_v59 = vand.u32 4294901760, %v3974_v44  ;;  %v4313_v11 = vsub.f32 %v15892_v25, %v19735_v22  ;;  %12209 = vmatpush3.msra.mxu0 %v15902_v28 }
 0x4bc   : > { %20011 = vst [vmem:[#allocation19_spill] sm:$0xff] %v15908_v23  ;;  %3649 = vst.msk [vmem:[#allocation4 + $0x31] sm:$0xff] %vm356_vm6, %v3640_v26  ;;  %v3643_v56 = vmax.f32 %v3623_v5, 0.0  ;;  %v3617_v33 = vadd.f32 %v3616_v32, %v3500_v27  ;;  %v3518_v54 = vadd.f32 %v13615_v17, %v15813_v30  ;;  %12262 = vmatprep.subr.mxu1 %v4426_v49  ;;  %v19734_v51 = vand.u32 4294901760, %v15908_v23  ;;  %v3989_v30 = vld [vmem:[%s19691_s7 + $0xa0] sm:$0xff]  ;;  %v3628_v26 = vpop.f32.mrf.mxu1 }
 0x4bd   : > { %20012 = vst [vmem:[#allocation20_spill] sm:$0xff] %v15911_v48  ;;  %20013 = vst [vmem:[#allocation21_spill] sm:$0xff] %v15913_v45  ;;  %v3511_v52 = vpop.f32.mrf.mxu0  ;;  %v15924_v60 = vld [vmem:[#allocation4 + $0x20] sm:$0xff]  ;;  %v19733_v43 = vand.u32 4294901760, %v15911_v48  ;;  %v15929_v47 = vsub.f32 %v3990_v1, %v15913_v45  ;;  %v15932_v32 = vsub.f32 %v3974_v44, %v15915_v59  ;;  %12210 = vmatprep.subr.mxu0 %v15913_v45  ;;  %v4314_v44 = vand.u32 4294901760, %v4313_v11 }
 0x4be   : > { %20014 = vst [vmem:[#allocation22_spill] sm:$0xff] %v15915_v59  ;;  %v3973_v17 = vld [vmem:[%s19691_s7 + $0x20] sm:$0xff]  ;;  %3652 = vst.msk [vmem:[#allocation4 + $0x61] sm:$0xff] %vm356_vm6, %v3643_v56  ;;  %v3642_v41 = vmax.f32 %v3617_v33, 0.0  ;;  %v3635_v49 = vadd.f32 %v13635_v20, %v3518_v54  ;;  %v3512_v1 = vadd.f32 %v3511_v52, %v15824_v38  ;;  %3864 = vrot.lane.b32.xlu0 %v15924_v60, %s14369_s17  ;;  %3802 = vrot.lane.b32.xlu1 %v15924_v60, %s14370_s18  ;;  %v3988_v56 = vld [vmem:[%s19691_s7 + $0x98] sm:$0xff] }
 0x4bf   : > { %20015 = vst [vmem:[#allocation23_spill] sm:$0xff] %v15929_v47  ;;  %20016 = vst [vmem:[#allocation24_spill] sm:$0xff] %v15932_v32  ;;  %v4432_v5 = vsub.f32 %v15908_v23, %v19734_v51  ;;  %v4320_v27 = vsub.f32 %v15911_v48, %v19733_v43  ;;  %v19738_v20 = vand.u32 4294901760, %v15929_v47  ;;  %12211 = vmatpush3.msra.mxu0 %v15915_v59  ;;  %12263 = vmatpush3.msra.mxu1 %v4314_v44  ;;  %v3972_v43 = vld [vmem:[%s19691_s7 + $0x18] sm:$0xff]  ;;  %v15967_v51 = vld [vmem:[#allocation4 + $0x21] sm:$0xff] }
 0x4c0   : > { %3651 = vst.msk [vmem:[#allocation4 + $0x51] sm:$0xff] %vm356_vm6, %v3642_v41  ;;  %v3645_v33 = vmax.f32 %v3635_v49, 0.0  ;;  %v3629_v54 = vadd.f32 %v3628_v26, %v3512_v1  ;;  %v15960_v11 = vand.u32 4294901760, %v3989_v30  ;;  %v15962_v52 = vand.u32 4294901760, %v3973_v17  ;;  %v3987_v1 = vld [vmem:[%s19691_s7 + $0x90] sm:$0xff] }
 0x4c1   : > { %v4433_v22 = vand.u32 4294901760, %v4432_v5  ;;  %v4321_v38 = vand.u32 4294901760, %v4320_v27  ;;  %v4439_v48 = vsub.f32 %v15929_v47, %v19738_v20  ;;  %v20019_v41 = vand.u32 4294901760, %v15932_v32 }
 0x4c2   : > { %20017 = vst [vmem:[#allocation25_spill] sm:$0xff] %v15960_v11  ;;  %20018 = vst [vmem:[#allocation26_spill] sm:$0xff] %v15962_v52  ;;  %v3644_v44 = vmax.f32 %v3629_v54, 0.0  ;;  %3896 = vrot.lane.b32.xlu0 %v15967_v51, %s14370_s18  ;;  %3740 = vrot.lane.b32.xlu1 %v15967_v51, %s14371_s21  ;;  %v15984_v26 = vsub.f32 %v3989_v30, %v15960_v11  ;;  %v15987_v5 = vsub.f32 %v3973_v17, %v15962_v52  ;;  %v3970_v30 = vld [vmem:[%s19691_s7 + $0x8] sm:$0xff] }
 0x4c3   : > { %v4327_v49 = vsub.f32 %v15932_v32, %v20019_v41  ;;  %3654 = vst.msk [vmem:[#allocation4 + $0x81] sm:$0xff] %vm356_vm6, %v3645_v33  ;;  %v15989_v27 = vand.u32 4294901760, %v3988_v56  ;;  %v3971_v41 = vld [vmem:[%s19691_s7 + $0x10] sm:$0xff]  ;;  %v3986_v33 = vld [vmem:[%s19691_s7 + $0x88] sm:$0xff]  ;;  %12264 = vmatprep.subr.mxu1 %v4433_v22  ;;  %v4440_v54 = vand.u32 4294901760, %v4439_v48  ;;  %v15997_v32 = vand.u32 4294901760, %v3972_v43  ;;  %12212 = vmatprep.subr.mxu0 %v15960_v11 }
 0x4c4   : > { %20020 = vst [vmem:[#allocation27_spill] sm:$0xff] %v15984_v26  ;;  %20021 = vst [vmem:[#allocation28_spill] sm:$0xff] %v15987_v5  ;;  %12265 = vmatpush3.msra.mxu1 %v4321_v38  ;;  %v19754_v17 = vand.u32 4294901760, %v15984_v26  ;;  %v19753_v47 = vand.u32 4294901760, %v15987_v5  ;;  %12213 = vmatpush3.msra.mxu0 %v15962_v52  ;;  %v3696_v22 = vld [vmem:[#allocation4 + $0x22] sm:$0xff]  ;;  %v16015_v25 = vand.u32 4294901760, %v3971_v41 }
 0x4c5   : > { %20022 = vst [vmem:[#allocation29_spill] sm:$0xff] %v15989_v27  ;;  %v4328_v20 = vand.u32 4294901760, %v4327_v49  ;;  %20023 = vst [vmem:[#allocation30_spill] sm:$0xff] %v15997_v32  ;;  %v16007_v23 = vsub.f32 %v3988_v56, %v15989_v27  ;;  %12266 = vmatprep.subr.mxu1 %v4440_v54  ;;  %v16011_v48 = vsub.f32 %v3972_v43, %v15997_v32  ;;  %v16013_v49 = vand.u32 4294901760, %v3987_v1 }
 0x4c6   : > { %3653 = vst.msk [vmem:[#allocation4 + $0x71] sm:$0xff] %vm356_vm6, %v3644_v44  ;;  %20027 = vst [vmem:[#allocation34_spill] sm:$0xff] %v16015_v25  ;;  %v16017_v44 = vand.u32 4294901760, %v3986_v33  ;;  %12214 = vmatprep.subr.mxu0 %v15989_v27  ;;  %3834 = vrot.lane.b32.xlu0 %v3696_v22, %s14371_s21  ;;  %v4446_v38 = vsub.f32 %v15984_v26, %v19754_v17  ;;  %v4334_v43 = vsub.f32 %v15987_v5, %v19753_v47  ;;  %v3985_v47 = vld [vmem:[%s19691_s7 + $0x80] sm:$0xff]  ;;  %v16055_v5 = vld [vmem:[#allocation4 + $0x10] sm:$0xff] }
 0x4c7   : > { %20024 = vst [vmem:[#allocation31_spill] sm:$0xff] %v16007_v23  ;;  %20025 = vst [vmem:[#allocation32_spill] sm:$0xff] %v16011_v48  ;;  %3772 = vrot.lane.b32.xlu1 %v3696_v22, %s14369_s17  ;;  %v19763_v56 = vand.u32 4294901760, %v16007_v23  ;;  %v16029_v54 = vand.u32 4294901760, %v3970_v30  ;;  %12267 = vmatpush3.msra.mxu1 %v4328_v20  ;;  %v16033_v27 = vsub.f32 %v3987_v1, %v16013_v49  ;;  %v3969_v17 = vld [vmem:[%s19691_s7] sm:$0xff]  ;;  %v20034_v26 = vand.u32 4294901760, %v16011_v48 }
 0x4c8   : > { %20026 = vst [vmem:[#allocation33_spill] sm:$0xff] %v16013_v49  ;;  %20028 = vst [vmem:[#allocation35_spill] sm:$0xff] %v16017_v44  ;;  %v16036_v22 = vsub.f32 %v3971_v41, %v16015_v25  ;;  %v16039_v61 = vsub.f32 %v3986_v33, %v16017_v44  ;;  %12215 = vmatpush3.msra.mxu0 %v15997_v32  ;;  %v4447_v20 = vand.u32 4294901760, %v4446_v38  ;;  %v4335_v52 = vand.u32 4294901760, %v4334_v43  ;;  %v3695_v33 = vld [vmem:[#allocation4 + $0x12] sm:$0xff] }
 0x4c9   : > { %20029 = vst [vmem:[#allocation36_spill] sm:$0xff] %v16029_v54  ;;  %20030 = vst [vmem:[#allocation37_spill] sm:$0xff] %v16033_v27  ;;  %v4453_v1 = vsub.f32 %v16007_v23, %v19763_v56  ;;  %v16052_v41 = vsub.f32 %v3970_v30, %v16029_v54  ;;  %12216 = vmatprep.subr.mxu0 %v16013_v49  ;;  %v4341_v11 = vsub.f32 %v16011_v48, %v20034_v26 }
 0x4ca   : > { %20031 = vst [vmem:[#allocation38_spill] sm:$0xff] %v16036_v22  ;;  %20032 = vst [vmem:[#allocation39_spill] sm:$0xff] %v16039_v61  ;;  %v19772_v32 = vand.u32 4294901760, %v16033_v27  ;;  %v19773_v38 = vand.u32 4294901760, %v16036_v22  ;;  %12217 = vmatpush3.msra.mxu0 %v16015_v25  ;;  %3832 = vrot.lane.b32.xlu0 %v3695_v33, %s14371_s21  ;;  %v16068_v23 = vand.u32 4294901760, %v3985_v47  ;;  %v16070_v49 = vand.u32 4294901760, %v3969_v17 }
 0x4cb   : > { %20033 = vst [vmem:[#allocation40_spill] sm:$0xff] %v16052_v41  ;;  %3800 = vrot.lane.b32.xlu1 %v16055_v5, %s14370_s18  ;;  %v4454_v30 = vand.u32 4294901760, %v4453_v1  ;;  %v19778_v56 = vand.u32 4294901760, %v16052_v41  ;;  %12268 = vmatprep.subr.mxu1 %v4447_v20  ;;  %v4342_v26 = vand.u32 4294901760, %v4341_v11  ;;  %v20037_v25 = vand.u32 4294901760, %v16039_v61 }
 0x4cc   : > { %20035 = vst [vmem:[#allocation41_spill] sm:$0xff] %v16068_v23  ;;  %20036 = vst [vmem:[#allocation42_spill] sm:$0xff] %v16070_v49  ;;  %v4460_v43 = vsub.f32 %v16033_v27, %v19772_v32  ;;  %v4348_v48 = vsub.f32 %v16036_v22, %v19773_v38  ;;  %12218 = vmatprep.subr.mxu0 %v16017_v44  ;;  %12269 = vmatpush3.msra.mxu1 %v4335_v52  ;;  %v16092_v38 = vld [vmem:[#allocation4 + $0x40] sm:$0xff]  ;;  %v16094_v22 = vld [vmem:[#allocation4 + $0x11] sm:$0xff] }
 0x4cd   : > { %v4467_v1 = vsub.f32 %v16039_v61, %v20037_v25  ;;  %v4355_v20 = vsub.f32 %v16052_v41, %v19778_v56  ;;  %v16086_v11 = vsub.f32 %v3985_v47, %v16068_v23  ;;  %v16089_v32 = vsub.f32 %v3969_v17, %v16070_v49  ;;  %12219 = vmatpush3.msra.mxu0 %v16029_v54  ;;  %v16111_v56 = vld [vmem:[#allocation4 + $0x41] sm:$0xff] }
 0x4ce   : > { %20040 = vst [vmem:[#allocation45_spill] sm:$0xff] %v16092_v38  ;;  %12270 = vmatprep.subr.mxu1 %v4454_v30  ;;  %v4461_v25 = vand.u32 4294901760, %v4460_v43  ;;  %v4349_v61 = vand.u32 4294901760, %v4348_v48  ;;  %12220 = vmatprep.subr.mxu0 %v16068_v23  ;;  %20041 = vst [vmem:[#allocation46_spill] sm:$0xff] %v16111_v56 }
 0x4cf   : > { %20038 = vst [vmem:[#allocation43_spill] sm:$0xff] %v16086_v11  ;;  %20039 = vst [vmem:[#allocation44_spill] sm:$0xff] %v16089_v32  ;;  %3868 = vrot.lane.b32.xlu0 %v16092_v38, %s14369_s17  ;;  %3738 = vrot.lane.b32.xlu1 %v16094_v22, %s14371_s21  ;;  %v19780_v47 = vand.u32 4294901760, %v16086_v11  ;;  %v19779_v52 = vand.u32 4294901760, %v16089_v32  ;;  %v4468_v17 = vand.u32 4294901760, %v4467_v1  ;;  %v4356_v30 = vand.u32 4294901760, %v4355_v20 }
 0x4d0   : > { %12271 = vmatpush3.msra.mxu1 %v4342_v26  ;;  %12221 = vmatpush3.msra.mxu0 %v16070_v49  ;;  %v3698_v20 = vld [vmem:[#allocation4 + $0x42] sm:$0xff] }
 0x4d1   : > { %12272 = vmatprep.subr.mxu1 %v4461_v25  ;;  %v4474_v48 = vsub.f32 %v16086_v11, %v19780_v47  ;;  %v4362_v43 = vsub.f32 %v16089_v32, %v19779_v52  ;;  %12302 = vmatprep.subr.mxu0 %v15620_v6  ;;  %v3697_v25 = vld [vmem:[#allocation4 + $0x32] sm:$0xff] }
 0x4d2   : > { %12273 = vmatpush3.msra.mxu1 %v4349_v61  ;;  %v16120_v61 = vld [vmem:[#allocation4 + $0x30] sm:$0xff] }
 0x4d3   : > { %3900 = vrot.lane.b32.xlu0 %v16111_v56, %s14370_s18  ;;  %3770 = vrot.lane.b32.xlu1 %v3695_v33, %s14369_s17  ;;  %v4475_v26 = vand.u32 4294901760, %v4474_v48  ;;  %v4363_v1 = vand.u32 4294901760, %v4362_v43  ;;  %v16126_v33 = vld [vmem:[#allocation4 + $0x31] sm:$0xff]  ;;  %v3700_v48 = vld [vmem:[#allocation4 + $0x62] sm:$0xff] }
 0x4d4   : > { %12274 = vmatprep.subr.mxu1 %v4468_v17  ;;  %v16134_v17 = vld [vmem:[#allocation4 + $0x60] sm:$0xff]  ;;  %v16148_v43 = vld [vmem:[#allocation4 + $0x50] sm:$0xff] }
 0x4d5   : > { %12275 = vmatpush3.msra.mxu1 %v4356_v30  ;;  %20042 = vst [vmem:[#allocation47_spill] sm:$0xff] %v16134_v17  ;;  %v16140_v30 = vld [vmem:[#allocation4 + $0x61] sm:$0xff]  ;;  %20044 = vst [vmem:[#allocation49_spill] sm:$0xff] %v16148_v43  ;;  %v16170_v52 = vld [vmem:[#allocation4 + $0x70] sm:$0xff] }
 0x4d6   : > { %12276 = vmatprep.subr.mxu1 %v4475_v26  ;;  %20043 = vst [vmem:[#allocation48_spill] sm:$0xff] %v16140_v30  ;;  %v16154_v26 = vld [vmem:[#allocation4 + $0x51] sm:$0xff]  ;;  %20047 = vst [vmem:[#allocation52_spill] sm:$0xff] %v16170_v52 }
 0x4d7   : > { %3838 = vrot.lane.b32.xlu0 %v3698_v20, %s14371_s21  ;;  %3806 = vrot.lane.b32.xlu1 %v16092_v38, %s14370_s18  ;;  %20045 = vst [vmem:[#allocation50_spill] sm:$0xff] %v16154_v26  ;;  %v16175_v47 = vld [vmem:[#allocation4 + $0x71] sm:$0xff] }
 0x4d8   : > { %12277 = vmatpush3.msra.mxu1 %v4363_v1  ;;  %v3699_v1 = vld [vmem:[#allocation4 + $0x52] sm:$0xff]  ;;  %20048 = vst [vmem:[#allocation53_spill] sm:$0xff] %v16175_v47 }
 0x4d9   : > { %12358 = vmatprep.subr.mxu1 %v15590_v10 }
 0x4db   : > { %3866 = vrot.lane.b32.xlu0 %v16120_v61, %s14369_s17  ;;  %3744 = vrot.lane.b32.xlu1 %v16111_v56, %s14371_s21 }
 0x4df   : > { %3898 = vrot.lane.b32.xlu0 %v16126_v33, %s14370_s18  ;;  %3776 = vrot.lane.b32.xlu1 %v3698_v20, %s14369_s17  ;;  %v3710_v20 = vld [vmem:[#allocation4 + $0x80] sm:$0xff] }
 0x4e3   : > { %3836 = vrot.lane.b32.xlu0 %v3697_v25, %s14371_s21  ;;  %3804 = vrot.lane.b32.xlu1 %v16120_v61, %s14370_s18 }
 0x4e7   : > { %3872 = vrot.lane.b32.xlu0 %v16134_v17, %s14369_s17  ;;  %3742 = vrot.lane.b32.xlu1 %v16126_v33, %s14371_s21 }
 0x4eb   : > { %3904 = vrot.lane.b32.xlu0 %v16140_v30, %s14370_s18  ;;  %3774 = vrot.lane.b32.xlu1 %v3697_v25, %s14369_s17  ;;  %v16165_v25 = vld [vmem:[#allocation4 + $0x81] sm:$0xff] }
 0x4ec   : > { %20046 = vst [vmem:[#allocation51_spill] sm:$0xff] %v16165_v25 }
 0x4ef   : > { %3842 = vrot.lane.b32.xlu0 %v3700_v48, %s14371_s21  ;;  %3810 = vrot.lane.b32.xlu1 %v16134_v17, %s14370_s18 }
 0x4f3   : > { %3870 = vrot.lane.b32.xlu0 %v16148_v43, %s14369_s17  ;;  %3748 = vrot.lane.b32.xlu1 %v16140_v30, %s14371_s21  ;;  %v3678_v30 = vld [vmem:[#allocation4 + $0x72] sm:$0xff] }
 0x4f7   : > { %3902 = vrot.lane.b32.xlu0 %v16154_v26, %s14370_s18  ;;  %3780 = vrot.lane.b32.xlu1 %v3700_v48, %s14369_s17  ;;  %v3702_v48 = vld [vmem:[#allocation4 + $0x82] sm:$0xff] }
 0x4fb   : > { %3840 = vrot.lane.b32.xlu0 %v3699_v1, %s14371_s21  ;;  %3808 = vrot.lane.b32.xlu1 %v16148_v43, %s14370_s18 }
 0x4ff   : > { %3876 = vrot.lane.b32.xlu0 %v3710_v20, %s14369_s17  ;;  %3746 = vrot.lane.b32.xlu1 %v16154_v26, %s14371_s21 }
 0x503   : > { %3908 = vrot.lane.b32.xlu0 %v16165_v25, %s14370_s18  ;;  %3778 = vrot.lane.b32.xlu1 %v3699_v1, %s14369_s17  ;;  %v3711_v1 = vld [vmem:[#allocation4 + $0x90] sm:$0xff]  ;;  %v3737_v25 = vpop.permute.xlu1 %3736 }
 0x507   : > { %3846 = vrot.lane.b32.xlu0 %v3702_v48, %s14371_s21  ;;  %3812 = vrot.lane.b32.xlu1 %v16170_v52, %s14370_s18  ;;  %v3719_v48 = vld [vmem:[#allocation4 + $0x91] sm:$0xff] }
 0x50b   : > { %3874 = vrot.lane.b32.xlu0 %v16170_v52, %s14369_s17  ;;  %3750 = vrot.lane.b32.xlu1 %v16175_v47, %s14371_s21  ;;  %v3769_v52 = vpop.permute.xlu1 %3768 }
 0x50f   : > { %3906 = vrot.lane.b32.xlu0 %v16175_v47, %s14370_s18  ;;  %3782 = vrot.lane.b32.xlu1 %v3678_v30, %s14369_s17  ;;  %v3655_v47 = vld [vmem:[#allocation4] sm:$0xff] }
 0x513   : > { %3844 = vrot.lane.b32.xlu0 %v3678_v30, %s14371_s21  ;;  %3814 = vrot.lane.b32.xlu1 %v3710_v20, %s14370_s18  ;;  %v3920_v30 = vsel %vm356_vm6, %v3655_v47, %v3737_v25 }
 0x514   : > { %v3928_v20 = vsel %vm1908_vm10, %v3920_v30, %v3769_v52 }
 0x517   : > { %3878 = vrot.lane.b32.xlu0 %v3711_v1, %s14369_s17 }
 0x51b   : > { %3910 = vrot.lane.b32.xlu0 %v3719_v48, %s14370_s18 }
 0x530   : > { %v3865_v17 = vpop.permute.xlu0 %3864  ;;  %v3803_v43 = vpop.permute.xlu1 %3802 }
 0x534   : > { %v3897_v6 = vpop.permute.xlu0 %3896  ;;  %v16188_v32 = vpop.permute.xlu1 %3740 }
 0x538   : > { %v3835_v11 = vpop.permute.xlu0 %3834 }
 0x539   : > { %v16190_v26 = vpop.permute.xlu1 %3772 }
 0x53c   : > { %v3833_v1 = vpop.permute.xlu0 %3832 }
 0x53d   : > { %v3801_v41 = vpop.permute.xlu1 %3800  ;;  %v3945_v48 = vsel %vm356_vm6, %v16094_v22, %v3833_v1 }
 0x53e   : > { %v3937_v38 = vsel %vm3936_vm14, %v3928_v20, %v3801_v41  ;;  %v3953_v27 = vsel %vm1908_vm10, %v3945_v48, %v3865_v17 }
 0x53f   : > { %v16198_v10 = vand.u32 4294901760, %v3937_v38  ;;  %v3961_v56 = vsel %vm3936_vm14, %v3953_v27, %v3897_v6 }
 0x540   : > { %v16201_v49 = vand.u32 4294901760, %v3961_v56 }
 0x541   : > { %20049 = vst [vmem:[#allocation54_spill] sm:$0xff] %v16198_v10  ;;  %v16204_v47 = vsub.f32 %v3937_v38, %v16198_v10  ;;  %v16206_v25 = vpop.permute.xlu0 %3868  ;;  %v3739_v52 = vpop.permute.xlu1 %3738 }
 0x542   : > { %20050 = vst [vmem:[#allocation55_spill] sm:$0xff] %v16201_v49  ;;  %v16209_v30 = vsub.f32 %v3961_v56, %v16201_v49  ;;  %4478 = vmatprep.mubr.f32.mxu1 %v16201_v49  ;;  %v3921_v6 = vsel %vm356_vm6, %v16055_v5, %v3739_v52  ;;  %v20059_v49 = vld [vmem:[#allocation29_spill] sm:$0xff] }
 0x543   : > { %v19802_v22 = vand.u32 4294901760, %v16204_v47  ;;  %4480 = vmatmul.mubr.f32.vlgmr.msra.gmra.mxu1 %v16198_v10 }
 0x544   : > { %v19803_v38 = vand.u32 4294901760, %v16209_v30  ;;  %12359 = vmatpush3.msra.mxu1 %v15605_v13 }
 0x545   : > { %v16216_v27 = vpop.permute.xlu0 %3900  ;;  %v3771_v41 = vpop.permute.xlu1 %3770  ;;  %v4141_v56 = vsub.f32 %v16204_v47, %v19802_v22  ;;  %12360 = vmatprep.subr.mxu1 %v15607_v39 }
 0x546   : > { %v3929_v17 = vsel %vm1908_vm10, %v3921_v6, %v3771_v41  ;;  %v4135_v20 = vsub.f32 %v16209_v30, %v19803_v38  ;;  %12361 = vmatpush3.msra.mxu1 %v15609_v31 }
 0x547   : > { %12362 = vmatprep.subr.mxu1 %v15622_v4  ;;  %v3938_v5 = vsel %vm3936_vm14, %v3929_v17, %v3803_v43  ;;  %v4142_v6 = vand.u32 4294901760, %v4141_v56  ;;  %v3946_v56 = vsel %vm356_vm6, %v15967_v51, %v3835_v11  ;;  %v3922_v11 = vsel %vm356_vm6, %v15924_v60, %v16188_v32 }
 0x548   : > { %v4136_v52 = vand.u32 4294901760, %v4135_v20  ;;  %12363 = vmatpush3.msra.mxu1 %v15636_v50  ;;  %v16238_v41 = vand.u32 4294901760, %v3938_v5 }
 0x549   : > { %v16231_v1 = vpop.permute.xlu0 %3838  ;;  %v16233_v48 = vpop.permute.xlu1 %3806  ;;  %12364 = vmatprep.subr.mxu1 %v15706_v3 }
 0x54a   : > { %4137 = vmatprep.mubr.f32.mxu0 %v4136_v52  ;;  %12365 = vmatpush3.msra.mxu1 %v15713_v34  ;;  %20051 = vst [vmem:[#allocation56_spill] sm:$0xff] %v16238_v41  ;;  %v16252_v17 = vsub.f32 %v3938_v5, %v16238_v41  ;;  %v3930_v5 = vsel %vm1908_vm10, %v3922_v11, %v16190_v26 }
 0x54b   : > { %4143 = vmatmul.mubr.f32.vlgmr.msra.gmra.mxu0 %v4142_v6  ;;  %12366 = vmatprep.subr.mxu1 %v15715_v15 }
 0x54c   : > { %12303 = vmatpush3.msra.mxu0 %v15628_v21  ;;  %12367 = vmatpush3.msra.mxu1 %v15717_v46 }
 0x54d   : > { %v3867_v22 = vpop.permute.xlu0 %3866  ;;  %v16241_v43 = vpop.permute.xlu1 %3744  ;;  %12304 = vmatprep.subr.mxu0 %v15631_v40  ;;  %12368 = vmatprep.subr.mxu1 %v15724_v37 }
 0x54e   : > { %12305 = vmatpush3.msra.mxu0 %v15634_v35  ;;  %12369 = vmatpush3.msra.mxu1 %v15738_v9  ;;  %v3954_v20 = vsel %vm1908_vm10, %v3946_v56, %v3867_v22  ;;  %v19804_v22 = vand.u32 4294901760, %v16252_v17 }
 0x54f   : > { %12306 = vmatprep.subr.mxu0 %v15641_v19  ;;  %12370 = vmatprep.subr.mxu1 %v15807_v29 }
 0x550   : > { %12307 = vmatpush3.msra.mxu0 %v15650_v16  ;;  %12371 = vmatpush3.msra.mxu1 %v15818_v58 }
 0x551   : > { %v3899_v52 = vpop.permute.xlu0 %3898  ;;  %v16257_v6 = vpop.permute.xlu1 %3776  ;;  %12308 = vmatprep.subr.mxu0 %v15722_v0  ;;  %12372 = vmatprep.subr.mxu1 %v15820_v8 }
 0x552   : > { %v3962_v38 = vsel %vm3936_vm14, %v3954_v20, %v3899_v52  ;;  %12309 = vmatpush3.msra.mxu0 %v15730_v18  ;;  %12373 = vmatpush3.msra.mxu1 %v15829_v7 }
 0x553   : > { %v16264_v51 = vand.u32 4294901760, %v3962_v38  ;;  %12310 = vmatprep.subr.mxu0 %v15733_v42  ;;  %12374 = vmatprep.subr.mxu1 %v15841_v63 }
 0x554   : > { %12311 = vmatpush3.msra.mxu0 %v15736_v14  ;;  %12375 = vmatpush3.msra.mxu1 %v15856_v62 }
 0x555   : > { %20052 = vst [vmem:[#allocation57_spill] sm:$0xff] %v16264_v51  ;;  %v16277_v56 = vsub.f32 %v3962_v38, %v16264_v51  ;;  %v3837_v20 = vpop.permute.xlu0 %3836  ;;  %4485 = vmatprep.mubr.f32.mxu1 %v16264_v51  ;;  %v3805_v52 = vpop.permute.xlu1 %3804  ;;  %12312 = vmatprep.subr.mxu0 %v15747_v2 }
 0x556   : > { %v3947_v60 = vsel %vm356_vm6, %v16126_v33, %v3837_v20  ;;  %v3939_v32 = vsel %vm3936_vm14, %v3930_v5, %v3805_v52  ;;  %4487 = vmatmul.mubr.f32.gmra.mxu1 %v16238_v41  ;;  %12313 = vmatpush3.msra.mxu0 %v15756_v53  ;;  %v4156_v5 = vsub.f32 %v16252_v17, %v19804_v22 }
 0x557   : > { %v3955_v26 = vsel %vm1908_vm10, %v3947_v60, %v16206_v25  ;;  %v16288_v38 = vand.u32 4294901760, %v3939_v32  ;;  %v19805_v11 = vand.u32 4294901760, %v16277_v56  ;;  %12376 = vmatprep.subr.mxu1 %v15900_v36  ;;  %12314 = vmatprep.subr.mxu0 %v15827_v57 }
 0x558   : > { %v3963_v33 = vsel %vm3936_vm14, %v3955_v26, %v16216_v27  ;;  %12377 = vmatpush3.msra.mxu1 %v15902_v28  ;;  %12315 = vmatpush3.msra.mxu0 %v15836_v12 }
 0x559   : > { %20053 = vst [vmem:[#allocation58_spill] sm:$0xff] %v16288_v38  ;;  %v16300_v25 = vand.u32 4294901760, %v3963_v33  ;;  %v16303_v20 = vsub.f32 %v3939_v32, %v16288_v38  ;;  %v16305_v52 = vpop.permute.xlu0 %3872  ;;  %v3743_v60 = vpop.permute.xlu1 %3742  ;;  %v4150_v27 = vsub.f32 %v16277_v56, %v19805_v11  ;;  %12378 = vmatprep.subr.mxu1 %v15913_v45  ;;  %12316 = vmatprep.subr.mxu0 %v15839_v55  ;;  %v4157_v11 = vand.u32 4294901760, %v4156_v5 }
 0x55a   : > { %12379 = vmatpush3.msra.mxu1 %v15915_v59  ;;  %12317 = vmatpush3.msra.mxu0 %v15848_v24  ;;  %v3923_v41 = vsel %vm356_vm6, %v16120_v61, %v3743_v60  ;;  %v20057_v60 = vld [vmem:[#allocation26_spill] sm:$0xff]  ;;  %v20062_v24 = vld [vmem:[#allocation20_spill] sm:$0xff] }
 0x55b   : > { %20054 = vst [vmem:[#allocation59_spill] sm:$0xff] %v16300_v25  ;;  %v16315_v26 = vsub.f32 %v3963_v33, %v16300_v25  ;;  %4492 = vmatprep.mubr.f32.mxu1 %v16300_v25  ;;  %v4151_v32 = vand.u32 4294901760, %v4150_v27  ;;  %v19818_v22 = vand.u32 4294901760, %v16303_v20  ;;  %v20055_v25 = vld [vmem:[#allocation25_spill] sm:$0xff] }
 0x55c   : > { %4494 = vmatmul.mubr.f32.gmra.mxu1 %v16288_v38  ;;  %12380 = vmatprep.subr.mxu1 %v20055_v25  ;;  %v20056_v38 = vld [vmem:[#allocation17_spill] sm:$0xff]  ;;  %v20060_v25 = vld [vmem:[#allocation19_spill] sm:$0xff] }
 0x55d   : > { %v16324_v51 = vpop.permute.xlu0 %3904  ;;  %4152 = vmatprep.mubr.f32.mxu0 %v4151_v32  ;;  %v3775_v33 = vpop.permute.xlu1 %3774  ;;  %v19820_v10 = vand.u32 4294901760, %v16315_v26  ;;  %v4171_v5 = vsub.f32 %v16303_v20, %v19818_v22  ;;  %12318 = vmatprep.subr.mxu0 %v20056_v38  ;;  %v20058_v32 = vld [vmem:[#allocation18_spill] sm:$0xff] }
 0x55e   : > { %v3931_v27 = vsel %vm1908_vm10, %v3923_v41, %v3775_v33  ;;  %4158 = vmatmul.mubr.f32.gmra.mxu0 %v4157_v11  ;;  %12381 = vmatpush3.msra.mxu1 %v20057_v60  ;;  %v20061_v38 = vld [vmem:[#allocation30_spill] sm:$0xff]  ;;  %v20063_v60 = vld [vmem:[#allocation33_spill] sm:$0xff] }
 0x55f   : > { %v4165_v61 = vsub.f32 %v16315_v26, %v19820_v10  ;;  %12319 = vmatpush3.msra.mxu0 %v20058_v32  ;;  %12382 = vmatprep.subr.mxu1 %v20059_v49  ;;  %v3940_v41 = vsel %vm3936_vm14, %v3931_v27, %v16233_v48  ;;  %v4172_v10 = vand.u32 4294901760, %v4171_v5  ;;  %v20064_v32 = vld [vmem:[#allocation23_spill] sm:$0xff]  ;;  %v20065_v49 = vld [vmem:[#allocation34_spill] sm:$0xff] }
 0x560   : > { %12320 = vmatprep.subr.mxu0 %v20060_v25  ;;  %12383 = vmatpush3.msra.mxu1 %v20061_v38  ;;  %v16351_v25 = vand.u32 4294901760, %v3940_v41  ;;  %v20068_v5 = vld [vmem:[#allocation27_spill] sm:$0xff] }
 0x561   : > { %v16342_v11 = vpop.permute.xlu0 %3842  ;;  %v16344_v33 = vpop.permute.xlu1 %3810  ;;  %v4166_v22 = vand.u32 4294901760, %v4165_v61  ;;  %12321 = vmatpush3.msra.mxu0 %v20062_v24  ;;  %12384 = vmatprep.subr.mxu1 %v20063_v60  ;;  %v20067_v61 = vld [vmem:[#allocation24_spill] sm:$0xff]  ;;  %v20072_v60 = vld [vmem:[#allocation31_spill] sm:$0xff] }
 0x562   : > { %12322 = vmatprep.subr.mxu0 %v20064_v32  ;;  %12385 = vmatpush3.msra.mxu1 %v20065_v49  ;;  %20066 = vst [vmem:[#allocation60_spill] sm:$0xff] %v16351_v25  ;;  %v20069_v32 = vld [vmem:[#allocation28_spill] sm:$0xff]  ;;  %v20071_v49 = vld [vmem:[#allocation46_spill] sm:$0xff] }
 0x563   : > { %4167 = vmatprep.mubr.f32.mxu0 %v4166_v22  ;;  %12386 = vmatprep.subr.mxu1 %v16017_v44  ;;  %v20070_v22 = vld [vmem:[#allocation42_spill] sm:$0xff]  ;;  %v16366_v44 = vsub.f32 %v3940_v41, %v16351_v25 }
 0x564   : > { %4173 = vmatmul.mubr.f32.gmra.mxu0 %v4172_v10  ;;  %12387 = vmatpush3.msra.mxu1 %v16029_v54  ;;  %v3948_v10 = vsel %vm356_vm6, %v20071_v49, %v16231_v1  ;;  %v20077_v49 = vld [vmem:[#allocation38_spill] sm:$0xff]  ;;  %v20078_v1 = vld [vmem:[#allocation45_spill] sm:$0xff] }
 0x565   : > { %v3871_v48 = vpop.permute.xlu0 %3870  ;;  %v16354_v27 = vpop.permute.xlu1 %3748  ;;  %12323 = vmatpush3.msra.mxu0 %v20067_v61  ;;  %12388 = vmatprep.subr.mxu1 %v16068_v23  ;;  %v20073_v61 = vld [vmem:[#allocation13_spill] sm:$0xff]  ;;  %v20074_v23 = vld [vmem:[#allocation32_spill] sm:$0xff]  ;;  %v3924_v41 = vsel %vm356_vm6, %v20078_v1, %v16241_v43  ;;  %v20082_v1 = vld [vmem:[#allocation43_spill] sm:$0xff] }
 0x566   : > { %12324 = vmatprep.subr.mxu0 %v20068_v5  ;;  %12389 = vmatpush3.msra.mxu1 %v20070_v22  ;;  %v3956_v54 = vsel %vm1908_vm10, %v3948_v10, %v3871_v48  ;;  %v20075_v22 = vld [vmem:[#allocation37_spill] sm:$0xff]  ;;  %v3932_v48 = vsel %vm1908_vm10, %v3924_v41, %v16257_v6 }
 0x567   : > { %12325 = vmatpush3.msra.mxu0 %v20069_v32  ;;  %12470 = vmatprep.subr.mxu1 %v20073_v61  ;;  %v20084_v61 = vld [vmem:[#allocation44_spill] sm:$0xff] }
 0x568   : > { %12326 = vmatprep.subr.mxu0 %v20072_v60  ;;  %v20079_v60 = vld [vmem:[#allocation39_spill] sm:$0xff] }
 0x569   : > { %v3903_v5 = vpop.permute.xlu0 %3902  ;;  %v3781_v24 = vpop.permute.xlu1 %3780  ;;  %12327 = vmatpush3.msra.mxu0 %v20074_v23 }
 0x56a   : > { %v3964_v32 = vsel %vm3936_vm14, %v3956_v54, %v3903_v5  ;;  %12328 = vmatprep.subr.mxu0 %v20075_v22  ;;  %v20080_v22 = vld [vmem:[#allocation40_spill] sm:$0xff] }
 0x56b   : > { %v16374_v38 = vand.u32 4294901760, %v3964_v32  ;;  %12329 = vmatpush3.msra.mxu0 %v20077_v49  ;;  %v20081_v49 = vld [vmem:[#allocation50_spill] sm:$0xff] }
 0x56c   : > { %12330 = vmatprep.subr.mxu0 %v20079_v60 }
 0x56d   : > { %20076 = vst [vmem:[#allocation46_spill] sm:$0xff] %v16374_v38  ;;  %v16385_v10 = vsub.f32 %v3964_v32, %v16374_v38  ;;  %v3841_v54 = vpop.permute.xlu0 %3840  ;;  %v3809_v5 = vpop.permute.xlu1 %3808  ;;  %4499 = vmatprep.mubr.f32.mxu1 %v16374_v38  ;;  %12331 = vmatpush3.msra.mxu0 %v20080_v22 }
 0x56e   : > { %v3949_v23 = vsel %vm356_vm6, %v20081_v49, %v3841_v54  ;;  %v3941_v43 = vsel %vm3936_vm14, %v3932_v48, %v3809_v5  ;;  %4501 = vmatmul.mubr.f32.gmra.mxu1 %v16351_v25  ;;  %12332 = vmatprep.subr.mxu0 %v20082_v1  ;;  %v20085_v49 = vand.u32 4294901760, %v16366_v44  ;;  %v20086_v54 = vld [vmem:[#allocation14_spill] sm:$0xff] }
 0x56f   : > { %v3957_v6 = vsel %vm1908_vm10, %v3949_v23, %v16305_v52  ;;  %v16396_v32 = vand.u32 4294901760, %v3941_v43  ;;  %v19829_v41 = vand.u32 4294901760, %v16385_v10  ;;  %12333 = vmatpush3.msra.mxu0 %v20084_v61  ;;  %v20087_v5 = vand.u32 4294901760, %v20086_v54 }
 0x570   : > { %v3965_v38 = vsel %vm3936_vm14, %v3957_v6, %v16324_v51  ;;  %v4186_v48 = vsub.f32 %v16366_v44, %v20085_v49 }
 0x571   : > { %20083 = vst [vmem:[#allocation13_spill] sm:$0xff] %v16396_v32  ;;  %12414 = vmatprep.subr.mxu0 %v20087_v5  ;;  %v16407_v25 = vand.u32 4294901760, %v3965_v38  ;;  %v16410_v23 = vsub.f32 %v3941_v43, %v16396_v32  ;;  %v3877_v52 = vpop.permute.xlu0 %3876  ;;  %v3747_v1 = vpop.permute.xlu1 %3746  ;;  %v4180_v61 = vsub.f32 %v16385_v10, %v19829_v41  ;;  %v20089_v5 = vld [vmem:[#allocation49_spill] sm:$0xff] }
 0x572   : > { %v4187_v54 = vand.u32 4294901760, %v4186_v48  ;;  %v3925_v43 = vsel %vm356_vm6, %v20089_v5, %v3747_v1 }
 0x573   : > { %20088 = vst [vmem:[#allocation45_spill] sm:$0xff] %v16407_v25  ;;  %v16416_v51 = vsub.f32 %v3965_v38, %v16407_v25  ;;  %4506 = vmatprep.mubr.f32.mxu1 %v16407_v25  ;;  %v4181_v6 = vand.u32 4294901760, %v4180_v61  ;;  %v19834_v49 = vand.u32 4294901760, %v16410_v23 }
 0x574   : > { %4508 = vmatmul.mubr.f32.gmra.mxu1 %v16396_v32 }
 0x575   : > { %v3909_v22 = vpop.permute.xlu0 %3908  ;;  %v3779_v60 = vpop.permute.xlu1 %3778  ;;  %4182 = vmatprep.mubr.f32.mxu0 %v4181_v6  ;;  %v19836_v59 = vand.u32 4294901760, %v16416_v51  ;;  %v4201_v38 = vsub.f32 %v16410_v23, %v19834_v49 }
 0x576   : > { %v3933_v41 = vsel %vm1908_vm10, %v3925_v43, %v3779_v60  ;;  %4188 = vmatmul.mubr.f32.gmra.mxu0 %v4187_v54  ;;  %v20090_v60 = vld [vmem:[#allocation47_spill] sm:$0xff] }
 0x577   : > { %v4195_v61 = vsub.f32 %v16416_v51, %v19836_v59  ;;  %v3942_v48 = vsel %vm3936_vm14, %v3933_v41, %v16344_v33  ;;  %v4202_v6 = vand.u32 4294901760, %v4201_v38  ;;  %v3926_v54 = vsel %vm356_vm6, %v20090_v60, %v16354_v27  ;;  %v20091_v33 = vld [vmem:[#allocation48_spill] sm:$0xff] }
 0x578   : > { %v16433_v25 = vand.u32 4294901760, %v3942_v48  ;;  %v3934_v55 = vsel %vm1908_vm10, %v3926_v54, %v3781_v24  ;;  %v3950_v41 = vsel %vm356_vm6, %v20091_v33, %v16342_v11  ;;  %v20093_v24 = vld [vmem:[#allocation52_spill] sm:$0xff] }
 0x579   : > { %v3847_v1 = vpop.permute.xlu0 %3846  ;;  %v3813_v5 = vpop.permute.xlu1 %3812  ;;  %v4196_v32 = vand.u32 4294901760, %v4195_v61 }
 0x57a   : > { %v3943_v59 = vsel %vm3936_vm14, %v3934_v55, %v3813_v5  ;;  %v16444_v38 = vsub.f32 %v3942_v48, %v16433_v25 }
 0x57b   : > { %4197 = vmatprep.mubr.f32.mxu0 %v4196_v32  ;;  %v16447_v45 = vand.u32 4294901760, %v3943_v59 }
 0x57c   : > { %4203 = vmatmul.mubr.f32.gmra.mxu0 %v4202_v6  ;;  %v19840_v5 = vand.u32 4294901760, %v16444_v38 }
 0x57d   : > { %v3875_v43 = vpop.permute.xlu0 %3874  ;;  %v3751_v49 = vpop.permute.xlu1 %3750  ;;  %v16461_v33 = vsub.f32 %v3943_v59, %v16447_v45 }
 0x57e   : > { %v3958_v32 = vsel %vm1908_vm10, %v3950_v41, %v3875_v43  ;;  %v3927_v55 = vsel %vm356_vm6, %v20093_v24, %v3751_v49  ;;  %v20094_v41 = vld [vmem:[#allocation53_spill] sm:$0xff]  ;;  %v4216_v59 = vsub.f32 %v16444_v38, %v19840_v5 }
 0x581   : > { %v3907_v61 = vpop.permute.xlu0 %3906  ;;  %v3783_v6 = vpop.permute.xlu1 %3782 }
 0x582   : > { %v3966_v27 = vsel %vm3936_vm14, %v3958_v32, %v3907_v61  ;;  %v3935_v48 = vsel %vm1908_vm10, %v3927_v55, %v3783_v6 }
 0x583   : > { %v16450_v60 = vand.u32 4294901760, %v3966_v27 }
 0x585   : > { %20092 = vst [vmem:[#allocation50_spill] sm:$0xff] %v16450_v60  ;;  %v16456_v11 = vsub.f32 %v3966_v27, %v16450_v60  ;;  %4513 = vmatprep.mubr.f32.mxu1 %v16450_v60  ;;  %v3845_v54 = vpop.permute.xlu0 %3844  ;;  %v3815_v43 = vpop.permute.xlu1 %3814 }
 0x586   : > { %v3951_v32 = vsel %vm356_vm6, %v20094_v41, %v3845_v54  ;;  %v3944_v61 = vsel %vm3936_vm14, %v3935_v48, %v3815_v43  ;;  %4515 = vmatmul.mubr.f32.gmra.mxu1 %v16433_v25  ;;  %v20096_v43 = vld [vmem:[#allocation51_spill] sm:$0xff] }
 0x587   : > { %v3959_v49 = vsel %vm1908_vm10, %v3951_v32, %v3877_v52  ;;  %v19841_v27 = vand.u32 4294901760, %v16456_v11  ;;  %v16470_v24 = vand.u32 4294901760, %v3944_v61  ;;  %v3952_v41 = vsel %vm356_vm6, %v20096_v43, %v3847_v1 }
 0x588   : > { %v3967_v6 = vsel %vm3936_vm14, %v3959_v49, %v3909_v22  ;;  %v4217_v49 = vand.u32 4294901760, %v4216_v59 }
 0x589   : > { %v16475_v55 = vand.u32 4294901760, %v3967_v6  ;;  %v3879_v60 = vpop.permute.xlu0 %3878  ;;  %v4210_v48 = vsub.f32 %v16456_v11, %v19841_v27  ;;  %v16488_v32 = vsub.f32 %v3944_v61, %v16470_v24 }
 0x58a   : > { %v3960_v5 = vsel %vm1908_vm10, %v3952_v41, %v3879_v60 }
 0x58b   : > { %20095 = vst [vmem:[#allocation14_spill] sm:$0xff] %v16475_v55  ;;  %v16482_v52 = vsub.f32 %v3967_v6, %v16475_v55  ;;  %4520 = vmatprep.mubr.f32.mxu1 %v16475_v55  ;;  %v4211_v22 = vand.u32 4294901760, %v4210_v48  ;;  %v20097_v48 = vand.u32 4294901760, %v16461_v33  ;;  %v4245_v59 = vand.u32 4294901760, %v16488_v32 }
 0x58c   : > { %4522 = vmatmul.mubr.f32.gmra.mxu1 %v16447_v45 }
 0x58d   : > { %4212 = vmatprep.mubr.f32.mxu0 %v4211_v22  ;;  %v3911_v27 = vpop.permute.xlu0 %3910  ;;  %v4224_v54 = vand.u32 4294901760, %v16482_v52  ;;  %v4231_v55 = vsub.f32 %v16461_v33, %v20097_v48  ;;  %v4246_v41 = vsub.f32 %v16488_v32, %v4245_v59 }
 0x58e   : > { %v3968_v6 = vsel %vm3936_vm14, %v3960_v5, %v3911_v27  ;;  %4218 = vmatmul.mubr.f32.gmra.mxu0 %v4217_v49  ;;  %v20098_v27 = vand.u32 4294901760, %v16209_v30 }
 0x58f   : > { %v16497_v1 = vand.u32 4294901760, %v3968_v6  ;;  %v4225_v61 = vsub.f32 %v16482_v52, %v4224_v54  ;;  %v4232_v5 = vand.u32 4294901760, %v4231_v55  ;;  %v20100_v55 = vand.u32 4294901760, %v16277_v56 }
 0x591   : > { %v16504_v60 = vsub.f32 %v3968_v6, %v16497_v1  ;;  %4527 = vmatprep.mubr.f32.mxu1 %v16497_v1  ;;  %v4226_v22 = vand.u32 4294901760, %v4225_v61  ;;  %v20099_v6 = vand.u32 4294901760, %v16204_v47  ;;  %v4247_v61 = vand.u32 4294901760, %v4246_v41  ;;  %v20146_v41 = vld [vmem:[#allocation24_spill] sm:$0xff] }
 0x592   : > { %4529 = vmatmul.mubr.f32.gmra.mxu1 %v16470_v24 }
 0x593   : > { %4227 = vmatprep.mubr.f32.mxu0 %v4226_v22  ;;  %4834 = vmatprep.mubr.f32.mxu1 %v20098_v27  ;;  %v4239_v43 = vand.u32 4294901760, %v16504_v60  ;;  %v20101_v22 = vand.u32 4294901760, %v16252_v17 }
 0x594   : > { %4233 = vmatmul.mubr.f32.gmra.mxu0 %v4232_v5  ;;  %v20102_v5 = vand.u32 4294901760, %v16315_v26 }
 0x595   : > { %v4240_v49 = vsub.f32 %v16504_v60, %v4239_v43 }
 0x596   : > { %4838 = vmatmul.mubr.f32.vlgmr.msra.gmra.mxu1 %v20099_v6 }
 0x597   : > { %4845 = vmatprep.mubr.f32.mxu1 %v20100_v55  ;;  %12471 = vmatpush3.msra.mxu1 %v15605_v13  ;;  %v4241_v48 = vand.u32 4294901760, %v4240_v49  ;;  %v20103_v13 = vand.u32 4294901760, %v16303_v20  ;;  %v20147_v49 = vand.u32 4294901760, %v20146_v41  ;;  %v20182_v41 = vld [vmem:[#allocation50_spill] sm:$0xff] }
 0x598   : > { %12472 = vmatprep.subr.mxu1 %v15607_v39  ;;  %v20104_v39 = vand.u32 4294901760, %v15628_v21  ;;  %v20108_v21 = vand.u32 4294901760, %v15641_v19  ;;  %v20112_v19 = vand.u32 4294901760, %v15722_v0  ;;  %v20117_v0 = vand.u32 4294901760, %v16456_v11 }
 0x599   : > { %4242 = vmatprep.mubr.f32.mxu0 %v4241_v48  ;;  %12473 = vmatpush3.msra.mxu1 %v15609_v31  ;;  %v20105_v31 = vand.u32 4294901760, %v16385_v10  ;;  %v20148_v48 = vld [vmem:[#allocation35_spill] sm:$0xff] }
 0x59a   : > { %4248 = vmatmul.mubr.f32.gmra.mxu0 %v4247_v61  ;;  %4849 = vmatmul.mubr.f32.gmra.mxu1 %v20101_v22  ;;  %v4002_v61 = vld [vmem:[%s19691_s7 + $0x108] sm:$0xff] }
 0x59b   : > { %12474 = vmatprep.subr.mxu1 %v15622_v4  ;;  %4664 = vmatprep.mubr.f32.mxu0 %v16209_v30  ;;  %v20106_v4 = vand.u32 4294901760, %v15631_v40  ;;  %v20110_v40 = vand.u32 4294901760, %v15650_v16  ;;  %v20114_v16 = vand.u32 4294901760, %v15733_v42  ;;  %v20120_v42 = vand.u32 4294901760, %v15827_v57  ;;  %v20136_v30 = vld [vmem:[#allocation29_spill] sm:$0xff] }
 0x59c   : > { %4856 = vmatprep.mubr.f32.mxu1 %v20102_v5  ;;  %12475 = vmatpush3.msra.mxu1 %v15636_v50  ;;  %v20107_v50 = vand.u32 4294901760, %v15634_v35  ;;  %v20111_v35 = vand.u32 4294901760, %v16416_v51  ;;  %v20152_v5 = vld [vmem:[#allocation55_spill] sm:$0xff] }
 0x59d   : > { %12476 = vmatprep.subr.mxu1 %v15706_v3  ;;  %v20109_v3 = vand.u32 4294901760, %v16366_v44 }
 0x59e   : > { %12477 = vmatpush3.msra.mxu1 %v15713_v34  ;;  %4667 = vmatmul.mubr.f32.vlgmr.msra.gmra.mxu0 %v16204_v47  ;;  %v20113_v34 = vand.u32 4294901760, %v15730_v18  ;;  %v20119_v18 = vand.u32 4294901760, %v15756_v53 }
 0x59f   : > { %4860 = vmatmul.mubr.f32.gmra.mxu1 %v20103_v13  ;;  %12415 = vmatpush3.msra.mxu0 %v20104_v39  ;;  %v20153_v13 = vld [vmem:[#allocation28_spill] sm:$0xff] }
 0x5a0   : > { %12478 = vmatprep.subr.mxu1 %v15715_v15  ;;  %4673 = vmatprep.mubr.f32.mxu0 %v16277_v56  ;;  %v20115_v15 = vand.u32 4294901760, %v16410_v23  ;;  %v20154_v39 = vand.u32 4294901760, %v20153_v13 }
 0x5a1   : > { %4867 = vmatprep.mubr.f32.mxu1 %v20105_v31  ;;  %12416 = vmatprep.subr.mxu0 %v20106_v4  ;;  %v20155_v31 = vld [vmem:[#allocation41_spill] sm:$0xff]  ;;  %v20156_v4 = vld [vmem:[#allocation31_spill] sm:$0xff] }
 0x5a2   : > { %12479 = vmatpush3.msra.mxu1 %v15717_v46  ;;  %12417 = vmatpush3.msra.mxu0 %v20107_v50  ;;  %v20116_v46 = vand.u32 4294901760, %v15736_v14  ;;  %v20121_v14 = vand.u32 4294901760, %v16444_v38  ;;  %v20157_v50 = vand.u32 4294901760, %v20156_v4 }
 0x5a3   : > { %12480 = vmatprep.subr.mxu1 %v15724_v37  ;;  %12418 = vmatprep.subr.mxu0 %v20108_v21  ;;  %v20118_v37 = vand.u32 4294901760, %v15747_v2  ;;  %v20123_v2 = vld [vmem:[#allocation21_spill] sm:$0xff] }
 0x5a4   : > { %12481 = vmatpush3.msra.mxu1 %v15738_v9  ;;  %4676 = vmatmul.mubr.f32.gmra.mxu0 %v16252_v17  ;;  %v20122_v9 = vand.u32 4294901760, %v15836_v12  ;;  %v20137_v17 = vld [vmem:[#allocation19_spill] sm:$0xff] }
 0x5a5   : > { %4871 = vmatmul.mubr.f32.gmra.mxu1 %v20109_v3  ;;  %12419 = vmatpush3.msra.mxu0 %v20110_v40  ;;  %v20138_v56 = vand.u32 4294901760, %v20137_v17  ;;  %v16661_v3 = vand.u32 4294901760, %v4002_v61  ;;  %v4001_v40 = vld [vmem:[%s19691_s7 + $0x100] sm:$0xff] }
 0x5a6   : > { %12482 = vmatprep.subr.mxu1 %v15807_v29  ;;  %4682 = vmatprep.mubr.f32.mxu0 %v16315_v26  ;;  %v20124_v29 = vld [vmem:[#allocation15_spill] sm:$0xff]  ;;  %v20139_v26 = vld [vmem:[#allocation30_spill] sm:$0xff] }
 0x5a7   : > { %4878 = vmatprep.mubr.f32.mxu1 %v20111_v35  ;;  %12420 = vmatprep.subr.mxu0 %v20112_v19  ;;  %v20125_v53 = vand.u32 4294901760, %v20124_v29  ;;  %v20158_v35 = vld [vmem:[#allocation42_spill] sm:$0xff]  ;;  %v20159_v19 = vld [vmem:[#allocation32_spill] sm:$0xff] }
 0x5a8   : > { %12483 = vmatpush3.msra.mxu1 %v15818_v58  ;;  %12421 = vmatpush3.msra.mxu0 %v20113_v34  ;;  %v20126_v58 = vld [vmem:[#allocation22_spill] sm:$0xff]  ;;  %v20160_v34 = vand.u32 4294901760, %v20159_v19  ;;  %v20169_v29 = vld [vmem:[#allocation40_spill] sm:$0xff] }
 0x5a9   : > { %12484 = vmatprep.subr.mxu1 %v15820_v8  ;;  %12422 = vmatprep.subr.mxu0 %v20114_v16  ;;  %v20127_v8 = vld [vmem:[#allocation16_spill] sm:$0xff]  ;;  %v20161_v16 = vld [vmem:[#allocation54_spill] sm:$0xff] }
 0x5aa   : > { %12485 = vmatpush3.msra.mxu1 %v15829_v7  ;;  %4685 = vmatmul.mubr.f32.gmra.mxu0 %v16303_v20  ;;  %v20128_v57 = vand.u32 4294901760, %v20127_v8  ;;  %v20129_v7 = vld [vmem:[#allocation25_spill] sm:$0xff]  ;;  %v20172_v8 = vld [vmem:[#allocation43_spill] sm:$0xff] }
 0x5ab   : > { %4882 = vmatmul.mubr.f32.gmra.mxu1 %v20115_v15  ;;  %12423 = vmatpush3.msra.mxu0 %v20116_v46  ;;  %v20162_v15 = vld [vmem:[#allocation37_spill] sm:$0xff] }
 0x5ac   : > { %12486 = vmatprep.subr.mxu1 %v15841_v63  ;;  %4691 = vmatprep.mubr.f32.mxu0 %v16385_v10  ;;  %v20130_v63 = vld [vmem:[#allocation17_spill] sm:$0xff]  ;;  %v20140_v10 = vld [vmem:[#allocation20_spill] sm:$0xff]  ;;  %v20163_v46 = vand.u32 4294901760, %v20162_v15 }
 0x5ad   : > { %4889 = vmatprep.mubr.f32.mxu1 %v20117_v0  ;;  %12424 = vmatprep.subr.mxu0 %v20118_v37  ;;  %v20131_v12 = vand.u32 4294901760, %v20130_v63  ;;  %v16674_v0 = vand.u32 4294901760, %v4001_v40  ;;  %v20164_v37 = vld [vmem:[#allocation57_spill] sm:$0xff]  ;;  %v20174_v63 = vld [vmem:[#allocation59_spill] sm:$0xff] }
 0x5ae   : > { %12487 = vmatpush3.msra.mxu1 %v15856_v62  ;;  %12425 = vmatpush3.msra.mxu0 %v20119_v18  ;;  %v20132_v62 = vld [vmem:[#allocation26_spill] sm:$0xff]  ;;  %v3727_v15 = vld [vmem:[#allocation4 + $0x92] sm:$0xff] }
 0x5af   : > { %12488 = vmatprep.subr.mxu1 %v15900_v36  ;;  %12426 = vmatprep.subr.mxu0 %v20120_v42  ;;  %v4004_v36 = vld [vmem:[%s19691_s7 + $0x118] sm:$0xff]  ;;  %v20165_v18 = vld [vmem:[#allocation38_spill] sm:$0xff] }
 0x5b0   : > { %12489 = vmatpush3.msra.mxu1 %v15902_v28  ;;  %4694 = vmatmul.mubr.f32.gmra.mxu0 %v16366_v44  ;;  %v20133_v28 = vand.u32 4294901760, %v16461_v33  ;;  %v20134_v44 = vld [vmem:[#allocation18_spill] sm:$0xff]  ;;  %v16619_v20 = vand.u32 4294901760, %v4004_v36  ;;  %v20166_v42 = vand.u32 4294901760, %v20165_v18 }
 0x5b1   : > { %4893 = vmatmul.mubr.f32.gmra.mxu1 %v20121_v14  ;;  %12427 = vmatpush3.msra.mxu0 %v20122_v9  ;;  %v20135_v47 = vand.u32 4294901760, %v20134_v44  ;;  %v16685_v9 = vsub.f32 %v4002_v61, %v16661_v3  ;;  %v20177_v44 = vld [vmem:[#allocation58_spill] sm:$0xff] }
 0x5b2   : > { %12490 = vmatprep.subr.mxu1 %v20123_v2  ;;  %4700 = vmatprep.mubr.f32.mxu0 %v16416_v51  ;;  %v4003_v51 = vld [vmem:[%s19691_s7 + $0x110] sm:$0xff]  ;;  %v16637_v6 = vsub.f32 %v4004_v36, %v16619_v20 }
 0x5b3   : > { %4900 = vmatprep.mubr.f32.mxu1 %v4224_v54  ;;  %12428 = vmatprep.subr.mxu0 %v20125_v53  ;;  %v20142_v54 = vld [vmem:[#allocation33_spill] sm:$0xff]  ;;  %v16639_v55 = vand.u32 4294901760, %v4003_v51  ;;  %v20170_v53 = vand.u32 4294901760, %v20169_v29 }
 0x5b4   : > { %12491 = vmatpush3.msra.mxu1 %v20126_v58  ;;  %12429 = vmatpush3.msra.mxu0 %v20128_v57  ;;  %v20171_v58 = vld [vmem:[#allocation56_spill] sm:$0xff]  ;;  %v20173_v57 = vand.u32 4294901760, %v20172_v8 }
 0x5b5   : > { %12492 = vmatprep.subr.mxu1 %v20129_v7  ;;  %12430 = vmatprep.subr.mxu0 %v20131_v12  ;;  %v16659_v21 = vsub.f32 %v4003_v51, %v16639_v55  ;;  %v16697_v7 = vsub.f32 %v4001_v40, %v16674_v0  ;;  %v20175_v12 = vld [vmem:[#allocation44_spill] sm:$0xff] }
 0x5b6   : > { %12493 = vmatpush3.msra.mxu1 %v20132_v62  ;;  %4703 = vmatmul.mubr.f32.gmra.mxu0 %v16410_v23  ;;  %v20141_v23 = vand.u32 4294901760, %v20140_v10  ;;  %v20176_v62 = vand.u32 4294901760, %v20175_v12  ;;  %v3720_v10 = vld [vmem:[#allocation4 + $0x22] sm:$0xff]  ;;  %v3725_v40 = vld [vmem:[#allocation4 + $0x72] sm:$0xff] }
 0x5b7   : > { %4904 = vmatmul.mubr.f32.gmra.mxu1 %v20133_v28  ;;  %12431 = vmatpush3.msra.mxu0 %v20135_v47  ;;  %v16682_v14 = vand.u32 4294901760, %v16659_v21  ;;  %v16705_v28 = vand.u32 4294901760, %v16685_v9  ;;  %v20178_v47 = vld [vmem:[#allocation46_spill] sm:$0xff] }
 0x5b8   : > { %12494 = vmatprep.subr.mxu1 %v20136_v30  ;;  %4709 = vmatprep.mubr.f32.mxu0 %v16456_v11  ;;  %v20143_v11 = vld [vmem:[#allocation23_spill] sm:$0xff]  ;;  %v16714_v30 = vand.u32 4294901760, %v16697_v7 }
 0x5b9   : > { %4911 = vmatprep.mubr.f32.mxu1 %v4239_v43  ;;  %12432 = vmatprep.subr.mxu0 %v20138_v56  ;;  %v20144_v27 = vand.u32 4294901760, %v20143_v11  ;;  %v20145_v43 = vld [vmem:[#allocation34_spill] sm:$0xff]  ;;  %v5481_v56 = vsub.f32 %v16685_v9, %v16705_v28  ;;  %v4013_v11 = vsel %vm356_vm6, %v3720_v10, 0 }
 0x5ba   : > { %12495 = vmatpush3.msra.mxu1 %v20139_v26  ;;  %12433 = vmatpush3.msra.mxu0 %v20141_v23  ;;  %v20179_v26 = vld [vmem:[#allocation60_spill] sm:$0xff]  ;;  %v20180_v23 = vld [vmem:[#allocation45_spill] sm:$0xff]  ;;  %v5488_v51 = vsub.f32 %v16697_v7, %v16714_v30  ;;  %v16733_v61 = vand.u32 4294901760, %v4013_v11 }
 0x5bb   : > { %12496 = vmatprep.subr.mxu1 %v20142_v54  ;;  %12434 = vmatprep.subr.mxu0 %v20144_v27  ;;  %v5482_v54 = vand.u32 4294901760, %v5481_v56  ;;  %v3721_v27 = vld [vmem:[#allocation4 + $0x32] sm:$0xff] }
 0x5bc   : > { %12497 = vmatpush3.msra.mxu1 %v20145_v43  ;;  %4712 = vmatmul.mubr.f32.gmra.mxu0 %v16444_v38  ;;  %v20149_v38 = vld [vmem:[#allocation27_spill] sm:$0xff]  ;;  %v20181_v43 = vld [vmem:[#allocation13_spill] sm:$0xff]  ;;  %v16747_v4 = vsub.f32 %v4013_v11, %v16733_v61 }
 0x5bd   : > { %4915 = vmatmul.mubr.f32.gmra.mxu1 %v4245_v59  ;;  %12435 = vmatpush3.msra.mxu0 %v20147_v49  ;;  %v20150_v22 = vand.u32 4294901760, %v20149_v38  ;;  %v20151_v59 = vld [vmem:[#allocation36_spill] sm:$0xff]  ;;  %v5489_v49 = vand.u32 4294901760, %v5488_v51  ;;  %v4016_v38 = vsel %vm356_vm6, %v3721_v27, 0 }
 0x5be   : > { %12498 = vmatprep.subr.mxu1 %v20148_v48  ;;  %4718 = vmatprep.mubr.f32.mxu0 %v16482_v52  ;;  %v16656_v52 = vand.u32 4294901760, %v16637_v6  ;;  %v3722_v48 = vld [vmem:[#allocation4 + $0x42] sm:$0xff]  ;;  %v16742_v13 = vand.u32 4294901760, %v4016_v38 }
 0x5bf   : > { %12436 = vmatprep.subr.mxu0 %v20150_v22  ;;  %12499 = vmatpush3.msra.mxu1 %v20151_v59  ;;  %v3723_v22 = vld [vmem:[#allocation4 + $0x52] sm:$0xff]  ;;  %v4019_v59 = vsel %vm356_vm6, %v3722_v48, 0 }
 0x5c0   : > { %5234 = vmatprep.mubr.f32.mxu1 %v20152_v5  ;;  %12437 = vmatpush3.msra.mxu0 %v20154_v39  ;;  %v3724_v39 = vld [vmem:[#allocation4 + $0x62] sm:$0xff]  ;;  %v16758_v19 = vsub.f32 %v4016_v38, %v16742_v13 }
 0x5c1   : > { %12500 = vmatprep.subr.mxu1 %v20155_v31  ;;  %12438 = vmatprep.subr.mxu0 %v20157_v50  ;;  %v4022_v31 = vsel %vm356_vm6, %v3723_v22, 0  ;;  %v16750_v50 = vand.u32 4294901760, %v4019_v59 }
 0x5c2   : > { %12501 = vmatpush3.msra.mxu1 %v20158_v35  ;;  %4721 = vmatmul.mubr.f32.gmra.mxu0 %v16461_v33  ;;  %v5467_v33 = vsub.f32 %v16637_v6, %v16656_v52  ;;  %v4025_v35 = vsel %vm356_vm6, %v3724_v39, 0 }
 0x5c3   : > { %12439 = vmatpush3.msra.mxu0 %v20160_v34  ;;  %5236 = vmatmul.mubr.f32.vlgmr.msra.gmra.mxu1 %v20161_v16  ;;  %v16760_v34 = vand.u32 4294901760, %v4022_v31  ;;  %v16766_v18 = vand.u32 4294901760, %v4025_v35 }
 0x5c4   : > { %4727 = vmatprep.mubr.f32.mxu0 %v16504_v60  ;;  %12440 = vmatprep.subr.mxu0 %v20163_v46  ;;  %v20167_v60 = vld [vmem:[#allocation39_spill] sm:$0xff]  ;;  %v5468_v36 = vand.u32 4294901760, %v5467_v33  ;;  %v5361_v46 = vand.u32 4294901760, %v16747_v4 }
 0x5c5   : > { %5241 = vmatprep.mubr.f32.mxu1 %v20164_v37  ;;  %12441 = vmatpush3.msra.mxu0 %v20166_v42  ;;  %v20168_v2 = vand.u32 4294901760, %v20167_v60  ;;  %v16769_v42 = vsub.f32 %v4019_v59, %v16750_v50  ;;  %v4034_v60 = vsel %vm356_vm6, %v3727_v15, 0 }
 0x5c6   : > { %4730 = vmatmul.mubr.f32.gmra.mxu0 %v16488_v32  ;;  %v5474_v32 = vsub.f32 %v16659_v21, %v16682_v14  ;;  %13656 = vmatprep.subr.mxu1 %v5468_v36 }
 0x5c7   : > { %12442 = vmatprep.subr.mxu0 %v20168_v2  ;;  %5243 = vmatmul.mubr.f32.gmra.mxu1 %v20171_v58  ;;  %v16777_v2 = vsub.f32 %v4022_v31, %v16760_v34 }
 0x5c8   : > { %12443 = vmatpush3.msra.mxu0 %v20170_v53  ;;  %5081 = vmatprep.mubr.f32.mxu0 %v20152_v5  ;;  %v5475_v17 = vand.u32 4294901760, %v5474_v32  ;;  %v20183_v5 = vld [vmem:[#allocation14_spill] sm:$0xff]  ;;  %v5362_v53 = vsub.f32 %v16747_v4, %v5361_v46 }
 0x5c9   : > { %12444 = vmatprep.subr.mxu0 %v20173_v57  ;;  %5248 = vmatprep.mubr.f32.mxu1 %v20174_v63  ;;  %v16789_v57 = vand.u32 4294901760, %v4034_v60 }
 0x5ca   : > { %12445 = vmatpush3.msra.mxu0 %v20176_v62  ;;  %13657 = vmatpush3.msra.mxu1 %v5468_v36  ;;  %v5363_v36 = vand.u32 4294901760, %v5362_v53 }
 0x5cb   : > { %13636 = vmatprep.subr.mxu0 %v16619_v20  ;;  %5083 = vmatmul.mubr.f32.vlgmr.msra.gmra.mxu0 %v20161_v16  ;;  %v3726_v16 = vld [vmem:[#allocation4 + $0x82] sm:$0xff] }
 0x5cc   : > { %5250 = vmatmul.mubr.f32.gmra.mxu1 %v20177_v44  ;;  %13637 = vmatpush3.msra.mxu0 %v16619_v20  ;;  %v4031_v33 = vsel %vm356_vm6, %v3726_v16, 0 }
 0x5cd   : > { %5088 = vmatprep.mubr.f32.mxu0 %v20164_v37  ;;  %5255 = vmatprep.mubr.f32.mxu1 %v20178_v47  ;;  %v4028_v37 = vsel %vm356_vm6, %v3725_v40, 0  ;;  %v16787_v8 = vand.u32 4294901760, %v4031_v33 }
 0x5ce   : > { %13638 = vmatprep.subr.mxu0 %v16639_v55  ;;  %13658 = vmatprep.subr.mxu1 %v5475_v17  ;;  %v16780_v29 = vand.u32 4294901760, %v4028_v37 }
 0x5cf   : > { %5090 = vmatmul.mubr.f32.gmra.mxu0 %v20171_v58  ;;  %13659 = vmatpush3.msra.mxu1 %v5475_v17  ;;  %v5381_v58 = vand.u32 4294901760, %v16769_v42 }
 0x5d0   : > { %5257 = vmatmul.mubr.f32.gmra.mxu1 %v20179_v26  ;;  %5095 = vmatprep.mubr.f32.mxu0 %v20174_v63  ;;  %v16792_v63 = vsub.f32 %v4025_v35, %v16766_v18  ;;  %v16799_v62 = vsub.f32 %v4028_v37, %v16780_v29 }
 0x5d1   : > { %5262 = vmatprep.mubr.f32.mxu1 %v20180_v23  ;;  %13639 = vmatpush3.msra.mxu0 %v16639_v55  ;;  %v5382_v32 = vsub.f32 %v16769_v42, %v5381_v58 }
 0x5d2   : > { %13640 = vmatprep.subr.mxu0 %v16661_v3  ;;  %13660 = vmatprep.subr.mxu1 %v5482_v54  ;;  %v5411_v56 = vand.u32 4294901760, %v16799_v62 }
 0x5d3   : > { %5097 = vmatmul.mubr.f32.gmra.mxu0 %v20177_v44  ;;  %13661 = vmatpush3.msra.mxu1 %v5482_v54  ;;  %v5401_v44 = vand.u32 4294901760, %v16792_v63 }
 0x5d4   : > { %5264 = vmatmul.mubr.f32.gmra.mxu1 %v20181_v43  ;;  %5102 = vmatprep.mubr.f32.mxu0 %v20178_v47  ;;  %v16812_v47 = vsub.f32 %v4031_v33, %v16787_v8  ;;  %v5412_v11 = vsub.f32 %v16799_v62, %v5411_v56 }
 0x5d5   : > { %5269 = vmatprep.mubr.f32.mxu1 %v20182_v41  ;;  %13641 = vmatpush3.msra.mxu0 %v16661_v3  ;;  %v5402_v10 = vsub.f32 %v16792_v63, %v5401_v44 }
 0x5d6   : > { %13642 = vmatprep.subr.mxu0 %v16674_v0  ;;  %13662 = vmatprep.subr.mxu1 %v5489_v49 }
 0x5d7   : > { %5104 = vmatmul.mubr.f32.gmra.mxu0 %v20179_v26  ;;  %13663 = vmatpush3.msra.mxu1 %v5489_v49  ;;  %v5383_v26 = vand.u32 4294901760, %v5382_v32  ;;  %v5403_v27 = vand.u32 4294901760, %v5402_v10 }
 0x5d8   : > { %5271 = vmatmul.mubr.f32.gmra.mxu1 %v16433_v25  ;;  %5109 = vmatprep.mubr.f32.mxu0 %v20180_v23  ;;  %v5421_v23 = vand.u32 4294901760, %v16812_v47 }
 0x5d9   : > { %5276 = vmatprep.mubr.f32.mxu1 %v20183_v5  ;;  %13643 = vmatpush3.msra.mxu0 %v16674_v0 }
 0x5da   : > { %13676 = vmatprep.subr.mxu0 %v16637_v6  ;;  %13696 = vmatprep.subr.mxu1 %v16619_v20 }
 0x5db   : > { %5111 = vmatmul.mubr.f32.gmra.mxu0 %v20181_v43  ;;  %v5422_v43 = vsub.f32 %v16812_v47, %v5421_v23 }
 0x5dc   : > { %5278 = vmatmul.mubr.f32.gmra.mxu1 %v16447_v45  ;;  %5116 = vmatprep.mubr.f32.mxu0 %v20182_v41 }
 0x5dd   : > { %5283 = vmatprep.mubr.f32.mxu1 %v16497_v1  ;;  %v5423_v49 = vand.u32 4294901760, %v5422_v43 }
 0x5df   : > { %5118 = vmatmul.mubr.f32.gmra.mxu0 %v16433_v25  ;;  %v5371_v25 = vand.u32 4294901760, %v16758_v19 }
 0x5e0   : > { %5285 = vmatmul.mubr.f32.gmra.mxu1 %v16470_v24  ;;  %5123 = vmatprep.mubr.f32.mxu0 %v20183_v5 }
 0x5e1   : > { %13664 = vmatprep.mubr.f32.mxu1 %v16733_v61  ;;  %v5372_v12 = vsub.f32 %v16758_v19, %v5371_v25 }
 0x5e3   : > { %5125 = vmatmul.mubr.f32.gmra.mxu0 %v16447_v45  ;;  %v5391_v45 = vand.u32 4294901760, %v16777_v2  ;;  %v5373_v17 = vand.u32 4294901760, %v5372_v12 }
 0x5e4   : > { %13665 = vmatmul.mubr.f32.vlgmr.msra.gmra.mxu1 %v16742_v13  ;;  %5130 = vmatprep.mubr.f32.mxu0 %v16497_v1  ;;  %v16808_v1 = vsub.f32 %v4034_v60, %v16789_v57 }
 0x5e5   : > { %13667 = vmatprep.mubr.f32.mxu1 %v16750_v50  ;;  %13697 = vmatpush3.msra.mxu1 %v16619_v20 }
 0x5e6   : > { %13698 = vmatprep.subr.mxu1 %v16639_v55  ;;  %v5431_v51 = vand.u32 4294901760, %v16808_v1 }
 0x5e7   : > { %5132 = vmatmul.mubr.f32.gmra.mxu0 %v16470_v24  ;;  %13699 = vmatpush3.msra.mxu1 %v16639_v55  ;;  %v5392_v24 = vsub.f32 %v16777_v2, %v5391_v45 }
 0x5e8   : > { %13668 = vmatmul.mubr.f32.gmra.mxu1 %v16760_v34  ;;  %13644 = vmatprep.mubr.f32.mxu0 %v5363_v36  ;;  %v5432_v41 = vsub.f32 %v16808_v1, %v5431_v51 }
 0x5e9   : > { %13670 = vmatprep.mubr.f32.mxu1 %v16766_v18  ;;  %13700 = vmatprep.subr.mxu1 %v16661_v3  ;;  %v5393_v54 = vand.u32 4294901760, %v5392_v24 }
 0x5ea   : > { %13701 = vmatpush3.msra.mxu1 %v16661_v3  ;;  %v5433_v48 = vand.u32 4294901760, %v5432_v41 }
 0x5eb   : > { %13645 = vmatmul.mubr.f32.vlgmr.msra.gmra.mxu0 %v5373_v17  ;;  %13702 = vmatprep.subr.mxu1 %v16674_v0 }
 0x5ec   : > { %13671 = vmatmul.mubr.f32.gmra.mxu1 %v16780_v29  ;;  %13677 = vmatpush3.msra.mxu0 %v16637_v6  ;;  %v5413_v6 = vand.u32 4294901760, %v5412_v11 }
 0x5ed   : > { %13647 = vmatprep.mubr.f32.mxu0 %v5383_v26  ;;  %13673 = vmatprep.mubr.f32.mxu1 %v16787_v8 }
 0x5ee   : > { %13678 = vmatprep.subr.mxu0 %v16659_v21  ;;  %13703 = vmatpush3.msra.mxu1 %v16674_v0 }
 0x5ef   : > { %13648 = vmatmul.mubr.f32.gmra.mxu0 %v5393_v54  ;;  %13736 = vmatprep.subr.mxu1 %v16619_v20 }
 0x5f0   : > { %13674 = vmatmul.mubr.f32.gmra.mxu1 %v16789_v57  ;;  %13679 = vmatpush3.msra.mxu0 %v16659_v21  ;;  %v16878_v21 = vld [vmem:[%s19692_s8] ss:$0 sm:$0xff] }
 0x5f1   : > { %13650 = vmatprep.mubr.f32.mxu0 %v5403_v27  ;;  %13704 = vmatprep.mubr.f32.mxu1 %v5361_v46 }
 0x5f2   : > { %13680 = vmatprep.subr.mxu0 %v16685_v9 }
 0x5f3   : > { %13651 = vmatmul.mubr.f32.gmra.mxu0 %v5413_v6 }
 0x5f4   : > { %13681 = vmatpush3.msra.mxu0 %v16685_v9  ;;  %13705 = vmatmul.mubr.f32.vlgmr.msra.gmra.mxu1 %v5371_v25 }
 0x5f5   : > { %13653 = vmatprep.mubr.f32.mxu0 %v5423_v49  ;;  %13707 = vmatprep.mubr.f32.mxu1 %v5381_v58 }
 0x5f6   : > { %13682 = vmatprep.subr.mxu0 %v16697_v7  ;;  %13737 = vmatpush3.msra.mxu1 %v16619_v20 }
 0x5f7   : > { %13654 = vmatmul.mubr.f32.gmra.mxu0 %v5433_v48  ;;  %13738 = vmatprep.subr.mxu1 %v16639_v55 }
 0x5f8   : > { %13683 = vmatpush3.msra.mxu0 %v16697_v7  ;;  %13708 = vmatmul.mubr.f32.gmra.mxu1 %v5391_v45 }
 0x5f9   : > { %13684 = vmatprep.mubr.f32.mxu0 %v16747_v4  ;;  %13710 = vmatprep.mubr.f32.mxu1 %v5401_v44 }
 0x5fa   : > { %13716 = vmatprep.subr.mxu0 %v16656_v52  ;;  %13739 = vmatpush3.msra.mxu1 %v16639_v55 }
 0x5fb   : > { %13685 = vmatmul.mubr.f32.vlgmr.msra.gmra.mxu0 %v16758_v19  ;;  %13740 = vmatprep.subr.mxu1 %v16661_v3 }
 0x5fc   : > { %13711 = vmatmul.mubr.f32.gmra.mxu1 %v5411_v56  ;;  %13717 = vmatpush3.msra.mxu0 %v16656_v52 }
 0x5fd   : > { %13687 = vmatprep.mubr.f32.mxu0 %v16769_v42  ;;  %13713 = vmatprep.mubr.f32.mxu1 %v5421_v23 }
 0x5fe   : > { %13718 = vmatprep.subr.mxu0 %v16682_v14  ;;  %13741 = vmatpush3.msra.mxu1 %v16661_v3 }
 0x5ff   : > { %13688 = vmatmul.mubr.f32.gmra.mxu0 %v16777_v2  ;;  %13742 = vmatprep.subr.mxu1 %v16674_v0 }
 0x600   : > { %13714 = vmatmul.mubr.f32.gmra.mxu1 %v5431_v51  ;;  %13719 = vmatpush3.msra.mxu0 %v16682_v14 }
 0x601   : > { %13690 = vmatprep.mubr.f32.mxu0 %v16792_v63  ;;  %13744 = vmatprep.mubr.f32.mxu1 %v16733_v61 }
 0x602   : > { %13720 = vmatprep.subr.mxu0 %v16705_v28  ;;  %13743 = vmatpush3.msra.mxu1 %v16674_v0 }
 0x603   : > { %13691 = vmatmul.mubr.f32.gmra.mxu0 %v16799_v62  ;;  %v12278_v20 = vpop.f32.mrf.mxu1 }
 0x604   : > { %13721 = vmatpush3.msra.mxu0 %v16705_v28  ;;  %13745 = vmatmul.mubr.f32.vlgmr.msra.gmra.mxu1 %v16742_v13 }
 0x605   : > { %13693 = vmatprep.mubr.f32.mxu0 %v16812_v47  ;;  %13747 = vmatprep.mubr.f32.mxu1 %v16750_v50  ;;  %v12279_v52 = vpop.f32.mrf.mxu1 }
 0x606   : > { %13722 = vmatprep.subr.mxu0 %v16714_v30  ;;  %v12280_v14 = vadd.f32 %v12279_v52, %v12278_v20 }
 0x607   : > { %13694 = vmatmul.mubr.f32.gmra.mxu0 %v16808_v1 }
 0x608   : > { %13723 = vmatpush3.msra.mxu0 %v16714_v30  ;;  %13748 = vmatmul.mubr.f32.gmra.mxu1 %v16760_v34 }
 0x609   : > { %13724 = vmatprep.mubr.f32.mxu0 %v16733_v61  ;;  %13750 = vmatprep.mubr.f32.mxu1 %v16766_v18 }
 0x60b   : > { %13725 = vmatmul.mubr.f32.vlgmr.msra.gmra.mxu0 %v16742_v13  ;;  %v12222_v55 = vpop.f32.mrf.mxu0 }
 0x60c   : > { %13751 = vmatmul.mubr.f32.gmra.mxu1 %v16780_v29  ;;  %13727 = vmatprep.mubr.f32.mxu0 %v16750_v50 }
 0x60d   : > { %13753 = vmatprep.mubr.f32.mxu1 %v16787_v8  ;;  %v12223_v3 = vpop.f32.mrf.mxu0 }
 0x60e   : > { %v12224_v0 = vadd.f32 %v12223_v3, %v12222_v55 }
 0x60f   : > { %13728 = vmatmul.mubr.f32.gmra.mxu0 %v16760_v34 }
 0x610   : > { %13730 = vmatprep.mubr.f32.mxu0 %v16766_v18  ;;  %13754 = vmatmul.mubr.f32.gmra.mxu1 %v16789_v57  ;;  %v4145_v9 = vadd.f32 %v12224_v0, %v16878_v21 }
 0x612   : > { %v16885_v7 = vadd.f32 %v12280_v14, %v4145_v9 }
 0x613   : > { %13731 = vmatmul.mubr.f32.gmra.mxu0 %v16780_v29 }
 0x614   : > { %13733 = vmatprep.mubr.f32.mxu0 %v16787_v8 }
 0x616   : > { %v12281_v28 = vpop.f32.mrf.mxu1 }
 0x617   : > { %13734 = vmatmul.mubr.f32.gmra.mxu0 %v16789_v57 }
 0x618   : > { %v12282_v61 = vpop.f32.mrf.mxu1 }
 0x619   : > { %v12283_v5 = vadd.f32 %v12282_v61, %v12281_v28 }
 0x61c   : > { %v12284_v59 = vpop.f32.mrf.mxu1 }
 0x61e   : > { %v12225_v30 = vpop.f32.mrf.mxu0  ;;  %v12285_v4 = vpop.f32.mrf.mxu1 }
 0x61f   : > { %v12286_v35 = vadd.f32 %v12285_v4, %v12284_v59 }
 0x620   : > { %v12226_v38 = vpop.f32.mrf.mxu0 }
 0x621   : > { %v12227_v22 = vadd.f32 %v12226_v38, %v12225_v30 }
 0x623   : > { %v4160_v13 = vadd.f32 %v12227_v22, %v16878_v21 }
 0x624   : > { %v12228_v39 = vpop.f32.mrf.mxu0 }
 0x625   : > { %v16889_v31 = vadd.f32 %v12283_v5, %v4160_v13 }
 0x626   : > { %v12229_v50 = vpop.f32.mrf.mxu0 }
 0x627   : > { %v12230_v40 = vadd.f32 %v12229_v50, %v12228_v39 }
 0x629   : > { %v4175_v19 = vadd.f32 %v12230_v40, %v16878_v21 }
 0x62b   : > { %v16892_v34 = vadd.f32 %v12286_v35, %v4175_v19 }
 0x62e   : > { %v12287_v16 = vpop.f32.mrf.mxu1 }
 0x630   : > { %v12288_v46 = vpop.f32.mrf.mxu1 }
 0x631   : > { %v12289_v33 = vadd.f32 %v12288_v46, %v12287_v16 }
 0x634   : > { %v12290_v42 = vpop.f32.mrf.mxu1 }
 0x636   : > { %v12231_v15 = vpop.f32.mrf.mxu0  ;;  %v12291_v29 = vpop.f32.mrf.mxu1 }
 0x637   : > { %v12292_v8 = vadd.f32 %v12291_v29, %v12290_v42 }
 0x638   : > { %v12232_v37 = vpop.f32.mrf.mxu0 }
 0x639   : > { %v12233_v18 = vadd.f32 %v12232_v37, %v12231_v15 }
 0x63b   : > { %v4190_v60 = vadd.f32 %v12233_v18, %v16878_v21 }
 0x63c   : > { %v12234_v2 = vpop.f32.mrf.mxu0 }
 0x63d   : > { %v16895_v25 = vadd.f32 %v12289_v33, %v4190_v60 }
 0x63e   : > { %v12235_v53 = vpop.f32.mrf.mxu0 }
 0x63f   : > { %v12236_v58 = vadd.f32 %v12235_v53, %v12234_v2 }
 0x641   : > { %v4205_v57 = vadd.f32 %v12236_v58, %v16878_v21 }
 0x643   : > { %v16898_v63 = vadd.f32 %v12292_v8, %v4205_v57 }
 0x646   : > { %v12293_v12 = vpop.f32.mrf.mxu1 }
 0x648   : > { %v12294_v62 = vpop.f32.mrf.mxu1 }
 0x649   : > { %v12295_v17 = vadd.f32 %v12294_v62, %v12293_v12 }
 0x64c   : > { %v12296_v45 = vpop.f32.mrf.mxu1 }
 0x64e   : > { %v12237_v36 = vpop.f32.mrf.mxu0  ;;  %v12297_v32 = vpop.f32.mrf.mxu1 }
 0x64f   : > { %v12298_v27 = vadd.f32 %v12297_v32, %v12296_v45 }
 0x650   : > { %v12238_v1 = vpop.f32.mrf.mxu0 }
 0x651   : > { %v12239_v44 = vadd.f32 %v12238_v1, %v12237_v36 }
 0x652   : > { %v12299_v47 = vpop.f32.mrf.mxu1 }
 0x653   : > { %v4220_v24 = vadd.f32 %v12239_v44, %v16878_v21 }
 0x654   : > { %v12240_v56 = vpop.f32.mrf.mxu0  ;;  %v12300_v26 = vpop.f32.mrf.mxu1 }
 0x655   : > { %v4517_v10 = vadd.f32 %v12295_v17, %v4220_v24  ;;  %v12301_v3 = vadd.f32 %v12300_v26, %v12299_v47 }
 0x656   : > { %v12241_v23 = vpop.f32.mrf.mxu0  ;;  %v12390_v51 = vpop.f32.mrf.mxu1 }
 0x657   : > { %v12242_v54 = vadd.f32 %v12241_v23, %v12240_v56 }
 0x658   : > { %v12391_v11 = vpop.f32.mrf.mxu1 }
 0x659   : > { %v4235_v43 = vadd.f32 %v12242_v54, %v16878_v21  ;;  %v12392_v38 = vadd.f32 %v12391_v11, %v12390_v51 }
 0x65a   : > { %v12243_v41 = vpop.f32.mrf.mxu0  ;;  %v12393_v6 = vpop.f32.mrf.mxu1 }
 0x65b   : > { %v4524_v49 = vadd.f32 %v12298_v27, %v4235_v43 }
 0x65c   : > { %v12244_v48 = vpop.f32.mrf.mxu0  ;;  %v12394_v20 = vpop.f32.mrf.mxu1 }
 0x65d   : > { %v12245_v55 = vadd.f32 %v12244_v48, %v12243_v41  ;;  %v12395_v40 = vadd.f32 %v12394_v20, %v12393_v6 }
 0x65e   : > { %v12334_v52 = vpop.f32.mrf.mxu0 }
 0x65f   : > { %v4250_v0 = vadd.f32 %v12245_v55, %v16878_v21  ;;  %v12396_v14 = vpop.f32.mrf.mxu1 }
 0x660   : > { %v12335_v9 = vpop.f32.mrf.mxu0 }
 0x661   : > { %v12336_v28 = vadd.f32 %v12335_v9, %v12334_v52  ;;  %v12397_v30 = vpop.f32.mrf.mxu1  ;;  %v16903_v61 = vadd.f32 %v12301_v3, %v4250_v0 }
 0x662   : > { %v12398_v18 = vadd.f32 %v12397_v30, %v12396_v14 }
 0x663   : > { %v4669_v22 = vadd.f32 %v12336_v28, %v16885_v7 }
 0x664   : > { %v12337_v59 = vpop.f32.mrf.mxu0 }
 0x665   : > { %v12399_v5 = vpop.f32.mrf.mxu1  ;;  %v16906_v13 = vadd.f32 %v12392_v38, %v4669_v22 }
 0x666   : > { %v12338_v39 = vpop.f32.mrf.mxu0 }
 0x667   : > { %v12339_v4 = vadd.f32 %v12338_v39, %v12337_v59  ;;  %v12400_v50 = vpop.f32.mrf.mxu1 }
 0x668   : > { %v12401_v58 = vadd.f32 %v12400_v50, %v12399_v5 }
 0x669   : > { %v4678_v35 = vadd.f32 %v12339_v4, %v16889_v31 }
 0x66a   : > { %v12340_v21 = vpop.f32.mrf.mxu0 }
 0x66b   : > { %v12402_v19 = vpop.f32.mrf.mxu1  ;;  %v16909_v16 = vadd.f32 %v12395_v40, %v4678_v35 }
 0x66c   : > { %v12341_v15 = vpop.f32.mrf.mxu0 }
 0x66d   : > { %v12342_v46 = vadd.f32 %v12341_v15, %v12340_v21  ;;  %v12403_v37 = vpop.f32.mrf.mxu1 }
 0x66e   : > { %v12404_v32 = vadd.f32 %v12403_v37, %v12402_v19 }
 0x66f   : > { %v4687_v7 = vadd.f32 %v12342_v46, %v16892_v34 }
 0x670   : > { %v12343_v42 = vpop.f32.mrf.mxu0 }
 0x671   : > { %v12405_v33 = vpop.f32.mrf.mxu1  ;;  %v16912_v60 = vadd.f32 %v12398_v18, %v4687_v7 }
 0x672   : > { %v12344_v2 = vpop.f32.mrf.mxu0 }
 0x673   : > { %v12345_v29 = vadd.f32 %v12344_v2, %v12343_v42  ;;  %v12406_v53 = vpop.f32.mrf.mxu1 }
 0x675   : > { %v4696_v31 = vadd.f32 %v12345_v29, %v16895_v25  ;;  %v12407_v25 = vadd.f32 %v12406_v53, %v12405_v33 }
 0x676   : > { %v12346_v8 = vpop.f32.mrf.mxu0 }
 0x677   : > { %v12408_v57 = vpop.f32.mrf.mxu1  ;;  %v16915_v12 = vadd.f32 %v12401_v58, %v4696_v31 }
 0x678   : > { %v12347_v62 = vpop.f32.mrf.mxu0 }
 0x679   : > { %v12348_v45 = vadd.f32 %v12347_v62, %v12346_v8  ;;  %v12409_v36 = vpop.f32.mrf.mxu1 }
 0x67a   : > { %v12410_v41 = vadd.f32 %v12409_v36, %v12408_v57 }
 0x67b   : > { %v4705_v34 = vadd.f32 %v12348_v45, %v16898_v63 }
 0x67c   : > { %v12349_v1 = vpop.f32.mrf.mxu0 }
 0x67d   : > { %v16918_v44 = vpop.f32.mrf.mxu1  ;;  %v16920_v47 = vadd.f32 %v12404_v32, %v4705_v34 }
 0x67e   : > { %v12350_v17 = vpop.f32.mrf.mxu0 }
 0x67f   : > { %v12351_v24 = vadd.f32 %v12350_v17, %v12349_v1  ;;  %v16922_v56 = vpop.f32.mrf.mxu1 }
 0x681   : > { %v4714_v26 = vadd.f32 %v12351_v24, %v4517_v10 }
 0x682   : > { %v12352_v23 = vpop.f32.mrf.mxu0 }
 0x683   : > { %v16924_v51 = vpop.f32.mrf.mxu1  ;;  %v16926_v54 = vadd.f32 %v12407_v25, %v4714_v26 }
 0x684   : > { %v12353_v11 = vpop.f32.mrf.mxu0 }
 0x685   : > { %v12354_v27 = vadd.f32 %v12353_v11, %v12352_v23  ;;  %v16928_v43 = vpop.f32.mrf.mxu1 }
 0x686   : > { %v12355_v63 = vpop.f32.mrf.mxu0 }
 0x687   : > { %v4723_v6 = vadd.f32 %v12354_v27, %v4524_v49  ;;  %v12505_v48 = vpop.f32.mrf.mxu1 }
 0x688   : > { %v12356_v20 = vpop.f32.mrf.mxu0 }
 0x689   : > { %v12506_v55 = vpop.f32.mrf.mxu1  ;;  %v16930_v52 = vadd.f32 %v12410_v41, %v4723_v6 }
 0x68b   : > { %v12446_v3 = vpop.f32.mrf.mxu0 }
 0x68c   : > { %v16932_v0 = vpop.f32.mrf.mxu1 }
 0x68d   : > { %v12447_v10 = vpop.f32.mrf.mxu0 }
 0x68e   : > { %v16934_v14 = vpop.f32.mrf.mxu1  ;;  %v12448_v41 = vadd.f32 %v12447_v10, %v12446_v3  ;;  %v12504_v3 = vadd.f32 %v16928_v43, %v16924_v51  ;;  %v12413_v51 = vadd.f32 %v16922_v56, %v16918_v44 }
 0x68f   : > { %v12449_v9 = vpop.f32.mrf.mxu0 }
 0x690   : > { %v12511_v28 = vpop.f32.mrf.mxu1 }
 0x691   : > { %v12450_v30 = vpop.f32.mrf.mxu0 }
 0x692   : > { %v12512_v38 = vpop.f32.mrf.mxu1  ;;  %v12451_v23 = vadd.f32 %v12450_v30, %v12449_v9 }
 0x693   : > { %v12452_v22 = vpop.f32.mrf.mxu0 }
 0x694   : > { %v16936_v59 = vpop.f32.mrf.mxu1 }
 0x695   : > { %v12453_v5 = vpop.f32.mrf.mxu0 }
 0x696   : > { %v16938_v49 = vpop.f32.mrf.mxu1  ;;  %v12454_v9 = vadd.f32 %v12453_v5, %v12452_v22 }
 0x697   : > { %v12455_v39 = vpop.f32.mrf.mxu0  ;;  %v12516_v56 = vadd.f32 %v16938_v49, %v16936_v59 }
 0x698   : > { %v16940_v4 = vpop.f32.mrf.mxu1 }
 0x699   : > { %v12456_v50 = vpop.f32.mrf.mxu0 }
 0x69a   : > { %v16942_v40 = vpop.f32.mrf.mxu1 }
 0x69b   : > { %v12458_v35 = vpop.f32.mrf.mxu0 }
 0x69c   : > { %v16944_v21 = vpop.f32.mrf.mxu1 }
 0x69d   : > { %v12459_v19 = vpop.f32.mrf.mxu0 }
 0x69e   : > { %v16946_v15 = vpop.f32.mrf.mxu1 }
 0x69f   : > { %v12461_v46 = vpop.f32.mrf.mxu0  ;;  %v12522_v49 = vadd.f32 %v16946_v15, %v16944_v21 }
 0x6a0   : > { %v16948_v37 = vpop.f32.mrf.mxu1 }
 0x6a1   : > { %v12462_v18 = vpop.f32.mrf.mxu0 }
 0x6a2   : > { %v16950_v7 = vpop.f32.mrf.mxu1 }
 0x6a3   : > { %v12464_v42 = vpop.f32.mrf.mxu0 }
 0x6a4   : > { %v13666_v33 = vpop.f32.mrf.mxu1 }
 0x6a5   : > { %v12465_v2 = vpop.f32.mrf.mxu0 }
 0x6a6   : > { %v16952_v29 = vpop.f32.mrf.mxu1 }
 0x6a7   : > { %v12467_v53 = vpop.f32.mrf.mxu0 }
 0x6a8   : > { %v16954_v58 = vpop.f32.mrf.mxu1 }
 0x6a9   : > { %v12468_v31 = vpop.f32.mrf.mxu0 }
 0x6aa   : > { %v16956_v8 = vpop.f32.mrf.mxu1  ;;  %v12469_v43 = vadd.f32 %v12468_v31, %v12467_v53 }
 0x6ab   : > { %20184 = vst [vmem:[#allocation49_spill] sm:$0xff] %v16956_v8  ;;  %v13646_v57 = vpop.f32.mrf.mxu0  ;;  %v12357_v8 = vadd.f32 %v12356_v20, %v12355_v63  ;;  %v12463_v63 = vadd.f32 %v12462_v18, %v12461_v46 }
 0x6ac   : > { %v16958_v62 = vpop.f32.mrf.mxu1 }
 0x6ad   : > { %20185 = vst [vmem:[#allocation47_spill] sm:$0xff] %v16958_v62  ;;  %v5365_v45 = vpop.f32.mrf.mxu0  ;;  %v12457_v62 = vadd.f32 %v12456_v50, %v12455_v39  ;;  %v12460_v39 = vadd.f32 %v12459_v19, %v12458_v35  ;;  %v12510_v50 = vadd.f32 %v16934_v14, %v16932_v0  ;;  %v12519_v0 = vadd.f32 %v16942_v40, %v16940_v4 }
 0x6ae   : > { %v16960_v36 = vpop.f32.mrf.mxu1 }
 0x6af   : > { %20186 = vst [vmem:[#allocation48_spill] sm:$0xff] %v16960_v36  ;;  %v13649_v32 = vpop.f32.mrf.mxu0  ;;  %v5106_v10 = vadd.f32 %v12457_v62, %v16915_v12 }
 0x6b0   : > { %v16962_v34 = vpop.f32.mrf.mxu1 }
 0x6b1   : > { %20187 = vst [vmem:[#allocation52_spill] sm:$0xff] %v16962_v34  ;;  %v5385_v1 = vpop.f32.mrf.mxu0  ;;  %v5092_v34 = vadd.f32 %v12451_v23, %v16909_v16  ;;  %v4732_v16 = vadd.f32 %v12357_v8, %v16903_v61 }
 0x6b2   : > { %v16964_v17 = vpop.f32.mrf.mxu1 }
 0x6b3   : > { %20188 = vst [vmem:[#allocation53_spill] sm:$0xff] %v16964_v17  ;;  %v16966_v24 = vpop.f32.mrf.mxu0  ;;  %v4917_v19 = vadd.f32 %v12413_v51, %v4732_v16 }
 0x6b4   : > { %20189 = vst [vmem:[#allocation51_spill] sm:$0xff] %v16966_v24  ;;  %v16968_v25 = vpop.f32.mrf.mxu1 }
 0x6b5   : > { %20190 = vst [vmem:[#allocation21_spill] sm:$0xff] %v16968_v25  ;;  %v16970_v26 = vpop.f32.mrf.mxu0  ;;  %v12507_v25 = vadd.f32 %v12506_v55, %v12505_v48  ;;  %v12513_v48 = vadd.f32 %v12512_v38, %v12511_v28  ;;  %v5113_v28 = vadd.f32 %v12460_v39, %v16920_v47  ;;  %v12466_v38 = vadd.f32 %v12465_v2, %v12464_v42 }
 0x6b6   : > { %20191 = vst [vmem:[#allocation15_spill] sm:$0xff] %v16970_v26  ;;  %v16972_v11 = vpop.f32.mrf.mxu1  ;;  %v5085_v26 = vadd.f32 %v12448_v41, %v16906_v13  ;;  %v5099_v13 = vadd.f32 %v12454_v9, %v16912_v60  ;;  %v5120_v60 = vadd.f32 %v12463_v63, %v16926_v54  ;;  %v5134_v14 = vadd.f32 %v12469_v43, %v4917_v19  ;;  %v20201_v63 = vld [vmem:[#allocation47_spill] sm:$0xff] }
 0x6b7   : > { %20192 = vst [vmem:[#allocation22_spill] sm:$0xff] %v16972_v11  ;;  %v16974_v27 = vpop.f32.mrf.mxu0  ;;  %v5259_v61 = vadd.f32 %v12513_v48, %v5106_v10  ;;  %v12525_v42 = vadd.f32 %v16950_v7, %v16948_v37  ;;  %v5127_v2 = vadd.f32 %v12466_v38, %v16930_v52  ;;  %v20197_v37 = vld [vmem:[#allocation49_spill] sm:$0xff] }
 0x6b8   : > { %v16976_v6 = vpop.f32.mrf.mxu1  ;;  %v5238_v22 = vadd.f32 %v12504_v3, %v5085_v26  ;;  %v5252_v8 = vadd.f32 %v12510_v50, %v5099_v13  ;;  %v20202_v13 = vld [vmem:[#allocation48_spill] sm:$0xff] }
 0x6b9   : > { %20193 = vst [vmem:[#allocation16_spill] sm:$0xff] %v16976_v6  ;;  %v16978_v36 = vpop.f32.mrf.mxu0  ;;  %v5245_v6 = vadd.f32 %v12507_v25, %v5092_v34  ;;  %v5396_v18 = vadd.f32 %v13649_v32, %v5259_v61  ;;  %v5266_v32 = vadd.f32 %v12516_v56, %v5113_v28  ;;  %v20204_v28 = vld [vmem:[#allocation52_spill] sm:$0xff] }
 0x6ba   : > { %20194 = vst [vmem:[#allocation25_spill] sm:$0xff] %v16978_v36  ;;  %v16981_v17 = vpop.f32.mrf.mxu1  ;;  %v5366_v62 = vadd.f32 %v5365_v45, %v5238_v22  ;;  %v5386_v31 = vadd.f32 %v5385_v1, %v5252_v8  ;;  %v20205_v56 = vld [vmem:[#allocation53_spill] sm:$0xff] }
 0x6bb   : > { %v13686_v24 = vpop.f32.mrf.mxu0  ;;  %v5376_v55 = vadd.f32 %v13646_v57, %v5245_v6  ;;  %v5545_v59 = vadd.f32 %v16954_v58, %v5396_v18  ;;  %v20195_v4 = vld [vmem:[#allocation51_spill] sm:$0xff] }
 0x6bc   : > { %v16984_v30 = vpop.f32.mrf.mxu1  ;;  %v5527_v47 = vadd.f32 %v16952_v29, %v5366_v62  ;;  %v5287_v29 = vadd.f32 %v12525_v42, %v5134_v14  ;;  %v5539_v7 = vadd.f32 %v20197_v37, %v5386_v31  ;;  %v20198_v52 = vld [vmem:[#allocation21_spill] sm:$0xff] }
 0x6bd   : > { %v5648_v11 = vpop.f32.mrf.mxu0  ;;  %v5533_v57 = vadd.f32 %v13666_v33, %v5376_v55  ;;  %v5273_v33 = vadd.f32 %v12519_v0, %v5120_v60  ;;  %v20196_v1 = vld [vmem:[#allocation15_spill] sm:$0xff] }
 0x6be   : > { %v16989_v36 = vpop.f32.mrf.mxu1  ;;  %v5649_v25 = vadd.f32 %v5648_v11, %v5527_v47  ;;  %v5436_v9 = vadd.f32 %v16974_v27, %v5287_v29  ;;  %v5280_v11 = vadd.f32 %v12522_v49, %v5127_v2  ;;  %v20199_v16 = vld [vmem:[#allocation22_spill] sm:$0xff] }
 0x6bf   : > { %v13689_v20 = vpop.f32.mrf.mxu0  ;;  %v5656_v45 = vadd.f32 %v13686_v24, %v5533_v57  ;;  %v5416_v40 = vadd.f32 %v20195_v4, %v5273_v33  ;;  %v5406_v24 = vadd.f32 %v20196_v1, %v5266_v32 }
 0x6c0   : > { %v16993_v5 = vpop.f32.mrf.mxu1  ;;  %v5670_v41 = vadd.f32 %v13689_v20, %v5545_v59  ;;  %v5775_v21 = vadd.f32 %v20199_v16, %v5649_v25  ;;  %v20203_v50 = vld [vmem:[#allocation16_spill] sm:$0xff] }
 0x6c1   : > { %v5662_v12 = vpop.f32.mrf.mxu0  ;;  %v5783_v6 = vadd.f32 %v20198_v52, %v5656_v45  ;;  %v20200_v15 = vld [vmem:[#allocation25_spill] sm:$0xff]  ;;  %v5557_v48 = vadd.f32 %v20201_v63, %v5416_v40  ;;  %v5551_v55 = vadd.f32 %v20202_v13, %v5406_v24 }
 0x6c2   : > { %v16999_v35 = vpop.f32.mrf.mxu1  ;;  %v5663_v58 = vadd.f32 %v5662_v12, %v5539_v7  ;;  %v5426_v39 = vadd.f32 %v20200_v15, %v5280_v11  ;;  %v5799_v62 = vadd.f32 %v20203_v50, %v5670_v41  ;;  %v5569_v12 = vadd.f32 %v20204_v28, %v5436_v9 }
 0x6c3   : > { %v13692_v46 = vpop.f32.mrf.mxu0 }
 0x6c4   : > { %v13746_v44 = vpop.f32.mrf.mxu1  ;;  %v5684_v27 = vadd.f32 %v13692_v46, %v5557_v48  ;;  %v5791_v8 = vadd.f32 %v16981_v17, %v5663_v58  ;;  %v5563_v0 = vadd.f32 %v20205_v56, %v5426_v39  ;;  %v11888_v39 = vld [vmem:[%s19685_s1 + $0x18] sm:$0xff] }
 0x6c5   : > { %v5676_v53 = vpop.f32.mrf.mxu0  ;;  %v17058_v48 = vand.u32 4294901760, %v11888_v39 }
 0x6c6   : > { %v6030_v54 = vpop.f32.mrf.mxu1  ;;  %v5677_v61 = vadd.f32 %v5676_v53, %v5551_v55  ;;  %v5815_v42 = vadd.f32 %v16984_v30, %v5684_v27  ;;  %v11887_v55 = vld [vmem:[%s19685_s1 + $0x10] sm:$0xff] }
 0x6c7   : > { %v13695_v34 = vpop.f32.mrf.mxu0  ;;  %13756 = vmatprep.subr.mxu0 %v17058_v48 }
 0x6c8   : > { %v13749_v26 = vpop.f32.mrf.mxu1  ;;  %v5698_v57 = vadd.f32 %v13695_v34, %v5569_v12  ;;  %13757 = vmatpush3.msra.mxu0 %v17058_v48 }
 0x6c9   : > { %v5690_v23 = vpop.f32.mrf.mxu0 }
 0x6ca   : > { %v6042_v22 = vpop.f32.mrf.mxu1  ;;  %v5691_v47 = vadd.f32 %v5690_v23, %v5563_v0  ;;  %v5831_v49 = vadd.f32 %v16993_v5, %v5698_v57 }
 0x6cb   : > { %v13726_v3 = vpop.f32.mrf.mxu0 }
 0x6cc   : > { %v5920_v10 = vadd.f32 %v13726_v3, %v5783_v6  ;;  %v5823_v29 = vadd.f32 %v16999_v35, %v5691_v47 }
 0x6cd   : > { %v5913_v20 = vpop.f32.mrf.mxu0 }
 0x6ce   : > { %v17023_v51 = vadd.f32 %v13746_v44, %v5920_v10  ;;  %v5914_v43 = vadd.f32 %v5913_v20, %v5775_v21  ;;  %v13752_v44 = vpop.f32.mrf.mxu1  ;;  %v17065_v20 = vsub.f32 %v11888_v39, %v17058_v48 }
 0x6cf   : > { %v13729_v60 = vpop.f32.mrf.mxu0 }
 0x6d0   : > { %v6077_v38 = vadd.f32 2.0, %v17023_v51  ;;  %v17028_v19 = vadd.f32 %v6030_v54, %v5914_v43  ;;  %v5932_v18 = vadd.f32 %v13729_v60, %v5799_v62  ;;  %v5807_v54 = vadd.f32 %v16989_v36, %v5677_v61  ;;  %v6054_v34 = vpop.f32.mrf.mxu1 }
 0x6d1   : > { %v5925_v14 = vpop.f32.mrf.mxu0  ;;  %v17067_v43 = vand.u32 4294901760, %v11887_v55  ;;  %v17071_v27 = vand.u32 4294901760, %v17065_v20 }
 0x6d2   : > { %v11880_v31 = vmul.f32 -1.442695, %v6077_v38  ;;  %v6076_v45 = vadd.f32 2.0, %v17028_v19  ;;  %v17033_v46 = vadd.f32 %v13749_v26, %v5932_v18  ;;  %v5926_v53 = vadd.f32 %v5925_v14, %v5791_v8  ;;  %v13755_v36 = vpop.f32.mrf.mxu1 }
 0x6d3   : > { %v13732_v2 = vpop.f32.mrf.mxu0  ;;  %v17074_v61 = vsub.f32 %v11887_v55, %v17067_v43  ;;  %13758 = vmatprep.subr.mxu0 %v17067_v43  ;;  %v6402_v60 = vsub.f32 %v17065_v20, %v17071_v27  ;;  %v20211_v55 = vld [vmem:[#allocation10_spill] sm:$0xff] }
 0x6d4   : > { %14294 = vpow2.f32 %v11880_v31  ;;  %v11879_v33 = vmul.f32 -1.442695, %v6076_v45  ;;  %v6079_v17 = vadd.f32 2.0, %v17033_v46  ;;  %v17038_v32 = vadd.f32 %v6042_v22, %v5926_v53  ;;  %v6066_v11 = vpop.f32.mrf.mxu1  ;;  %13759 = vmatpush3.msra.mxu0 %v17067_v43 }
 0x6d5   : > { %v5944_v25 = vadd.f32 %v13732_v2, %v5815_v42  ;;  %v5937_v59 = vpop.f32.mrf.mxu0  ;;  %v17081_v38 = vand.u32 4294901760, %v17074_v61  ;;  %13788 = vmatprep.subr.mxu0 %v17065_v20  ;;  %v6403_v8 = vand.u32 4294901760, %v6402_v60 }
 0x6d6   : > { %14296 = vpow2.f32 %v11879_v33  ;;  %v11882_v4 = vmul.f32 -1.442695, %v6079_v17  ;;  %v6078_v40 = vadd.f32 2.0, %v17038_v32  ;;  %v5938_v1 = vadd.f32 %v5937_v59, %v5807_v54 }
 0x6d7   : > { %v17042_v30 = vadd.f32 %v13752_v44, %v5944_v25  ;;  %v13735_v24 = vpop.f32.mrf.mxu0  ;;  %v6409_v57 = vsub.f32 %v17074_v61, %v17081_v38  ;;  %13772 = vmatprep.subr.mxu1 %v6403_v8 }
 0x6d8   : > { %14298 = vpow2.f32 %v11882_v4  ;;  %v11881_v26 = vmul.f32 -1.442695, %v6078_v40  ;;  %v17045_v23 = vadd.f32 %v6054_v34, %v5938_v1  ;;  %v5956_v41 = vadd.f32 %v13735_v24, %v5831_v49  ;;  %13773 = vmatpush3.msra.mxu1 %v6403_v8  ;;  %v20206_v49 = vld [vmem:[#allocation5_spill] sm:$0xff]  ;;  %v20207_v24 = vld [vmem:[#allocation6_spill] sm:$0xff] }
 0x6d9   : > { %v6081_v37 = vadd.f32 2.0, %v17042_v30  ;;  %v5949_v7 = vpop.f32.mrf.mxu0  ;;  %v6410_v14 = vand.u32 4294901760, %v6409_v57  ;;  %v6133_v4 = vadd.f32 %v17023_v51, %v20206_v49 }
 0x6da   : > { %14300 = vpow2.f32 %v11881_v26  ;;  %v6080_v5 = vadd.f32 2.0, %v17045_v23  ;;  %v17049_v52 = vadd.f32 %v13755_v36, %v5956_v41  ;;  %v5950_v6 = vadd.f32 %v5949_v7, %v5823_v29 }
 0x6db   : > { %v11884_v9 = vmul.f32 -1.442695, %v6081_v37  ;;  %13774 = vmatprep.subr.mxu1 %v6410_v14  ;;  %v6132_v36 = vadd.f32 %v17028_v19, %v20207_v24  ;;  %v20208_v37 = vld [vmem:[#allocation7_spill] sm:$0xff] }
 0x6dc   : > { %v11883_v3 = vmul.f32 -1.442695, %v6080_v5  ;;  %v6083_v58 = vadd.f32 2.0, %v17049_v52  ;;  %v17052_v35 = vadd.f32 %v6066_v11, %v5950_v6  ;;  %13775 = vmatpush3.msra.mxu1 %v6410_v14  ;;  %v6135_v7 = vadd.f32 %v17033_v46, %v20208_v37 }
 0x6dd   : > { %14302 = vpow2.f32 %v11884_v9  ;;  %13804 = vmatprep.subr.mxu1 %v17058_v48 }
 0x6de   : > { %14304 = vpow2.f32 %v11883_v3  ;;  %v11886_v10 = vmul.f32 -1.442695, %v6083_v58  ;;  %v6082_v16 = vadd.f32 2.0, %v17052_v35  ;;  %v20209_v3 = vld [vmem:[#allocation8_spill] sm:$0xff] }
 0x6df   : > { %v6134_v19 = vadd.f32 %v17038_v32, %v20209_v3  ;;  %v6136_v32 = vadd.f32 %v17045_v23, %v20211_v55 }
 0x6e0   : > { %14306 = vpow2.f32 %v11886_v10  ;;  %v11885_v21 = vmul.f32 -1.442695, %v6082_v16 }
 0x6e1   : > { %v14295_v15 = vpop.eup %14294 }
 0x6e2   : > { %v6109_v63 = vadd.f32 1.0, %v14295_v15  ;;  %14308 = vpow2.f32 %v11885_v21 }
 0x6e3   : > { %v14297_v13 = vpop.eup %14296 }
 0x6e4   : > { %14310 = vrcp.f32 %v6109_v63  ;;  %v6108_v22 = vadd.f32 1.0, %v14297_v13  ;;  %v20210_v63 = vld [vmem:[#allocation9_spill] sm:$0xff] }
 0x6e5   : > { %v14299_v50 = vpop.eup %14298  ;;  %v6137_v13 = vadd.f32 %v17042_v30, %v20210_v63 }
 0x6e6   : > { %14312 = vrcp.f32 %v6108_v22  ;;  %v6111_v62 = vadd.f32 1.0, %v14299_v50 }
 0x6e7   : > { %v14301_v28 = vpop.eup %14300 }
 0x6e8   : > { %14314 = vrcp.f32 %v6111_v62  ;;  %v6110_v12 = vadd.f32 1.0, %v14301_v28 }
 0x6ea   : > { %v14303_v18 = vpop.eup %14302  ;;  %14316 = vrcp.f32 %v6110_v12 }
 0x6eb   : > { %v14305_v56 = vpop.eup %14304  ;;  %v6113_v0 = vadd.f32 1.0, %v14303_v18 }
 0x6ec   : > { %v6112_v44 = vadd.f32 1.0, %v14305_v56  ;;  %v20212_v56 = vld [vmem:[#allocation11_spill] sm:$0xff] }
 0x6ed   : > { %v14307_v31 = vpop.eup %14306  ;;  %14318 = vrcp.f32 %v6113_v0  ;;  %v6139_v0 = vadd.f32 %v17049_v52, %v20212_v56  ;;  %v20213_v52 = vld [vmem:[#allocation12_spill] sm:$0xff] }
 0x6ee   : > { %14320 = vrcp.f32 %v6112_v44  ;;  %v6115_v45 = vadd.f32 1.0, %v14307_v31 }
 0x6ef   : > { %v14309_v53 = vpop.eup %14308 }
 0x6f0   : > { %14322 = vrcp.f32 %v6115_v45  ;;  %v6114_v47 = vadd.f32 1.0, %v14309_v53 }
 0x6f1   : > { %v14311_v42 = vpop.eup %14310 }
 0x6f2   : > { %14324 = vrcp.f32 %v6114_v47  ;;  %6150 = vrot.lane.b32.xlu1 %v14311_v42, %s14375_s26  ;;  %v6138_v42 = vadd.f32 %v17052_v35, %v20213_v52 }
 0x6f3   : > { %v14313_v2 = vpop.eup %14312 }
 0x6f4   : > { %6148 = vrot.lane.b32.xlu0 %v14313_v2, %s14375_s26 }
 0x6f5   : > { %v14315_v54 = vpop.eup %14314 }
 0x6f6   : > { %6154 = vrot.lane.b32.xlu1 %v14315_v54, %s14375_s26 }
 0x6f7   : > { %v14317_v33 = vpop.eup %14316 }
 0x6f8   : > { %6152 = vrot.lane.b32.xlu0 %v14317_v33, %s14375_s26 }
 0x6fa   : > { %v14319_v17 = vpop.eup %14318 }
 0x6fb   : > { %v14321_v34 = vpop.eup %14320  ;;  %6158 = vrot.lane.b32.xlu1 %v14319_v17, %s14375_s26 }
 0x6fc   : > { %6156 = vrot.lane.b32.xlu0 %v14321_v34, %s14375_s26 }
 0x6fd   : > { %v14323_v25 = vpop.eup %14322 }
 0x6ff   : > { %v14325_v59 = vpop.eup %14324  ;;  %6162 = vrot.lane.b32.xlu1 %v14323_v25, %s14375_s26 }
 0x700   : > { %6160 = vrot.lane.b32.xlu0 %v14325_v59, %s14375_s26 }
 0x764   : > { %v6151_v40 = vpop.permute.xlu1 %6150 }
 0x765   : > { %v6173_v1 = vmul.f32 %v6151_v40, %v6133_v4 }
 0x766   : > { %v6149_v29 = vpop.permute.xlu0 %6148 }
 0x767   : > { %v6181_v26 = vsel %vm328_vm2, %v20206_v49, %v6173_v1  ;;  %v6172_v41 = vmul.f32 %v6149_v29, %v6132_v36 }
 0x768   : > { %v6203_v5 = vsel %vm725_vm1, %v6181_v26, 0  ;;  %v6155_v6 = vpop.permute.xlu1 %6154 }
 0x769   : > { %v17104_v9 = vand.u32 4294901760, %v6203_v5  ;;  %v6180_v51 = vsel %vm328_vm2, %v20207_v24, %v6172_v41  ;;  %v6175_v11 = vmul.f32 %v6155_v6, %v6135_v7 }
 0x76a   : > { %v6200_v58 = vsel %vm725_vm1, %v6180_v51, 0  ;;  %v6153_v10 = vpop.permute.xlu0 %6152 }
 0x76b   : > { %v17112_v16 = vsub.f32 %v6203_v5, %v17104_v9  ;;  %v6183_v46 = vsel %vm328_vm2, %v20208_v37, %v6175_v11  ;;  %v6174_v21 = vmul.f32 %v6153_v10, %v6134_v19  ;;  %v17116_v15 = vand.u32 4294901760, %v6200_v58 }
 0x76c   : > { %v6209_v39 = vsel %vm725_vm1, %v6183_v46, 0 }
 0x76d   : > { %v6302_v22 = vand.u32 4294901760, %v17112_v16  ;;  %v6182_v50 = vsel %vm328_vm2, %v20209_v3, %v6174_v21  ;;  %v6159_v62 = vpop.permute.xlu1 %6158  ;;  %13776 = vmatprep.mubr.f32.mxu1 %v17116_v15  ;;  %v17127_v28 = vand.u32 4294901760, %v6209_v39  ;;  %v17130_v12 = vsub.f32 %v6200_v58, %v17116_v15 }
 0x76e   : > { %v6206_v60 = vsel %vm725_vm1, %v6182_v50, 0  ;;  %v6177_v18 = vmul.f32 %v6159_v62, %v6137_v13  ;;  %13777 = vmatmul.mubr.f32.vlgmr.msra.gmra.mxu1 %v17104_v9  ;;  %v6157_v30 = vpop.permute.xlu0 %6156 }
 0x76f   : > { %v6176_v23 = vmul.f32 %v6157_v30, %v6136_v32  ;;  %v17134_v8 = vand.u32 4294901760, %v6206_v60  ;;  %v6292_v57 = vand.u32 4294901760, %v17130_v12  ;;  %13805 = vmatpush3.msra.mxu1 %v17058_v48  ;;  %v6303_v44 = vsub.f32 %v17112_v16, %v6302_v22 }
 0x770   : > { %v6185_v14 = vsel %vm328_vm2, %v20210_v63, %v6177_v18  ;;  %v17146_v31 = vsub.f32 %v6209_v39, %v17127_v28  ;;  %13806 = vmatprep.subr.mxu1 %v17067_v43 }
 0x771   : > { %v6215_v45 = vsel %vm725_vm1, %v6185_v14, 0  ;;  %v6184_v53 = vsel %vm328_vm2, %v20211_v55, %v6176_v23  ;;  %v6163_v47 = vpop.permute.xlu1 %6162  ;;  %13779 = vmatprep.mubr.f32.mxu1 %v17134_v8  ;;  %v6293_v2 = vsub.f32 %v17130_v12, %v6292_v57  ;;  %13807 = vmatpush3.msra.mxu1 %v17067_v43  ;;  %v6311_v25 = vsub.f32 %v6206_v60, %v17134_v8 }
 0x772   : > { %v6212_v54 = vsel %vm725_vm1, %v6184_v53, 0  ;;  %v6179_v33 = vmul.f32 %v6163_v47, %v6139_v0  ;;  %13780 = vmatmul.mubr.f32.gmra.mxu1 %v17127_v28  ;;  %v6161_v17 = vpop.permute.xlu0 %6160  ;;  %v17159_v34 = vand.u32 4294901760, %v6215_v45  ;;  %13836 = vmatprep.subr.mxu1 %v17058_v48  ;;  %v6322_v35 = vand.u32 4294901760, %v17146_v31 }
 0x773   : > { %v6178_v59 = vmul.f32 %v6161_v17, %v6138_v42  ;;  %v6294_v49 = vand.u32 4294901760, %v6293_v2  ;;  %v17163_v4 = vand.u32 4294901760, %v6212_v54  ;;  %v6304_v40 = vand.u32 4294901760, %v6303_v44 }
 0x774   : > { %v6187_v1 = vsel %vm328_vm2, %v20212_v56, %v6179_v33  ;;  %v6312_v24 = vand.u32 4294901760, %v6311_v25  ;;  %v6341_v36 = vsub.f32 %v6215_v45, %v17159_v34  ;;  %v6323_v41 = vsub.f32 %v17146_v31, %v6322_v35 }
 0x775   : > { %v6221_v29 = vsel %vm725_vm1, %v6187_v1, 0  ;;  %v6186_v26 = vsel %vm328_vm2, %v20213_v52, %v6178_v59  ;;  %13760 = vmatprep.mubr.f32.mxu0 %v6294_v49  ;;  %13782 = vmatprep.mubr.f32.mxu1 %v17163_v4  ;;  %v6331_v37 = vsub.f32 %v6212_v54, %v17163_v4  ;;  %v11890_v54 = vld [vmem:[%s19686_s2 + $0x1] ss:$0 sm:$0xff] }
 0x776   : > { %v6218_v7 = vsel %vm725_vm1, %v6186_v26, 0  ;;  %13761 = vmatmul.mubr.f32.vlgmr.msra.gmra.mxu0 %v6304_v40  ;;  %13783 = vmatmul.mubr.f32.gmra.mxu1 %v17159_v34  ;;  %v6313_v5 = vsub.f32 %v6311_v25, %v6312_v24  ;;  %v17177_v6 = vand.u32 4294901760, %v6221_v29  ;;  %v6342_v51 = vand.u32 4294901760, %v6341_v36 }
 0x777   : > { %13789 = vmatpush3.msra.mxu0 %v17065_v20  ;;  %v6350_v11 = vand.u32 4294901760, %v6218_v7  ;;  %v6332_v3 = vand.u32 4294901760, %v6331_v37  ;;  %v6324_v10 = vand.u32 4294901760, %v6323_v41 }
 0x778   : > { %v6314_v19 = vand.u32 4294901760, %v6313_v5  ;;  %13790 = vmatprep.subr.mxu0 %v17074_v61  ;;  %v6361_v58 = vsub.f32 %v6221_v29, %v17177_v6  ;;  %v6343_v21 = vsub.f32 %v6341_v36, %v6342_v51 }
 0x779   : > { %13785 = vmatprep.mubr.f32.mxu1 %v6350_v11  ;;  %v6333_v46 = vsub.f32 %v6331_v37, %v6332_v3  ;;  %13791 = vmatpush3.msra.mxu0 %v17074_v61  ;;  %v6351_v39 = vsub.f32 %v6218_v7, %v6350_v11 }
 0x77a   : > { %13763 = vmatprep.mubr.f32.mxu0 %v6314_v19  ;;  %13786 = vmatmul.mubr.f32.gmra.mxu1 %v17177_v6  ;;  %v6362_v63 = vand.u32 4294901760, %v6361_v58  ;;  %v6344_v55 = vand.u32 4294901760, %v6343_v21 }
 0x77b   : > { %13764 = vmatmul.mubr.f32.gmra.mxu0 %v6324_v10  ;;  %13808 = vmatprep.mubr.f32.mxu1 %v6292_v57  ;;  %v6334_v20 = vand.u32 4294901760, %v6333_v46  ;;  %v6352_v13 = vand.u32 4294901760, %v6351_v39 }
 0x77c   : > { %13820 = vmatprep.subr.mxu0 %v17071_v27  ;;  %v6363_v50 = vsub.f32 %v6361_v58, %v6362_v63 }
 0x77d   : > { %13766 = vmatprep.mubr.f32.mxu0 %v6334_v20  ;;  %v6353_v32 = vsub.f32 %v6351_v39, %v6352_v13 }
 0x77e   : > { %13809 = vmatmul.mubr.f32.vlgmr.msra.gmra.mxu1 %v6302_v22  ;;  %v6364_v62 = vand.u32 4294901760, %v6363_v50 }
 0x77f   : > { %13767 = vmatmul.mubr.f32.gmra.mxu0 %v6344_v55  ;;  %13811 = vmatprep.mubr.f32.mxu1 %v6312_v24  ;;  %v6354_v61 = vand.u32 4294901760, %v6353_v32 }
 0x780   : > { %13837 = vmatpush3.msra.mxu1 %v17058_v48  ;;  %v6999_v48 = vld [vmem:[#allocation3 + $0x1] sm:$0xff] }
 0x781   : > { %13769 = vmatprep.mubr.f32.mxu0 %v6354_v61  ;;  %13838 = vmatprep.subr.mxu1 %v17067_v43 }
 0x782   : > { %13812 = vmatmul.mubr.f32.gmra.mxu1 %v6322_v35  ;;  %7071 = vrot.lane.b32.xlu0 %v6999_v48, %s14375_s26 }
 0x783   : > { %13770 = vmatmul.mubr.f32.gmra.mxu0 %v6364_v62  ;;  %13814 = vmatprep.mubr.f32.mxu1 %v6332_v3 }
 0x784   : > { %13792 = vmatprep.mubr.f32.mxu0 %v17130_v12  ;;  %13839 = vmatpush3.msra.mxu1 %v17067_v43  ;;  %v7046_v43 = vld [vmem:[#allocation3 + $0x90] sm:$0xff] }
 0x785   : > { %7245 = vrot.lane.b32.xlu1 %v7046_v43, %s14372_s22 }
 0x786   : > { %13815 = vmatmul.mubr.f32.gmra.mxu1 %v6342_v51 }
 0x787   : > { %13793 = vmatmul.mubr.f32.vlgmr.msra.gmra.mxu0 %v17112_v16  ;;  %13817 = vmatprep.mubr.f32.mxu1 %v6352_v13 }
 0x788   : > { %13821 = vmatpush3.msra.mxu0 %v17071_v27  ;;  %13795 = vmatprep.mubr.f32.mxu0 %v6311_v25  ;;  %v7007_v27 = vld [vmem:[#allocation3 + $0x2] sm:$0xff] }
 0x789   : > { %13822 = vmatprep.subr.mxu0 %v17081_v38  ;;  %7103 = vrot.lane.b32.xlu0 %v7007_v27, %s14373_s25 }
 0x78a   : > { %13818 = vmatmul.mubr.f32.gmra.mxu1 %v6362_v63  ;;  %13823 = vmatpush3.msra.mxu0 %v17081_v38  ;;  %v7054_v38 = vld [vmem:[#allocation3 + $0x91] sm:$0xff] }
 0x78b   : > { %13796 = vmatmul.mubr.f32.gmra.mxu0 %v17146_v31  ;;  %13840 = vmatprep.mubr.f32.mxu1 %v17116_v15 }
 0x78c   : > { %13798 = vmatprep.mubr.f32.mxu0 %v6331_v37  ;;  %7277 = vrot.lane.b32.xlu1 %v7054_v38, %s14376_s27 }
 0x78e   : > { %13841 = vmatmul.mubr.f32.vlgmr.msra.gmra.mxu1 %v17104_v9 }
 0x78f   : > { %13799 = vmatmul.mubr.f32.gmra.mxu0 %v6341_v36  ;;  %13843 = vmatprep.mubr.f32.mxu1 %v17134_v8 }
 0x790   : > { %13801 = vmatprep.mubr.f32.mxu0 %v6351_v39 }
 0x792   : > { %13844 = vmatmul.mubr.f32.gmra.mxu1 %v17127_v28 }
 0x793   : > { %13802 = vmatmul.mubr.f32.gmra.mxu0 %v6361_v58  ;;  %13846 = vmatprep.mubr.f32.mxu1 %v17163_v4 }
 0x794   : > { %13824 = vmatprep.mubr.f32.mxu0 %v17116_v15 }
 0x796   : > { %13847 = vmatmul.mubr.f32.gmra.mxu1 %v17159_v34 }
 0x797   : > { %13825 = vmatmul.mubr.f32.vlgmr.msra.gmra.mxu0 %v17104_v9  ;;  %13849 = vmatprep.mubr.f32.mxu1 %v6350_v11 }
 0x798   : > { %13827 = vmatprep.mubr.f32.mxu0 %v17134_v8 }
 0x79a   : > { %13850 = vmatmul.mubr.f32.gmra.mxu1 %v17177_v6 }
 0x79b   : > { %13828 = vmatmul.mubr.f32.gmra.mxu0 %v17127_v28 }
 0x79c   : > { %13830 = vmatprep.mubr.f32.mxu0 %v17163_v4 }
 0x79f   : > { %13831 = vmatmul.mubr.f32.gmra.mxu0 %v17159_v34 }
 0x7a0   : > { %13833 = vmatprep.mubr.f32.mxu0 %v6350_v11 }
 0x7a3   : > { %13834 = vmatmul.mubr.f32.gmra.mxu0 %v17177_v6 }
 0x82e   : > { %v13778_v9 = vpop.f32.mrf.mxu1 }
 0x830   : > { %v6447_v16 = vpop.f32.mrf.mxu1 }
 0x832   : > { %v13781_v15 = vpop.f32.mrf.mxu1 }
 0x834   : > { %v6459_v22 = vpop.f32.mrf.mxu1 }
 0x836   : > { %v13762_v28 = vpop.f32.mrf.mxu0  ;;  %v13784_v12 = vpop.f32.mrf.mxu1 }
 0x837   : > { %v6307_v25 = vadd.f32 %v13762_v28, %v11890_v54 }
 0x838   : > { %v6296_v60 = vpop.f32.mrf.mxu0  ;;  %v6471_v18 = vpop.f32.mrf.mxu1 }
 0x839   : > { %v6297_v4 = vadd.f32 %v11890_v54, %v6296_v60  ;;  %v6454_v24 = vadd.f32 %v13778_v9, %v6307_v25 }
 0x83a   : > { %v13787_v30 = vpop.f32.mrf.mxu1 }
 0x83b   : > { %v13765_v23 = vpop.f32.mrf.mxu0  ;;  %v6448_v37 = vadd.f32 %v6447_v16, %v6297_v4 }
 0x83c   : > { %v6483_v8 = vpop.f32.mrf.mxu1  ;;  %v6327_v1 = vadd.f32 %v13765_v23, %v11890_v54 }
 0x83d   : > { %v6316_v57 = vpop.f32.mrf.mxu0 }
 0x83e   : > { %v13810_v56 = vpop.f32.mrf.mxu1  ;;  %v6317_v26 = vadd.f32 %v11890_v54, %v6316_v57  ;;  %v6466_v11 = vadd.f32 %v13781_v15, %v6327_v1 }
 0x83f   : > { %v13768_v0 = vpop.f32.mrf.mxu0 }
 0x840   : > { %v6689_v44 = vpop.f32.mrf.mxu1  ;;  %v6347_v6 = vadd.f32 %v13768_v0, %v11890_v54  ;;  %v6460_v10 = vadd.f32 %v6459_v22, %v6317_v26 }
 0x841   : > { %v6336_v14 = vpop.f32.mrf.mxu0 }
 0x842   : > { %v13813_v31 = vpop.f32.mrf.mxu1  ;;  %v6337_v3 = vadd.f32 %v11890_v54, %v6336_v14  ;;  %v6478_v13 = vadd.f32 %v13784_v12, %v6347_v6 }
 0x843   : > { %v13771_v45 = vpop.f32.mrf.mxu0 }
 0x844   : > { %v6705_v53 = vpop.f32.mrf.mxu1  ;;  %v6367_v21 = vadd.f32 %v13771_v45, %v11890_v54  ;;  %v6472_v61 = vadd.f32 %v6471_v18, %v6337_v3 }
 0x845   : > { %v6356_v47 = vpop.f32.mrf.mxu0 }
 0x846   : > { %v13816_v52 = vpop.f32.mrf.mxu1  ;;  %v6357_v50 = vadd.f32 %v11890_v54, %v6356_v47  ;;  %v6490_v9 = vadd.f32 %v13787_v30, %v6367_v21 }
 0x847   : > { %v13794_v42 = vpop.f32.mrf.mxu0 }
 0x848   : > { %v17214_v2 = vpop.f32.mrf.mxu1  ;;  %v6573_v41 = vadd.f32 %v13794_v42, %v6454_v24  ;;  %v6484_v23 = vadd.f32 %v6483_v8, %v6357_v50 }
 0x849   : > { %v6565_v33 = vpop.f32.mrf.mxu0 }
 0x84a   : > { %v17219_v17 = vpop.f32.mrf.mxu1  ;;  %v6566_v51 = vadd.f32 %v6565_v33, %v6448_v37  ;;  %v6698_v46 = vadd.f32 %v13810_v56, %v6573_v41  ;;  %v11898_v41 = vld [vmem:[%s19687_s3 + $0x80] sm:$0xff] }
 0x84b   : > { %v13797_v34 = vpop.f32.mrf.mxu0  ;;  %v17284_v6 = vand.u32 4294901760, %v11898_v41 }
 0x84c   : > { %v17221_v59 = vpop.f32.mrf.mxu1  ;;  %v6587_v58 = vadd.f32 %v13797_v34, %v6466_v11  ;;  %v6690_v32 = vadd.f32 %v6689_v44, %v6566_v51  ;;  %v11897_v51 = vld [vmem:[%s19687_s3 + $0x78] sm:$0xff] }
 0x84d   : > { %v6579_v49 = vpop.f32.mrf.mxu0  ;;  %v17298_v3 = vsub.f32 %v11898_v41, %v17284_v6 }
 0x84e   : > { %v13842_v35 = vpop.f32.mrf.mxu1  ;;  %v6580_v20 = vadd.f32 %v6579_v49, %v6460_v10  ;;  %v6714_v38 = vadd.f32 %v13813_v31, %v6587_v58  ;;  %v11896_v58 = vld [vmem:[%s19687_s3 + $0x70] sm:$0xff] }
 0x84f   : > { %v13800_v40 = vpop.f32.mrf.mxu0  ;;  %v17312_v21 = vand.u32 4294901760, %v17298_v3 }
 0x850   : > { %v6937_v36 = vpop.f32.mrf.mxu1  ;;  %v6601_v48 = vadd.f32 %v13800_v40, %v6478_v13  ;;  %v6706_v60 = vadd.f32 %v6705_v53, %v6580_v20  ;;  %v11895_v20 = vld [vmem:[%s19687_s3 + $0x68] sm:$0xff] }
 0x851   : > { %v6593_v29 = vpop.f32.mrf.mxu0 }
 0x852   : > { %v13845_v5 = vpop.f32.mrf.mxu1  ;;  %v6594_v22 = vadd.f32 %v6593_v29, %v6472_v61  ;;  %v6730_v30 = vadd.f32 %v13816_v52, %v6601_v48  ;;  %v17335_v61 = vand.u32 4294901760, %v11895_v20 }
 0x853   : > { %v13803_v7 = vpop.f32.mrf.mxu0 }
 0x854   : > { %v6949_v39 = vpop.f32.mrf.mxu1  ;;  %v6615_v18 = vadd.f32 %v13803_v7, %v6490_v9  ;;  %v6722_v8 = vadd.f32 %v17214_v2, %v6594_v22  ;;  %v17358_v22 = vsub.f32 %v11895_v20, %v17335_v61 }
 0x855   : > { %v6607_v19 = vpop.f32.mrf.mxu0 }
 0x856   : > { %v13848_v16 = vpop.f32.mrf.mxu1  ;;  %v6608_v31 = vadd.f32 %v6607_v19, %v6484_v23  ;;  %v6746_v52 = vadd.f32 %v17219_v17, %v6615_v18  ;;  %v17300_v19 = vand.u32 4294901760, %v11897_v51  ;;  %v11892_v18 = vld [vmem:[%s19687_s3 + $0x50] sm:$0xff] }
 0x857   : > { %v13826_v63 = vpop.f32.mrf.mxu0 }
 0x858   : > { %v6829_v55 = vadd.f32 %v13826_v63, %v6698_v46  ;;  %v6961_v44 = vpop.f32.mrf.mxu1  ;;  %v6738_v2 = vadd.f32 %v17221_v59, %v6608_v31  ;;  %v11899_v59 = vld [vmem:[%s19687_s3 + $0x88] sm:$0xff]  ;;  %v17317_v63 = vand.u32 4294901760, %v11896_v58 }
 0x859   : > { %v6822_v62 = vpop.f32.mrf.mxu0  ;;  %v17270_v26 = vand.u32 4294901760, %v11899_v59 }
 0x85a   : > { %v17223_v43 = vadd.f32 %v13842_v35, %v6829_v55  ;;  %v6823_v27 = vadd.f32 %v6822_v62, %v6690_v32  ;;  %v13851_v33 = vpop.f32.mrf.mxu1  ;;  %v7604_v55 = vsub.f32 %v17298_v3, %v17312_v21  ;;  %v17332_v50 = vsub.f32 %v11896_v58, %v17317_v63  ;;  %v11894_v62 = vld [vmem:[%s19687_s3 + $0x60] sm:$0xff] }
 0x85b   : > { %v13829_v15 = vpop.f32.mrf.mxu0  ;;  %13852 = vmatprep.subr.mxu0 %v17270_v26 }
 0x85c   : > { %20214 = vst [vmem:[#allocation17_spill] sm:$0xff] %v17223_v43  ;;  %6984 = vst.msk [vmem:[#allocation3 + $0x21] sm:$0xff] %vm328_vm2, %v17223_v43  ;;  %v17227_v28 = vadd.f32 %v6937_v36, %v6823_v27  ;;  %v6841_v12 = vadd.f32 %v13829_v15, %v6714_v38  ;;  %v6973_v1 = vpop.f32.mrf.mxu1  ;;  %13853 = vmatpush3.msra.mxu0 %v17270_v26  ;;  %v7605_v27 = vand.u32 4294901760, %v7604_v55  ;;  %v17346_v9 = vand.u32 4294901760, %v17332_v50  ;;  %v11893_v15 = vld [vmem:[%s19687_s3 + $0x58] sm:$0xff] }
 0x85d   : > { %v6834_v57 = vpop.f32.mrf.mxu0  ;;  %13854 = vmatprep.subr.mxu0 %v17284_v6 }
 0x85e   : > { %20215 = vst [vmem:[#allocation26_spill] sm:$0xff] %v17227_v28  ;;  %6983 = vst.msk [vmem:[#allocation3 + $0x11] sm:$0xff] %vm328_vm2, %v17227_v28  ;;  %v17231_v56 = vadd.f32 %v13845_v5, %v6841_v12  ;;  %v6835_v0 = vadd.f32 %v6834_v57, %v6706_v60  ;;  %v17282_v5 = vsub.f32 %v11899_v59, %v17270_v26  ;;  %13855 = vmatpush3.msra.mxu0 %v17284_v6 }
 0x85f   : > { %v13832_v14 = vpop.f32.mrf.mxu0  ;;  %13856 = vmatprep.subr.mxu0 %v17300_v19  ;;  %v17360_v12 = vand.u32 4294901760, %v11893_v15  ;;  %v7618_v23 = vsub.f32 %v17332_v50, %v17346_v9 }
 0x860   : > { %20216 = vst [vmem:[#allocation18_spill] sm:$0xff] %v17231_v56  ;;  %6986 = vst.msk [vmem:[#allocation3 + $0x41] sm:$0xff] %vm328_vm2, %v17231_v56  ;;  %v17235_v45 = vadd.f32 %v6949_v39, %v6835_v0  ;;  %v6853_v47 = vadd.f32 %v13832_v14, %v6730_v30  ;;  %v17295_v11 = vand.u32 4294901760, %v17282_v5  ;;  %v17315_v39 = vsub.f32 %v11897_v51, %v17300_v19 }
 0x861   : > { %v6846_v53 = vpop.f32.mrf.mxu0  ;;  %13857 = vmatpush3.msra.mxu0 %v17300_v19  ;;  %v17372_v0 = vand.u32 4294901760, %v17358_v22  ;;  %v17375_v30 = vsub.f32 %v11893_v15, %v17360_v12  ;;  %v7619_v31 = vand.u32 4294901760, %v7618_v23 }
 0x862   : > { %20217 = vst [vmem:[#allocation29_spill] sm:$0xff] %v17235_v45  ;;  %6985 = vst.msk [vmem:[#allocation3 + $0x31] sm:$0xff] %vm328_vm2, %v17235_v45  ;;  %v17240_v42 = vadd.f32 %v13848_v16, %v6853_v47  ;;  %v6847_v54 = vadd.f32 %v6846_v53, %v6722_v8  ;;  %v7597_v46 = vsub.f32 %v17282_v5, %v17295_v11  ;;  %v17329_v32 = vand.u32 4294901760, %v17315_v39  ;;  %v11891_v8 = vld [vmem:[%s19687_s3 + $0x48] sm:$0xff] }
 0x863   : > { %v13835_v34 = vpop.f32.mrf.mxu0  ;;  %v17243_v25 = vld [vmem:[#allocation3 + $0x20] sm:$0xff]  ;;  %v17348_v16 = vand.u32 4294901760, %v11894_v62  ;;  %13858 = vmatprep.subr.mxu0 %v17317_v63  ;;  %v7625_v53 = vsub.f32 %v17358_v22, %v17372_v0 }
 0x864   : > { %20218 = vst [vmem:[#allocation19_spill] sm:$0xff] %v17240_v42  ;;  %6988 = vst.msk [vmem:[#allocation3 + $0x61] sm:$0xff] %vm328_vm2, %v17240_v42  ;;  %v17247_v49 = vadd.f32 %v6961_v44, %v6847_v54  ;;  %v6865_v4 = vadd.f32 %v13835_v34, %v6746_v52  ;;  %7231 = vrot.lane.b32.xlu0 %v17243_v25, %s14372_s22  ;;  %7137 = vrot.lane.b32.xlu1 %v17243_v25, %s14377_s12  ;;  %v7024_v24 = vld [vmem:[#allocation3 + $0x21] sm:$0xff]  ;;  %v7598_v13 = vand.u32 4294901760, %v7597_v46 }
 0x865   : > { %v6858_v35 = vpop.f32.mrf.mxu0  ;;  %v17258_v36 = vld [vmem:[#allocation3 + $0x10] sm:$0xff]  ;;  %v17277_v37 = vld [vmem:[#allocation3 + $0x22] sm:$0xff]  ;;  %v7611_v38 = vsub.f32 %v17315_v39, %v17329_v32  ;;  %v17365_v57 = vsub.f32 %v11894_v62, %v17348_v16  ;;  %13859 = vmatpush3.msra.mxu0 %v17317_v63  ;;  %v17377_v44 = vand.u32 4294901760, %v11892_v18  ;;  %v17396_v54 = vand.u32 4294901760, %v17375_v30 }
 0x866   : > { %20219 = vst [vmem:[#allocation30_spill] sm:$0xff] %v17247_v49  ;;  %6987 = vst.msk [vmem:[#allocation3 + $0x51] sm:$0xff] %vm328_vm2, %v17247_v49  ;;  %v17256_v17 = vadd.f32 %v13851_v33, %v6865_v4  ;;  %v6859_v40 = vadd.f32 %v6858_v35, %v6738_v2  ;;  %v17279_v7 = vld [vmem:[#allocation3 + $0x11] sm:$0xff]  ;;  %13882 = vmatprep.subr.mxu1 %v7598_v13  ;;  %13860 = vmatprep.subr.mxu0 %v17335_v61  ;;  %v17401_v33 = vand.u32 4294901760, %v11891_v8 }
 0x867   : > { %v17307_v10 = vld [vmem:[#allocation3 + $0x12] sm:$0xff]  ;;  %v17341_v48 = vld [vmem:[#allocation3 + $0x41] sm:$0xff]  ;;  %13883 = vmatpush3.msra.mxu1 %v7598_v13  ;;  %v7612_v60 = vand.u32 4294901760, %v7611_v38  ;;  %v17383_v47 = vand.u32 4294901760, %v17365_v57  ;;  %13861 = vmatpush3.msra.mxu0 %v17335_v61  ;;  %v17399_v52 = vsub.f32 %v11892_v18, %v17377_v44  ;;  %v7626_v4 = vand.u32 4294901760, %v7625_v53  ;;  %v7072_v53 = vpop.permute.xlu0 %7071 }
 0x868   : > { %20220 = vst [vmem:[#allocation20_spill] sm:$0xff] %v17256_v17  ;;  %6990 = vst.msk [vmem:[#allocation3 + $0x81] sm:$0xff] %vm328_vm2, %v17256_v17  ;;  %v17262_v29 = vadd.f32 %v6973_v1, %v6859_v40  ;;  %7169 = vrot.lane.b32.xlu1 %v7024_v24, %s14371_s21  ;;  %7135 = vrot.lane.b32.xlu0 %v17258_v36, %s14377_s12  ;;  %v17380_v14 = vld [vmem:[#allocation3 + $0x42] sm:$0xff]  ;;  %v17410_v35 = vsub.f32 %v11891_v8, %v17401_v33 }
 0x869   : > { %13884 = vmatprep.subr.mxu1 %v7605_v27  ;;  %v7632_v34 = vsub.f32 %v17365_v57, %v17383_v47  ;;  %13862 = vmatprep.subr.mxu0 %v17348_v16  ;;  %v17407_v2 = vand.u32 4294901760, %v17399_v52  ;;  %v17413_v40 = vld [vmem:[#allocation3 + $0x30] sm:$0xff]  ;;  %v7639_v1 = vsub.f32 %v17375_v30, %v17396_v54  ;;  %v17441_v13 = vld [vmem:[#allocation3 + $0x40] sm:$0xff] }
 0x86a   : > { %20221 = vst [vmem:[#allocation33_spill] sm:$0xff] %v17262_v29  ;;  %6989 = vst.msk [vmem:[#allocation3 + $0x71] sm:$0xff] %vm328_vm2, %v17262_v29  ;;  %13885 = vmatpush3.msra.mxu1 %v7605_v27  ;;  %13863 = vmatpush3.msra.mxu0 %v17348_v16  ;;  %v17423_v59 = vand.u32 4294901760, %v17410_v35  ;;  %v7002_v51 = vld [vmem:[#allocation3 + $0x31] sm:$0xff] }
 0x86b   : > { %13886 = vmatprep.subr.mxu1 %v7612_v60  ;;  %13864 = vmatprep.subr.mxu0 %v17360_v12  ;;  %v7646_v41 = vsub.f32 %v17399_v52, %v17407_v2  ;;  %v7640_v58 = vand.u32 4294901760, %v7639_v1  ;;  %v7010_v20 = vld [vmem:[#allocation3 + $0x32] sm:$0xff]  ;;  %v7005_v55 = vld [vmem:[#allocation3 + $0x61] sm:$0xff] }
 0x86c   : > { %7201 = vrot.lane.b32.xlu1 %v17277_v37, %s14378_s23  ;;  %7167 = vrot.lane.b32.xlu0 %v17279_v7, %s14371_s21  ;;  %v7036_v62 = vld [vmem:[#allocation3 + $0x62] sm:$0xff]  ;;  %v7062_v1 = vld [vmem:[#allocation3 + $0x92] sm:$0xff] }
 0x86d   : > { %13887 = vmatpush3.msra.mxu1 %v7612_v60  ;;  %13865 = vmatpush3.msra.mxu0 %v17360_v12  ;;  %v7647_v46 = vand.u32 4294901760, %v7646_v41  ;;  %v7004_v27 = vld [vmem:[#allocation3 + $0x51] sm:$0xff] }
 0x86e   : > { %13888 = vmatprep.subr.mxu1 %v7619_v31  ;;  %13866 = vmatprep.subr.mxu0 %v17377_v44  ;;  %v7012_v38 = vld [vmem:[#allocation3 + $0x52] sm:$0xff] }
 0x86f   : > { %13889 = vmatpush3.msra.mxu1 %v7619_v31  ;;  %13867 = vmatpush3.msra.mxu0 %v17377_v44  ;;  %v17470_v15 = vld [vmem:[#allocation3 + $0x50] sm:$0xff]  ;;  %v7030_v60 = vld [vmem:[#allocation3 + $0x81] sm:$0xff]  ;;  %v17493_v31 = vpop.permute.xlu1 %7245 }
 0x870   : > { %7075 = vrot.lane.b32.xlu1 %v7024_v24, %s14375_s26  ;;  %7199 = vrot.lane.b32.xlu0 %v17307_v10, %s14378_s23  ;;  %v7038_v18 = vld [vmem:[#allocation3 + $0x82] sm:$0xff] }
 0x871   : > { %13890 = vmatprep.subr.mxu1 %v7626_v4  ;;  %13868 = vmatprep.subr.mxu0 %v17401_v33  ;;  %v7006_v23 = vld [vmem:[#allocation3 + $0x71] sm:$0xff] }
 0x872   : > { %13891 = vmatpush3.msra.mxu1 %v7626_v4  ;;  %13869 = vmatpush3.msra.mxu0 %v17401_v33  ;;  %v17495_v8 = vld [vmem:[#allocation3 + $0x70] sm:$0xff]  ;;  %v7104_v4 = vpop.permute.xlu0 %7103 }
 0x873   : > { %13912 = vmatprep.subr.mxu0 %v17282_v5 }
 0x874   : > { %7263 = vrot.lane.b32.xlu1 %v7024_v24, %s14376_s27  ;;  %7173 = vrot.lane.b32.xlu0 %v17341_v48, %s14371_s21  ;;  %v7633_v24 = vand.u32 4294901760, %v7632_v34  ;;  %v17503_v34 = vpop.permute.xlu1 %7277 }
 0x876   : > { %13892 = vmatprep.subr.mxu1 %v7633_v24 }
 0x877   : > { %13893 = vmatpush3.msra.mxu1 %v7633_v24 }
 0x878   : > { %7107 = vrot.lane.b32.xlu1 %v17277_v37, %s14373_s25  ;;  %7205 = vrot.lane.b32.xlu0 %v17380_v14, %s14378_s23 }
 0x879   : > { %13894 = vmatprep.subr.mxu1 %v7640_v58 }
 0x87a   : > { %13895 = vmatpush3.msra.mxu1 %v7640_v58 }
 0x87b   : > { %13896 = vmatprep.subr.mxu1 %v7647_v46 }
 0x87c   : > { %7295 = vrot.lane.b32.xlu1 %v17277_v37, %s14369_s17  ;;  %7233 = vrot.lane.b32.xlu0 %v17413_v40, %s14372_s22  ;;  %v7653_v37 = vsub.f32 %v17410_v35, %v17423_v59 }
 0x87d   : > { %13897 = vmatpush3.msra.mxu1 %v7647_v46 }
 0x880   : > { %7077 = vrot.lane.b32.xlu0 %v7002_v51, %s14375_s26  ;;  %7073 = vrot.lane.b32.xlu1 %v17279_v7, %s14375_s26  ;;  %v7654_v7 = vand.u32 4294901760, %v7653_v37 }
 0x882   : > { %13898 = vmatprep.subr.mxu1 %v7654_v7 }
 0x883   : > { %13899 = vmatpush3.msra.mxu1 %v7654_v7  ;;  %v6991_v7 = vld [vmem:[#allocation3] sm:$0xff] }
 0x884   : > { %7265 = vrot.lane.b32.xlu0 %v7002_v51, %s14376_s27  ;;  %7105 = vrot.lane.b32.xlu1 %v17307_v10, %s14373_s25  ;;  %v17453_v10 = vld [vmem:[#allocation3 + $0x60] sm:$0xff] }
 0x885   : > { %13942 = vmatprep.subr.mxu1 %v17270_v26 }
 0x888   : > { %7109 = vrot.lane.b32.xlu0 %v7010_v20, %s14373_s25  ;;  %7141 = vrot.lane.b32.xlu1 %v17441_v13, %s14377_s12 }
 0x88c   : > { %7297 = vrot.lane.b32.xlu0 %v7010_v20, %s14369_s17  ;;  %7079 = vrot.lane.b32.xlu1 %v17341_v48, %s14375_s26 }
 0x890   : > { %7171 = vrot.lane.b32.xlu0 %v7002_v51, %s14371_s21  ;;  %7111 = vrot.lane.b32.xlu1 %v17380_v14, %s14373_s25 }
 0x894   : > { %7145 = vrot.lane.b32.xlu0 %v17453_v10, %s14377_s12  ;;  %7235 = vrot.lane.b32.xlu1 %v17441_v13, %s14372_s22 }
 0x898   : > { %7083 = vrot.lane.b32.xlu0 %v7005_v55, %s14375_s26  ;;  %7267 = vrot.lane.b32.xlu1 %v17341_v48, %s14376_s27  ;;  %v7022_v48 = vld [vmem:[#allocation3 + $0x80] sm:$0xff] }
 0x89c   : > { %7209 = vrot.lane.b32.xlu0 %v7036_v62, %s14378_s23  ;;  %7299 = vrot.lane.b32.xlu1 %v17380_v14, %s14369_s17  ;;  %v7014_v14 = vld [vmem:[#allocation3 + $0x72] sm:$0xff] }
 0x8a0   : > { %7081 = vrot.lane.b32.xlu0 %v7004_v27, %s14375_s26  ;;  %7139 = vrot.lane.b32.xlu1 %v17413_v40, %s14377_s12 }
 0x8a4   : > { %7113 = vrot.lane.b32.xlu0 %v7012_v38, %s14373_s25  ;;  %7203 = vrot.lane.b32.xlu1 %v7010_v20, %s14378_s23 }
 0x8a8   : > { %7237 = vrot.lane.b32.xlu0 %v17470_v15, %s14372_s22  ;;  %7177 = vrot.lane.b32.xlu1 %v7005_v55, %s14371_s21 }
 0x8ac   : > { %7269 = vrot.lane.b32.xlu0 %v7004_v27, %s14376_s27  ;;  %7115 = vrot.lane.b32.xlu1 %v7036_v62, %s14373_s25 }
 0x8b0   : > { %7207 = vrot.lane.b32.xlu0 %v7012_v38, %s14378_s23  ;;  %7239 = vrot.lane.b32.xlu1 %v17453_v10, %s14372_s22 }
 0x8b4   : > { %7149 = vrot.lane.b32.xlu0 %v7022_v48, %s14377_s12  ;;  %7271 = vrot.lane.b32.xlu1 %v7005_v55, %s14376_s27 }
 0x8b8   : > { %7181 = vrot.lane.b32.xlu0 %v7030_v60, %s14371_s21  ;;  %7303 = vrot.lane.b32.xlu1 %v7036_v62, %s14369_s17  ;;  %v7319_v62 = vsel %vm328_vm2, %v6991_v7, %v7072_v53 }
 0x8bc   : > { %7243 = vrot.lane.b32.xlu0 %v7022_v48, %s14372_s22  ;;  %7143 = vrot.lane.b32.xlu1 %v17470_v15, %s14377_s12  ;;  %v7327_v48 = vsel %vm725_vm1, %v7319_v62, %v7104_v4 }
 0x8c0   : > { %7275 = vrot.lane.b32.xlu0 %v7030_v60, %s14376_s27  ;;  %7175 = vrot.lane.b32.xlu1 %v7004_v27, %s14371_s21 }
 0x8c4   : > { %7301 = vrot.lane.b32.xlu1 %v7012_v38, %s14369_s17  ;;  %7085 = vrot.lane.b32.xlu0 %v7006_v23, %s14375_s26 }
 0x8c8   : > { %7213 = vrot.lane.b32.xlu1 %v7038_v18, %s14378_s23  ;;  %7117 = vrot.lane.b32.xlu0 %v7014_v14, %s14373_s25 }
 0x8cc   : > { %7147 = vrot.lane.b32.xlu1 %v17495_v8, %s14377_s12  ;;  %7241 = vrot.lane.b32.xlu0 %v17495_v8, %s14372_s22 }
 0x8d0   : > { %7179 = vrot.lane.b32.xlu1 %v7006_v23, %s14371_s21  ;;  %7273 = vrot.lane.b32.xlu0 %v7006_v23, %s14376_s27 }
 0x8d4   : > { %7211 = vrot.lane.b32.xlu1 %v7014_v14, %s14378_s23  ;;  %7305 = vrot.lane.b32.xlu0 %v7014_v14, %s14369_s17 }
 0x8d6   : > { %v7232_v24 = vpop.permute.xlu0 %7231  ;;  %v7138_v41 = vpop.permute.xlu1 %7137 }
 0x8d8   : > { %7309 = vrot.lane.b32.xlu1 %v7062_v1, %s14369_s17  ;;  %7307 = vrot.lane.b32.xlu0 %v7038_v18, %s14369_s17 }
 0x8da   : > { %v7136_v51 = vpop.permute.xlu0 %7135  ;;  %v7170_v58 = vpop.permute.xlu1 %7169 }
 0x8db   : > { %v7335_v60 = vsel %vm1864_vm5, %v7327_v48, %v7136_v51 }
 0x8de   : > { %v7168_v37 = vpop.permute.xlu0 %7167  ;;  %v7202_v46 = vpop.permute.xlu1 %7201 }
 0x8df   : > { %v7343_v23 = vsel %vm356_vm6, %v7335_v60, %v7168_v37 }
 0x8e2   : > { %v7200_v20 = vpop.permute.xlu0 %7199  ;;  %v17509_v55 = vpop.permute.xlu1 %7075 }
 0x8e3   : > { %v7351_v18 = vsel %vm1881_vm7, %v7343_v23, %v7200_v20 }
 0x8e4   : > { %v7359_v29 = vsel %vm1890_vm8, %v7351_v18, %v7232_v24 }
 0x8e6   : > { %v17512_v27 = vpop.permute.xlu0 %7173  ;;  %v7264_v38 = vpop.permute.xlu1 %7263 }
 0x8e7   : > { %v7367_v17 = vsel %vm1899_vm9, %v7359_v29, %v7264_v38 }
 0x8ea   : > { %v17518_v14 = vpop.permute.xlu0 %7205  ;;  %v17520_v1 = vpop.permute.xlu1 %7107 }
 0x8ee   : > { %v7234_v53 = vpop.permute.xlu0 %7233  ;;  %v7296_v7 = vpop.permute.xlu1 %7295 }
 0x8ef   : > { %v7375_v49 = vsel %vm1908_vm10, %v7367_v17, %v7296_v7 }
 0x8f0   : > { %v7402_v4 = vsel %vm1933_vm11, %v7375_v49, 0 }
 0x8f1   : > { %v17526_v62 = vand.u32 4294901760, %v7402_v4 }
 0x8f2   : > { %v17528_v51 = vpop.permute.xlu0 %7077  ;;  %v7074_v37 = vpop.permute.xlu1 %7073 }
 0x8f3   : > { %v17531_v20 = vsub.f32 %v7402_v4, %v17526_v62  ;;  %13900 = vmatprep.mubr.f32.mxu1 %v17526_v62  ;;  %v7320_v29 = vsel %vm328_vm2, %v17258_v36, %v7074_v37 }
 0x8f5   : > { %v19852_v24 = vand.u32 4294901760, %v17531_v20 }
 0x8f6   : > { %v7266_v38 = vpop.permute.xlu0 %7265  ;;  %v7106_v48 = vpop.permute.xlu1 %7105 }
 0x8f7   : > { %v7328_v17 = vsel %vm725_vm1, %v7320_v29, %v7106_v48  ;;  %v7502_v49 = vsub.f32 %v17531_v20, %v19852_v24 }
 0x8f8   : > { %v7336_v60 = vsel %vm1864_vm5, %v7328_v17, %v7138_v41 }
 0x8f9   : > { %v7344_v23 = vsel %vm356_vm6, %v7336_v60, %v7170_v58  ;;  %v7503_v18 = vand.u32 4294901760, %v7502_v49 }
 0x8fa   : > { %v17543_v7 = vpop.permute.xlu0 %7109  ;;  %v17545_v4 = vpop.permute.xlu1 %7141  ;;  %v7352_v42 = vsel %vm1881_vm7, %v7344_v23, %v7202_v46 }
 0x8fb   : > { %13870 = vmatprep.mubr.f32.mxu0 %v7503_v18  ;;  %v7360_v36 = vsel %vm1890_vm8, %v7352_v42, %v7234_v53 }
 0x8fc   : > { %v7368_v29 = vsel %vm1899_vm9, %v7360_v36, %v7266_v38 }
 0x8fe   : > { %v7298_v37 = vpop.permute.xlu0 %7297  ;;  %v17550_v48 = vpop.permute.xlu1 %7079 }
 0x8ff   : > { %v7376_v24 = vsel %vm1908_vm10, %v7368_v29, %v7298_v37 }
 0x900   : > { %v7405_v41 = vsel %vm1933_vm11, %v7376_v24, 0 }
 0x901   : > { %v17554_v58 = vand.u32 4294901760, %v7405_v41 }
 0x902   : > { %v7172_v17 = vpop.permute.xlu0 %7171  ;;  %v17556_v49 = vpop.permute.xlu1 %7111 }
 0x903   : > { %v17559_v60 = vsub.f32 %v7405_v41, %v17554_v58  ;;  %13901 = vmatmul.mubr.f32.vlgmr.msra.gmra.mxu1 %v17554_v58 }
 0x904   : > { %13943 = vmatpush3.msra.mxu1 %v17270_v26 }
 0x905   : > { %v19853_v42 = vand.u32 4294901760, %v17559_v60  ;;  %13944 = vmatprep.subr.mxu1 %v17284_v6 }
 0x906   : > { %v17565_v46 = vpop.permute.xlu0 %7145  ;;  %v7236_v53 = vpop.permute.xlu1 %7235  ;;  %13945 = vmatpush3.msra.mxu1 %v17284_v6 }
 0x907   : > { %v7512_v24 = vsub.f32 %v17559_v60, %v19853_v42  ;;  %13946 = vmatprep.subr.mxu1 %v17300_v19 }
 0x908   : > { %13947 = vmatpush3.msra.mxu1 %v17300_v19 }
 0x909   : > { %v7513_v38 = vand.u32 4294901760, %v7512_v24  ;;  %13948 = vmatprep.subr.mxu1 %v17317_v63 }
 0x90a   : > { %v17574_v23 = vpop.permute.xlu0 %7083  ;;  %v7268_v18 = vpop.permute.xlu1 %7267  ;;  %13949 = vmatpush3.msra.mxu1 %v17317_v63 }
 0x90b   : > { %13871 = vmatmul.mubr.f32.vlgmr.msra.gmra.mxu0 %v7513_v38  ;;  %13950 = vmatprep.subr.mxu1 %v17335_v61 }
 0x90c   : > { %13913 = vmatpush3.msra.mxu0 %v17282_v5  ;;  %13951 = vmatpush3.msra.mxu1 %v17335_v61  ;;  %v7321_v5 = vsel %vm328_vm2, %v17243_v25, %v17509_v55 }
 0x90d   : > { %13914 = vmatprep.subr.mxu0 %v17298_v3  ;;  %13952 = vmatprep.subr.mxu1 %v17348_v16 }
 0x90e   : > { %v17582_v36 = vpop.permute.xlu0 %7209  ;;  %v7300_v37 = vpop.permute.xlu1 %7299  ;;  %13915 = vmatpush3.msra.mxu0 %v17298_v3  ;;  %13953 = vmatpush3.msra.mxu1 %v17348_v16  ;;  %v7329_v3 = vsel %vm725_vm1, %v7321_v5, %v17520_v1 }
 0x90f   : > { %13916 = vmatprep.subr.mxu0 %v17315_v39  ;;  %13954 = vmatprep.subr.mxu1 %v17360_v12 }
 0x910   : > { %13917 = vmatpush3.msra.mxu0 %v17315_v39  ;;  %13955 = vmatpush3.msra.mxu1 %v17360_v12 }
 0x911   : > { %13918 = vmatprep.subr.mxu0 %v17332_v50  ;;  %13956 = vmatprep.subr.mxu1 %v17377_v44 }
 0x912   : > { %v17597_v29 = vpop.permute.xlu0 %7081  ;;  %v7140_v41 = vpop.permute.xlu1 %7139  ;;  %13919 = vmatpush3.msra.mxu0 %v17332_v50  ;;  %13957 = vmatpush3.msra.mxu1 %v17377_v44 }
 0x913   : > { %v7337_v39 = vsel %vm1864_vm5, %v7329_v3, %v7140_v41  ;;  %13920 = vmatprep.subr.mxu0 %v17358_v22  ;;  %13958 = vmatprep.subr.mxu1 %v17401_v33 }
 0x914   : > { %13921 = vmatpush3.msra.mxu0 %v17358_v22  ;;  %13959 = vmatpush3.msra.mxu1 %v17401_v33  ;;  %v7345_v50 = vsel %vm356_vm6, %v7337_v39, %v7172_v17 }
 0x915   : > { %13922 = vmatprep.subr.mxu0 %v17365_v57  ;;  %14002 = vmatprep.subr.mxu1 %v17270_v26 }
 0x916   : > { %v17608_v25 = vpop.permute.xlu0 %7113  ;;  %v7204_v55 = vpop.permute.xlu1 %7203  ;;  %13923 = vmatpush3.msra.mxu0 %v17365_v57 }
 0x917   : > { %v7353_v1 = vsel %vm1881_vm7, %v7345_v50, %v7204_v55  ;;  %13924 = vmatprep.subr.mxu0 %v17375_v30 }
 0x918   : > { %v7361_v24 = vsel %vm1890_vm8, %v7353_v1, %v7236_v53  ;;  %13925 = vmatpush3.msra.mxu0 %v17375_v30  ;;  %v7322_v1 = vsel %vm328_vm2, %v17413_v40, %v17528_v51 }
 0x919   : > { %v7369_v22 = vsel %vm1899_vm9, %v7361_v24, %v7268_v18  ;;  %13926 = vmatprep.subr.mxu0 %v17399_v52 }
 0x91a   : > { %v7377_v38 = vsel %vm1908_vm10, %v7369_v22, %v7300_v37  ;;  %v7238_v5 = vpop.permute.xlu0 %7237  ;;  %v17619_v3 = vpop.permute.xlu1 %7177  ;;  %13927 = vmatpush3.msra.mxu0 %v17399_v52 }
 0x91b   : > { %v7408_v57 = vsel %vm1933_vm11, %v7377_v38, 0  ;;  %13928 = vmatprep.subr.mxu0 %v17410_v35  ;;  %v7330_v38 = vsel %vm725_vm1, %v7322_v1, %v17543_v7 }
 0x91c   : > { %v17624_v17 = vand.u32 4294901760, %v7408_v57  ;;  %13929 = vmatpush3.msra.mxu0 %v17410_v35 }
 0x91d   : > { %13972 = vmatprep.subr.mxu0 %v17295_v11 }
 0x91e   : > { %v7270_v30 = vpop.permute.xlu0 %7269  ;;  %13903 = vmatprep.mubr.f32.mxu1 %v17624_v17  ;;  %v17629_v53 = vpop.permute.xlu1 %7115  ;;  %v17632_v18 = vsub.f32 %v7408_v57, %v17624_v17  ;;  %v7338_v57 = vsel %vm1864_vm5, %v7330_v38, %v17545_v4 }
 0x920   : > { %v19856_v52 = vand.u32 4294901760, %v17632_v18 }
 0x922   : > { %v7208_v37 = vpop.permute.xlu0 %7207  ;;  %v7240_v41 = vpop.permute.xlu1 %7239  ;;  %v7522_v39 = vsub.f32 %v17632_v18, %v19856_v52 }
 0x924   : > { %v7523_v50 = vand.u32 4294901760, %v7522_v39  ;;  %v7323_v39 = vsel %vm328_vm2, %v17441_v13, %v17550_v48 }
 0x925   : > { %v7331_v40 = vsel %vm725_vm1, %v7323_v39, %v17556_v49 }
 0x926   : > { %v7150_v35 = vpop.permute.xlu0 %7149  ;;  %13873 = vmatprep.mubr.f32.mxu0 %v7523_v50  ;;  %v7272_v55 = vpop.permute.xlu1 %7271  ;;  %v7346_v50 = vsel %vm356_vm6, %v7338_v57, %v17512_v27 }
 0x927   : > { %v7354_v4 = vsel %vm1881_vm7, %v7346_v50, %v17518_v14 }
 0x928   : > { %v7362_v56 = vsel %vm1890_vm8, %v7354_v4, %v7238_v5 }
 0x929   : > { %v7370_v27 = vsel %vm1899_vm9, %v7362_v56, %v7270_v30 }
 0x92a   : > { %v7182_v24 = vpop.permute.xlu0 %7181  ;;  %v7304_v22 = vpop.permute.xlu1 %7303 }
 0x92e   : > { %v17645_v42 = vpop.permute.xlu0 %7243  ;;  %v7144_v45 = vpop.permute.xlu1 %7143 }
 0x92f   : > { %v7339_v51 = vsel %vm1864_vm5, %v7331_v40, %v7144_v45 }
 0x932   : > { %v7276_v52 = vpop.permute.xlu0 %7275  ;;  %v7176_v7 = vpop.permute.xlu1 %7175 }
 0x933   : > { %v7347_v1 = vsel %vm356_vm6, %v7339_v51, %v7176_v7  ;;  %v7324_v51 = vsel %vm328_vm2, %v17470_v15, %v17597_v29 }
 0x934   : > { %v7355_v38 = vsel %vm1881_vm7, %v7347_v1, %v7208_v37 }
 0x935   : > { %v7363_v13 = vsel %vm1890_vm8, %v7355_v38, %v7240_v41 }
 0x936   : > { %v7371_v48 = vsel %vm1899_vm9, %v7363_v13, %v7272_v55  ;;  %v7086_v49 = vpop.permute.xlu0 %7085  ;;  %v7302_v57 = vpop.permute.xlu1 %7301 }
 0x937   : > { %v7378_v45 = vsel %vm1908_vm10, %v7370_v27, %v7302_v57  ;;  %v7379_v39 = vsel %vm1908_vm10, %v7371_v48, %v7304_v22  ;;  %v7326_v5 = vsel %vm328_vm2, %v17495_v8, %v7086_v49  ;;  %v7332_v8 = vsel %vm725_vm1, %v7324_v51, %v17608_v25 }
 0x938   : > { %v7411_v40 = vsel %vm1933_vm11, %v7378_v45, 0  ;;  %v7414_v14 = vsel %vm1933_vm11, %v7379_v39, 0  ;;  %v7340_v15 = vsel %vm1864_vm5, %v7332_v8, %v17565_v46  ;;  %v7325_v39 = vsel %vm328_vm2, %v17453_v10, %v17574_v23 }
 0x939   : > { %v17667_v50 = vand.u32 4294901760, %v7411_v40  ;;  %v17669_v37 = vand.u32 4294901760, %v7414_v14  ;;  %v7348_v25 = vsel %vm356_vm6, %v7340_v15, %v17619_v3  ;;  %v7333_v46 = vsel %vm725_vm1, %v7325_v39, %v17629_v53 }
 0x93a   : > { %v7118_v56 = vpop.permute.xlu0 %7117  ;;  %v7214_v30 = vpop.permute.xlu1 %7213  ;;  %v20222_v39 = vand.u32 4294901760, %v17531_v20 }
 0x93b   : > { %v17674_v41 = vsub.f32 %v7411_v40, %v17667_v50  ;;  %v7334_v55 = vsel %vm725_vm1, %v7326_v5, %v7118_v56  ;;  %13904 = vmatmul.mubr.f32.gmra.mxu1 %v17667_v50  ;;  %v17679_v22 = vsub.f32 %v7414_v14, %v17669_v37  ;;  %v7356_v14 = vsel %vm1881_vm7, %v7348_v25, %v17582_v36 }
 0x93c   : > { %13906 = vmatprep.mubr.f32.mxu1 %v17669_v37  ;;  %v7342_v4 = vsel %vm1864_vm5, %v7334_v55, %v7150_v35 }
 0x93d   : > { %v7531_v7 = vand.u32 4294901760, %v17674_v41  ;;  %v7541_v1 = vand.u32 4294901760, %v17679_v22  ;;  %v7350_v48 = vsel %vm356_vm6, %v7342_v4, %v7182_v24 }
 0x93e   : > { %v7242_v38 = vpop.permute.xlu0 %7241  ;;  %v7148_v13 = vpop.permute.xlu1 %7147  ;;  %v7358_v40 = vsel %vm1881_vm7, %v7350_v48, %v7214_v30 }
 0x93f   : > { %v7532_v27 = vsub.f32 %v17674_v41, %v7531_v7  ;;  %v7542_v29 = vsub.f32 %v17679_v22, %v7541_v1  ;;  %v7364_v3 = vsel %vm1890_vm8, %v7356_v14, %v7242_v38  ;;  %v7341_v24 = vsel %vm1864_vm5, %v7333_v46, %v7148_v13 }
 0x940   : > { %v7366_v23 = vsel %vm1890_vm8, %v7358_v40, %v17493_v31  ;;  %vm11677_vm5 = vcmask 1045509  }
 0x941   : > { %v7533_v49 = vand.u32 4294901760, %v7532_v27  ;;  %v7543_v45 = vand.u32 4294901760, %v7542_v29  ;;  %v7374_v13 = vsel %vm1899_vm9, %v7366_v23, %v17503_v34 }
 0x942   : > { %v7274_v35 = vpop.permute.xlu0 %7273  ;;  %v7180_v57 = vpop.permute.xlu1 %7179 }
 0x943   : > { %13874 = vmatmul.mubr.f32.gmra.mxu0 %v7533_v49  ;;  %v7372_v5 = vsel %vm1899_vm9, %v7364_v3, %v7274_v35  ;;  %v7349_v56 = vsel %vm356_vm6, %v7341_v24, %v7180_v57  ;;  %v20223_v24 = vand.u32 4294901760, %v17559_v60 }
 0x944   : > { %13876 = vmatprep.mubr.f32.mxu0 %v7543_v45 }
 0x946   : > { %v7306_v55 = vpop.permute.xlu0 %7305  ;;  %v7212_v10 = vpop.permute.xlu1 %7211 }
 0x947   : > { %v7380_v53 = vsel %vm1908_vm10, %v7372_v5, %v7306_v55  ;;  %v7357_v30 = vsel %vm1881_vm7, %v7349_v56, %v7212_v10  ;;  %v20224_v5 = vand.u32 4294901760, %v17632_v18  ;;  %vm11680_vm7 = vcmask 1046534  }
 0x948   : > { %v7417_v36 = vsel %vm1933_vm11, %v7380_v53, 0  ;;  %v7365_v51 = vsel %vm1890_vm8, %v7357_v30, %v17645_v42 }
 0x949   : > { %v17720_v8 = vand.u32 4294901760, %v7417_v36  ;;  %v7373_v4 = vsel %vm1899_vm9, %v7365_v51, %v7276_v52  ;;  %vm11683_vm9 = vcmask 1047559  }
 0x94a   : > { %v7308_v38 = vpop.permute.xlu0 %7307  ;;  %v7310_v27 = vpop.permute.xlu1 %7309 }
 0x94b   : > { %v7550_v31 = vsub.f32 %v7417_v36, %v17720_v8  ;;  %v7381_v15 = vsel %vm1908_vm10, %v7373_v4, %v7308_v38  ;;  %v7382_v29 = vsel %vm1908_vm10, %v7374_v13, %v7310_v27  ;;  %13907 = vmatmul.mubr.f32.gmra.mxu1 %v17720_v8 }
 0x94c   : > { %v7420_v25 = vsel %vm1933_vm11, %v7381_v15, 0  ;;  %v7423_v42 = vsel %vm1933_vm11, %v7382_v29, 0  ;;  %vm11812_vm11 = vcmask 916480  }
 0x94d   : > { %v7551_v48 = vand.u32 4294901760, %v7550_v31  ;;  %v17731_v49 = vand.u32 4294901760, %v7420_v25  ;;  %v17733_v52 = vand.u32 4294901760, %v7423_v42 }
 0x94f   : > { %v7560_v34 = vsub.f32 %v7420_v25, %v17731_v49  ;;  %v7570_v35 = vsub.f32 %v7423_v42, %v17733_v52  ;;  %13909 = vmatprep.mubr.f32.mxu1 %v17731_v49  ;;  %v7552_v57 = vsub.f32 %v7550_v31, %v7551_v48 }
 0x950   : > { %13910 = vmatmul.mubr.f32.gmra.mxu1 %v17733_v52 }
 0x951   : > { %v7571_v45 = vand.u32 4294901760, %v7570_v35  ;;  %13960 = vmatprep.mubr.f32.mxu1 %v20222_v39  ;;  %v7553_v46 = vand.u32 4294901760, %v7552_v57  ;;  %v7561_v40 = vand.u32 4294901760, %v7560_v34 }
 0x953   : > { %13877 = vmatmul.mubr.f32.gmra.mxu0 %v7553_v46  ;;  %v7562_v14 = vsub.f32 %v7560_v34, %v7561_v40  ;;  %v7572_v3 = vsub.f32 %v7570_v35, %v7571_v45 }
 0x954   : > { %13961 = vmatmul.mubr.f32.vlgmr.msra.gmra.mxu1 %v20223_v24 }
 0x955   : > { %14003 = vmatpush3.msra.mxu1 %v17270_v26  ;;  %13963 = vmatprep.mubr.f32.mxu1 %v20224_v5  ;;  %v7563_v56 = vand.u32 4294901760, %v7562_v14  ;;  %v7573_v55 = vand.u32 4294901760, %v7572_v3  ;;  %v11905_v26 = vld [vmem:[%s19689_s5 + $0x38] sm:$0xff] }
 0x956   : > { %14004 = vmatprep.subr.mxu1 %v17284_v6 }
 0x957   : > { %14005 = vmatpush3.msra.mxu1 %v17284_v6  ;;  %13879 = vmatprep.mubr.f32.mxu0 %v7563_v56  ;;  %v17807_v6 = vand.u32 4294901760, %v11905_v26 }
 0x958   : > { %14006 = vmatprep.subr.mxu1 %v17300_v19  ;;  %13880 = vmatmul.mubr.f32.gmra.mxu0 %v7573_v55 }
 0x959   : > { %13964 = vmatmul.mubr.f32.gmra.mxu1 %v7531_v7  ;;  %13930 = vmatprep.mubr.f32.mxu0 %v17531_v20 }
 0x95a   : > { %14007 = vmatpush3.msra.mxu1 %v17300_v19  ;;  %13966 = vmatprep.mubr.f32.mxu1 %v7541_v1  ;;  %v17814_v19 = vsub.f32 %v11905_v26, %v17807_v6 }
 0x95b   : > { %14008 = vmatprep.subr.mxu1 %v17317_v63 }
 0x95c   : > { %14009 = vmatpush3.msra.mxu1 %v17317_v63  ;;  %13931 = vmatmul.mubr.f32.vlgmr.msra.gmra.mxu0 %v17559_v60  ;;  %v11903_v63 = vld [vmem:[%s19689_s5 + $0x28] sm:$0xff] }
 0x95d   : > { %14010 = vmatprep.subr.mxu1 %v17335_v61  ;;  %13967 = vmatmul.mubr.f32.gmra.mxu1 %v7551_v48 }
 0x95e   : > { %13973 = vmatpush3.msra.mxu0 %v17295_v11  ;;  %14011 = vmatpush3.msra.mxu1 %v17335_v61  ;;  %v11904_v11 = vld [vmem:[%s19689_s5 + $0x30] sm:$0xff] }
 0x95f   : > { %13933 = vmatprep.mubr.f32.mxu0 %v17632_v18  ;;  %13969 = vmatprep.mubr.f32.mxu1 %v7561_v40 }
 0x960   : > { %13974 = vmatprep.subr.mxu0 %v17312_v21  ;;  %14012 = vmatprep.subr.mxu1 %v17348_v16 }
 0x961   : > { %13975 = vmatpush3.msra.mxu0 %v17312_v21  ;;  %14013 = vmatpush3.msra.mxu1 %v17348_v16  ;;  %v17816_v21 = vand.u32 4294901760, %v11904_v11  ;;  %v11902_v16 = vld [vmem:[%s19689_s5 + $0x20] sm:$0xff] }
 0x962   : > { %13976 = vmatprep.subr.mxu0 %v17329_v32  ;;  %14014 = vmatprep.subr.mxu1 %v17360_v12 }
 0x963   : > { %13934 = vmatmul.mubr.f32.gmra.mxu0 %v17674_v41  ;;  %13970 = vmatmul.mubr.f32.gmra.mxu1 %v7571_v45  ;;  %v17826_v61 = vsub.f32 %v11904_v11, %v17816_v21 }
 0x964   : > { %13977 = vmatpush3.msra.mxu0 %v17329_v32  ;;  %14015 = vmatpush3.msra.mxu1 %v17360_v12  ;;  %v17823_v32 = vand.u32 4294901760, %v17814_v19 }
 0x965   : > { %13936 = vmatprep.mubr.f32.mxu0 %v17679_v22  ;;  %13978 = vmatprep.subr.mxu0 %v17346_v9 }
 0x966   : > { %14016 = vmatprep.subr.mxu1 %v17377_v44  ;;  %14020 = vmatprep.mubr.f32.mxu1 %v17526_v62  ;;  %v8498_v12 = vsub.f32 %v17814_v19, %v17823_v32 }
 0x967   : > { %13979 = vmatpush3.msra.mxu0 %v17346_v9  ;;  %14017 = vmatpush3.msra.mxu1 %v17377_v44  ;;  %v17829_v9 = vand.u32 4294901760, %v11903_v63 }
 0x968   : > { %13980 = vmatprep.subr.mxu0 %v17372_v0  ;;  %14018 = vmatprep.subr.mxu1 %v17401_v33 }
 0x969   : > { %13937 = vmatmul.mubr.f32.gmra.mxu0 %v7550_v31  ;;  %14019 = vmatpush3.msra.mxu1 %v17401_v33  ;;  %v17841_v44 = vsub.f32 %v11903_v63, %v17829_v9 }
 0x96a   : > { %13981 = vmatpush3.msra.mxu0 %v17372_v0  ;;  %13939 = vmatprep.mubr.f32.mxu0 %v7560_v34  ;;  %v17838_v0 = vand.u32 4294901760, %v17826_v61 }
 0x96b   : > { %13982 = vmatprep.subr.mxu0 %v17383_v47  ;;  %14021 = vmatmul.mubr.f32.vlgmr.msra.gmra.mxu1 %v17554_v58 }
 0x96c   : > { %13983 = vmatpush3.msra.mxu0 %v17383_v47  ;;  %14023 = vmatprep.mubr.f32.mxu1 %v17624_v17  ;;  %v17843_v47 = vand.u32 4294901760, %v11902_v16  ;;  %v8505_v33 = vsub.f32 %v17826_v61, %v17838_v0 }
 0x96d   : > { %13984 = vmatprep.subr.mxu0 %v17396_v54  ;;  %13940 = vmatmul.mubr.f32.gmra.mxu0 %v7570_v35  ;;  %v11901_v35 = vld [vmem:[%s19688_s4 + $0x1] ss:$0 sm:$0xff] }
 0x96e   : > { %13985 = vmatpush3.msra.mxu0 %v17396_v54  ;;  %13990 = vmatprep.mubr.f32.mxu0 %v17526_v62  ;;  %v8499_v54 = vand.u32 4294901760, %v8498_v12  ;;  %v8506_v62 = vand.u32 4294901760, %v8505_v33 }
 0x96f   : > { %13986 = vmatprep.subr.mxu0 %v17407_v2  ;;  %14024 = vmatmul.mubr.f32.gmra.mxu1 %v17667_v50 }
 0x970   : > { %13987 = vmatpush3.msra.mxu0 %v17407_v2  ;;  %14026 = vmatprep.mubr.f32.mxu1 %v17669_v37  ;;  %v17850_v2 = vand.u32 4294901760, %v17841_v44 }
 0x971   : > { %13988 = vmatprep.subr.mxu0 %v17423_v59  ;;  %14052 = vmatprep.subr.mxu1 %v8499_v54 }
 0x972   : > { %13989 = vmatpush3.msra.mxu0 %v17423_v59  ;;  %v17853_v59 = vsub.f32 %v11902_v16, %v17843_v47  ;;  %v8512_v20 = vsub.f32 %v17841_v44, %v17850_v2  ;;  %14053 = vmatpush3.msra.mxu1 %v8499_v54 }
 0x973   : > { %13991 = vmatmul.mubr.f32.vlgmr.msra.gmra.mxu0 %v17554_v58  ;;  %14027 = vmatmul.mubr.f32.gmra.mxu1 %v17720_v8 }
 0x974   : > { %13993 = vmatprep.mubr.f32.mxu0 %v17624_v17  ;;  %14029 = vmatprep.mubr.f32.mxu1 %v17731_v49  ;;  %v17860_v58 = vand.u32 4294901760, %v17853_v59  ;;  %v8513_v60 = vand.u32 4294901760, %v8512_v20 }
 0x975   : > { %14032 = vmatprep.subr.mxu0 %v17807_v6  ;;  %14054 = vmatprep.subr.mxu1 %v8506_v62 }
 0x976   : > { %14033 = vmatpush3.msra.mxu0 %v17807_v6  ;;  %20225 = vst [vmem:[#allocation23_spill] sm:$0xff] %v17860_v58  ;;  %v8519_v17 = vsub.f32 %v17853_v59, %v17860_v58  ;;  %14055 = vmatpush3.msra.mxu1 %v8506_v62 }
 0x977   : > { %13994 = vmatmul.mubr.f32.gmra.mxu0 %v17667_v50  ;;  %14030 = vmatmul.mubr.f32.gmra.mxu1 %v17733_v52 }
 0x978   : > { %13996 = vmatprep.mubr.f32.mxu0 %v17669_v37  ;;  %14034 = vmatprep.subr.mxu0 %v17816_v21  ;;  %v8520_v18 = vand.u32 4294901760, %v8519_v17 }
 0x979   : > { %14035 = vmatpush3.msra.mxu0 %v17816_v21  ;;  %14056 = vmatprep.subr.mxu1 %v8513_v60 }
 0x97a   : > { %14036 = vmatprep.subr.mxu0 %v17829_v9  ;;  %14057 = vmatpush3.msra.mxu1 %v8513_v60 }
 0x97b   : > { %13997 = vmatmul.mubr.f32.gmra.mxu0 %v17720_v8  ;;  %14058 = vmatprep.subr.mxu1 %v8520_v18 }
 0x97c   : > { %13999 = vmatprep.mubr.f32.mxu0 %v17731_v49  ;;  %14037 = vmatpush3.msra.mxu0 %v17829_v9 }
 0x97d   : > { %14038 = vmatprep.subr.mxu0 %v17843_v47  ;;  %14059 = vmatpush3.msra.mxu1 %v8520_v18 }
 0x97e   : > { %14039 = vmatpush3.msra.mxu0 %v17843_v47  ;;  %14092 = vmatprep.subr.mxu1 %v17807_v6 }
 0x97f   : > { %14000 = vmatmul.mubr.f32.gmra.mxu0 %v17733_v52  ;;  %14072 = vmatprep.subr.mxu0 %v17814_v19 }
 0x9c3   : > { %v13902_v50 = vpop.f32.mrf.mxu1 }
 0x9c5   : > { %v7691_v37 = vpop.f32.mrf.mxu1 }
 0x9cb   : > { %v13872_v22 = vpop.f32.mrf.mxu0 }
 0x9cc   : > { %v7516_v39 = vadd.f32 %v13872_v22, %v11901_v35 }
 0x9cd   : > { %v7505_v1 = vpop.f32.mrf.mxu0 }
 0x9ce   : > { %v7506_v40 = vadd.f32 %v11901_v35, %v7505_v1  ;;  %v7698_v5 = vadd.f32 %v13902_v50, %v7516_v39 }
 0x9d0   : > { %v7692_v63 = vadd.f32 %v7691_v37, %v7506_v40 }
 0x9fb   : > { %v13905_v41 = vpop.f32.mrf.mxu1 }
 0x9fd   : > { %v7703_v7 = vpop.f32.mrf.mxu1 }
 0xa03   : > { %v13875_v23 = vpop.f32.mrf.mxu0 }
 0xa04   : > { %v7536_v24 = vadd.f32 %v13875_v23, %v11901_v35 }
 0xa05   : > { %v7525_v36 = vpop.f32.mrf.mxu0 }
 0xa06   : > { %v7526_v26 = vadd.f32 %v11901_v35, %v7525_v36  ;;  %v7710_v62 = vadd.f32 %v13905_v41, %v7536_v24 }
 0xa08   : > { %v7704_v17 = vadd.f32 %v7703_v7, %v7526_v26 }
 0xa0b   : > { %v13908_v10 = vpop.f32.mrf.mxu1 }
 0xa0d   : > { %v7715_v53 = vpop.f32.mrf.mxu1 }
 0xa10   : > { %v13911_v30 = vpop.f32.mrf.mxu1 }
 0xa12   : > { %v7727_v51 = vpop.f32.mrf.mxu1 }
 0xa13   : > { %v13878_v8 = vpop.f32.mrf.mxu0 }
 0xa14   : > { %v13962_v4 = vpop.f32.mrf.mxu1  ;;  %v7556_v16 = vadd.f32 %v13878_v8, %v11901_v35 }
 0xa15   : > { %v7545_v38 = vpop.f32.mrf.mxu0 }
 0xa16   : > { %v7954_v13 = vpop.f32.mrf.mxu1  ;;  %v7546_v20 = vadd.f32 %v11901_v35, %v7545_v38  ;;  %v7722_v1 = vadd.f32 %v13908_v10, %v7556_v16 }
 0xa18   : > { %v13881_v27 = vpop.f32.mrf.mxu0 }
 0xa19   : > { %v13965_v31 = vpop.f32.mrf.mxu1  ;;  %v7576_v22 = vadd.f32 %v13881_v27, %v11901_v35 }
 0xa1a   : > { %v7565_v15 = vpop.f32.mrf.mxu0 }
 0xa1b   : > { %v7970_v29 = vpop.f32.mrf.mxu1  ;;  %v7566_v58 = vadd.f32 %v11901_v35, %v7565_v15  ;;  %v7734_v41 = vadd.f32 %v13911_v30, %v7576_v22 }
 0xa1c   : > { %v13932_v25 = vpop.f32.mrf.mxu0 }
 0xa1d   : > { %v13968_v42 = vpop.f32.mrf.mxu1  ;;  %v7831_v11 = vadd.f32 %v13932_v25, %v7698_v5  ;;  %v7716_v25 = vadd.f32 %v7715_v53, %v7546_v20  ;;  %v7728_v26 = vadd.f32 %v7727_v51, %v7566_v58 }
 0xa1e   : > { %v7823_v48 = vpop.f32.mrf.mxu0 }
 0xa1f   : > { %v7986_v49 = vpop.f32.mrf.mxu1  ;;  %v7824_v33 = vadd.f32 %v7823_v48, %v7692_v63  ;;  %v7963_v18 = vadd.f32 %v13962_v4, %v7831_v11 }
 0xa21   : > { %v7955_v39 = vadd.f32 %v7954_v13, %v7824_v33 }
 0xa23   : > { %v13935_v52 = vpop.f32.mrf.mxu0  ;;  %v17866_v34 = vpop.f32.mrf.mxu1 }
 0xa24   : > { %v7845_v60 = vadd.f32 %v13935_v52, %v7710_v62 }
 0xa25   : > { %v7837_v57 = vpop.f32.mrf.mxu0  ;;  %v17871_v45 = vpop.f32.mrf.mxu1 }
 0xa26   : > { %v7838_v23 = vadd.f32 %v7837_v57, %v7704_v17  ;;  %v7979_v5 = vadd.f32 %v13965_v31, %v7845_v60 }
 0xa28   : > { %v7971_v10 = vadd.f32 %v7970_v29, %v7838_v23 }
 0xa29   : > { %v13938_v46 = vpop.f32.mrf.mxu0 }
 0xa2a   : > { %v7859_v36 = vadd.f32 %v13938_v46, %v7722_v1 }
 0xa2b   : > { %v14022_v14 = vpop.f32.mrf.mxu1  ;;  %v7851_v3 = vpop.f32.mrf.mxu0 }
 0xa2c   : > { %v7852_v48 = vadd.f32 %v7851_v3, %v7716_v25 }
 0xa2d   : > { %v8230_v56 = vpop.f32.mrf.mxu1  ;;  %v13941_v55 = vpop.f32.mrf.mxu0 }
 0xa2e   : > { %v7873_v24 = vadd.f32 %v13941_v55, %v7734_v41  ;;  %v7987_v3 = vadd.f32 %v7986_v49, %v7852_v48 }
 0xa2f   : > { %v14025_v12 = vpop.f32.mrf.mxu1  ;;  %v7865_v54 = vpop.f32.mrf.mxu0 }
 0xa30   : > { %v7866_v46 = vadd.f32 %v7865_v54, %v7728_v26  ;;  %v8011_v55 = vadd.f32 %v17866_v34, %v7873_v24 }
 0xa31   : > { %v8242_v28 = vpop.f32.mrf.mxu1 }
 0xa32   : > { %v8003_v17 = vadd.f32 %v17871_v45, %v7866_v46 }
 0xa33   : > { %v13992_v43 = vpop.f32.mrf.mxu0  ;;  %v14028_v38 = vpop.f32.mrf.mxu1 }
 0xa34   : > { %v8115_v50 = vadd.f32 %v13992_v43, %v7963_v18  ;;  %v7995_v43 = vadd.f32 %v13968_v42, %v7859_v36 }
 0xa35   : > { %v8108_v37 = vpop.f32.mrf.mxu0  ;;  %v8254_v31 = vpop.f32.mrf.mxu1 }
 0xa36   : > { %v8237_v8 = vadd.f32 %v14022_v14, %v8115_v50  ;;  %v8109_v40 = vadd.f32 %v8108_v37, %v7955_v39 }
 0xa37   : > { %v13995_v52 = vpop.f32.mrf.mxu0  ;;  %v14031_v20 = vpop.f32.mrf.mxu1 }
 0xa38   : > { %v8277_v7 = vmax.f32 %v8237_v8, 0.0  ;;  %v8231_v4 = vadd.f32 %v8230_v56, %v8109_v40  ;;  %v8127_v27 = vadd.f32 %v13995_v52, %v7979_v5 }
 0xa39   : > { %v8120_v57 = vpop.f32.mrf.mxu0  ;;  %v8266_v48 = vpop.f32.mrf.mxu1 }
 0xa3a   : > { %v8301_v13 = vsel %vm356_vm6, %v8277_v7, 0  ;;  %v8276_v15 = vmax.f32 %v8231_v4, 0.0  ;;  %v8249_v53 = vadd.f32 %v14025_v12, %v8127_v27  ;;  %v8121_v35 = vadd.f32 %v8120_v57, %v7971_v10 }
 0xa3b   : > { %v17874_v14 = vand.u32 4294901760, %v8301_v13  ;;  %v13998_v30 = vpop.f32.mrf.mxu0 }
 0xa3c   : > { %v8298_v11 = vsel %vm356_vm6, %v8276_v15, 0  ;;  %v8279_v56 = vmax.f32 %v8249_v53, 0.0  ;;  %v8243_v63 = vadd.f32 %v8242_v28, %v8121_v35  ;;  %v8139_v29 = vadd.f32 %v13998_v30, %v7995_v43 }
 0xa3d   : > { %v17878_v58 = vsub.f32 %v8301_v13, %v17874_v14  ;;  %v17880_v51 = vand.u32 4294901760, %v8298_v11  ;;  %v8132_v42 = vpop.f32.mrf.mxu0 }
 0xa3e   : > { %v8307_v16 = vsel %vm356_vm6, %v8279_v56, 0  ;;  %v8278_v12 = vmax.f32 %v8243_v63, 0.0  ;;  %v8261_v54 = vadd.f32 %v14028_v38, %v8139_v29  ;;  %v8133_v33 = vadd.f32 %v8132_v42, %v7987_v3 }
 0xa3f   : > { %v8402_v49 = vand.u32 4294901760, %v17878_v58  ;;  %v17886_v62 = vsub.f32 %v8298_v11, %v17880_v51  ;;  %v17888_v28 = vand.u32 4294901760, %v8307_v16  ;;  %v14001_v60 = vpop.f32.mrf.mxu0  ;;  %14060 = vmatprep.mubr.f32.mxu1 %v17880_v51 }
 0xa40   : > { %v8304_v34 = vsel %vm356_vm6, %v8278_v12, 0  ;;  %v8281_v18 = vmax.f32 %v8261_v54, 0.0  ;;  %v8255_v22 = vadd.f32 %v8254_v31, %v8133_v33  ;;  %v8151_v1 = vadd.f32 %v14001_v60, %v8011_v55  ;;  %14061 = vmatmul.mubr.f32.vlgmr.msra.gmra.mxu1 %v17874_v14 }
 0xa41   : > { %v8403_v23 = vsub.f32 %v17878_v58, %v8402_v49  ;;  %v17898_v50 = vsub.f32 %v8307_v16, %v17888_v28  ;;  %v17900_v39 = vand.u32 4294901760, %v8304_v34  ;;  %v8144_v36 = vpop.f32.mrf.mxu0  ;;  %v8392_v25 = vand.u32 4294901760, %v17886_v62  ;;  %14093 = vmatpush3.msra.mxu1 %v17807_v6 }
 0xa42   : > { %v8313_v45 = vsel %vm356_vm6, %v8281_v18, 0  ;;  %v8280_v37 = vmax.f32 %v8255_v22, 0.0  ;;  %v8273_v8 = vadd.f32 %v14031_v20, %v8151_v1  ;;  %v8145_v40 = vadd.f32 %v8144_v36, %v8003_v17  ;;  %14094 = vmatprep.subr.mxu1 %v17816_v21 }
 0xa43   : > { %v17907_v5 = vsub.f32 %v8304_v34, %v17900_v39  ;;  %v17909_v41 = vand.u32 4294901760, %v8313_v45  ;;  %14063 = vmatprep.mubr.f32.mxu1 %v17900_v39  ;;  %v8393_v38 = vsub.f32 %v17886_v62, %v8392_v25  ;;  %14095 = vmatpush3.msra.mxu1 %v17816_v21  ;;  %v8422_v27 = vand.u32 4294901760, %v17898_v50 }
 0xa44   : > { %v8310_v52 = vsel %vm356_vm6, %v8280_v37, 0  ;;  %v8283_v7 = vmax.f32 %v8273_v8, 0.0  ;;  %v8267_v4 = vadd.f32 %v8266_v48, %v8145_v40  ;;  %14064 = vmatmul.mubr.f32.gmra.mxu1 %v17888_v28  ;;  %14096 = vmatprep.subr.mxu1 %v17829_v9  ;;  %v8404_v43 = vand.u32 4294901760, %v8403_v23  ;;  %v11939_v8 = vld [vmem:[%s19691_s7 + $0x218] sm:$0xff] }
 0xa45   : > { %v17919_v10 = vsub.f32 %v8313_v45, %v17909_v41  ;;  %v17921_v24 = vand.u32 4294901760, %v8310_v52  ;;  %v8394_v26 = vand.u32 4294901760, %v8393_v38  ;;  %v8412_v57 = vand.u32 4294901760, %v17907_v5  ;;  %14097 = vmatpush3.msra.mxu1 %v17829_v9  ;;  %v11923_v38 = vld [vmem:[%s19691_s7 + $0x198] sm:$0xff] }
 0xa46   : > { %v8319_v13 = vsel %vm356_vm6, %v8283_v7, 0  ;;  %v8282_v15 = vmax.f32 %v8267_v4, 0.0  ;;  %v8423_v53 = vsub.f32 %v17898_v50, %v8422_v27  ;;  %14098 = vmatprep.subr.mxu1 %v17843_v47  ;;  %v11922_v7 = vld [vmem:[%s19691_s7 + $0x190] sm:$0xff] }
 0xa47   : > { %v8431_v35 = vsub.f32 %v8310_v52, %v17921_v24  ;;  %v17929_v46 = vand.u32 4294901760, %v8319_v13  ;;  %14040 = vmatprep.mubr.f32.mxu0 %v8394_v26  ;;  %14066 = vmatprep.mubr.f32.mxu1 %v17921_v24  ;;  %v8413_v31 = vsub.f32 %v17907_v5, %v8412_v57  ;;  %v8442_v30 = vand.u32 4294901760, %v17919_v10  ;;  %v11938_v52 = vld [vmem:[%s19691_s7 + $0x210] sm:$0xff] }
 0xa48   : > { %v8316_v3 = vsel %vm356_vm6, %v8282_v15, 0  ;;  %14041 = vmatmul.mubr.f32.vlgmr.msra.gmra.mxu0 %v8404_v43  ;;  %14067 = vmatmul.mubr.f32.gmra.mxu1 %v17909_v41  ;;  %v8424_v42 = vand.u32 4294901760, %v8423_v53  ;;  %v18032_v26 = vand.u32 4294901760, %v11938_v52  ;;  %v11937_v43 = vld [vmem:[%s19691_s7 + $0x208] sm:$0xff] }
 0xa49   : > { %v17937_v11 = vsub.f32 %v8319_v13, %v17929_v46  ;;  %v17939_v56 = vand.u32 4294901760, %v8316_v3  ;;  %14073 = vmatpush3.msra.mxu0 %v17814_v19  ;;  %v8414_v63 = vand.u32 4294901760, %v8413_v31  ;;  %v8432_v29 = vand.u32 4294901760, %v8431_v35  ;;  %14099 = vmatpush3.msra.mxu1 %v17843_v47  ;;  %v11921_v13 = vld [vmem:[%s19691_s7 + $0x188] sm:$0xff] }
 0xa4a   : > { %14074 = vmatprep.subr.mxu0 %v17826_v61  ;;  %v8443_v55 = vsub.f32 %v17919_v10, %v8442_v30  ;;  %14132 = vmatprep.subr.mxu1 %v17807_v6 }
 0xa4b   : > { %v8451_v16 = vsub.f32 %v8316_v3, %v17939_v56  ;;  %14043 = vmatprep.mubr.f32.mxu0 %v8414_v63  ;;  %14069 = vmatprep.mubr.f32.mxu1 %v17939_v56  ;;  %v8433_v12 = vsub.f32 %v8431_v35, %v8432_v29  ;;  %v8462_v54 = vand.u32 4294901760, %v17937_v11  ;;  %v18061_v63 = vand.u32 4294901760, %v11921_v13 }
 0xa4c   : > { %14044 = vmatmul.mubr.f32.gmra.mxu0 %v8424_v42  ;;  %14070 = vmatmul.mubr.f32.gmra.mxu1 %v17929_v46  ;;  %v8444_v20 = vand.u32 4294901760, %v8443_v55 }
 0xa4d   : > { %14075 = vmatpush3.msra.mxu0 %v17826_v61  ;;  %14100 = vmatprep.mubr.f32.mxu1 %v8392_v25  ;;  %v8434_v19 = vand.u32 4294901760, %v8433_v12  ;;  %v8452_v33 = vand.u32 4294901760, %v8451_v16  ;;  %v8463_v60 = vsub.f32 %v17937_v11, %v8462_v54 }
 0xa4e   : > { %14076 = vmatprep.subr.mxu0 %v17841_v44 }
 0xa4f   : > { %14046 = vmatprep.mubr.f32.mxu0 %v8434_v19  ;;  %14077 = vmatpush3.msra.mxu0 %v17841_v44  ;;  %v8453_v17 = vsub.f32 %v8451_v16, %v8452_v33  ;;  %v8464_v61 = vand.u32 4294901760, %v8463_v60  ;;  %v18075_v60 = vsub.f32 %v11921_v13, %v18061_v63 }
 0xa50   : > { %14047 = vmatmul.mubr.f32.gmra.mxu0 %v8444_v20  ;;  %14101 = vmatmul.mubr.f32.vlgmr.msra.gmra.mxu1 %v8402_v49 }
 0xa51   : > { %14103 = vmatprep.mubr.f32.mxu1 %v8412_v57  ;;  %v8454_v34 = vand.u32 4294901760, %v8453_v17  ;;  %14078 = vmatprep.subr.mxu0 %v17853_v59  ;;  %v18034_v57 = vand.u32 4294901760, %v11922_v7 }
 0xa52   : > { %14079 = vmatpush3.msra.mxu0 %v17853_v59  ;;  %14133 = vmatpush3.msra.mxu1 %v17807_v6  ;;  %v20226_v6 = vld [vmem:[#allocation23_spill] sm:$0xff] }
 0xa53   : > { %14049 = vmatprep.mubr.f32.mxu0 %v8454_v34  ;;  %14112 = vmatprep.subr.mxu0 %v17823_v32 }
 0xa54   : > { %14050 = vmatmul.mubr.f32.gmra.mxu0 %v8464_v61  ;;  %14104 = vmatmul.mubr.f32.gmra.mxu1 %v8422_v27 }
 0xa55   : > { %14080 = vmatprep.mubr.f32.mxu0 %v17886_v62  ;;  %14106 = vmatprep.mubr.f32.mxu1 %v8432_v29 }
 0xa56   : > { %14134 = vmatprep.subr.mxu1 %v17816_v21 }
 0xa57   : > { %14135 = vmatpush3.msra.mxu1 %v17816_v21  ;;  %v9131_v21 = vld [vmem:[#allocation4 + $0x1] sm:$0xff] }
 0xa58   : > { %14081 = vmatmul.mubr.f32.vlgmr.msra.gmra.mxu0 %v17878_v58  ;;  %14107 = vmatmul.mubr.f32.gmra.mxu1 %v8442_v30 }
 0xa59   : > { %14113 = vmatpush3.msra.mxu0 %v17823_v32  ;;  %14083 = vmatprep.mubr.f32.mxu0 %v17907_v5  ;;  %v9139_v32 = vld [vmem:[#allocation4 + $0x2] sm:$0xff] }
 0xa5a   : > { %14109 = vmatprep.mubr.f32.mxu1 %v8452_v33  ;;  %14114 = vmatprep.subr.mxu0 %v17838_v0 }
 0xa5b   : > { %14115 = vmatpush3.msra.mxu0 %v17838_v0  ;;  %14136 = vmatprep.subr.mxu1 %v17829_v9 }
 0xa5c   : > { %14084 = vmatmul.mubr.f32.gmra.mxu0 %v17898_v50  ;;  %14110 = vmatmul.mubr.f32.gmra.mxu1 %v8462_v54 }
 0xa5d   : > { %14086 = vmatprep.mubr.f32.mxu0 %v8431_v35  ;;  %14137 = vmatpush3.msra.mxu1 %v17829_v9 }
 0xa5e   : > { %14140 = vmatprep.mubr.f32.mxu1 %v17880_v51  ;;  %14138 = vmatprep.subr.mxu1 %v17843_v47 }
 0xa5f   : > { %14116 = vmatprep.subr.mxu0 %v17850_v2  ;;  %14139 = vmatpush3.msra.mxu1 %v17843_v47 }
 0xa60   : > { %14087 = vmatmul.mubr.f32.gmra.mxu0 %v17919_v10  ;;  %14141 = vmatmul.mubr.f32.vlgmr.msra.gmra.mxu1 %v17874_v14 }
 0xa61   : > { %14117 = vmatpush3.msra.mxu0 %v17850_v2  ;;  %14089 = vmatprep.mubr.f32.mxu0 %v8451_v16 }
 0xa62   : > { %14143 = vmatprep.mubr.f32.mxu1 %v17900_v39  ;;  %14118 = vmatprep.subr.mxu0 %v20226_v6 }
 0xa63   : > { %14119 = vmatpush3.msra.mxu0 %v20226_v6  ;;  %9203 = vrot.lane.b32.xlu1 %v9131_v21, %s14371_s21 }
 0xa64   : > { %14090 = vmatmul.mubr.f32.gmra.mxu0 %v17937_v11  ;;  %14144 = vmatmul.mubr.f32.gmra.mxu1 %v17888_v28  ;;  %v18056_v11 = vsub.f32 %v11938_v52, %v18032_v26  ;;  %v11918_v52 = vld [vmem:[%s19691_s7 + $0x170] sm:$0xff] }
 0xa65   : > { %14120 = vmatprep.mubr.f32.mxu0 %v17880_v51  ;;  %14146 = vmatprep.mubr.f32.mxu1 %v17921_v24  ;;  %v11907_v51 = vld [vmem:[%s19690_s6 + $0x1] ss:$0 sm:$0xff] }
 0xa66   : > { %v19877_v33 = vand.u32 4294901760, %v18056_v11 }
 0xa67   : > { %9235 = vrot.lane.b32.xlu1 %v9139_v32, %s14369_s17 }
 0xa68   : > { %14121 = vmatmul.mubr.f32.vlgmr.msra.gmra.mxu0 %v17874_v14  ;;  %14147 = vmatmul.mubr.f32.gmra.mxu1 %v17909_v41 }
 0xa69   : > { %14123 = vmatprep.mubr.f32.mxu0 %v17900_v39  ;;  %14149 = vmatprep.mubr.f32.mxu1 %v17939_v56 }
 0xa6c   : > { %14124 = vmatmul.mubr.f32.gmra.mxu0 %v17888_v28  ;;  %14150 = vmatmul.mubr.f32.gmra.mxu1 %v17929_v46 }
 0xa6d   : > { %14126 = vmatprep.mubr.f32.mxu0 %v17921_v24  ;;  %v18030_v24 = vand.u32 4294901760, %v11923_v38 }
 0xa6f   : > { %v18053_v3 = vsub.f32 %v11923_v38, %v18030_v24 }
 0xa70   : > { %14127 = vmatmul.mubr.f32.gmra.mxu0 %v17909_v41  ;;  %v18015_v41 = vand.u32 4294901760, %v11939_v8 }
 0xa71   : > { %14129 = vmatprep.mubr.f32.mxu0 %v17939_v56  ;;  %v18059_v56 = vsub.f32 %v11922_v7, %v18034_v57  ;;  %v19878_v19 = vand.u32 4294901760, %v18053_v3 }
 0xa72   : > { %20227 = vst [vmem:[#allocation34_spill] sm:$0xff] %v18015_v41  ;;  %v18045_v35 = vsub.f32 %v11939_v8, %v18015_v41  ;;  %12832 = vmatprep.subr.mxu0 %v18015_v41 }
 0xa73   : > { %12833 = vmatpush3.msra.mxu0 %v18030_v24  ;;  %v19876_v20 = vand.u32 4294901760, %v18059_v56 }
 0xa74   : > { %14130 = vmatmul.mubr.f32.gmra.mxu0 %v17929_v46  ;;  %20228 = vst [vmem:[#allocation24_spill] sm:$0xff] %v18045_v35  ;;  %v18047_v46 = vand.u32 4294901760, %v11937_v43  ;;  %v19881_v55 = vand.u32 4294901760, %v18045_v35  ;;  %12834 = vmatprep.subr.mxu0 %v18032_v26 }
 0xa75   : > { %12835 = vmatpush3.msra.mxu0 %v18034_v57 }
 0xa76   : > { %v18066_v16 = vsub.f32 %v11937_v43, %v18047_v46  ;;  %v9837_v61 = vsub.f32 %v18045_v35, %v19881_v55  ;;  %12836 = vmatprep.subr.mxu0 %v18047_v46 }
 0xa77   : > { %12837 = vmatpush3.msra.mxu0 %v18061_v63 }
 0xa78   : > { %v19875_v6 = vand.u32 4294901760, %v18066_v16 }
 0xb00   : > { %v14062_v9 = vpop.f32.mrf.mxu1 }
 0xb02   : > { %v8557_v0 = vpop.f32.mrf.mxu1 }
 0xb04   : > { %v14065_v44 = vpop.f32.mrf.mxu1 }
 0xb06   : > { %v8569_v47 = vpop.f32.mrf.mxu1 }
 0xb08   : > { %v14042_v2 = vpop.f32.mrf.mxu0  ;;  %v14068_v59 = vpop.f32.mrf.mxu1 }
 0xb09   : > { %v8407_v22 = vadd.f32 %v14042_v2, %v11907_v51  ;;  %v11936_v2 = vld [vmem:[%s19691_s7 + $0x200] sm:$0xff] }
 0xb0a   : > { %v8396_v14 = vpop.f32.mrf.mxu0  ;;  %v8581_v58 = vpop.f32.mrf.mxu1  ;;  %v18131_v38 = vand.u32 4294901760, %v11936_v2 }
 0xb0b   : > { %v8397_v1 = vadd.f32 %v11907_v51, %v8396_v14  ;;  %v8564_v40 = vadd.f32 %v14062_v9, %v8407_v22  ;;  %v9725_v9 = vsub.f32 %v18053_v3, %v19878_v19 }
 0xb0c   : > { %v14045_v49 = vpop.f32.mrf.mxu0  ;;  %v18000_v62 = vpop.f32.mrf.mxu1  ;;  %12838 = vmatprep.subr.mxu0 %v18131_v38 }
 0xb0d   : > { %v8427_v23 = vadd.f32 %v14045_v49, %v11907_v51  ;;  %v18011_v5 = vadd.f32 %v8557_v0, %v8397_v1  ;;  %v9844_v0 = vsub.f32 %v18056_v11, %v19877_v33  ;;  %v11920_v49 = vld [vmem:[%s19691_s7 + $0x180] sm:$0xff]  ;;  %v9726_v1 = vand.u32 4294901760, %v9725_v9 }
 0xb0e   : > { %v8416_v28 = vpop.f32.mrf.mxu0  ;;  %v18002_v18 = vpop.f32.mrf.mxu1  ;;  %v18138_v13 = vand.u32 4294901760, %v11920_v49 }
 0xb0f   : > { %v8417_v50 = vadd.f32 %v11907_v51, %v8416_v28  ;;  %v18013_v48 = vadd.f32 %v14065_v44, %v8427_v23  ;;  %v9732_v44 = vsub.f32 %v18059_v56, %v19876_v20  ;;  %v11935_v28 = vld [vmem:[%s19691_s7 + $0x1f8] sm:$0xff]  ;;  %v9845_v23 = vand.u32 4294901760, %v9844_v0 }
 0xb10   : > { %v14048_v39 = vpop.f32.mrf.mxu0  ;;  %v18004_v36 = vpop.f32.mrf.mxu1  ;;  %12839 = vmatpush3.msra.mxu0 %v18138_v13 }
 0xb11   : > { %v8447_v25 = vadd.f32 %v14048_v39, %v11907_v51  ;;  %v18028_v10 = vadd.f32 %v8569_v47, %v8417_v50  ;;  %v19871_v47 = vand.u32 4294901760, %v18075_v60  ;;  %v9733_v50 = vand.u32 4294901760, %v9732_v44 }
 0xb12   : > { %v8436_v45 = vpop.f32.mrf.mxu0  ;;  %v18006_v37 = vpop.f32.mrf.mxu1 }
 0xb13   : > { %v8437_v15 = vadd.f32 %v11907_v51, %v8436_v45  ;;  %v18042_v53 = vadd.f32 %v14068_v59, %v8447_v25  ;;  %v9739_v39 = vsub.f32 %v18075_v60, %v19871_v47  ;;  %v11934_v25 = vld [vmem:[%s19691_s7 + $0x1f0] sm:$0xff] }
 0xb14   : > { %v14051_v4 = vpop.f32.mrf.mxu0  ;;  %v18026_v27 = vpop.f32.mrf.mxu1 }
 0xb15   : > { %v8467_v29 = vadd.f32 %v14051_v4, %v11907_v51  ;;  %v18078_v34 = vadd.f32 %v8581_v58, %v8437_v15  ;;  %v9838_v58 = vand.u32 4294901760, %v9837_v61  ;;  %v9740_v43 = vand.u32 4294901760, %v9739_v39 }
 0xb16   : > { %v8456_v31 = vpop.f32.mrf.mxu0  ;;  %v18050_v30 = vpop.f32.mrf.mxu1  ;;  %v18140_v15 = vand.u32 4294901760, %v11935_v28  ;;  %v18155_v61 = vsub.f32 %v11920_v49, %v18138_v13 }
 0xb17   : > { %v8457_v42 = vadd.f32 %v11907_v51, %v8456_v31  ;;  %v18102_v59 = vadd.f32 %v18000_v62, %v8467_v29  ;;  %v9851_v51 = vsub.f32 %v18066_v16, %v19875_v6  ;;  %v11919_v62 = vld [vmem:[%s19691_s7 + $0x178] sm:$0xff]  ;;  %12888 = vmatprep.subr.mxu1 %v9838_v58  ;;  %v18147_v29 = vsub.f32 %v11936_v2, %v18131_v38 }
 0xb18   : > { %v14082_v12 = vpop.f32.mrf.mxu0  ;;  %v18069_v54 = vpop.f32.mrf.mxu1  ;;  %12889 = vmatpush3.msra.mxu1 %v9726_v1  ;;  %12840 = vmatprep.subr.mxu0 %v18140_v15  ;;  %v19868_v49 = vand.u32 4294901760, %v18155_v61 }
 0xb19   : > { %v8687_v17 = vadd.f32 %v14082_v12, %v8564_v40  ;;  %v18105_v14 = vadd.f32 %v18002_v18, %v8457_v42  ;;  %v9852_v40 = vand.u32 4294901760, %v9851_v51  ;;  %12890 = vmatprep.subr.mxu1 %v9845_v23  ;;  %v18149_v42 = vand.u32 4294901760, %v11934_v25 }
 0xb1a   : > { %v8679_v21 = vpop.f32.mrf.mxu0  ;;  %v18085_v32 = vpop.f32.mrf.mxu1  ;;  %12891 = vmatpush3.msra.mxu1 %v9733_v50  ;;  %v19870_v44 = vand.u32 4294901760, %v18147_v29 }
 0xb1b   : > { %v8680_v45 = vadd.f32 %v8679_v21, %v18011_v5  ;;  %v18129_v8 = vadd.f32 %v18004_v36, %v8687_v17  ;;  %v18142_v5 = vand.u32 4294901760, %v11919_v62  ;;  %v18158_v21 = vsub.f32 %v11935_v28, %v18140_v15  ;;  %12892 = vmatprep.subr.mxu1 %v9852_v40  ;;  %v11933_v40 = vld [vmem:[%s19691_s7 + $0x1e8] sm:$0xff] }
 0xb1c   : > { %v14085_v22 = vpop.f32.mrf.mxu0  ;;  %v18119_v18 = vpop.f32.mrf.mxu1  ;;  %v18172_v2 = vsub.f32 %v11934_v25, %v18149_v42  ;;  %12893 = vmatpush3.msra.mxu1 %v9740_v43  ;;  %v9858_v1 = vsub.f32 %v18147_v29, %v19870_v44 }
 0xb1d   : > { %v8701_v36 = vadd.f32 %v14085_v22, %v18013_v48  ;;  %v18161_v48 = vsub.f32 %v11919_v62, %v18142_v5  ;;  %v18168_v0 = vadd.f32 %v18006_v37, %v8680_v45  ;;  %v19867_v28 = vand.u32 4294901760, %v18158_v21  ;;  %12841 = vmatpush3.msra.mxu0 %v18142_v5 }
 0xb1e   : > { %v8693_v7 = vpop.f32.mrf.mxu0  ;;  %v18136_v4 = vpop.f32.mrf.mxu1  ;;  %v19866_v23 = vand.u32 4294901760, %v18172_v2  ;;  %12842 = vmatprep.subr.mxu0 %v18149_v42 }
 0xb1f   : > { %v8694_v31 = vadd.f32 %v8693_v7, %v18028_v10  ;;  %v18163_v10 = vand.u32 4294901760, %v11918_v52  ;;  %v18186_v22 = vadd.f32 %v18026_v27, %v8701_v36  ;;  %v9865_v27 = vsub.f32 %v18158_v21, %v19867_v28  ;;  %v11917_v36 = vld [vmem:[%s19691_s7 + $0x168] sm:$0xff] }
 0xb20   : > { %v14088_v12 = vpop.f32.mrf.mxu0  ;;  %v18152_v17 = vpop.f32.mrf.mxu1  ;;  %v9859_v7 = vand.u32 4294901760, %v9858_v1  ;;  %v9872_v43 = vsub.f32 %v18172_v2, %v19866_v23  ;;  %v18232_v28 = vand.u32 4294901760, %v11933_v40 }
 0xb21   : > { %v8715_v9 = vadd.f32 %v14088_v12, %v18042_v53  ;;  %v19865_v53 = vand.u32 4294901760, %v18161_v48  ;;  %v18181_v37 = vsub.f32 %v11918_v52, %v18163_v10  ;;  %v18196_v25 = vadd.f32 %v18050_v30, %v8694_v31  ;;  %12843 = vmatpush3.msra.mxu0 %v18163_v10  ;;  %v11932_v31 = vld [vmem:[%s19691_s7 + $0x1e0] sm:$0xff] }
 0xb22   : > { %v8707_v58 = vpop.f32.mrf.mxu0  ;;  %v18175_v51 = vpop.f32.mrf.mxu1  ;;  %12894 = vmatprep.subr.mxu1 %v9859_v7  ;;  %v9873_v23 = vand.u32 4294901760, %v9872_v43  ;;  %12844 = vmatprep.subr.mxu0 %v18232_v28 }
 0xb23   : > { %v8708_v62 = vadd.f32 %v8707_v58, %v18078_v34  ;;  %v9746_v34 = vsub.f32 %v18155_v61, %v19868_v49  ;;  %v9753_v45 = vsub.f32 %v18161_v48, %v19865_v53  ;;  %v18213_v52 = vadd.f32 %v18069_v54, %v8715_v9  ;;  %v11916_v9 = vld [vmem:[%s19691_s7 + $0x160] sm:$0xff] }
 0xb24   : > { %v14091_v50 = vpop.f32.mrf.mxu0  ;;  %v18193_v39 = vpop.f32.mrf.mxu1  ;;  %v9866_v53 = vand.u32 4294901760, %v9865_v27  ;;  %v19869_v54 = vand.u32 4294901760, %v18181_v37 }
 0xb25   : > { %v8729_v30 = vadd.f32 %v14091_v50, %v18102_v59  ;;  %v9747_v58 = vand.u32 4294901760, %v9746_v34  ;;  %v9754_v59 = vand.u32 4294901760, %v9753_v45  ;;  %v18230_v50 = vadd.f32 %v18085_v32, %v8708_v62  ;;  %v11931_v34 = vld [vmem:[%s19691_s7 + $0x1d8] sm:$0xff] }
 0xb26   : > { %v8721_v12 = vpop.f32.mrf.mxu0  ;;  %v9073_v27 = vpop.f32.mrf.mxu1  ;;  %v18243_v32 = vand.u32 4294901760, %v11917_v36  ;;  %v18245_v62 = vand.u32 4294901760, %v11932_v31 }
 0xb27   : > { %v8722_v1 = vadd.f32 %v8721_v12, %v18105_v14  ;;  %v18238_v49 = vadd.f32 %v18119_v18, %v8729_v30  ;;  %12895 = vmatpush3.msra.mxu1 %v9747_v58  ;;  %v9760_v14 = vsub.f32 %v18181_v37, %v19869_v54  ;;  %v18252_v12 = vsub.f32 %v11933_v40, %v18232_v28  ;;  %v11915_v30 = vld [vmem:[%s19691_s7 + $0x158] sm:$0xff] }
 0xb28   : > { %v14122_v45 = vpop.f32.mrf.mxu0  ;;  %12896 = vmatprep.subr.mxu1 %v9866_v53  ;;  %v18254_v18 = vand.u32 4294901760, %v11916_v9  ;;  %v18266_v53 = vand.u32 4294901760, %v11931_v34  ;;  %12845 = vmatpush3.msra.mxu0 %v18243_v32 }
 0xb29   : > { %v8951_v7 = vadd.f32 %v14122_v45, %v18129_v8  ;;  %v18249_v43 = vadd.f32 %v18136_v4, %v8722_v1  ;;  %12897 = vmatpush3.msra.mxu1 %v9754_v59  ;;  %v9761_v54 = vand.u32 4294901760, %v9760_v14  ;;  %v18261_v8 = vsub.f32 %v11917_v36, %v18243_v32  ;;  %12846 = vmatprep.subr.mxu0 %v18245_v62  ;;  %v14148_v36 = vpop.f32.mrf.mxu1 }
 0xb2a   : > { %v8944_v58 = vpop.f32.mrf.mxu0  ;;  %v18264_v4 = vsub.f32 %v11932_v31, %v18245_v62  ;;  %12898 = vmatprep.subr.mxu1 %v9873_v23  ;;  %v19872_v45 = vand.u32 4294901760, %v18252_v12  ;;  %v18273_v59 = vsub.f32 %v11916_v9, %v18254_v18  ;;  %v18279_v47 = vsub.f32 %v11931_v34, %v18266_v53  ;;  %12847 = vmatpush3.msra.mxu0 %v18254_v18 }
 0xb2b   : > { %v9068_v40 = vadd.f32 %v18152_v17, %v8951_v7  ;;  %v8945_v1 = vadd.f32 %v8944_v58, %v18168_v0  ;;  %12899 = vmatpush3.msra.mxu1 %v9761_v54  ;;  %v19873_v31 = vand.u32 4294901760, %v18261_v8  ;;  %v18281_v17 = vand.u32 4294901760, %v11915_v30  ;;  %12848 = vmatprep.subr.mxu0 %v18266_v53  ;;  %v9085_v6 = vpop.f32.mrf.mxu1 }
 0xb2c   : > { %20229 = vst [vmem:[#allocation35_spill] sm:$0xff] %v18264_v4  ;;  %20230 = vst [vmem:[#allocation27_spill] sm:$0xff] %v18273_v59  ;;  %v14125_v14 = vpop.f32.mrf.mxu0  ;;  %v19874_v44 = vand.u32 4294901760, %v18264_v4  ;;  %v9879_v54 = vsub.f32 %v18252_v12, %v19872_v45 }
 0xb2d   : > { %20231 = vst [vmem:[#allocation36_spill] sm:$0xff] %v18279_v47  ;;  %v9108_v0 = vmax.f32 %v9068_v40, 0.0  ;;  %v9062_v23 = vadd.f32 %v18175_v51, %v8945_v1  ;;  %v8963_v9 = vadd.f32 %v14125_v14, %v18186_v22  ;;  %v9767_v34 = vsub.f32 %v18261_v8, %v19873_v31  ;;  %12849 = vmatpush3.msra.mxu0 %v18281_v17  ;;  %v11930_v31 = vld [vmem:[%s19691_s7 + $0x1d0] sm:$0xff] }
 0xb2e   : > { %v8956_v7 = vpop.f32.mrf.mxu0  ;;  %v9886_v58 = vsub.f32 %v18264_v4, %v19874_v44  ;;  %v19880_v40 = vand.u32 4294901760, %v18273_v59  ;;  %v19879_v51 = vand.u32 4294901760, %v18279_v47  ;;  %v9880_v45 = vand.u32 4294901760, %v9879_v54  ;;  %v11914_v44 = vld [vmem:[%s19691_s7 + $0x150] sm:$0xff] }
 0xb2f   : > { %9116 = vst.msk [vmem:[#allocation4 + $0x21] sm:$0xff] %vm356_vm6, %v9108_v0  ;;  %v9107_v22 = vmax.f32 %v9062_v23, 0.0  ;;  %v9080_v1 = vadd.f32 %v18193_v39, %v8963_v9  ;;  %v8957_v14 = vadd.f32 %v8956_v7, %v18196_v25  ;;  %v9768_v33 = vand.u32 4294901760, %v9767_v34  ;;  %v11929_v7 = vld [vmem:[%s19691_s7 + $0x1c8] sm:$0xff] }
 0xb30   : > { %v14128_v20 = vpop.f32.mrf.mxu0  ;;  %v9887_v19 = vand.u32 4294901760, %v9886_v58  ;;  %v9774_v0 = vsub.f32 %v18273_v59, %v19880_v40  ;;  %v9893_v39 = vsub.f32 %v18279_v47, %v19879_v51  ;;  %12900 = vmatprep.subr.mxu1 %v9880_v45  ;;  %v18317_v54 = vsub.f32 %v11915_v30, %v18281_v17  ;;  %v11913_v34 = vld [vmem:[%s19691_s7 + $0x148] sm:$0xff] }
 0xb31   : > { %9115 = vst.msk [vmem:[#allocation4 + $0x11] sm:$0xff] %vm356_vm6, %v9107_v22  ;;  %v9110_v25 = vmax.f32 %v9080_v1, 0.0  ;;  %v9074_v23 = vadd.f32 %v9073_v27, %v8957_v14  ;;  %v8975_v9 = vadd.f32 %v14128_v20, %v18213_v52  ;;  %12901 = vmatpush3.msra.mxu1 %v9768_v33  ;;  %v18325_v1 = vand.u32 4294901760, %v11930_v31  ;;  %v14151_v14 = vpop.f32.mrf.mxu1 }
 0xb32   : > { %20232 = vst [vmem:[#allocation55_spill] sm:$0xff] %v18317_v54  ;;  %v8968_v58 = vpop.f32.mrf.mxu0  ;;  %v9775_v51 = vand.u32 4294901760, %v9774_v0  ;;  %v9894_v22 = vand.u32 4294901760, %v9893_v39  ;;  %v18327_v27 = vand.u32 4294901760, %v11914_v44  ;;  %12902 = vmatprep.subr.mxu1 %v9887_v19  ;;  %v19884_v45 = vand.u32 4294901760, %v18317_v54 }
 0xb33   : > { %9118 = vst.msk [vmem:[#allocation4 + $0x41] sm:$0xff] %vm356_vm6, %v9110_v25  ;;  %v9109_v20 = vmax.f32 %v9074_v23, 0.0  ;;  %v9092_v52 = vadd.f32 %v14148_v36, %v8975_v9  ;;  %v8969_v30 = vadd.f32 %v8968_v58, %v18230_v50  ;;  %v18333_v33 = vsub.f32 %v11930_v31, %v18325_v1  ;;  %12850 = vmatprep.subr.mxu0 %v18325_v1 }
 0xb34   : > { %v14131_v40 = vpop.f32.mrf.mxu0  ;;  %12903 = vmatpush3.msra.mxu1 %v9775_v51  ;;  %v18336_v0 = vsub.f32 %v11914_v44, %v18327_v27  ;;  %v18338_v39 = vand.u32 4294901760, %v11929_v7  ;;  %v18340_v55 = vand.u32 4294901760, %v11913_v34  ;;  %v9781_v31 = vsub.f32 %v18317_v54, %v19884_v45  ;;  %12851 = vmatpush3.msra.mxu0 %v18327_v27 }
 0xb35   : > { %20233 = vst [vmem:[#allocation28_spill] sm:$0xff] %v18333_v33  ;;  %9117 = vst.msk [vmem:[#allocation4 + $0x31] sm:$0xff] %vm356_vm6, %v9109_v20  ;;  %v9112_v19 = vmax.f32 %v9092_v52, 0.0  ;;  %v9086_v50 = vadd.f32 %v9085_v6, %v8969_v30  ;;  %v8987_v36 = vadd.f32 %v14131_v40, %v18238_v49  ;;  %12904 = vmatprep.subr.mxu1 %v9894_v22  ;;  %v19883_v25 = vand.u32 4294901760, %v18333_v33  ;;  %v11928_v49 = vld [vmem:[%s19691_s7 + $0x1c0] sm:$0xff]  ;;  %v9097_v20 = vpop.f32.mrf.mxu1 }
 0xb36   : > { %20234 = vst [vmem:[#allocation41_spill] sm:$0xff] %v18336_v0  ;;  %20235 = vst [vmem:[#allocation31_spill] sm:$0xff] %v18338_v39  ;;  %v8980_v44 = vpop.f32.mrf.mxu0  ;;  %v18349_v51 = vld [vmem:[#allocation4 + $0x20] sm:$0xff]  ;;  %v19882_v23 = vand.u32 4294901760, %v18336_v0  ;;  %v18354_v9 = vsub.f32 %v11929_v7, %v18338_v39  ;;  %v18357_v6 = vsub.f32 %v11913_v34, %v18340_v55  ;;  %12852 = vmatprep.subr.mxu0 %v18338_v39  ;;  %v9782_v34 = vand.u32 4294901760, %v9781_v31 }
 0xb37   : > { %20236 = vst [vmem:[#allocation42_spill] sm:$0xff] %v18340_v55  ;;  %v11912_v40 = vld [vmem:[%s19691_s7 + $0x140] sm:$0xff]  ;;  %9120 = vst.msk [vmem:[#allocation4 + $0x61] sm:$0xff] %vm356_vm6, %v9112_v19  ;;  %v9111_v58 = vmax.f32 %v9086_v50, 0.0  ;;  %v9104_v22 = vadd.f32 %v14151_v14, %v8987_v36  ;;  %v8981_v7 = vadd.f32 %v8980_v44, %v18249_v43  ;;  %9331 = vrot.lane.b32.xlu0 %v18349_v51, %s14369_s17  ;;  %9269 = vrot.lane.b32.xlu1 %v18349_v51, %s14370_s18  ;;  %v11927_v19 = vld [vmem:[%s19691_s7 + $0x1b8] sm:$0xff] }
 0xb38   : > { %20237 = vst [vmem:[#allocation32_spill] sm:$0xff] %v18354_v9  ;;  %20238 = vst [vmem:[#allocation54_spill] sm:$0xff] %v18357_v6  ;;  %v9900_v52 = vsub.f32 %v18333_v33, %v19883_v25  ;;  %v9788_v30 = vsub.f32 %v18336_v0, %v19882_v23  ;;  %v19887_v14 = vand.u32 4294901760, %v18354_v9  ;;  %12853 = vmatpush3.msra.mxu0 %v18340_v55  ;;  %12905 = vmatpush3.msra.mxu1 %v9782_v34  ;;  %v11911_v23 = vld [vmem:[%s19691_s7 + $0x138] sm:$0xff]  ;;  %v18392_v25 = vld [vmem:[#allocation4 + $0x21] sm:$0xff] }
 0xb39   : > { %9119 = vst.msk [vmem:[#allocation4 + $0x51] sm:$0xff] %vm356_vm6, %v9111_v58  ;;  %v9114_v50 = vmax.f32 %v9104_v22, 0.0  ;;  %v9098_v36 = vadd.f32 %v9097_v20, %v8981_v7  ;;  %v18385_v31 = vand.u32 4294901760, %v11928_v49  ;;  %v18387_v44 = vand.u32 4294901760, %v11912_v40  ;;  %v11926_v7 = vld [vmem:[%s19691_s7 + $0x1b0] sm:$0xff] }
 0xb3a   : > { %v9901_v45 = vand.u32 4294901760, %v9900_v52  ;;  %v9789_v43 = vand.u32 4294901760, %v9788_v30  ;;  %v9907_v0 = vsub.f32 %v18354_v9, %v19887_v14  ;;  %v20241_v58 = vand.u32 4294901760, %v18357_v6  ;;  %v11910_v34 = vld [vmem:[%s19691_s7 + $0x130] sm:$0xff]  ;;  %v11925_v14 = vld [vmem:[%s19691_s7 + $0x1a8] sm:$0xff] }
 0xb3b   : > { %20239 = vst [vmem:[#allocation37_spill] sm:$0xff] %v18385_v31  ;;  %20240 = vst [vmem:[#allocation57_spill] sm:$0xff] %v18387_v44  ;;  %v9113_v20 = vmax.f32 %v9098_v36, 0.0  ;;  %9363 = vrot.lane.b32.xlu0 %v18392_v25, %s14370_s18  ;;  %9207 = vrot.lane.b32.xlu1 %v18392_v25, %s14371_s21  ;;  %v18412_v52 = vsub.f32 %v11928_v49, %v18385_v31  ;;  %v18415_v30 = vsub.f32 %v11912_v40, %v18387_v44 }
 0xb3c   : > { %v9795_v22 = vsub.f32 %v18357_v6, %v20241_v58  ;;  %9122 = vst.msk [vmem:[#allocation4 + $0x81] sm:$0xff] %vm356_vm6, %v9114_v50  ;;  %v18417_v58 = vand.u32 4294901760, %v11927_v19  ;;  %v11909_v50 = vld [vmem:[%s19691_s7 + $0x128] sm:$0xff]  ;;  %12906 = vmatprep.subr.mxu1 %v9901_v45  ;;  %v9908_v36 = vand.u32 4294901760, %v9907_v0  ;;  %v18425_v9 = vand.u32 4294901760, %v11911_v23  ;;  %12854 = vmatprep.subr.mxu0 %v18385_v31 }
 0xb3d   : > { %20242 = vst [vmem:[#allocation38_spill] sm:$0xff] %v18412_v52  ;;  %20243 = vst [vmem:[#allocation39_spill] sm:$0xff] %v18415_v30  ;;  %12907 = vmatpush3.msra.mxu1 %v9789_v43  ;;  %v19902_v49 = vand.u32 4294901760, %v18412_v52  ;;  %v19903_v40 = vand.u32 4294901760, %v18415_v30  ;;  %v18434_v54 = vand.u32 4294901760, %v11926_v7  ;;  %12855 = vmatpush3.msra.mxu0 %v18387_v44  ;;  %v9164_v45 = vld [vmem:[#allocation4 + $0x22] sm:$0xff] }
 0xb3e   : > { %20244 = vst [vmem:[#allocation40_spill] sm:$0xff] %v18417_v58  ;;  %v9796_v6 = vand.u32 4294901760, %v9795_v22  ;;  %20245 = vst [vmem:[#allocation56_spill] sm:$0xff] %v18425_v9  ;;  %v18432_v33 = vsub.f32 %v11927_v19, %v18417_v58  ;;  %12908 = vmatprep.subr.mxu1 %v9908_v36  ;;  %v18438_v0 = vsub.f32 %v11911_v23, %v18425_v9  ;;  %v18440_v22 = vand.u32 4294901760, %v11910_v34 }
 0xb3f   : > { %9121 = vst.msk [vmem:[#allocation4 + $0x71] sm:$0xff] %vm356_vm6, %v9113_v20  ;;  %20247 = vst [vmem:[#allocation59_spill] sm:$0xff] %v18434_v54  ;;  %v18442_v20 = vand.u32 4294901760, %v11925_v14  ;;  %v18444_v43 = vand.u32 4294901760, %v11909_v50  ;;  %12856 = vmatprep.subr.mxu0 %v18417_v58  ;;  %9301 = vrot.lane.b32.xlu0 %v9164_v45, %s14371_s21  ;;  %v9914_v19 = vsub.f32 %v18412_v52, %v19902_v49 }
 0xb40   : > { %20246 = vst [vmem:[#allocation43_spill] sm:$0xff] %v18432_v33  ;;  %20248 = vst [vmem:[#allocation44_spill] sm:$0xff] %v18438_v0  ;;  %9239 = vrot.lane.b32.xlu1 %v9164_v45, %s14369_s17  ;;  %v9802_v23 = vsub.f32 %v18415_v30, %v19903_v40  ;;  %v19912_v36 = vand.u32 4294901760, %v18432_v33  ;;  %v18457_v44 = vsub.f32 %v11926_v7, %v18434_v54  ;;  %12909 = vmatpush3.msra.mxu1 %v9796_v6  ;;  %v11924_v40 = vld [vmem:[%s19691_s7 + $0x1a0] sm:$0xff]  ;;  %v18481_v30 = vld [vmem:[#allocation4 + $0x10] sm:$0xff] }
 0xb41   : > { %20249 = vst [vmem:[#allocation58_spill] sm:$0xff] %v18440_v22  ;;  %20250 = vst [vmem:[#allocation46_spill] sm:$0xff] %v18442_v20  ;;  %v18461_v47 = vsub.f32 %v11910_v34, %v18440_v22  ;;  %v18464_v45 = vsub.f32 %v11925_v14, %v18442_v20  ;;  %v18467_v49 = vsub.f32 %v11909_v50, %v18444_v43  ;;  %v11908_v7 = vld [vmem:[%s19691_s7 + $0x120] sm:$0xff]  ;;  %12857 = vmatpush3.msra.mxu0 %v18425_v9  ;;  %v9163_v50 = vld [vmem:[#allocation4 + $0x12] sm:$0xff] }
 0xb42   : > { %20251 = vst [vmem:[#allocation60_spill] sm:$0xff] %v18444_v43  ;;  %20252 = vst [vmem:[#allocation45_spill] sm:$0xff] %v18457_v44  ;;  %v9915_v6 = vand.u32 4294901760, %v9914_v19  ;;  %v9803_v58 = vand.u32 4294901760, %v9802_v23  ;;  %v9921_v14 = vsub.f32 %v18432_v33, %v19912_v36  ;;  %v19921_v34 = vand.u32 4294901760, %v18457_v44  ;;  %12858 = vmatprep.subr.mxu0 %v18434_v54 }
 0xb43   : > { %20253 = vst [vmem:[#allocation13_spill] sm:$0xff] %v18461_v47  ;;  %20254 = vst [vmem:[#allocation50_spill] sm:$0xff] %v18464_v45  ;;  %v20256_v52 = vand.u32 4294901760, %v18438_v0  ;;  %v19926_v59 = vand.u32 4294901760, %v18461_v47  ;;  %12859 = vmatpush3.msra.mxu0 %v18440_v22  ;;  %9299 = vrot.lane.b32.xlu0 %v9163_v50, %s14371_s21  ;;  %v18496_v54 = vand.u32 4294901760, %v11924_v40 }
 0xb44   : > { %20255 = vst [vmem:[#allocation14_spill] sm:$0xff] %v18467_v49  ;;  %9267 = vrot.lane.b32.xlu1 %v18481_v30, %s14370_s18  ;;  %v9922_v36 = vand.u32 4294901760, %v9921_v14  ;;  %v9928_v33 = vsub.f32 %v18457_v44, %v19921_v34  ;;  %12910 = vmatprep.subr.mxu1 %v9915_v6  ;;  %v20260_v34 = vand.u32 4294901760, %v18467_v49  ;;  %v18517_v6 = vld [vmem:[#allocation4 + $0x40] sm:$0xff] }
 0xb45   : > { %v9809_v31 = vsub.f32 %v18438_v0, %v20256_v52  ;;  %20257 = vst [vmem:[#allocation51_spill] sm:$0xff] %v18496_v54  ;;  %v18498_v52 = vand.u32 4294901760, %v11908_v7  ;;  %v9816_v23 = vsub.f32 %v18461_v47, %v19926_v59  ;;  %v20259_v0 = vand.u32 4294901760, %v18464_v45  ;;  %12860 = vmatprep.subr.mxu0 %v18442_v20  ;;  %12911 = vmatpush3.msra.mxu1 %v9803_v58  ;;  %v18519_v59 = vld [vmem:[#allocation4 + $0x11] sm:$0xff] }
 0xb46   : > { %v9929_v14 = vand.u32 4294901760, %v9928_v33  ;;  %v9823_v44 = vsub.f32 %v18467_v49, %v20260_v34  ;;  %v18511_v9 = vsub.f32 %v11924_v40, %v18496_v54  ;;  %12861 = vmatpush3.msra.mxu0 %v18444_v43  ;;  %20263 = vst [vmem:[#allocation22_spill] sm:$0xff] %v18517_v6  ;;  %12912 = vmatprep.subr.mxu1 %v9922_v36 }
 0xb47   : > { %20258 = vst [vmem:[#allocation15_spill] sm:$0xff] %v18498_v52  ;;  %v9810_v19 = vand.u32 4294901760, %v9809_v31  ;;  %v9935_v22 = vsub.f32 %v18464_v45, %v20259_v0  ;;  %v18514_v31 = vsub.f32 %v11908_v7, %v18498_v52  ;;  %v9817_v0 = vand.u32 4294901760, %v9816_v23  ;;  %12862 = vmatprep.subr.mxu0 %v18496_v54  ;;  %9335 = vrot.lane.b32.xlu0 %v18517_v6, %s14369_s17  ;;  %v18536_v23 = vld [vmem:[#allocation4 + $0x41] sm:$0xff] }
 0xb48   : > { %20261 = vst [vmem:[#allocation49_spill] sm:$0xff] %v18511_v9  ;;  %9205 = vrot.lane.b32.xlu1 %v18519_v59, %s14371_s21  ;;  %v19928_v33 = vand.u32 4294901760, %v18511_v9  ;;  %12863 = vmatpush3.msra.mxu0 %v18498_v52  ;;  %v9824_v7 = vand.u32 4294901760, %v9823_v44  ;;  %20264 = vst [vmem:[#allocation25_spill] sm:$0xff] %v18536_v23 }
 0xb49   : > { %20262 = vst [vmem:[#allocation21_spill] sm:$0xff] %v18514_v31  ;;  %v19927_v58 = vand.u32 4294901760, %v18514_v31  ;;  %12913 = vmatpush3.msra.mxu1 %v9810_v19  ;;  %v9936_v40 = vand.u32 4294901760, %v9935_v22  ;;  %12944 = vmatprep.subr.mxu0 %v18045_v35  ;;  %v9166_v19 = vld [vmem:[#allocation4 + $0x42] sm:$0xff] }
 0xb4a   : > { %12914 = vmatprep.subr.mxu1 %v9929_v14  ;;  %v9942_v36 = vsub.f32 %v18511_v9, %v19928_v33  ;;  %v18545_v14 = vld [vmem:[#allocation4 + $0x30] sm:$0xff] }
 0xb4b   : > { %v9830_v34 = vsub.f32 %v18514_v31, %v19927_v58  ;;  %12915 = vmatpush3.msra.mxu1 %v9817_v0  ;;  %9367 = vrot.lane.b32.xlu0 %v18536_v23, %s14370_s18  ;;  %v9165_v0 = vld [vmem:[#allocation4 + $0x32] sm:$0xff] }
 0xb4c   : > { %9237 = vrot.lane.b32.xlu1 %v9163_v50, %s14369_s17  ;;  %v9943_v22 = vand.u32 4294901760, %v9942_v36  ;;  %12916 = vmatprep.subr.mxu1 %v9936_v40  ;;  %v18551_v50 = vld [vmem:[#allocation4 + $0x31] sm:$0xff]  ;;  %v18559_v40 = vld [vmem:[#allocation4 + $0x60] sm:$0xff] }
 0xb4d   : > { %v9831_v44 = vand.u32 4294901760, %v9830_v34  ;;  %12917 = vmatpush3.msra.mxu1 %v9824_v7  ;;  %20265 = vst [vmem:[#allocation47_spill] sm:$0xff] %v18559_v40  ;;  %v18565_v7 = vld [vmem:[#allocation4 + $0x61] sm:$0xff]  ;;  %v18573_v34 = vld [vmem:[#allocation4 + $0x50] sm:$0xff] }
 0xb4e   : > { %12918 = vmatprep.subr.mxu1 %v9943_v22  ;;  %20266 = vst [vmem:[#allocation48_spill] sm:$0xff] %v18565_v7  ;;  %v9168_v36 = vld [vmem:[#allocation4 + $0x62] sm:$0xff]  ;;  %20267 = vst [vmem:[#allocation16_spill] sm:$0xff] %v18573_v34  ;;  %v18579_v22 = vld [vmem:[#allocation4 + $0x51] sm:$0xff] }
 0xb4f   : > { %9305 = vrot.lane.b32.xlu0 %v9166_v19, %s14371_s21  ;;  %12919 = vmatpush3.msra.mxu1 %v9831_v44  ;;  %20268 = vst [vmem:[#allocation52_spill] sm:$0xff] %v18579_v22  ;;  %v9167_v44 = vld [vmem:[#allocation4 + $0x52] sm:$0xff] }
 0xb50   : > { %9273 = vrot.lane.b32.xlu1 %v18517_v6, %s14370_s18  ;;  %13000 = vmatprep.subr.mxu1 %v18015_v41  ;;  %v18595_v58 = vld [vmem:[#allocation4 + $0x70] sm:$0xff] }
 0xb51   : > { %20270 = vst [vmem:[#allocation5_spill] sm:$0xff] %v18595_v58  ;;  %v18600_v33 = vld [vmem:[#allocation4 + $0x71] sm:$0xff] }
 0xb52   : > { %20271 = vst [vmem:[#allocation6_spill] sm:$0xff] %v18600_v33 }
 0xb53   : > { %9333 = vrot.lane.b32.xlu0 %v18545_v14, %s14369_s17 }
 0xb54   : > { %9211 = vrot.lane.b32.xlu1 %v18536_v23, %s14371_s21 }
 0xb57   : > { %9365 = vrot.lane.b32.xlu0 %v18551_v50, %s14370_s18 }
 0xb58   : > { %9243 = vrot.lane.b32.xlu1 %v9166_v19, %s14369_s17  ;;  %v9177_v19 = vld [vmem:[#allocation4 + $0x80] sm:$0xff] }
 0xb5b   : > { %9303 = vrot.lane.b32.xlu0 %v9165_v0, %s14371_s21 }
 0xb5c   : > { %9271 = vrot.lane.b32.xlu1 %v18545_v14, %s14370_s18 }
 0xb5f   : > { %9339 = vrot.lane.b32.xlu0 %v18559_v40, %s14369_s17 }
 0xb60   : > { %9209 = vrot.lane.b32.xlu1 %v18551_v50, %s14371_s21 }
 0xb63   : > { %9371 = vrot.lane.b32.xlu0 %v18565_v7, %s14370_s18 }
 0xb64   : > { %9241 = vrot.lane.b32.xlu1 %v9165_v0, %s14369_s17  ;;  %v18590_v0 = vld [vmem:[#allocation4 + $0x81] sm:$0xff] }
 0xb65   : > { %20269 = vst [vmem:[#allocation53_spill] sm:$0xff] %v18590_v0 }
 0xb67   : > { %9309 = vrot.lane.b32.xlu0 %v9168_v36, %s14371_s21 }
 0xb68   : > { %9277 = vrot.lane.b32.xlu1 %v18559_v40, %s14370_s18 }
 0xb6b   : > { %9337 = vrot.lane.b32.xlu0 %v18573_v34, %s14369_s17 }
 0xb6c   : > { %9215 = vrot.lane.b32.xlu1 %v18565_v7, %s14371_s21  ;;  %v9146_v7 = vld [vmem:[#allocation4 + $0x72] sm:$0xff] }
 0xb6f   : > { %9369 = vrot.lane.b32.xlu0 %v18579_v22, %s14370_s18 }
 0xb70   : > { %9247 = vrot.lane.b32.xlu1 %v9168_v36, %s14369_s17  ;;  %v9170_v36 = vld [vmem:[#allocation4 + $0x82] sm:$0xff] }
 0xb73   : > { %9307 = vrot.lane.b32.xlu0 %v9167_v44, %s14371_s21 }
 0xb74   : > { %9275 = vrot.lane.b32.xlu1 %v18573_v34, %s14370_s18 }
 0xb77   : > { %9343 = vrot.lane.b32.xlu0 %v9177_v19, %s14369_s17 }
 0xb78   : > { %9213 = vrot.lane.b32.xlu1 %v18579_v22, %s14371_s21 }
 0xb7b   : > { %9375 = vrot.lane.b32.xlu0 %v18590_v0, %s14370_s18  ;;  %v9204_v0 = vpop.permute.xlu1 %9203 }
 0xb7c   : > { %9245 = vrot.lane.b32.xlu1 %v9167_v44, %s14369_s17  ;;  %v9178_v44 = vld [vmem:[#allocation4 + $0x90] sm:$0xff] }
 0xb7f   : > { %9313 = vrot.lane.b32.xlu0 %v9170_v36, %s14371_s21  ;;  %v9186_v36 = vld [vmem:[#allocation4 + $0x91] sm:$0xff] }
 0xb80   : > { %9279 = vrot.lane.b32.xlu1 %v18595_v58, %s14370_s18 }
 0xb83   : > { %9341 = vrot.lane.b32.xlu0 %v18595_v58, %s14369_s17  ;;  %v9236_v58 = vpop.permute.xlu1 %9235 }
 0xb84   : > { %9217 = vrot.lane.b32.xlu1 %v18600_v33, %s14371_s21 }
 0xb87   : > { %9373 = vrot.lane.b32.xlu0 %v18600_v33, %s14370_s18  ;;  %v9123_v33 = vld [vmem:[#allocation4] sm:$0xff] }
 0xb88   : > { %9249 = vrot.lane.b32.xlu1 %v9146_v7, %s14369_s17 }
 0xb8b   : > { %9311 = vrot.lane.b32.xlu0 %v9146_v7, %s14371_s21  ;;  %v9387_v7 = vsel %vm356_vm6, %v9123_v33, %v9204_v0 }
 0xb8c   : > { %9281 = vrot.lane.b32.xlu1 %v9177_v19, %s14370_s18  ;;  %v9395_v19 = vsel %vm1908_vm10, %v9387_v7, %v9236_v58 }
 0xb8f   : > { %9345 = vrot.lane.b32.xlu0 %v9178_v44, %s14369_s17 }
 0xb93   : > { %9377 = vrot.lane.b32.xlu0 %v9186_v36, %s14370_s18 }
 0xba9   : > { %v9332_v40 = vpop.permute.xlu0 %9331  ;;  %v9270_v34 = vpop.permute.xlu1 %9269 }
 0xbad   : > { %v9364_v35 = vpop.permute.xlu0 %9363  ;;  %v18613_v31 = vpop.permute.xlu1 %9207 }
 0xbb1   : > { %v9302_v9 = vpop.permute.xlu0 %9301 }
 0xbb2   : > { %v18615_v22 = vpop.permute.xlu1 %9239 }
 0xbb5   : > { %v9300_v49 = vpop.permute.xlu0 %9299 }
 0xbb6   : > { %v9268_v44 = vpop.permute.xlu1 %9267  ;;  %v9411_v36 = vsel %vm356_vm6, %v18519_v59, %v9300_v49 }
 0xbb7   : > { %v9403_v45 = vsel %vm3936_vm14, %v9395_v19, %v9268_v44  ;;  %v9419_v6 = vsel %vm1908_vm10, %v9411_v36, %v9332_v40 }
 0xbb8   : > { %v18623_v47 = vand.u32 4294901760, %v9403_v45  ;;  %v9427_v41 = vsel %vm3936_vm14, %v9419_v6, %v9364_v35 }
 0xbb9   : > { %v18626_v23 = vand.u32 4294901760, %v9427_v41  ;;  %v18631_v33 = vpop.permute.xlu0 %9335 }
 0xbba   : > { %20272 = vst [vmem:[#allocation7_spill] sm:$0xff] %v18623_v47  ;;  %v18629_v52 = vsub.f32 %v9403_v45, %v18623_v47  ;;  %v9206_v58 = vpop.permute.xlu1 %9205 }
 0xbbb   : > { %20273 = vst [vmem:[#allocation8_spill] sm:$0xff] %v18626_v23  ;;  %v18634_v0 = vsub.f32 %v9427_v41, %v18626_v23  ;;  %9946 = vmatprep.mubr.f32.mxu1 %v18626_v23  ;;  %v9388_v35 = vsel %vm356_vm6, %v18481_v30, %v9206_v58  ;;  %v20284_v23 = vld [vmem:[#allocation40_spill] sm:$0xff] }
 0xbbc   : > { %v19952_v59 = vand.u32 4294901760, %v18629_v52  ;;  %9948 = vmatmul.mubr.f32.vlgmr.msra.gmra.mxu1 %v18623_v47 }
 0xbbd   : > { %v18641_v49 = vpop.permute.xlu0 %9367  ;;  %v19955_v45 = vand.u32 4294901760, %v18634_v0  ;;  %13001 = vmatpush3.msra.mxu1 %v18030_v24 }
 0xbbe   : > { %v9238_v6 = vpop.permute.xlu1 %9237  ;;  %v9609_v41 = vsub.f32 %v18629_v52, %v19952_v59  ;;  %13002 = vmatprep.subr.mxu1 %v18032_v26 }
 0xbbf   : > { %v9396_v40 = vsel %vm1908_vm10, %v9388_v35, %v9238_v6  ;;  %v9603_v7 = vsub.f32 %v18634_v0, %v19955_v45  ;;  %13003 = vmatpush3.msra.mxu1 %v18034_v57  ;;  %v20278_v45 = vld [vmem:[#allocation27_spill] sm:$0xff] }
 0xbc0   : > { %13004 = vmatprep.subr.mxu1 %v18047_v46  ;;  %v9404_v30 = vsel %vm3936_vm14, %v9396_v40, %v9270_v34  ;;  %v9610_v58 = vand.u32 4294901760, %v9609_v41  ;;  %v9412_v41 = vsel %vm356_vm6, %v18392_v25, %v9302_v9  ;;  %v9389_v9 = vsel %vm356_vm6, %v18349_v51, %v18613_v31 }
 0xbc1   : > { %v18656_v19 = vpop.permute.xlu0 %9305  ;;  %v9604_v36 = vand.u32 4294901760, %v9603_v7  ;;  %13005 = vmatpush3.msra.mxu1 %v18061_v63  ;;  %v18663_v35 = vand.u32 4294901760, %v9404_v30 }
 0xbc2   : > { %v18658_v44 = vpop.permute.xlu1 %9273  ;;  %13006 = vmatprep.subr.mxu1 %v18131_v38 }
 0xbc3   : > { %9605 = vmatprep.mubr.f32.mxu0 %v9604_v36  ;;  %13007 = vmatpush3.msra.mxu1 %v18138_v13  ;;  %20274 = vst [vmem:[#allocation9_spill] sm:$0xff] %v18663_v35  ;;  %v18677_v40 = vsub.f32 %v9404_v30, %v18663_v35 }
 0xbc4   : > { %9611 = vmatmul.mubr.f32.vlgmr.msra.gmra.mxu0 %v9610_v58  ;;  %13008 = vmatprep.subr.mxu1 %v18140_v15 }
 0xbc5   : > { %v9334_v6 = vpop.permute.xlu0 %9333  ;;  %12945 = vmatpush3.msra.mxu0 %v18053_v3  ;;  %13009 = vmatpush3.msra.mxu1 %v18142_v5  ;;  %v19953_v30 = vand.u32 4294901760, %v18677_v40 }
 0xbc6   : > { %v18666_v34 = vpop.permute.xlu1 %9211  ;;  %12946 = vmatprep.subr.mxu0 %v18056_v11  ;;  %13010 = vmatprep.subr.mxu1 %v18149_v42  ;;  %v9420_v7 = vsel %vm1908_vm10, %v9412_v41, %v9334_v6  ;;  %v9397_v6 = vsel %vm1908_vm10, %v9389_v9, %v18615_v22 }
 0xbc7   : > { %12947 = vmatpush3.msra.mxu0 %v18059_v56  ;;  %13011 = vmatpush3.msra.mxu1 %v18163_v10 }
 0xbc8   : > { %12948 = vmatprep.subr.mxu0 %v18066_v16  ;;  %13012 = vmatprep.subr.mxu1 %v18232_v28 }
 0xbc9   : > { %v9366_v36 = vpop.permute.xlu0 %9365  ;;  %12949 = vmatpush3.msra.mxu0 %v18075_v60  ;;  %13013 = vmatpush3.msra.mxu1 %v18243_v32 }
 0xbca   : > { %v18682_v58 = vpop.permute.xlu1 %9243  ;;  %v9428_v59 = vsel %vm3936_vm14, %v9420_v7, %v9366_v36  ;;  %12950 = vmatprep.subr.mxu0 %v18147_v29  ;;  %13014 = vmatprep.subr.mxu1 %v18245_v62 }
 0xbcb   : > { %v18689_v25 = vand.u32 4294901760, %v9428_v59  ;;  %12951 = vmatpush3.msra.mxu0 %v18155_v61  ;;  %13015 = vmatpush3.msra.mxu1 %v18254_v18 }
 0xbcc   : > { %12952 = vmatprep.subr.mxu0 %v18158_v21  ;;  %13016 = vmatprep.subr.mxu1 %v18266_v53 }
 0xbcd   : > { %20275 = vst [vmem:[#allocation10_spill] sm:$0xff] %v18689_v25  ;;  %v18702_v41 = vsub.f32 %v9428_v59, %v18689_v25  ;;  %v9304_v7 = vpop.permute.xlu0 %9303  ;;  %9953 = vmatprep.mubr.f32.mxu1 %v18689_v25  ;;  %12953 = vmatpush3.msra.mxu0 %v18161_v48 }
 0xbce   : > { %v9272_v36 = vpop.permute.xlu1 %9271  ;;  %v9413_v51 = vsel %vm356_vm6, %v18551_v50, %v9304_v7  ;;  %9955 = vmatmul.mubr.f32.gmra.mxu1 %v18663_v35  ;;  %12954 = vmatprep.subr.mxu0 %v18172_v2 }
 0xbcf   : > { %v9405_v31 = vsel %vm3936_vm14, %v9397_v6, %v9272_v36  ;;  %v9421_v22 = vsel %vm1908_vm10, %v9413_v51, %v18631_v33  ;;  %v19954_v9 = vand.u32 4294901760, %v18702_v41  ;;  %13017 = vmatpush3.msra.mxu1 %v18281_v17  ;;  %12955 = vmatpush3.msra.mxu0 %v18181_v37  ;;  %v9624_v6 = vsub.f32 %v18677_v40, %v19953_v30 }
 0xbd0   : > { %v18713_v59 = vand.u32 4294901760, %v9405_v31  ;;  %v9429_v50 = vsel %vm3936_vm14, %v9421_v22, %v18641_v49  ;;  %13018 = vmatprep.subr.mxu1 %v18325_v1  ;;  %12956 = vmatprep.subr.mxu0 %v18252_v12 }
 0xbd1   : > { %v18725_v33 = vand.u32 4294901760, %v9429_v50  ;;  %v18730_v36 = vpop.permute.xlu0 %9339  ;;  %v9618_v49 = vsub.f32 %v18702_v41, %v19954_v9  ;;  %13019 = vmatpush3.msra.mxu1 %v18327_v27  ;;  %12957 = vmatpush3.msra.mxu0 %v18261_v8  ;;  %v9625_v9 = vand.u32 4294901760, %v9624_v6  ;;  %v20281_v6 = vld [vmem:[#allocation36_spill] sm:$0xff] }
 0xbd2   : > { %20276 = vst [vmem:[#allocation11_spill] sm:$0xff] %v18713_v59  ;;  %v18728_v7 = vsub.f32 %v9405_v31, %v18713_v59  ;;  %v9210_v51 = vpop.permute.xlu1 %9209  ;;  %13020 = vmatprep.subr.mxu1 %v18338_v39  ;;  %12958 = vmatprep.subr.mxu0 %v18264_v4  ;;  %v20279_v31 = vld [vmem:[#allocation37_spill] sm:$0xff] }
 0xbd3   : > { %20277 = vst [vmem:[#allocation12_spill] sm:$0xff] %v18725_v33  ;;  %v18740_v22 = vsub.f32 %v9429_v50, %v18725_v33  ;;  %9960 = vmatprep.mubr.f32.mxu1 %v18725_v33  ;;  %v9619_v30 = vand.u32 4294901760, %v9618_v49  ;;  %13021 = vmatpush3.msra.mxu1 %v18340_v55  ;;  %v9390_v35 = vsel %vm356_vm6, %v18545_v14, %v9210_v51  ;;  %v20282_v51 = vld [vmem:[#allocation57_spill] sm:$0xff] }
 0xbd4   : > { %9962 = vmatmul.mubr.f32.gmra.mxu1 %v18713_v59  ;;  %12959 = vmatpush3.msra.mxu0 %v20278_v45  ;;  %v20280_v49 = vand.u32 4294901760, %v18728_v7 }
 0xbd5   : > { %v18749_v25 = vpop.permute.xlu0 %9371  ;;  %9620 = vmatprep.mubr.f32.mxu0 %v9619_v30  ;;  %v19968_v47 = vand.u32 4294901760, %v18740_v22  ;;  %13022 = vmatprep.subr.mxu1 %v20279_v31  ;;  %v20283_v30 = vld [vmem:[#allocation55_spill] sm:$0xff]  ;;  %v20285_v31 = vld [vmem:[#allocation28_spill] sm:$0xff] }
 0xbd6   : > { %v9242_v50 = vpop.permute.xlu1 %9241  ;;  %v9639_v33 = vsub.f32 %v18728_v7, %v20280_v49  ;;  %9626 = vmatmul.mubr.f32.gmra.mxu0 %v9625_v9  ;;  %12960 = vmatprep.subr.mxu0 %v20281_v6  ;;  %v20287_v6 = vld [vmem:[#allocation41_spill] sm:$0xff] }
 0xbd7   : > { %v9398_v59 = vsel %vm1908_vm10, %v9390_v35, %v9242_v50  ;;  %v9633_v14 = vsub.f32 %v18740_v22, %v19968_v47  ;;  %13023 = vmatpush3.msra.mxu1 %v20282_v51  ;;  %12961 = vmatpush3.msra.mxu0 %v20283_v30  ;;  %v20286_v50 = vld [vmem:[#allocation56_spill] sm:$0xff]  ;;  %v20288_v51 = vld [vmem:[#allocation59_spill] sm:$0xff] }
 0xbd8   : > { %13024 = vmatprep.subr.mxu1 %v20284_v23  ;;  %12962 = vmatprep.subr.mxu0 %v20285_v31  ;;  %v9406_v49 = vsel %vm3936_vm14, %v9398_v59, %v18658_v44  ;;  %v9640_v47 = vand.u32 4294901760, %v9639_v33  ;;  %v20289_v30 = vld [vmem:[#allocation32_spill] sm:$0xff]  ;;  %v20290_v23 = vld [vmem:[#allocation58_spill] sm:$0xff] }
 0xbd9   : > { %v18767_v45 = vpop.permute.xlu0 %9309  ;;  %v9634_v9 = vand.u32 4294901760, %v9633_v14  ;;  %13025 = vmatpush3.msra.mxu1 %v20286_v50  ;;  %12963 = vmatpush3.msra.mxu0 %v20287_v6  ;;  %v18776_v31 = vand.u32 4294901760, %v9406_v49  ;;  %v20292_v14 = vld [vmem:[#allocation54_spill] sm:$0xff] }
 0xbda   : > { %v18769_v35 = vpop.permute.xlu1 %9277  ;;  %13026 = vmatprep.subr.mxu1 %v20288_v51  ;;  %12964 = vmatprep.subr.mxu0 %v20289_v30  ;;  %v20293_v33 = vld [vmem:[#allocation38_spill] sm:$0xff]  ;;  %v20294_v30 = vld [vmem:[#allocation39_spill] sm:$0xff] }
 0xbdb   : > { %9635 = vmatprep.mubr.f32.mxu0 %v9634_v9  ;;  %13027 = vmatpush3.msra.mxu1 %v20290_v23  ;;  %20291 = vst [vmem:[#allocation23_spill] sm:$0xff] %v18776_v31  ;;  %v20295_v9 = vld [vmem:[#allocation15_spill] sm:$0xff]  ;;  %v20296_v23 = vld [vmem:[#allocation25_spill] sm:$0xff] }
 0xbdc   : > { %9641 = vmatmul.mubr.f32.gmra.mxu0 %v9640_v47  ;;  %13028 = vmatprep.subr.mxu1 %v18442_v20  ;;  %v9414_v47 = vsel %vm356_vm6, %v20296_v23, %v18656_v19  ;;  %v18791_v20 = vsub.f32 %v9406_v49, %v18776_v31  ;;  %v20297_v51 = vld [vmem:[#allocation43_spill] sm:$0xff]  ;;  %v20302_v23 = vld [vmem:[#allocation13_spill] sm:$0xff]  ;;  %v20303_v19 = vld [vmem:[#allocation22_spill] sm:$0xff] }
 0xbdd   : > { %v9338_v44 = vpop.permute.xlu0 %9337  ;;  %12965 = vmatpush3.msra.mxu0 %v20292_v14  ;;  %13029 = vmatpush3.msra.mxu1 %v18444_v43  ;;  %v20298_v14 = vld [vmem:[#allocation34_spill] sm:$0xff]  ;;  %v9391_v49 = vsel %vm356_vm6, %v20303_v19, %v18666_v34  ;;  %v20307_v19 = vld [vmem:[#allocation49_spill] sm:$0xff] }
 0xbde   : > { %v18779_v59 = vpop.permute.xlu1 %9215  ;;  %12966 = vmatprep.subr.mxu0 %v20293_v33  ;;  %13030 = vmatprep.subr.mxu1 %v18496_v54  ;;  %v9422_v43 = vsel %vm1908_vm10, %v9414_v47, %v9338_v44  ;;  %v20299_v54 = vld [vmem:[#allocation44_spill] sm:$0xff]  ;;  %v9399_v44 = vsel %vm1908_vm10, %v9391_v49, %v18682_v58 }
 0xbdf   : > { %12967 = vmatpush3.msra.mxu0 %v20294_v30  ;;  %13031 = vmatpush3.msra.mxu1 %v20295_v9  ;;  %v20300_v9 = vld [vmem:[#allocation45_spill] sm:$0xff] }
 0xbe0   : > { %12968 = vmatprep.subr.mxu0 %v20297_v51  ;;  %13112 = vmatprep.subr.mxu1 %v20298_v14  ;;  %v20304_v51 = vld [vmem:[#allocation50_spill] sm:$0xff]  ;;  %v20309_v14 = vld [vmem:[#allocation21_spill] sm:$0xff] }
 0xbe1   : > { %v9370_v33 = vpop.permute.xlu0 %9369  ;;  %12969 = vmatpush3.msra.mxu0 %v20299_v54 }
 0xbe2   : > { %v9248_v6 = vpop.permute.xlu1 %9247  ;;  %v9430_v30 = vsel %vm3936_vm14, %v9422_v43, %v9370_v33  ;;  %12970 = vmatprep.subr.mxu0 %v20300_v9  ;;  %v20305_v9 = vld [vmem:[#allocation14_spill] sm:$0xff] }
 0xbe3   : > { %v18799_v50 = vand.u32 4294901760, %v9430_v30  ;;  %12971 = vmatpush3.msra.mxu0 %v20302_v23  ;;  %v20306_v23 = vld [vmem:[#allocation52_spill] sm:$0xff] }
 0xbe4   : > { %12972 = vmatprep.subr.mxu0 %v20304_v51 }
 0xbe5   : > { %20301 = vst [vmem:[#allocation25_spill] sm:$0xff] %v18799_v50  ;;  %v18810_v47 = vsub.f32 %v9430_v30, %v18799_v50  ;;  %v9308_v43 = vpop.permute.xlu0 %9307  ;;  %9967 = vmatprep.mubr.f32.mxu1 %v18799_v50  ;;  %12973 = vmatpush3.msra.mxu0 %v20305_v9 }
 0xbe6   : > { %v9276_v33 = vpop.permute.xlu1 %9275  ;;  %v9415_v54 = vsel %vm356_vm6, %v20306_v23, %v9308_v43  ;;  %9969 = vmatmul.mubr.f32.gmra.mxu1 %v18776_v31  ;;  %12974 = vmatprep.subr.mxu0 %v20307_v19  ;;  %v20310_v23 = vand.u32 4294901760, %v18791_v20  ;;  %v20311_v43 = vld [vmem:[#allocation24_spill] sm:$0xff] }
 0xbe7   : > { %v9407_v34 = vsel %vm3936_vm14, %v9399_v44, %v9276_v33  ;;  %v9423_v58 = vsel %vm1908_vm10, %v9415_v54, %v18730_v36  ;;  %v19977_v49 = vand.u32 4294901760, %v18810_v47  ;;  %12975 = vmatpush3.msra.mxu0 %v20309_v14  ;;  %v20312_v33 = vand.u32 4294901760, %v20311_v43 }
 0xbe8   : > { %v18821_v30 = vand.u32 4294901760, %v9407_v34  ;;  %v9431_v50 = vsel %vm3936_vm14, %v9423_v58, %v18749_v25  ;;  %v9654_v44 = vsub.f32 %v18791_v20, %v20310_v23 }
 0xbe9   : > { %13056 = vmatprep.subr.mxu0 %v20312_v33  ;;  %v18832_v31 = vand.u32 4294901760, %v9431_v50  ;;  %v9344_v36 = vpop.permute.xlu0 %9343  ;;  %v9648_v14 = vsub.f32 %v18810_v47, %v19977_v49  ;;  %v20314_v33 = vld [vmem:[#allocation16_spill] sm:$0xff] }
 0xbea   : > { %20308 = vst [vmem:[#allocation34_spill] sm:$0xff] %v18821_v30  ;;  %v18835_v54 = vsub.f32 %v9407_v34, %v18821_v30  ;;  %v9214_v19 = vpop.permute.xlu1 %9213  ;;  %v9655_v43 = vand.u32 4294901760, %v9654_v44 }
 0xbeb   : > { %20313 = vst [vmem:[#allocation22_spill] sm:$0xff] %v18832_v31  ;;  %v18841_v25 = vsub.f32 %v9431_v50, %v18832_v31  ;;  %9974 = vmatprep.mubr.f32.mxu1 %v18832_v31  ;;  %v9649_v23 = vand.u32 4294901760, %v9648_v14  ;;  %v9392_v34 = vsel %vm356_vm6, %v20314_v33, %v9214_v19 }
 0xbec   : > { %v19982_v58 = vand.u32 4294901760, %v18835_v54  ;;  %9976 = vmatmul.mubr.f32.gmra.mxu1 %v18821_v30 }
 0xbed   : > { %v9376_v9 = vpop.permute.xlu0 %9375  ;;  %9650 = vmatprep.mubr.f32.mxu0 %v9649_v23  ;;  %v19984_v55 = vand.u32 4294901760, %v18841_v25 }
 0xbee   : > { %v9246_v51 = vpop.permute.xlu1 %9245  ;;  %v9669_v50 = vsub.f32 %v18835_v54, %v19982_v58  ;;  %9656 = vmatmul.mubr.f32.gmra.mxu0 %v9655_v43  ;;  %v20315_v58 = vld [vmem:[#allocation47_spill] sm:$0xff] }
 0xbef   : > { %v9400_v49 = vsel %vm1908_vm10, %v9392_v34, %v9246_v51  ;;  %v9663_v14 = vsub.f32 %v18841_v25, %v19984_v55  ;;  %v9393_v51 = vsel %vm356_vm6, %v20315_v58, %v18779_v59 }
 0xbf0   : > { %v9408_v44 = vsel %vm3936_vm14, %v9400_v49, %v18769_v35  ;;  %v9670_v30 = vand.u32 4294901760, %v9669_v50  ;;  %v9401_v4 = vsel %vm1908_vm10, %v9393_v51, %v9248_v6  ;;  %v20316_v35 = vld [vmem:[#allocation48_spill] sm:$0xff] }
 0xbf1   : > { %v9314_v19 = vpop.permute.xlu0 %9313  ;;  %v9664_v23 = vand.u32 4294901760, %v9663_v14  ;;  %v18858_v31 = vand.u32 4294901760, %v9408_v44  ;;  %v9416_v49 = vsel %vm356_vm6, %v20316_v35, %v18767_v45 }
 0xbf2   : > { %v9280_v33 = vpop.permute.xlu1 %9279 }
 0xbf3   : > { %9665 = vmatprep.mubr.f32.mxu0 %v9664_v23  ;;  %v9409_v55 = vsel %vm3936_vm14, %v9401_v4, %v9280_v33  ;;  %v18869_v50 = vsub.f32 %v9408_v44, %v18858_v31  ;;  %v20318_v4 = vld [vmem:[#allocation5_spill] sm:$0xff] }
 0xbf4   : > { %9671 = vmatmul.mubr.f32.gmra.mxu0 %v9670_v30  ;;  %v18872_v39 = vand.u32 4294901760, %v9409_v55 }
 0xbf5   : > { %v9342_v43 = vpop.permute.xlu0 %9341  ;;  %v19988_v6 = vand.u32 4294901760, %v18869_v50 }
 0xbf6   : > { %v9218_v34 = vpop.permute.xlu1 %9217  ;;  %v9424_v14 = vsel %vm1908_vm10, %v9416_v49, %v9342_v43  ;;  %v18886_v35 = vsub.f32 %v9409_v55, %v18872_v39  ;;  %v20319_v49 = vld [vmem:[#allocation6_spill] sm:$0xff] }
 0xbf7   : > { %v9394_v33 = vsel %vm356_vm6, %v20318_v4, %v9218_v34  ;;  %v9684_v55 = vsub.f32 %v18869_v50, %v19988_v6 }
 0xbf9   : > { %v9374_v30 = vpop.permute.xlu0 %9373 }
 0xbfa   : > { %v9250_v23 = vpop.permute.xlu1 %9249  ;;  %v9432_v59 = vsel %vm3936_vm14, %v9424_v14, %v9374_v30 }
 0xbfb   : > { %v18875_v58 = vand.u32 4294901760, %v9432_v59  ;;  %v9402_v44 = vsel %vm1908_vm10, %v9394_v33, %v9250_v23 }
 0xbfd   : > { %20317 = vst [vmem:[#allocation52_spill] sm:$0xff] %v18875_v58  ;;  %v18881_v45 = vsub.f32 %v9432_v59, %v18875_v58  ;;  %v9312_v51 = vpop.permute.xlu0 %9311  ;;  %9981 = vmatprep.mubr.f32.mxu1 %v18875_v58 }
 0xbfe   : > { %v9282_v43 = vpop.permute.xlu1 %9281  ;;  %v9417_v14 = vsel %vm356_vm6, %v20319_v49, %v9312_v51  ;;  %9983 = vmatmul.mubr.f32.gmra.mxu1 %v18858_v31 }
 0xbff   : > { %v9410_v30 = vsel %vm3936_vm14, %v9402_v44, %v9282_v43  ;;  %v9425_v34 = vsel %vm1908_vm10, %v9417_v14, %v9344_v36  ;;  %v19989_v59 = vand.u32 4294901760, %v18881_v45  ;;  %v20321_v43 = vld [vmem:[#allocation53_spill] sm:$0xff] }
 0xc00   : > { %v9433_v23 = vsel %vm3936_vm14, %v9425_v34, %v9376_v9  ;;  %v18895_v4 = vand.u32 4294901760, %v9410_v30  ;;  %v9418_v49 = vsel %vm356_vm6, %v20321_v43, %v9314_v19  ;;  %v9685_v34 = vand.u32 4294901760, %v9684_v55 }
 0xc01   : > { %v18900_v33 = vand.u32 4294901760, %v9433_v23  ;;  %v9346_v58 = vpop.permute.xlu0 %9345  ;;  %v9678_v44 = vsub.f32 %v18881_v45, %v19989_v59 }
 0xc02   : > { %v18913_v14 = vsub.f32 %v9410_v30, %v18895_v4  ;;  %v9426_v6 = vsel %vm1908_vm10, %v9418_v49, %v9346_v58 }
 0xc03   : > { %20320 = vst [vmem:[#allocation24_spill] sm:$0xff] %v18900_v33  ;;  %v18907_v36 = vsub.f32 %v9433_v23, %v18900_v33  ;;  %9988 = vmatprep.mubr.f32.mxu1 %v18900_v33  ;;  %v9679_v9 = vand.u32 4294901760, %v9678_v44  ;;  %v20322_v23 = vand.u32 4294901760, %v18886_v35 }
 0xc04   : > { %9990 = vmatmul.mubr.f32.gmra.mxu1 %v18872_v39  ;;  %v9713_v55 = vand.u32 4294901760, %v18913_v14 }
 0xc05   : > { %v9378_v59 = vpop.permute.xlu0 %9377  ;;  %9680 = vmatprep.mubr.f32.mxu0 %v9679_v9  ;;  %v9692_v51 = vand.u32 4294901760, %v18907_v36  ;;  %v9699_v33 = vsub.f32 %v18886_v35, %v20322_v23  ;;  %v20324_v23 = vand.u32 4294901760, %v18629_v52 }
 0xc06   : > { %v9434_v44 = vsel %vm3936_vm14, %v9426_v6, %v9378_v59  ;;  %9686 = vmatmul.mubr.f32.gmra.mxu0 %v9685_v34  ;;  %v20323_v6 = vand.u32 4294901760, %v18634_v0  ;;  %v9714_v49 = vsub.f32 %v18913_v14, %v9713_v55 }
 0xc07   : > { %v18922_v19 = vand.u32 4294901760, %v9434_v44  ;;  %v9693_v30 = vsub.f32 %v18907_v36, %v9692_v51  ;;  %v9700_v43 = vand.u32 4294901760, %v9699_v33  ;;  %v20325_v33 = vand.u32 4294901760, %v18702_v41 }
 0xc09   : > { %v18929_v58 = vsub.f32 %v9434_v44, %v18922_v19  ;;  %9995 = vmatprep.mubr.f32.mxu1 %v18922_v19  ;;  %v9694_v9 = vand.u32 4294901760, %v9693_v30  ;;  %v9715_v30 = vand.u32 4294901760, %v9714_v49  ;;  %v20371_v49 = vld [vmem:[#allocation54_spill] sm:$0xff] }
 0xc0a   : > { %9997 = vmatmul.mubr.f32.gmra.mxu1 %v18895_v4 }
 0xc0b   : > { %9695 = vmatprep.mubr.f32.mxu0 %v9694_v9  ;;  %10302 = vmatprep.mubr.f32.mxu1 %v20323_v6  ;;  %v9707_v59 = vand.u32 4294901760, %v18929_v58  ;;  %v20326_v9 = vand.u32 4294901760, %v18677_v40 }
 0xc0c   : > { %9701 = vmatmul.mubr.f32.gmra.mxu0 %v9700_v43  ;;  %v20327_v43 = vand.u32 4294901760, %v18740_v22 }
 0xc0d   : > { %v9708_v34 = vsub.f32 %v18929_v58, %v9707_v59 }
 0xc0e   : > { %10306 = vmatmul.mubr.f32.vlgmr.msra.gmra.mxu1 %v20324_v23 }
 0xc0f   : > { %10313 = vmatprep.mubr.f32.mxu1 %v20325_v33  ;;  %13113 = vmatpush3.msra.mxu1 %v18030_v24  ;;  %v9709_v44 = vand.u32 4294901760, %v9708_v34  ;;  %v20328_v24 = vand.u32 4294901760, %v18728_v7  ;;  %v20372_v34 = vand.u32 4294901760, %v20371_v49  ;;  %v20407_v49 = vld [vmem:[#allocation52_spill] sm:$0xff] }
 0xc10   : > { %13114 = vmatprep.subr.mxu1 %v18032_v26  ;;  %v20329_v26 = vand.u32 4294901760, %v18053_v3  ;;  %v20333_v3 = vand.u32 4294901760, %v18066_v16  ;;  %v20337_v16 = vand.u32 4294901760, %v18147_v29  ;;  %v20342_v29 = vand.u32 4294901760, %v18881_v45 }
 0xc11   : > { %9710 = vmatprep.mubr.f32.mxu0 %v9709_v44  ;;  %13115 = vmatpush3.msra.mxu1 %v18034_v57  ;;  %v20330_v57 = vand.u32 4294901760, %v18810_v47  ;;  %v20373_v44 = vld [vmem:[#allocation46_spill] sm:$0xff] }
 0xc12   : > { %9716 = vmatmul.mubr.f32.gmra.mxu0 %v9715_v30  ;;  %10317 = vmatmul.mubr.f32.gmra.mxu1 %v20326_v9  ;;  %v11941_v30 = vld [vmem:[%s19691_s7 + $0x228] sm:$0xff] }
 0xc13   : > { %13116 = vmatprep.subr.mxu1 %v18047_v46  ;;  %10132 = vmatprep.mubr.f32.mxu0 %v18634_v0  ;;  %v20331_v46 = vand.u32 4294901760, %v18056_v11  ;;  %v20335_v11 = vand.u32 4294901760, %v18075_v60  ;;  %v20339_v60 = vand.u32 4294901760, %v18158_v21  ;;  %v20345_v21 = vand.u32 4294901760, %v18252_v12  ;;  %v20361_v0 = vld [vmem:[#allocation40_spill] sm:$0xff] }
 0xc14   : > { %10324 = vmatprep.mubr.f32.mxu1 %v20327_v43  ;;  %13117 = vmatpush3.msra.mxu1 %v18061_v63  ;;  %v20332_v63 = vand.u32 4294901760, %v18059_v56  ;;  %v20336_v56 = vand.u32 4294901760, %v18841_v25  ;;  %v20377_v43 = vld [vmem:[#allocation8_spill] sm:$0xff] }
 0xc15   : > { %13118 = vmatprep.subr.mxu1 %v18131_v38  ;;  %v20334_v38 = vand.u32 4294901760, %v18791_v20 }
 0xc16   : > { %13119 = vmatpush3.msra.mxu1 %v18138_v13  ;;  %10135 = vmatmul.mubr.f32.vlgmr.msra.gmra.mxu0 %v18629_v52  ;;  %v20338_v13 = vand.u32 4294901760, %v18155_v61  ;;  %v20344_v61 = vand.u32 4294901760, %v18181_v37 }
 0xc17   : > { %10328 = vmatmul.mubr.f32.gmra.mxu1 %v20328_v24  ;;  %13057 = vmatpush3.msra.mxu0 %v20329_v26  ;;  %v20378_v24 = vld [vmem:[#allocation39_spill] sm:$0xff] }
 0xc18   : > { %13120 = vmatprep.subr.mxu1 %v18140_v15  ;;  %10141 = vmatprep.mubr.f32.mxu0 %v18702_v41  ;;  %v20340_v15 = vand.u32 4294901760, %v18835_v54  ;;  %v20379_v26 = vand.u32 4294901760, %v20378_v24 }
 0xc19   : > { %10335 = vmatprep.mubr.f32.mxu1 %v20330_v57  ;;  %13058 = vmatprep.subr.mxu0 %v20331_v46  ;;  %v20380_v57 = vld [vmem:[#allocation51_spill] sm:$0xff] }
 0xc1a   : > { %13121 = vmatpush3.msra.mxu1 %v18142_v5  ;;  %13059 = vmatpush3.msra.mxu0 %v20332_v63  ;;  %v20341_v5 = vand.u32 4294901760, %v18161_v48  ;;  %v20346_v48 = vand.u32 4294901760, %v18869_v50  ;;  %v20381_v46 = vld [vmem:[#allocation43_spill] sm:$0xff] }
 0xc1b   : > { %13122 = vmatprep.subr.mxu1 %v18149_v42  ;;  %13060 = vmatprep.subr.mxu0 %v20333_v3  ;;  %v20343_v42 = vand.u32 4294901760, %v18172_v2  ;;  %v20348_v2 = vld [vmem:[#allocation31_spill] sm:$0xff]  ;;  %v20382_v63 = vand.u32 4294901760, %v20381_v46 }
 0xc1c   : > { %13123 = vmatpush3.msra.mxu1 %v18163_v10  ;;  %10144 = vmatmul.mubr.f32.gmra.mxu0 %v18677_v40  ;;  %v20347_v10 = vand.u32 4294901760, %v18261_v8  ;;  %v20362_v40 = vld [vmem:[#allocation28_spill] sm:$0xff] }
 0xc1d   : > { %10339 = vmatmul.mubr.f32.gmra.mxu1 %v20334_v38  ;;  %13061 = vmatpush3.msra.mxu0 %v20335_v11  ;;  %v20363_v41 = vand.u32 4294901760, %v20362_v40  ;;  %v19086_v38 = vand.u32 4294901760, %v11941_v30  ;;  %v11940_v11 = vld [vmem:[%s19691_s7 + $0x220] sm:$0xff] }
 0xc1e   : > { %13124 = vmatprep.subr.mxu1 %v18232_v28  ;;  %10150 = vmatprep.mubr.f32.mxu0 %v18740_v22  ;;  %v20349_v28 = vld [vmem:[#allocation35_spill] sm:$0xff]  ;;  %v20364_v22 = vld [vmem:[#allocation56_spill] sm:$0xff] }
 0xc1f   : > { %10346 = vmatprep.mubr.f32.mxu1 %v20336_v56  ;;  %13062 = vmatprep.subr.mxu0 %v20337_v16  ;;  %v20350_v37 = vand.u32 4294901760, %v20349_v28  ;;  %v20383_v56 = vld [vmem:[#allocation15_spill] sm:$0xff]  ;;  %v20384_v16 = vld [vmem:[#allocation44_spill] sm:$0xff]  ;;  %v20394_v28 = vld [vmem:[#allocation14_spill] sm:$0xff] }
 0xc20   : > { %13125 = vmatpush3.msra.mxu1 %v18243_v32  ;;  %13063 = vmatpush3.msra.mxu0 %v20338_v13  ;;  %v20351_v32 = vld [vmem:[#allocation42_spill] sm:$0xff]  ;;  %v20385_v13 = vand.u32 4294901760, %v20384_v16 }
 0xc21   : > { %13126 = vmatprep.subr.mxu1 %v18245_v62  ;;  %13064 = vmatprep.subr.mxu0 %v20339_v60  ;;  %v20352_v62 = vld [vmem:[#allocation27_spill] sm:$0xff] }
 0xc22   : > { %13127 = vmatpush3.msra.mxu1 %v18254_v18  ;;  %10153 = vmatmul.mubr.f32.gmra.mxu0 %v18728_v7  ;;  %v20353_v12 = vand.u32 4294901760, %v20352_v62  ;;  %v20354_v18 = vld [vmem:[#allocation37_spill] sm:$0xff]  ;;  %v20386_v60 = vld [vmem:[#allocation7_spill] sm:$0xff] }
 0xc23   : > { %10350 = vmatmul.mubr.f32.gmra.mxu1 %v20340_v15  ;;  %13065 = vmatpush3.msra.mxu0 %v20341_v5  ;;  %v20387_v15 = vld [vmem:[#allocation45_spill] sm:$0xff] }
 0xc24   : > { %13128 = vmatprep.subr.mxu1 %v18266_v53  ;;  %10159 = vmatprep.mubr.f32.mxu0 %v18810_v47  ;;  %v20355_v53 = vld [vmem:[#allocation36_spill] sm:$0xff]  ;;  %v20365_v47 = vld [vmem:[#allocation41_spill] sm:$0xff]  ;;  %v20388_v5 = vand.u32 4294901760, %v20387_v15 }
 0xc25   : > { %10357 = vmatprep.mubr.f32.mxu1 %v20342_v29  ;;  %13066 = vmatprep.subr.mxu0 %v20343_v42  ;;  %v20356_v8 = vand.u32 4294901760, %v20355_v53  ;;  %v19099_v29 = vand.u32 4294901760, %v11940_v11  ;;  %v20389_v42 = vld [vmem:[#allocation10_spill] sm:$0xff]  ;;  %v20397_v62 = vld [vmem:[#allocation49_spill] sm:$0xff]  ;;  %v20399_v53 = vld [vmem:[#allocation12_spill] sm:$0xff] }
 0xc26   : > { %13129 = vmatpush3.msra.mxu1 %v18281_v17  ;;  %13067 = vmatpush3.msra.mxu0 %v20344_v61  ;;  %v20357_v17 = vld [vmem:[#allocation57_spill] sm:$0xff]  ;;  %v9194_v15 = vld [vmem:[#allocation4 + $0x92] sm:$0xff] }
 0xc27   : > { %13130 = vmatprep.subr.mxu1 %v18325_v1  ;;  %13068 = vmatprep.subr.mxu0 %v20345_v21  ;;  %v11943_v1 = vld [vmem:[%s19691_s7 + $0x238] sm:$0xff]  ;;  %v20390_v61 = vld [vmem:[#allocation13_spill] sm:$0xff] }
 0xc28   : > { %13131 = vmatpush3.msra.mxu1 %v18327_v27  ;;  %10162 = vmatmul.mubr.f32.gmra.mxu0 %v18791_v20  ;;  %v20358_v27 = vand.u32 4294901760, %v18886_v35  ;;  %v20359_v20 = vld [vmem:[#allocation55_spill] sm:$0xff]  ;;  %v19044_v7 = vand.u32 4294901760, %v11943_v1  ;;  %v20391_v21 = vand.u32 4294901760, %v20390_v61 }
 0xc29   : > { %10361 = vmatmul.mubr.f32.gmra.mxu1 %v20346_v48  ;;  %13069 = vmatpush3.msra.mxu0 %v20347_v10  ;;  %v20360_v52 = vand.u32 4294901760, %v20359_v20  ;;  %v19110_v10 = vsub.f32 %v11941_v30, %v19086_v38  ;;  %v20402_v20 = vld [vmem:[#allocation11_spill] sm:$0xff] }
 0xc2a   : > { %13132 = vmatprep.subr.mxu1 %v20348_v2  ;;  %10168 = vmatprep.mubr.f32.mxu0 %v18841_v25  ;;  %v11942_v25 = vld [vmem:[%s19691_s7 + $0x230] sm:$0xff]  ;;  %v19062_v23 = vsub.f32 %v11943_v1, %v19044_v7 }
 0xc2b   : > { %10368 = vmatprep.mubr.f32.mxu1 %v9692_v51  ;;  %13070 = vmatprep.subr.mxu0 %v20350_v37  ;;  %v20367_v51 = vld [vmem:[#allocation59_spill] sm:$0xff]  ;;  %v19064_v33 = vand.u32 4294901760, %v11942_v25  ;;  %v20395_v37 = vand.u32 4294901760, %v20394_v28 }
 0xc2c   : > { %13133 = vmatpush3.msra.mxu1 %v20351_v32  ;;  %13071 = vmatpush3.msra.mxu0 %v20353_v12  ;;  %v20396_v32 = vld [vmem:[#allocation9_spill] sm:$0xff]  ;;  %v20398_v12 = vand.u32 4294901760, %v20397_v62 }
 0xc2d   : > { %13134 = vmatprep.subr.mxu1 %v20354_v18  ;;  %13072 = vmatprep.subr.mxu0 %v20356_v8  ;;  %v19084_v3 = vsub.f32 %v11942_v25, %v19064_v33  ;;  %v19122_v18 = vsub.f32 %v11940_v11, %v19099_v29  ;;  %v20400_v8 = vld [vmem:[#allocation21_spill] sm:$0xff]  ;;  %v9192_v11 = vld [vmem:[#allocation4 + $0x72] sm:$0xff] }
 0xc2e   : > { %13135 = vmatpush3.msra.mxu1 %v20357_v17  ;;  %10171 = vmatmul.mubr.f32.gmra.mxu0 %v18835_v54  ;;  %v20366_v54 = vand.u32 4294901760, %v20365_v47  ;;  %v20401_v17 = vand.u32 4294901760, %v20400_v8  ;;  %v9187_v47 = vld [vmem:[#allocation4 + $0x22] sm:$0xff] }
 0xc2f   : > { %10372 = vmatmul.mubr.f32.gmra.mxu1 %v20358_v27  ;;  %13073 = vmatpush3.msra.mxu0 %v20360_v52  ;;  %v19107_v48 = vand.u32 4294901760, %v19084_v3  ;;  %v19130_v27 = vand.u32 4294901760, %v19110_v10  ;;  %v20403_v52 = vld [vmem:[#allocation25_spill] sm:$0xff] }
 0xc30   : > { %13136 = vmatprep.subr.mxu1 %v20361_v0  ;;  %10177 = vmatprep.mubr.f32.mxu0 %v18881_v45  ;;  %v20368_v45 = vld [vmem:[#allocation32_spill] sm:$0xff]  ;;  %v19139_v0 = vand.u32 4294901760, %v19122_v18 }
 0xc31   : > { %10379 = vmatprep.mubr.f32.mxu1 %v9707_v59  ;;  %13074 = vmatprep.subr.mxu0 %v20363_v41  ;;  %v20369_v6 = vand.u32 4294901760, %v20368_v45  ;;  %v20370_v59 = vld [vmem:[#allocation58_spill] sm:$0xff]  ;;  %v10949_v41 = vsub.f32 %v19110_v10, %v19130_v27  ;;  %v9481_v45 = vsel %vm356_vm6, %v9187_v47, 0 }
 0xc32   : > { %13137 = vmatpush3.msra.mxu1 %v20364_v22  ;;  %13075 = vmatpush3.msra.mxu0 %v20366_v54  ;;  %v20404_v22 = vld [vmem:[#allocation23_spill] sm:$0xff]  ;;  %v20405_v54 = vld [vmem:[#allocation22_spill] sm:$0xff]  ;;  %v10956_v25 = vsub.f32 %v19122_v18, %v19139_v0  ;;  %v19158_v30 = vand.u32 4294901760, %v9481_v45 }
 0xc33   : > { %13138 = vmatprep.subr.mxu1 %v20367_v51  ;;  %13076 = vmatprep.subr.mxu0 %v20369_v6  ;;  %v10950_v51 = vand.u32 4294901760, %v10949_v41  ;;  %v9188_v6 = vld [vmem:[#allocation4 + $0x32] sm:$0xff] }
 0xc34   : > { %13139 = vmatpush3.msra.mxu1 %v20370_v59  ;;  %10180 = vmatmul.mubr.f32.gmra.mxu0 %v18869_v50  ;;  %v20374_v50 = vld [vmem:[#allocation38_spill] sm:$0xff]  ;;  %v19172_v46 = vsub.f32 %v9481_v45, %v19158_v30 }
 0xc35   : > { %10383 = vmatmul.mubr.f32.gmra.mxu1 %v9713_v55  ;;  %13077 = vmatpush3.msra.mxu0 %v20372_v34  ;;  %v20375_v9 = vand.u32 4294901760, %v20374_v50  ;;  %v20376_v55 = vld [vmem:[#allocation60_spill] sm:$0xff]  ;;  %v20406_v59 = vld [vmem:[#allocation34_spill] sm:$0xff]  ;;  %v10957_v34 = vand.u32 4294901760, %v10956_v25  ;;  %v9484_v50 = vsel %vm356_vm6, %v9188_v6, 0 }
 0xc36   : > { %13140 = vmatprep.subr.mxu1 %v20373_v44  ;;  %10186 = vmatprep.mubr.f32.mxu0 %v18907_v36  ;;  %v19081_v36 = vand.u32 4294901760, %v19062_v23  ;;  %v9189_v44 = vld [vmem:[#allocation4 + $0x42] sm:$0xff]  ;;  %v19167_v24 = vand.u32 4294901760, %v9484_v50 }
 0xc37   : > { %13078 = vmatprep.subr.mxu0 %v20375_v9  ;;  %13141 = vmatpush3.msra.mxu1 %v20376_v55  ;;  %v9190_v9 = vld [vmem:[#allocation4 + $0x52] sm:$0xff]  ;;  %v9487_v55 = vsel %vm356_vm6, %v9189_v44, 0 }
 0xc38   : > { %10702 = vmatprep.mubr.f32.mxu1 %v20377_v43  ;;  %13079 = vmatpush3.msra.mxu0 %v20379_v26  ;;  %v9191_v26 = vld [vmem:[#allocation4 + $0x62] sm:$0xff]  ;;  %v19183_v16 = vsub.f32 %v9484_v50, %v19167_v24 }
 0xc39   : > { %13142 = vmatprep.subr.mxu1 %v20380_v57  ;;  %13080 = vmatprep.subr.mxu0 %v20382_v63  ;;  %v9490_v57 = vsel %vm356_vm6, %v9190_v9, 0  ;;  %v19175_v63 = vand.u32 4294901760, %v9487_v55 }
 0xc3a   : > { %13143 = vmatpush3.msra.mxu1 %v20383_v56  ;;  %10189 = vmatmul.mubr.f32.gmra.mxu0 %v18886_v35  ;;  %v10935_v35 = vsub.f32 %v19062_v23, %v19081_v36  ;;  %v9493_v56 = vsel %vm356_vm6, %v9191_v26, 0 }
 0xc3b   : > { %13081 = vmatpush3.msra.mxu0 %v20385_v13  ;;  %10704 = vmatmul.mubr.f32.vlgmr.msra.gmra.mxu1 %v20386_v60  ;;  %v19185_v13 = vand.u32 4294901760, %v9490_v57  ;;  %v19191_v61 = vand.u32 4294901760, %v9493_v56 }
 0xc3c   : > { %10195 = vmatprep.mubr.f32.mxu0 %v18929_v58  ;;  %13082 = vmatprep.subr.mxu0 %v20388_v5  ;;  %v20392_v58 = vld [vmem:[#allocation50_spill] sm:$0xff]  ;;  %v10936_v1 = vand.u32 4294901760, %v10935_v35  ;;  %v10829_v5 = vand.u32 4294901760, %v19172_v46 }
 0xc3d   : > { %10709 = vmatprep.mubr.f32.mxu1 %v20389_v42  ;;  %13083 = vmatpush3.msra.mxu0 %v20391_v21  ;;  %v20393_v2 = vand.u32 4294901760, %v20392_v58  ;;  %v19194_v21 = vsub.f32 %v9487_v55, %v19175_v63  ;;  %v9502_v58 = vsel %vm356_vm6, %v9194_v15, 0 }
 0xc3e   : > { %10198 = vmatmul.mubr.f32.gmra.mxu0 %v18913_v14  ;;  %v10942_v14 = vsub.f32 %v19084_v3, %v19107_v48  ;;  %14172 = vmatprep.subr.mxu1 %v10936_v1 }
 0xc3f   : > { %13084 = vmatprep.subr.mxu0 %v20393_v2  ;;  %10711 = vmatmul.mubr.f32.gmra.mxu1 %v20396_v32  ;;  %v19202_v2 = vsub.f32 %v9490_v57, %v19185_v13 }
 0xc40   : > { %13085 = vmatpush3.msra.mxu0 %v20395_v37  ;;  %10549 = vmatprep.mubr.f32.mxu0 %v20377_v43  ;;  %v10943_v40 = vand.u32 4294901760, %v10942_v14  ;;  %v20408_v43 = vld [vmem:[#allocation24_spill] sm:$0xff]  ;;  %v10830_v37 = vsub.f32 %v19172_v46, %v10829_v5 }
 0xc41   : > { %13086 = vmatprep.subr.mxu0 %v20398_v12  ;;  %10716 = vmatprep.mubr.f32.mxu1 %v20399_v53  ;;  %v19214_v12 = vand.u32 4294901760, %v9502_v58 }
 0xc42   : > { %13087 = vmatpush3.msra.mxu0 %v20401_v17  ;;  %14173 = vmatpush3.msra.mxu1 %v10936_v1  ;;  %v10831_v1 = vand.u32 4294901760, %v10830_v37 }
 0xc43   : > { %14152 = vmatprep.subr.mxu0 %v19044_v7  ;;  %10551 = vmatmul.mubr.f32.vlgmr.msra.gmra.mxu0 %v20386_v60  ;;  %v9193_v60 = vld [vmem:[#allocation4 + $0x82] sm:$0xff] }
 0xc44   : > { %10718 = vmatmul.mubr.f32.gmra.mxu1 %v20402_v20  ;;  %14153 = vmatpush3.msra.mxu0 %v19044_v7  ;;  %v9499_v35 = vsel %vm356_vm6, %v9193_v60, 0 }
 0xc45   : > { %10556 = vmatprep.mubr.f32.mxu0 %v20389_v42  ;;  %10723 = vmatprep.mubr.f32.mxu1 %v20403_v52  ;;  %v9496_v42 = vsel %vm356_vm6, %v9192_v11, 0  ;;  %v19212_v62 = vand.u32 4294901760, %v9499_v35 }
 0xc46   : > { %14154 = vmatprep.subr.mxu0 %v19064_v33  ;;  %14174 = vmatprep.subr.mxu1 %v10943_v40  ;;  %v19205_v28 = vand.u32 4294901760, %v9496_v42 }
 0xc47   : > { %10558 = vmatmul.mubr.f32.gmra.mxu0 %v20396_v32  ;;  %14175 = vmatpush3.msra.mxu1 %v10943_v40  ;;  %v10849_v32 = vand.u32 4294901760, %v19194_v21 }
 0xc48   : > { %10725 = vmatmul.mubr.f32.gmra.mxu1 %v20404_v22  ;;  %10563 = vmatprep.mubr.f32.mxu0 %v20399_v53  ;;  %v19217_v53 = vsub.f32 %v9493_v56, %v19191_v61  ;;  %v19224_v17 = vsub.f32 %v9496_v42, %v19205_v28 }
 0xc49   : > { %10730 = vmatprep.mubr.f32.mxu1 %v20405_v54  ;;  %14155 = vmatpush3.msra.mxu0 %v19064_v33  ;;  %v10850_v14 = vsub.f32 %v19194_v21, %v10849_v32 }
 0xc4a   : > { %14156 = vmatprep.subr.mxu0 %v19086_v38  ;;  %14176 = vmatprep.subr.mxu1 %v10950_v51  ;;  %v10879_v41 = vand.u32 4294901760, %v19224_v17 }
 0xc4b   : > { %10565 = vmatmul.mubr.f32.gmra.mxu0 %v20402_v20  ;;  %14177 = vmatpush3.msra.mxu1 %v10950_v51  ;;  %v10869_v20 = vand.u32 4294901760, %v19217_v53 }
 0xc4c   : > { %10732 = vmatmul.mubr.f32.gmra.mxu1 %v20406_v59  ;;  %10570 = vmatprep.mubr.f32.mxu0 %v20403_v52  ;;  %v19237_v52 = vsub.f32 %v9499_v35, %v19212_v62  ;;  %v10880_v45 = vsub.f32 %v19224_v17, %v10879_v41 }
 0xc4d   : > { %10737 = vmatprep.mubr.f32.mxu1 %v20407_v49  ;;  %14157 = vmatpush3.msra.mxu0 %v19086_v38  ;;  %v10870_v47 = vsub.f32 %v19217_v53, %v10869_v20 }
 0xc4e   : > { %14158 = vmatprep.subr.mxu0 %v19099_v29  ;;  %14178 = vmatprep.subr.mxu1 %v10957_v34 }
 0xc4f   : > { %10572 = vmatmul.mubr.f32.gmra.mxu0 %v20404_v22  ;;  %14179 = vmatpush3.msra.mxu1 %v10957_v34  ;;  %v10851_v22 = vand.u32 4294901760, %v10850_v14  ;;  %v10871_v6 = vand.u32 4294901760, %v10870_v47 }
 0xc50   : > { %10739 = vmatmul.mubr.f32.gmra.mxu1 %v18858_v31  ;;  %10577 = vmatprep.mubr.f32.mxu0 %v20405_v54  ;;  %v10889_v54 = vand.u32 4294901760, %v19237_v52 }
 0xc51   : > { %10744 = vmatprep.mubr.f32.mxu1 %v20408_v43  ;;  %14159 = vmatpush3.msra.mxu0 %v19099_v29 }
 0xc52   : > { %14192 = vmatprep.subr.mxu0 %v19062_v23  ;;  %14212 = vmatprep.subr.mxu1 %v19044_v7 }
 0xc53   : > { %10579 = vmatmul.mubr.f32.gmra.mxu0 %v20406_v59  ;;  %v10890_v59 = vsub.f32 %v19237_v52, %v10889_v54 }
 0xc54   : > { %10746 = vmatmul.mubr.f32.gmra.mxu1 %v18872_v39  ;;  %10584 = vmatprep.mubr.f32.mxu0 %v20407_v49 }
 0xc55   : > { %10751 = vmatprep.mubr.f32.mxu1 %v18922_v19  ;;  %v10891_v34 = vand.u32 4294901760, %v10890_v59 }
 0xc57   : > { %10586 = vmatmul.mubr.f32.gmra.mxu0 %v18858_v31  ;;  %v10839_v31 = vand.u32 4294901760, %v19183_v16 }
 0xc58   : > { %10753 = vmatmul.mubr.f32.gmra.mxu1 %v18895_v4  ;;  %10591 = vmatprep.mubr.f32.mxu0 %v20408_v43 }
 0xc59   : > { %14180 = vmatprep.mubr.f32.mxu1 %v19158_v30  ;;  %v10840_v8 = vsub.f32 %v19183_v16, %v10839_v31 }
 0xc5b   : > { %10593 = vmatmul.mubr.f32.gmra.mxu0 %v18872_v39  ;;  %v10859_v39 = vand.u32 4294901760, %v19202_v2  ;;  %v10841_v40 = vand.u32 4294901760, %v10840_v8 }
 0xc5c   : > { %14181 = vmatmul.mubr.f32.vlgmr.msra.gmra.mxu1 %v19167_v24  ;;  %10598 = vmatprep.mubr.f32.mxu0 %v18922_v19  ;;  %v19233_v19 = vsub.f32 %v9502_v58, %v19214_v12 }
 0xc5d   : > { %14183 = vmatprep.mubr.f32.mxu1 %v19175_v63  ;;  %14213 = vmatpush3.msra.mxu1 %v19044_v7 }
 0xc5e   : > { %14214 = vmatprep.subr.mxu1 %v19064_v33  ;;  %v10899_v25 = vand.u32 4294901760, %v19233_v19 }
 0xc5f   : > { %10600 = vmatmul.mubr.f32.gmra.mxu0 %v18895_v4  ;;  %14215 = vmatpush3.msra.mxu1 %v19064_v33  ;;  %v10860_v4 = vsub.f32 %v19202_v2, %v10859_v39 }
 0xc60   : > { %14184 = vmatmul.mubr.f32.gmra.mxu1 %v19185_v13  ;;  %14160 = vmatprep.mubr.f32.mxu0 %v10831_v1  ;;  %v10900_v49 = vsub.f32 %v19233_v19, %v10899_v25 }
 0xc61   : > { %14186 = vmatprep.mubr.f32.mxu1 %v19191_v61  ;;  %14216 = vmatprep.subr.mxu1 %v19086_v38  ;;  %v10861_v51 = vand.u32 4294901760, %v10860_v4 }
 0xc62   : > { %14217 = vmatpush3.msra.mxu1 %v19086_v38  ;;  %v10901_v44 = vand.u32 4294901760, %v10900_v49 }
 0xc63   : > { %14161 = vmatmul.mubr.f32.vlgmr.msra.gmra.mxu0 %v10841_v40  ;;  %14218 = vmatprep.subr.mxu1 %v19099_v29 }
 0xc64   : > { %14187 = vmatmul.mubr.f32.gmra.mxu1 %v19205_v28  ;;  %14193 = vmatpush3.msra.mxu0 %v19062_v23  ;;  %v10881_v23 = vand.u32 4294901760, %v10880_v45 }
 0xc65   : > { %14163 = vmatprep.mubr.f32.mxu0 %v10851_v22  ;;  %14189 = vmatprep.mubr.f32.mxu1 %v19212_v62 }
 0xc66   : > { %14194 = vmatprep.subr.mxu0 %v19084_v3  ;;  %14219 = vmatpush3.msra.mxu1 %v19099_v29 }
 0xc67   : > { %14164 = vmatmul.mubr.f32.gmra.mxu0 %v10861_v51  ;;  %14252 = vmatprep.subr.mxu1 %v19044_v7 }
 0xc68   : > { %14190 = vmatmul.mubr.f32.gmra.mxu1 %v19214_v12  ;;  %14195 = vmatpush3.msra.mxu0 %v19084_v3 }
 0xc69   : > { %14166 = vmatprep.mubr.f32.mxu0 %v10871_v6  ;;  %14220 = vmatprep.mubr.f32.mxu1 %v10829_v5 }
 0xc6a   : > { %14196 = vmatprep.subr.mxu0 %v19110_v10 }
 0xc6b   : > { %14167 = vmatmul.mubr.f32.gmra.mxu0 %v10881_v23 }
 0xc6c   : > { %14197 = vmatpush3.msra.mxu0 %v19110_v10  ;;  %14221 = vmatmul.mubr.f32.vlgmr.msra.gmra.mxu1 %v10839_v31 }
 0xc6d   : > { %14169 = vmatprep.mubr.f32.mxu0 %v10891_v34  ;;  %14223 = vmatprep.mubr.f32.mxu1 %v10849_v32 }
 0xc6e   : > { %14198 = vmatprep.subr.mxu0 %v19122_v18  ;;  %14253 = vmatpush3.msra.mxu1 %v19044_v7 }
 0xc6f   : > { %14170 = vmatmul.mubr.f32.gmra.mxu0 %v10901_v44  ;;  %14254 = vmatprep.subr.mxu1 %v19064_v33 }
 0xc70   : > { %14199 = vmatpush3.msra.mxu0 %v19122_v18  ;;  %14224 = vmatmul.mubr.f32.gmra.mxu1 %v10859_v39 }
 0xc71   : > { %14200 = vmatprep.mubr.f32.mxu0 %v19172_v46  ;;  %14226 = vmatprep.mubr.f32.mxu1 %v10869_v20 }
 0xc72   : > { %14232 = vmatprep.subr.mxu0 %v19081_v36  ;;  %14255 = vmatpush3.msra.mxu1 %v19064_v33 }
 0xc73   : > { %14201 = vmatmul.mubr.f32.vlgmr.msra.gmra.mxu0 %v19183_v16  ;;  %14256 = vmatprep.subr.mxu1 %v19086_v38 }
 0xc74   : > { %14227 = vmatmul.mubr.f32.gmra.mxu1 %v10879_v41  ;;  %14233 = vmatpush3.msra.mxu0 %v19081_v36 }
 0xc75   : > { %14203 = vmatprep.mubr.f32.mxu0 %v19194_v21  ;;  %14229 = vmatprep.mubr.f32.mxu1 %v10889_v54 }
 0xc76   : > { %14234 = vmatprep.subr.mxu0 %v19107_v48  ;;  %14257 = vmatpush3.msra.mxu1 %v19086_v38  ;;  %v19303_v38 = vld [vmem:[%s19692_s8 + $0x1] ss:$0 sm:$0xff] }
 0xc77   : > { %14204 = vmatmul.mubr.f32.gmra.mxu0 %v19202_v2  ;;  %14258 = vmatprep.subr.mxu1 %v19099_v29 }
 0xc78   : > { %14230 = vmatmul.mubr.f32.gmra.mxu1 %v10899_v25  ;;  %14235 = vmatpush3.msra.mxu0 %v19107_v48 }
 0xc79   : > { %14206 = vmatprep.mubr.f32.mxu0 %v19217_v53  ;;  %14260 = vmatprep.mubr.f32.mxu1 %v19158_v30 }
 0xc7a   : > { %14236 = vmatprep.subr.mxu0 %v19130_v27  ;;  %14259 = vmatpush3.msra.mxu1 %v19099_v29 }
 0xc7b   : > { %14207 = vmatmul.mubr.f32.gmra.mxu0 %v19224_v17 }
 0xc7c   : > { %14237 = vmatpush3.msra.mxu0 %v19130_v27  ;;  %14261 = vmatmul.mubr.f32.vlgmr.msra.gmra.mxu1 %v19167_v24  ;;  %v12920_v7 = vpop.f32.mrf.mxu1 }
 0xc7d   : > { %14209 = vmatprep.mubr.f32.mxu0 %v19237_v52  ;;  %14263 = vmatprep.mubr.f32.mxu1 %v19175_v63 }
 0xc7e   : > { %14238 = vmatprep.subr.mxu0 %v19139_v0  ;;  %v12921_v33 = vpop.f32.mrf.mxu1 }
 0xc7f   : > { %14210 = vmatmul.mubr.f32.gmra.mxu0 %v19233_v19  ;;  %v12922_v36 = vadd.f32 %v12921_v33, %v12920_v7 }
 0xc80   : > { %14239 = vmatpush3.msra.mxu0 %v19139_v0  ;;  %14264 = vmatmul.mubr.f32.gmra.mxu1 %v19185_v13 }
 0xc81   : > { %14240 = vmatprep.mubr.f32.mxu0 %v19158_v30  ;;  %14266 = vmatprep.mubr.f32.mxu1 %v19191_v61 }
 0xc83   : > { %14241 = vmatmul.mubr.f32.vlgmr.msra.gmra.mxu0 %v19167_v24 }
 0xc84   : > { %14267 = vmatmul.mubr.f32.gmra.mxu1 %v19205_v28  ;;  %14243 = vmatprep.mubr.f32.mxu0 %v19175_v63  ;;  %v12864_v3 = vpop.f32.mrf.mxu0 }
 0xc85   : > { %14269 = vmatprep.mubr.f32.mxu1 %v19212_v62 }
 0xc86   : > { %v12865_v29 = vpop.f32.mrf.mxu0 }
 0xc87   : > { %14244 = vmatmul.mubr.f32.gmra.mxu0 %v19185_v13  ;;  %v12866_v48 = vadd.f32 %v12865_v29, %v12864_v3 }
 0xc88   : > { %14246 = vmatprep.mubr.f32.mxu0 %v19191_v61  ;;  %14270 = vmatmul.mubr.f32.gmra.mxu1 %v19214_v12 }
 0xc89   : > { %v9613_v10 = vadd.f32 %v12866_v48, %v19303_v38 }
 0xc8b   : > { %14247 = vmatmul.mubr.f32.gmra.mxu0 %v19205_v28  ;;  %v19310_v18 = vadd.f32 %v12922_v36, %v9613_v10 }
 0xc8c   : > { %14249 = vmatprep.mubr.f32.mxu0 %v19212_v62 }
 0xc8e   : > { %v12923_v27 = vpop.f32.mrf.mxu1 }
 0xc8f   : > { %14250 = vmatmul.mubr.f32.gmra.mxu0 %v19214_v12 }
 0xc90   : > { %v12924_v0 = vpop.f32.mrf.mxu1 }
 0xc91   : > { %v12925_v30 = vadd.f32 %v12924_v0, %v12923_v27 }
 0xc94   : > { %v12926_v50 = vpop.f32.mrf.mxu1 }
 0xc96   : > { %v12867_v9 = vpop.f32.mrf.mxu0  ;;  %v12927_v55 = vpop.f32.mrf.mxu1 }
 0xc97   : > { %v12928_v43 = vadd.f32 %v12927_v55, %v12926_v50 }
 0xc98   : > { %v12868_v24 = vpop.f32.mrf.mxu0 }
 0xc99   : > { %v12869_v26 = vadd.f32 %v12868_v24, %v12867_v9 }
 0xc9b   : > { %v9628_v57 = vadd.f32 %v12869_v26, %v19303_v38 }
 0xc9c   : > { %v12870_v46 = vpop.f32.mrf.mxu0 }
 0xc9d   : > { %v19314_v63 = vadd.f32 %v12925_v30, %v9628_v57 }
 0xc9e   : > { %v12871_v11 = vpop.f32.mrf.mxu0 }
 0xc9f   : > { %v12872_v56 = vadd.f32 %v12871_v11, %v12870_v46 }
 0xca1   : > { %v9643_v16 = vadd.f32 %v12872_v56, %v19303_v38 }
 0xca3   : > { %v19317_v13 = vadd.f32 %v12928_v43, %v9643_v16 }
 0xca6   : > { %v12929_v60 = vpop.f32.mrf.mxu1 }
 0xca8   : > { %v12930_v15 = vpop.f32.mrf.mxu1 }
 0xca9   : > { %v12931_v5 = vadd.f32 %v12930_v15, %v12929_v60 }
 0xcac   : > { %v12932_v42 = vpop.f32.mrf.mxu1 }
 0xcae   : > { %v12873_v61 = vpop.f32.mrf.mxu0  ;;  %v12933_v21 = vpop.f32.mrf.mxu1 }
 0xcaf   : > { %v12934_v35 = vadd.f32 %v12933_v21, %v12932_v42 }
 0xcb0   : > { %v12874_v58 = vpop.f32.mrf.mxu0 }
 0xcb1   : > { %v12875_v2 = vadd.f32 %v12874_v58, %v12873_v61 }
 0xcb3   : > { %v9658_v31 = vadd.f32 %v12875_v2, %v19303_v38 }
 0xcb4   : > { %v12876_v28 = vpop.f32.mrf.mxu0 }
 0xcb5   : > { %v19320_v37 = vadd.f32 %v12931_v5, %v9658_v31 }
 0xcb6   : > { %v12877_v32 = vpop.f32.mrf.mxu0 }
 0xcb7   : > { %v12878_v62 = vadd.f32 %v12877_v32, %v12876_v28 }
 0xcb9   : > { %v9673_v12 = vadd.f32 %v12878_v62, %v19303_v38 }
 0xcbb   : > { %v19323_v53 = vadd.f32 %v12934_v35, %v9673_v12 }
 0xcbe   : > { %v12935_v8 = vpop.f32.mrf.mxu1 }
 0xcc0   : > { %v12936_v17 = vpop.f32.mrf.mxu1 }
 0xcc1   : > { %v12937_v39 = vadd.f32 %v12936_v17, %v12935_v8 }
 0xcc4   : > { %v12938_v1 = vpop.f32.mrf.mxu1 }
 0xcc6   : > { %v12879_v14 = vpop.f32.mrf.mxu0  ;;  %v12939_v19 = vpop.f32.mrf.mxu1 }
 0xcc7   : > { %v12940_v20 = vadd.f32 %v12939_v19, %v12938_v1 }
 0xcc8   : > { %v12880_v52 = vpop.f32.mrf.mxu0 }
 0xcc9   : > { %v12881_v40 = vadd.f32 %v12880_v52, %v12879_v14 }
 0xcca   : > { %v12941_v4 = vpop.f32.mrf.mxu1 }
 0xccb   : > { %v9688_v41 = vadd.f32 %v12881_v40, %v19303_v38 }
 0xccc   : > { %v12882_v22 = vpop.f32.mrf.mxu0  ;;  %v12942_v47 = vpop.f32.mrf.mxu1 }
 0xccd   : > { %v12943_v54 = vadd.f32 %v12942_v47, %v12941_v4  ;;  %v9985_v25 = vadd.f32 %v12937_v39, %v9688_v41 }
 0xcce   : > { %v12883_v51 = vpop.f32.mrf.mxu0  ;;  %v13032_v45 = vpop.f32.mrf.mxu1 }
 0xccf   : > { %v12884_v6 = vadd.f32 %v12883_v51, %v12882_v22 }
 0xcd0   : > { %v13033_v59 = vpop.f32.mrf.mxu1 }
 0xcd1   : > { %v9703_v49 = vadd.f32 %v12884_v6, %v19303_v38  ;;  %v13034_v23 = vadd.f32 %v13033_v59, %v13032_v45 }
 0xcd2   : > { %v12885_v34 = vpop.f32.mrf.mxu0  ;;  %v13035_v44 = vpop.f32.mrf.mxu1 }
 0xcd3   : > { %v9992_v7 = vadd.f32 %v12940_v20, %v9703_v49 }
 0xcd4   : > { %v12886_v33 = vpop.f32.mrf.mxu0  ;;  %v13036_v36 = vpop.f32.mrf.mxu1 }
 0xcd5   : > { %v12887_v3 = vadd.f32 %v12886_v33, %v12885_v34  ;;  %v13037_v29 = vadd.f32 %v13036_v36, %v13035_v44 }
 0xcd6   : > { %v12976_v48 = vpop.f32.mrf.mxu0 }
 0xcd7   : > { %v9718_v10 = vadd.f32 %v12887_v3, %v19303_v38  ;;  %v13038_v27 = vpop.f32.mrf.mxu1 }
 0xcd8   : > { %v12977_v0 = vpop.f32.mrf.mxu0 }
 0xcd9   : > { %v12978_v30 = vadd.f32 %v12977_v0, %v12976_v48  ;;  %v13039_v50 = vpop.f32.mrf.mxu1  ;;  %v19328_v9 = vadd.f32 %v12943_v54, %v9718_v10 }
 0xcda   : > { %v13040_v55 = vadd.f32 %v13039_v50, %v13038_v27 }
 0xcdb   : > { %v10137_v43 = vadd.f32 %v12978_v30, %v19310_v18 }
 0xcdc   : > { %v12979_v24 = vpop.f32.mrf.mxu0 }
 0xcdd   : > { %v13041_v26 = vpop.f32.mrf.mxu1  ;;  %v19331_v57 = vadd.f32 %v13034_v23, %v10137_v43 }
 0xcde   : > { %v12980_v46 = vpop.f32.mrf.mxu0 }
 0xcdf   : > { %v12981_v11 = vadd.f32 %v12980_v46, %v12979_v24  ;;  %v13042_v56 = vpop.f32.mrf.mxu1 }
 0xce0   : > { %v13043_v16 = vadd.f32 %v13042_v56, %v13041_v26 }
 0xce1   : > { %v10146_v60 = vadd.f32 %v12981_v11, %v19314_v63 }
 0xce2   : > { %v12982_v38 = vpop.f32.mrf.mxu0 }
 0xce3   : > { %v13044_v15 = vpop.f32.mrf.mxu1  ;;  %v19334_v5 = vadd.f32 %v13037_v29, %v10146_v60 }
 0xce4   : > { %v12983_v42 = vpop.f32.mrf.mxu0 }
 0xce5   : > { %v12984_v61 = vadd.f32 %v12983_v42, %v12982_v38  ;;  %v13045_v21 = vpop.f32.mrf.mxu1 }
 0xce6   : > { %v13046_v35 = vadd.f32 %v13045_v21, %v13044_v15 }
 0xce7   : > { %v10155_v18 = vadd.f32 %v12984_v61, %v19317_v13 }
 0xce8   : > { %v12985_v58 = vpop.f32.mrf.mxu0 }
 0xce9   : > { %v13047_v2 = vpop.f32.mrf.mxu1  ;;  %v19337_v31 = vadd.f32 %v13040_v55, %v10155_v18 }
 0xcea   : > { %v12986_v28 = vpop.f32.mrf.mxu0 }
 0xceb   : > { %v12987_v32 = vadd.f32 %v12986_v28, %v12985_v58  ;;  %v13048_v62 = vpop.f32.mrf.mxu1 }
 0xcec   : > { %v13049_v12 = vadd.f32 %v13048_v62, %v13047_v2 }
 0xced   : > { %v10164_v63 = vadd.f32 %v12987_v32, %v19320_v37 }
 0xcee   : > { %v12988_v8 = vpop.f32.mrf.mxu0 }
 0xcef   : > { %v13050_v17 = vpop.f32.mrf.mxu1  ;;  %v19340_v39 = vadd.f32 %v13043_v16, %v10164_v63 }
 0xcf0   : > { %v12989_v1 = vpop.f32.mrf.mxu0 }
 0xcf1   : > { %v12990_v14 = vadd.f32 %v12989_v1, %v12988_v8  ;;  %v13051_v19 = vpop.f32.mrf.mxu1 }
 0xcf2   : > { %v13052_v20 = vadd.f32 %v13051_v19, %v13050_v17 }
 0xcf3   : > { %v10173_v13 = vadd.f32 %v12990_v14, %v19323_v53 }
 0xcf4   : > { %v12991_v52 = vpop.f32.mrf.mxu0 }
 0xcf5   : > { %v19343_v40 = vpop.f32.mrf.mxu1  ;;  %v19345_v4 = vadd.f32 %v13046_v35, %v10173_v13 }
 0xcf6   : > { %v12992_v41 = vpop.f32.mrf.mxu0 }
 0xcf7   : > { %v12993_v22 = vadd.f32 %v12992_v41, %v12991_v52  ;;  %v19347_v47 = vpop.f32.mrf.mxu1 }
 0xcf9   : > { %v10182_v37 = vadd.f32 %v12993_v22, %v9985_v25 }
 0xcfa   : > { %v12994_v54 = vpop.f32.mrf.mxu0 }
 0xcfb   : > { %v19349_v51 = vpop.f32.mrf.mxu1  ;;  %v19351_v45 = vadd.f32 %v13049_v12, %v10182_v37 }
 0xcfc   : > { %v12995_v6 = vpop.f32.mrf.mxu0 }
 0xcfd   : > { %v12996_v59 = vadd.f32 %v12995_v6, %v12994_v54  ;;  %v19353_v49 = vpop.f32.mrf.mxu1 }
 0xcfe   : > { %v12997_v53 = vpop.f32.mrf.mxu0 }
 0xcff   : > { %v10191_v23 = vadd.f32 %v12996_v59, %v9992_v7  ;;  %v13147_v34 = vpop.f32.mrf.mxu1 }
 0xd00   : > { %v12998_v44 = vpop.f32.mrf.mxu0 }
 0xd01   : > { %v13148_v33 = vpop.f32.mrf.mxu1  ;;  %v19355_v36 = vadd.f32 %v13052_v20, %v10191_v23 }
 0xd03   : > { %v13088_v3 = vpop.f32.mrf.mxu0 }
 0xd04   : > { %v19357_v29 = vpop.f32.mrf.mxu1 }
 0xd05   : > { %v13089_v25 = vpop.f32.mrf.mxu0 }
 0xd06   : > { %v19359_v48 = vpop.f32.mrf.mxu1  ;;  %v13090_v59 = vadd.f32 %v13089_v25, %v13088_v3  ;;  %v13146_v3 = vadd.f32 %v19353_v49, %v19349_v51  ;;  %v13055_v51 = vadd.f32 %v19347_v47, %v19343_v40 }
 0xd07   : > { %v13091_v10 = vpop.f32.mrf.mxu0 }
 0xd08   : > { %v13153_v27 = vpop.f32.mrf.mxu1 }
 0xd09   : > { %v13092_v0 = vpop.f32.mrf.mxu0 }
 0xd0a   : > { %v13154_v30 = vpop.f32.mrf.mxu1  ;;  %v13093_v37 = vadd.f32 %v13092_v0, %v13091_v10 }
 0xd0b   : > { %v13094_v50 = vpop.f32.mrf.mxu0 }
 0xd0c   : > { %v19361_v55 = vpop.f32.mrf.mxu1 }
 0xd0d   : > { %v13095_v43 = vpop.f32.mrf.mxu0 }
 0xd0e   : > { %v19363_v7 = vpop.f32.mrf.mxu1  ;;  %v13096_v10 = vadd.f32 %v13095_v43, %v13094_v50 }
 0xd0f   : > { %v13097_v24 = vpop.f32.mrf.mxu0  ;;  %v13158_v47 = vadd.f32 %v19363_v7, %v19361_v55 }
 0xd10   : > { %v19365_v26 = vpop.f32.mrf.mxu1 }
 0xd11   : > { %v13098_v46 = vpop.f32.mrf.mxu0 }
 0xd12   : > { %v19367_v11 = vpop.f32.mrf.mxu1 }
 0xd13   : > { %v13100_v56 = vpop.f32.mrf.mxu0 }
 0xd14   : > { %v19369_v16 = vpop.f32.mrf.mxu1 }
 0xd15   : > { %v13101_v60 = vpop.f32.mrf.mxu0 }
 0xd16   : > { %v19371_v38 = vpop.f32.mrf.mxu1 }
 0xd17   : > { %v13103_v15 = vpop.f32.mrf.mxu0  ;;  %v13164_v7 = vadd.f32 %v19371_v38, %v19369_v16 }
 0xd18   : > { %v19373_v42 = vpop.f32.mrf.mxu1 }
 0xd19   : > { %v13104_v61 = vpop.f32.mrf.mxu0 }
 0xd1a   : > { %v19375_v21 = vpop.f32.mrf.mxu1 }
 0xd1b   : > { %v13106_v35 = vpop.f32.mrf.mxu0 }
 0xd1c   : > { %v14182_v18 = vpop.f32.mrf.mxu1 }
 0xd1d   : > { %v13107_v58 = vpop.f32.mrf.mxu0 }
 0xd1e   : > { %v19377_v2 = vpop.f32.mrf.mxu1 }
 0xd1f   : > { %v13109_v28 = vpop.f32.mrf.mxu0 }
 0xd20   : > { %v19379_v32 = vpop.f32.mrf.mxu1 }
 0xd21   : > { %v13110_v62 = vpop.f32.mrf.mxu0 }
 0xd22   : > { %v19381_v12 = vpop.f32.mrf.mxu1  ;;  %v13111_v49 = vadd.f32 %v13110_v62, %v13109_v28 }
 0xd23   : > { %20409 = vst [vmem:[#allocation16_spill] sm:$0xff] %v19381_v12  ;;  %v14162_v63 = vpop.f32.mrf.mxu0  ;;  %v12999_v12 = vadd.f32 %v12998_v44, %v12997_v53  ;;  %v13105_v53 = vadd.f32 %v13104_v61, %v13103_v15 }
 0xd24   : > { %v19383_v8 = vpop.f32.mrf.mxu1 }
 0xd25   : > { %20410 = vst [vmem:[#allocation47_spill] sm:$0xff] %v19383_v8  ;;  %v10833_v17 = vpop.f32.mrf.mxu0  ;;  %v13099_v8 = vadd.f32 %v13098_v46, %v13097_v24  ;;  %v13102_v24 = vadd.f32 %v13101_v60, %v13100_v56  ;;  %v13152_v46 = vadd.f32 %v19359_v48, %v19357_v29  ;;  %v13161_v29 = vadd.f32 %v19367_v11, %v19365_v26 }
 0xd26   : > { %v19385_v1 = vpop.f32.mrf.mxu1 }
 0xd27   : > { %20411 = vst [vmem:[#allocation48_spill] sm:$0xff] %v19385_v1  ;;  %v14165_v14 = vpop.f32.mrf.mxu0  ;;  %v10574_v25 = vadd.f32 %v13099_v8, %v19340_v39 }
 0xd28   : > { %v19387_v19 = vpop.f32.mrf.mxu1 }
 0xd29   : > { %20412 = vst [vmem:[#allocation5_spill] sm:$0xff] %v19387_v19  ;;  %v10853_v20 = vpop.f32.mrf.mxu0  ;;  %v10560_v19 = vadd.f32 %v13093_v37, %v19334_v5  ;;  %v10200_v5 = vadd.f32 %v12999_v12, %v19328_v9 }
 0xd2a   : > { %v19389_v13 = vpop.f32.mrf.mxu1 }
 0xd2b   : > { %20413 = vst [vmem:[#allocation6_spill] sm:$0xff] %v19389_v13  ;;  %v19391_v52 = vpop.f32.mrf.mxu0  ;;  %v10385_v60 = vadd.f32 %v13055_v51, %v10200_v5 }
 0xd2c   : > { %20414 = vst [vmem:[#allocation53_spill] sm:$0xff] %v19391_v52  ;;  %v19393_v41 = vpop.f32.mrf.mxu1 }
 0xd2d   : > { %20415 = vst [vmem:[#allocation31_spill] sm:$0xff] %v19393_v41  ;;  %v19395_v22 = vpop.f32.mrf.mxu0  ;;  %v13149_v41 = vadd.f32 %v13148_v33, %v13147_v34  ;;  %v13155_v34 = vadd.f32 %v13154_v30, %v13153_v27  ;;  %v10581_v27 = vadd.f32 %v13102_v24, %v19345_v4  ;;  %v13108_v30 = vadd.f32 %v13107_v58, %v13106_v35 }
 0xd2e   : > { %20416 = vst [vmem:[#allocation35_spill] sm:$0xff] %v19395_v22  ;;  %v19397_v54 = vpop.f32.mrf.mxu1  ;;  %v10553_v22 = vadd.f32 %v13090_v59, %v19331_v57  ;;  %v10567_v57 = vadd.f32 %v13096_v10, %v19337_v31  ;;  %v10588_v31 = vadd.f32 %v13105_v53, %v19351_v45  ;;  %v10602_v48 = vadd.f32 %v13111_v49, %v10385_v60  ;;  %v20426_v53 = vld [vmem:[#allocation47_spill] sm:$0xff] }
 0xd2f   : > { %20417 = vst [vmem:[#allocation42_spill] sm:$0xff] %v19397_v54  ;;  %v19399_v6 = vpop.f32.mrf.mxu0  ;;  %v10727_v9 = vadd.f32 %v13155_v34, %v10574_v25  ;;  %v13167_v35 = vadd.f32 %v19375_v21, %v19373_v42  ;;  %v10595_v58 = vadd.f32 %v13108_v30, %v19355_v36  ;;  %v20422_v42 = vld [vmem:[#allocation16_spill] sm:$0xff] }
 0xd30   : > { %v19401_v23 = vpop.f32.mrf.mxu1  ;;  %v10706_v50 = vadd.f32 %v13146_v3, %v10553_v22  ;;  %v10720_v12 = vadd.f32 %v13152_v46, %v10567_v57  ;;  %v20427_v57 = vld [vmem:[#allocation48_spill] sm:$0xff] }
 0xd31   : > { %20418 = vst [vmem:[#allocation27_spill] sm:$0xff] %v19401_v23  ;;  %v19403_v1 = vpop.f32.mrf.mxu0  ;;  %v10713_v23 = vadd.f32 %v13149_v41, %v10560_v19  ;;  %v10864_v61 = vadd.f32 %v14165_v14, %v10727_v9  ;;  %v10734_v14 = vadd.f32 %v13158_v47, %v10581_v27  ;;  %v20429_v27 = vld [vmem:[#allocation5_spill] sm:$0xff] }
 0xd32   : > { %20419 = vst [vmem:[#allocation37_spill] sm:$0xff] %v19403_v1  ;;  %v19406_v13 = vpop.f32.mrf.mxu1  ;;  %v10834_v8 = vadd.f32 %v10833_v17, %v10706_v50  ;;  %v10854_v62 = vadd.f32 %v10853_v20, %v10720_v12  ;;  %v20430_v47 = vld [vmem:[#allocation6_spill] sm:$0xff] }
 0xd33   : > { %v14202_v52 = vpop.f32.mrf.mxu0  ;;  %v10844_v33 = vadd.f32 %v14162_v63, %v10713_v23  ;;  %v11013_v55 = vadd.f32 %v19379_v32, %v10864_v61  ;;  %v20420_v26 = vld [vmem:[#allocation53_spill] sm:$0xff] }
 0xd34   : > { %v19409_v0 = vpop.f32.mrf.mxu1  ;;  %v10995_v4 = vadd.f32 %v19377_v2, %v10834_v8  ;;  %v10755_v2 = vadd.f32 %v13167_v35, %v10602_v48  ;;  %v11007_v21 = vadd.f32 %v20422_v42, %v10854_v62  ;;  %v20423_v36 = vld [vmem:[#allocation31_spill] sm:$0xff] }
 0xd35   : > { %v11116_v54 = vpop.f32.mrf.mxu0  ;;  %v11001_v63 = vadd.f32 %v14182_v18, %v10844_v33  ;;  %v10741_v18 = vadd.f32 %v13161_v29, %v10588_v31  ;;  %v20421_v20 = vld [vmem:[#allocation35_spill] sm:$0xff] }
 0xd36   : > { %v19414_v1 = vpop.f32.mrf.mxu1  ;;  %v11117_v41 = vadd.f32 %v11116_v54, %v10995_v4  ;;  %v10904_v10 = vadd.f32 %v19399_v6, %v10755_v2  ;;  %v10748_v54 = vadd.f32 %v13164_v7, %v10595_v58  ;;  %v20424_v5 = vld [vmem:[#allocation42_spill] sm:$0xff] }
 0xd37   : > { %v14205_v44 = vpop.f32.mrf.mxu0  ;;  %v11124_v17 = vadd.f32 %v14202_v52, %v11001_v63  ;;  %v10884_v11 = vadd.f32 %v20420_v26, %v10741_v18  ;;  %v10874_v52 = vadd.f32 %v20421_v20, %v10734_v14 }
 0xd38   : > { %v19418_v43 = vpop.f32.mrf.mxu1  ;;  %v11138_v59 = vadd.f32 %v14205_v44, %v11013_v55  ;;  %v11243_v16 = vadd.f32 %v20424_v5, %v11117_v41  ;;  %v20428_v46 = vld [vmem:[#allocation27_spill] sm:$0xff] }
 0xd39   : > { %v11130_v39 = vpop.f32.mrf.mxu0  ;;  %v11251_v23 = vadd.f32 %v20423_v36, %v11124_v17  ;;  %v20425_v38 = vld [vmem:[#allocation37_spill] sm:$0xff]  ;;  %v11025_v34 = vadd.f32 %v20426_v53, %v10884_v11  ;;  %v11019_v33 = vadd.f32 %v20427_v57, %v10874_v52 }
 0xd3a   : > { %v19424_v56 = vpop.f32.mrf.mxu1  ;;  %v11131_v32 = vadd.f32 %v11130_v39, %v11007_v21  ;;  %v10894_v24 = vadd.f32 %v20425_v38, %v10748_v54  ;;  %v11267_v8 = vadd.f32 %v20428_v46, %v11138_v59  ;;  %v11037_v39 = vadd.f32 %v20429_v27, %v10904_v10 }
 0xd3b   : > { %v14208_v15 = vpop.f32.mrf.mxu0 }
 0xd3c   : > { %v14262_v40 = vpop.f32.mrf.mxu1  ;;  %v11152_v6 = vadd.f32 %v14208_v15, %v11025_v34  ;;  %v11259_v12 = vadd.f32 %v19406_v13, %v11131_v32  ;;  %v11031_v29 = vadd.f32 %v20430_v47, %v10894_v24 }
 0xd3d   : > { %v11144_v28 = vpop.f32.mrf.mxu0 }
 0xd3e   : > { %v11498_v45 = vpop.f32.mrf.mxu1  ;;  %v11145_v9 = vadd.f32 %v11144_v28, %v11019_v33  ;;  %v11283_v35 = vadd.f32 %v19409_v0, %v11152_v6 }
 0xd3f   : > { %v14211_v19 = vpop.f32.mrf.mxu0 }
 0xd40   : > { %v14265_v22 = vpop.f32.mrf.mxu1  ;;  %v11166_v63 = vadd.f32 %v14211_v19, %v11037_v39 }
 0xd41   : > { %v11158_v37 = vpop.f32.mrf.mxu0 }
 0xd42   : > { %v11510_v50 = vpop.f32.mrf.mxu1  ;;  %v11159_v4 = vadd.f32 %v11158_v37, %v11031_v29  ;;  %v11299_v7 = vadd.f32 %v19418_v43, %v11166_v63 }
 0xd43   : > { %v14242_v3 = vpop.f32.mrf.mxu0 }
 0xd44   : > { %v11388_v25 = vadd.f32 %v14242_v3, %v11251_v23  ;;  %v11291_v2 = vadd.f32 %v19424_v56, %v11159_v4  ;;  %v20432_v4 = vld [vmem:[#allocation26_spill] sm:$0xff] }
 0xd45   : > { %v11381_v44 = vpop.f32.mrf.mxu0 }
 0xd46   : > { %v19448_v51 = vadd.f32 %v14262_v40, %v11388_v25  ;;  %v11382_v49 = vadd.f32 %v11381_v44, %v11243_v16  ;;  %v14268_v40 = vpop.f32.mrf.mxu1 }
 0xd47   : > { %v14245_v31 = vpop.f32.mrf.mxu0 }
 0xd48   : > { %v11545_v30 = vadd.f32 2.0, %v19448_v51  ;;  %v19453_v60 = vadd.f32 %v11498_v45, %v11382_v49  ;;  %v11400_v61 = vadd.f32 %v14245_v31, %v11267_v8  ;;  %v11275_v45 = vadd.f32 %v19414_v1, %v11145_v9  ;;  %v11522_v19 = vpop.f32.mrf.mxu1 }
 0xd49   : > { %v11393_v48 = vpop.f32.mrf.mxu0 }
 0xd4a   : > { %v11947_v62 = vmul.f32 -1.442695, %v11545_v30  ;;  %v11544_v17 = vadd.f32 2.0, %v19453_v60  ;;  %v19458_v15 = vadd.f32 %v14265_v22, %v11400_v61  ;;  %v11394_v28 = vadd.f32 %v11393_v48, %v11259_v12  ;;  %v14271_v1 = vpop.f32.mrf.mxu1 }
 0xd4b   : > { %v14248_v58 = vpop.f32.mrf.mxu0 }
 0xd4c   : > { %14326 = vpow2.f32 %v11947_v62  ;;  %v11946_v18 = vmul.f32 -1.442695, %v11544_v17  ;;  %v11547_v13 = vadd.f32 2.0, %v19458_v15  ;;  %v19463_v14 = vadd.f32 %v11510_v50, %v11394_v28  ;;  %v11534_v54 = vpop.f32.mrf.mxu1  ;;  %v20431_v62 = vld [vmem:[#allocation17_spill] sm:$0xff] }
 0xd4d   : > { %v11412_v41 = vadd.f32 %v14248_v58, %v11283_v35  ;;  %v11405_v55 = vpop.f32.mrf.mxu0  ;;  %v11601_v17 = vadd.f32 %v19448_v51, %v20431_v62  ;;  %v11600_v35 = vadd.f32 %v19453_v60, %v20432_v4 }
 0xd4e   : > { %14328 = vpow2.f32 %v11946_v18  ;;  %v11949_v26 = vmul.f32 -1.442695, %v11547_v13  ;;  %v11546_v11 = vadd.f32 2.0, %v19463_v14  ;;  %v11406_v20 = vadd.f32 %v11405_v55, %v11275_v45  ;;  %v20433_v45 = vld [vmem:[#allocation18_spill] sm:$0xff]  ;;  %v20434_v13 = vld [vmem:[#allocation29_spill] sm:$0xff] }
 0xd4f   : > { %v19467_v0 = vadd.f32 %v14268_v40, %v11412_v41  ;;  %v14251_v52 = vpop.f32.mrf.mxu0  ;;  %v11603_v18 = vadd.f32 %v19458_v15, %v20433_v45  ;;  %v20435_v41 = vld [vmem:[#allocation19_spill] sm:$0xff] }
 0xd50   : > { %14330 = vpow2.f32 %v11949_v26  ;;  %v11948_v22 = vmul.f32 -1.442695, %v11546_v11  ;;  %v19470_v37 = vadd.f32 %v11522_v19, %v11406_v20  ;;  %v11424_v59 = vadd.f32 %v14251_v52, %v11299_v7  ;;  %v20436_v26 = vld [vmem:[#allocation30_spill] sm:$0xff]  ;;  %v20437_v20 = vld [vmem:[#allocation20_spill] sm:$0xff]  ;;  %v20438_v52 = vld [vmem:[#allocation33_spill] sm:$0xff] }
 0xd51   : > { %v11549_v42 = vadd.f32 2.0, %v19467_v0  ;;  %v11417_v21 = vpop.f32.mrf.mxu0  ;;  %v11602_v19 = vadd.f32 %v19463_v14, %v20434_v13  ;;  %v11605_v55 = vadd.f32 %v19467_v0, %v20435_v41 }
 0xd52   : > { %14332 = vpow2.f32 %v11948_v22  ;;  %v11548_v43 = vadd.f32 2.0, %v19470_v37  ;;  %v19474_v36 = vadd.f32 %v14271_v1, %v11424_v59  ;;  %v11418_v23 = vadd.f32 %v11417_v21, %v11291_v2 }
 0xd53   : > { %v11951_v10 = vmul.f32 -1.442695, %v11549_v42  ;;  %v11604_v11 = vadd.f32 %v19470_v37, %v20436_v26 }
 0xd54   : > { %v11950_v3 = vmul.f32 -1.442695, %v11548_v43  ;;  %v11551_v32 = vadd.f32 2.0, %v19474_v36  ;;  %v11535_v56 = vadd.f32 %v11534_v54, %v11418_v23  ;;  %v11607_v51 = vadd.f32 %v19474_v36, %v20437_v20 }
 0xd55   : > { %14334 = vpow2.f32 %v11951_v10 }
 0xd56   : > { %14336 = vpow2.f32 %v11950_v3  ;;  %v11953_v25 = vmul.f32 -1.442695, %v11551_v32  ;;  %v11550_v5 = vadd.f32 2.0, %v11535_v56  ;;  %v11606_v1 = vadd.f32 %v11535_v56, %v20438_v52 }
 0xd58   : > { %14338 = vpow2.f32 %v11953_v25  ;;  %v11952_v16 = vmul.f32 -1.442695, %v11550_v5 }
 0xd59   : > { %v14327_v38 = vpop.eup %14326 }
 0xd5a   : > { %v11577_v24 = vadd.f32 1.0, %v14327_v38  ;;  %14340 = vpow2.f32 %v11952_v16 }
 0xd5b   : > { %v14329_v53 = vpop.eup %14328 }
 0xd5c   : > { %14342 = vrcp.f32 %v11577_v24  ;;  %v11576_v34 = vadd.f32 1.0, %v14329_v53 }
 0xd5d   : > { %v14331_v57 = vpop.eup %14330 }
 0xd5e   : > { %14344 = vrcp.f32 %v11576_v34  ;;  %v11579_v33 = vadd.f32 1.0, %v14331_v57 }
 0xd5f   : > { %v14333_v50 = vpop.eup %14332 }
 0xd60   : > { %14346 = vrcp.f32 %v11579_v33  ;;  %v11578_v44 = vadd.f32 1.0, %v14333_v50 }
 0xd62   : > { %v14335_v49 = vpop.eup %14334  ;;  %14348 = vrcp.f32 %v11578_v44 }
 0xd63   : > { %v14337_v46 = vpop.eup %14336  ;;  %v11581_v8 = vadd.f32 1.0, %v14335_v49 }
 0xd64   : > { %v11580_v6 = vadd.f32 1.0, %v14337_v46 }
 0xd65   : > { %v14339_v9 = vpop.eup %14338  ;;  %14350 = vrcp.f32 %v11581_v8 }
 0xd66   : > { %14352 = vrcp.f32 %v11580_v6  ;;  %v11583_v27 = vadd.f32 1.0, %v14339_v9 }
 0xd67   : > { %v14341_v39 = vpop.eup %14340 }
 0xd68   : > { %14354 = vrcp.f32 %v11583_v27  ;;  %v11582_v31 = vadd.f32 1.0, %v14341_v39 }
 0xd69   : > { %v14343_v30 = vpop.eup %14342 }
 0xd6a   : > { %14356 = vrcp.f32 %v11582_v31  ;;  %11618 = vrot.lane.b32.xlu1 %v14343_v30, %s14375_s26 }
 0xd6b   : > { %v14345_v61 = vpop.eup %14344 }
 0xd6c   : > { %11616 = vrot.lane.b32.xlu0 %v14345_v61, %s14375_s26 }
 0xd6d   : > { %v14347_v12 = vpop.eup %14346 }
 0xd6e   : > { %11622 = vrot.lane.b32.xlu1 %v14347_v12, %s14375_s26 }
 0xd6f   : > { %v14349_v63 = vpop.eup %14348 }
 0xd70   : > { %11620 = vrot.lane.b32.xlu0 %v14349_v63, %s14375_s26 }
 0xd72   : > { %v14351_v47 = vpop.eup %14350 }
 0xd73   : > { %v14353_v29 = vpop.eup %14352  ;;  %11626 = vrot.lane.b32.xlu1 %v14351_v47, %s14375_s26 }
 0xd74   : > { %11624 = vrot.lane.b32.xlu0 %v14353_v29, %s14375_s26 }
 0xd75   : > { %v14355_v40 = vpop.eup %14354 }
 0xd77   : > { %v14357_v48 = vpop.eup %14356  ;;  %11630 = vrot.lane.b32.xlu1 %v14355_v40, %s14375_s26 }
 0xd78   : > { %11628 = vrot.lane.b32.xlu0 %v14357_v48, %s14375_s26 }
 0xddc   : > { %v11619_v28 = vpop.permute.xlu1 %11618 }
 0xddd   : > { %v11641_v58 = vmul.f32 %v11619_v28, %v11601_v17 }
 0xdde   : > { %v11617_v7 = vpop.permute.xlu0 %11616 }
 0xddf   : > { %v19502_v60 = vsel %vm328_vm2, %v20431_v62, %v11641_v58  ;;  %v11640_v15 = vmul.f32 %v11617_v7, %v11600_v35 }
 0xde0   : > { %v11664_v14 = vrot.slane %v19502_v60, 7  ;;  %v11704_v0 = vrot.slane %v19502_v60, 1  ;;  %v11721_v2 = vrot.slane %v19502_v60, 2  ;;  %v11738_v22 = vrot.slane %v19502_v60, 3  ;;  %v11623_v37 = vpop.permute.xlu1 %11622 }
 0xde1   : > { %v11755_v59 = vrot.slane %v19502_v60, 4  ;;  %v11772_v42 = vrot.slane %v19502_v60, 5  ;;  %v11789_v21 = vrot.slane %v19502_v60, 6  ;;  %v19513_v43 = vsel %vm328_vm2, %v20432_v4, %v11640_v15 }
 0xde2   : > { %v11686_v36 = vrot.slane %v19513_v43, 1  ;;  %v11703_v23 = vrot.slane %v19513_v43, 2  ;;  %v11720_v10 = vrot.slane %v19513_v43, 3  ;;  %v11737_v54 = vrot.slane %v19513_v43, 4  ;;  %v11621_v3 = vpop.permute.xlu0 %11620 }
 0xde3   : > { %v11754_v32 = vrot.slane %v19513_v43, 5  ;;  %v11771_v56 = vrot.slane %v19513_v43, 6  ;;  %v11788_v25 = vrot.slane %v19513_v43, 7  ;;  %v11643_v5 = vmul.f32 %v11623_v37, %v11603_v18 }
 0xde4   : > { %v11642_v16 = vmul.f32 %v11621_v3, %v11602_v19  ;;  %v11705_v38 = vsel %vm11665_vm15, %v11704_v0, %v11703_v23  ;;  %v11687_v24 = vsel %vm11665_vm15, %v19502_v60, %v11686_v36  ;;  %v11739_v53 = vsel %vm11665_vm15, %v11738_v22, %v11737_v54 }
 0xde5   : > { %v19528_v34 = vsel %vm328_vm2, %v20433_v45, %v11643_v5  ;;  %v11627_v57 = vpop.permute.xlu1 %11626  ;;  %v11722_v33 = vsel %vm11665_vm15, %v11721_v2, %v11720_v10  ;;  %v19532_v50 = vsel %vm11665_vm15, %v11772_v42, %v11771_v56  ;;  %v19535_v44 = vsel %vm11665_vm15, %v11755_v59, %v11754_v32 }
 0xde6   : > { %v19539_v49 = vsel %vm328_vm2, %v20434_v13, %v11642_v16  ;;  %v11645_v46 = vmul.f32 %v11627_v57, %v11605_v55  ;;  %v11625_v8 = vpop.permute.xlu0 %11624  ;;  %v11707_v6 = vrot.slane %v19528_v34, 7  ;;  %v11690_v9 = vrot.slane %v19528_v34, 6 }
 0xde7   : > { %v11644_v27 = vmul.f32 %v11625_v8, %v11604_v11  ;;  %v11706_v39 = vsel %vm11668_vm0, %v19539_v49, %v11705_v38  ;;  %v11688_v31 = vrot.slane %v19539_v49, 7  ;;  %v11740_v30 = vrot.slane %v19539_v49, 2 }
 0xde8   : > { %v19549_v61 = vsel %vm328_vm2, %v20435_v41, %v11645_v46  ;;  %v11708_v12 = vsel %vm11671_vm3, %v11707_v6, %v11706_v39  ;;  %v11742_v63 = vrot.slane %v19528_v34, 1  ;;  %v11723_v47 = vrot.slane %v19539_v49, 1 }
 0xde9   : > { %v19556_v29 = vsel %vm328_vm2, %v20436_v26, %v11644_v27  ;;  %v11631_v40 = vpop.permute.xlu1 %11630  ;;  %v11711_v48 = vrot.slane %v19549_v61, 5  ;;  %v11689_v62 = vsel %vm11668_vm0, %v11688_v31, %v11687_v24  ;;  %v11694_v17 = vrot.slane %v19549_v61, 4 }
 0xdea   : > { %v11647_v28 = vmul.f32 %v11631_v40, %v11607_v51  ;;  %v11629_v4 = vpop.permute.xlu0 %11628  ;;  %v11709_v35 = vrot.slane %v19556_v29, 6  ;;  %v11691_v58 = vsel %vm11671_vm3, %v11690_v9, %v11689_v62  ;;  %v11692_v45 = vrot.slane %v19556_v29, 5 }
 0xdeb   : > { %v11646_v18 = vmul.f32 %v11629_v4, %v11606_v1  ;;  %v11741_v13 = vsel %vm11668_vm0, %v11740_v30, %v11739_v53  ;;  %v11745_v19 = vrot.slane %v19549_v61, 7  ;;  %v11724_v41 = vsel %vm11668_vm0, %v11723_v47, %v11722_v33 }
 0xdec   : > { %v19569_v55 = vsel %vm328_vm2, %v20437_v20, %v11647_v28  ;;  %v11710_v7 = vsel %vm11674_vm4, %v11709_v35, %v11708_v12  ;;  %v11693_v26 = vsel %vm11674_vm4, %v11692_v45, %v11691_v58  ;;  %v11743_v11 = vsel %vm11671_vm3, %v11742_v63, %v11741_v13 }
 0xded   : > { %v19576_v51 = vsel %vm328_vm2, %v20438_v52, %v11646_v18  ;;  %v11712_v1 = vsel %vm11677_vm5, %v11711_v48, %v11710_v7  ;;  %v11715_v15 = vrot.slane %v19569_v55, 3  ;;  %v11695_v0 = vsel %vm11677_vm5, %v11694_v17, %v11693_v26 }
 0xdee   : > { %v11713_v2 = vrot.slane %v19576_v51, 4  ;;  %v11696_v20 = vrot.slane %v19576_v51, 3  ;;  %v11698_v22 = vrot.slane %v19569_v55, 2  ;;  %v11744_v37 = vsel %vm11674_vm4, %v19556_v29, %v11743_v11 }
 0xdef   : > { %v11746_v59 = vsel %vm11677_vm5, %v11745_v19, %v11744_v37  ;;  %v11747_v52 = vrot.slane %v19576_v51, 6  ;;  %v11749_v42 = vrot.slane %v19569_v55, 5  ;;  %v11725_v36 = vsel %vm11671_vm3, %v19528_v34, %v11724_v41 }
 0xdf0   : > { %v11714_v23 = vsel %vm11680_vm7, %v11713_v2, %v11712_v1  ;;  %v11697_v10 = vsel %vm11680_vm7, %v11696_v20, %v11695_v0  ;;  %v11726_v54 = vrot.slane %v19556_v29, 7  ;;  %v11728_v3 = vrot.slane %v19549_v61, 6 }
 0xdf1   : > { %v11716_v32 = vsel %vm11683_vm9, %v11715_v15, %v11714_v23  ;;  %v11699_v56 = vsel %vm11683_vm9, %v11698_v22, %v11697_v10  ;;  %v11748_v5 = vsel %vm11680_vm7, %v11747_v52, %v11746_v59  ;;  %v11730_v16 = vrot.slane %v19576_v51, 5 }
 0xdf2   : > { %11717 = vrot.lane.b32.xlu1 %v11716_v32, %s14371_s21  ;;  %11700 = vrot.lane.b32.xlu0 %v11699_v56, %s14373_s25  ;;  %v11750_v38 = vsel %vm11683_vm9, %v11749_v42, %v11748_v5  ;;  %v11727_v24 = vsel %vm11674_vm4, %v11726_v54, %v11725_v36  ;;  %v11732_v53 = vrot.slane %v19569_v55, 4  ;;  %v11774_v57 = vrot.slane %v19539_v49, 4 }
 0xdf3   : > { %v11729_v33 = vsel %vm11677_vm5, %v11728_v3, %v11727_v24  ;;  %v11776_v46 = vrot.slane %v19528_v34, 3  ;;  %v11778_v8 = vrot.slane %v19556_v29, 2  ;;  %v11780_v6 = vrot.slane %v19549_v61, 1 }
 0xdf4   : > { %v11731_v9 = vsel %vm11680_vm7, %v11730_v16, %v11729_v33  ;;  %v11775_v27 = vsel %vm11668_vm0, %v11774_v57, %v19532_v50  ;;  %v11783_v39 = vrot.slane %v19569_v55, 7  ;;  %v11757_v31 = vrot.slane %v19539_v49, 3 }
 0xdf5   : > { %v11733_v30 = vsel %vm11683_vm9, %v11732_v53, %v11731_v9  ;;  %v11777_v12 = vsel %vm11671_vm3, %v11776_v46, %v11775_v27  ;;  %v11759_v63 = vrot.slane %v19528_v34, 2  ;;  %v11761_v47 = vrot.slane %v19556_v29, 1 }
 0xdf6   : > { %11751 = vrot.lane.b32.xlu1 %v11750_v38, %s14369_s17  ;;  %11734 = vrot.lane.b32.xlu0 %v11733_v30, %s14372_s22  ;;  %v11779_v40 = vsel %vm11674_vm4, %v11778_v8, %v11777_v12  ;;  %v11758_v50 = vsel %vm11668_vm0, %v11757_v31, %v19535_v44  ;;  %v11764_v48 = vrot.slane %v19576_v51, 7  ;;  %v11766_v62 = vrot.slane %v19569_v55, 6 }
 0xdf7   : > { %v11781_v17 = vsel %vm11677_vm5, %v11780_v6, %v11779_v40  ;;  %v11760_v28 = vsel %vm11671_vm3, %v11759_v63, %v11758_v50  ;;  %v11790_v4 = vsel %vm11665_vm15, %v11789_v21, %v11788_v25  ;;  %v11791_v35 = vrot.slane %v19539_v49, 5 }
 0xdf8   : > { %v11782_v58 = vsel %vm11680_vm7, %v19576_v51, %v11781_v17  ;;  %v11762_v44 = vsel %vm11674_vm4, %v11761_v47, %v11760_v28  ;;  %v11793_v45 = vrot.slane %v19528_v34, 4  ;;  %v11795_v18 = vrot.slane %v19556_v29, 3 }
 0xdf9   : > { %v11784_v13 = vsel %vm11683_vm9, %v11783_v39, %v11782_v58  ;;  %v11763_v19 = vsel %vm11677_vm5, %v19549_v61, %v11762_v44  ;;  %v11792_v41 = vsel %vm11668_vm0, %v11791_v35, %v11790_v4  ;;  %v11797_v21 = vrot.slane %v19549_v61, 2 }
 0xdfa   : > { %11785 = vrot.lane.b32.xlu1 %v11784_v13, %s14370_s18  ;;  %v11765_v25 = vsel %vm11680_vm7, %v11764_v48, %v11763_v19  ;;  %v11794_v7 = vsel %vm11671_vm3, %v11793_v45, %v11792_v41  ;;  %v11799_v26 = vrot.slane %v19576_v51, 1  ;;  %v11666_v11 = vsel %vm11665_vm15, %v11664_v14, %v19513_v43 }
 0xdfb   : > { %v11767_v1 = vsel %vm11683_vm9, %v11766_v62, %v11765_v25  ;;  %v11796_v15 = vsel %vm11674_vm4, %v11795_v18, %v11794_v7  ;;  %v11667_v0 = vrot.slane %v19539_v49, 6  ;;  %v11670_v20 = vrot.slane %v19528_v34, 5 }
 0xdfc   : > { %11768 = vrot.lane.b32.xlu0 %v11767_v1, %s14367_s15  ;;  %v11798_v2 = vsel %vm11677_vm5, %v11797_v21, %v11796_v15  ;;  %v11673_v22 = vrot.slane %v19556_v29, 4  ;;  %v11679_v14 = vrot.slane %v19576_v51, 2  ;;  %v11676_v49 = vrot.slane %v19549_v61, 3  ;;  %s20439_s15 = sshll.u32 %s20441_s10, 3 }
 0xdfd   : > { %v11800_v37 = vsel %vm11680_vm7, %v11799_v26, %v11798_v2  ;;  %v11669_v60 = vsel %vm11668_vm0, %v11667_v0, %v11666_v11  ;;  %v11682_v29 = vrot.slane %v19569_v55, 1  ;;  %vm11809_vm2 = vcmask 654336   ;;  %s327_s18 = scalar_lea.vmem %s19693_s9, %s20439_s15 }
 0xdfe   : > { %v11801_v43 = vsel %vm11683_vm9, %v19569_v55, %v11800_v37  ;;  %v11672_v59 = vsel %vm11671_vm3, %v11670_v20, %v11669_v60 }
 0xdff   : > { %v11675_v52 = vsel %vm11674_vm4, %v11673_v22, %v11672_v59 }
 0xe00   : > { %11802 = vrot.lane.b32.xlu0 %v11801_v43, %s14368_s16  ;;  %v11678_v34 = vsel %vm11677_vm5, %v11676_v49, %v11675_v52 }
 0xe01   : > { %v11681_v42 = vsel %vm11680_vm7, %v11679_v14, %v11678_v34 }
 0xe02   : > { %v11684_v51 = vsel %vm11683_vm9, %v11682_v29, %v11681_v42 }
 0xe64   : > { %v11718_v36 = vpop.permute.xlu1 %11717  ;;  %v11701_v23 = vpop.permute.xlu0 %11700 }
 0xe65   : > { %v11805_v10 = vsel %vm725_vm1, %v11684_v51, %v11701_v23 }
 0xe66   : > { %v11806_v61 = vsel %vm356_vm6, %v11805_v10, %v11718_v36 }
 0xe68   : > { %v11735_v54 = vpop.permute.xlu0 %11734  ;;  %v11752_v3 = vpop.permute.xlu1 %11751 }
 0xe69   : > { %v11807_v32 = vsel %vm1890_vm8, %v11806_v61, %v11735_v54 }
 0xe6a   : > { %v11808_v5 = vsel %vm1908_vm10, %v11807_v32, %v11752_v3 }
 0xe6c   : > { %v11786_v55 = vpop.permute.xlu1 %11785 }
 0xe6e   : > { %v11769_v56 = vpop.permute.xlu0 %11768 }
 0xe6f   : > { %v11810_v16 = vsel %vm11809_vm2, %v11808_v5, %v11769_v56 }
 0xe70   : > { %v11811_v24 = vsel %vm3936_vm14, %v11810_v16, %v11786_v55 }
 0xe72   : > { %v11803_v38 = vpop.permute.xlu0 %11802 }
 0xe73   : > { %v11813_v53 = vsel %vm11812_vm11, %v11811_v24, %v11803_v38 }
 0xe74   : > { %11814 = vst [vmem:[%s327_s18] sm:$0xff] %v11813_v53 }
 0xe75 PF: > { %s19_s30 = sadd.s32 1, %s14364_s30  }
 0xe76   : > { %p16_p4 = scmp.ge.s32.totalorder %s19_s30, 4  }
 0xe78   :  { %18 = sbr.rel (!%p16_p4) target bundleno = 1 (0x1), region = 100 }

</bundles_post_ra>
